<compile_context>
chip_gen: v6e
topology: v6e:2x2x1
jax: 0.10.0
libtpu: 0.0.40
codegen_flags: <defaults>
</compile_context>

<pallas_src>
import jax
import jax.numpy as jnp
from jax import lax
from jax.experimental import pallas as pl
from jax.experimental.pallas import tpu as pltpu


# ----------------------- fused 2-layer LSTM + attention kernel -----------------------
def _encoder2_kernel(x_ref, wih0_ref, whh0_ref, b0_ref, w1_ref, b1_ref,
                     womega_ref, uomega_ref, mask_ref,
                     feat_ref, aa_ref, xg_ref, hseq_ref):
    T, B, E = x_ref.shape                       # B here is the batch tile
    H = whh0_ref.shape[0]
    wdt = wih0_ref.dtype                        # matmul (weight) dtype, e.g. bfloat16
    f32 = jnp.float32

    # ---- prologue: layer-0 input projection for all timesteps in ONE MXU matmul ----
    x2 = x_ref[...].reshape(T * B, E).astype(wdt)
    g0_all = jnp.dot(x2, wih0_ref[...], preferred_element_type=f32) + b0_ref[...]
    xg_ref[...] = g0_all.reshape(T, B, 4 * H).astype(xg_ref.dtype)

    # Resident weights (loaded once) and the hoisted bias broadcast (not replicated per
    # unrolled iteration).
    whh0 = whh0_ref[...]
    w1 = w1_ref[...]
    b1b = jnp.broadcast_to(b1_ref[...], (B, 4 * H))

    def gates(pre):
        # PyTorch gate order: i, f, g, o.  H % 128 == 0 -> lane-aligned slices.
        i = jax.nn.sigmoid(pre[:, 0:H])
        f = jax.nn.sigmoid(pre[:, H:2 * H])
        g = jnp.tanh(pre[:, 2 * H:3 * H])
        o = jax.nn.sigmoid(pre[:, 3 * H:4 * H])
        return i, f, g, o

    def step(t, carry):
        h0, c0, h1, c1 = carry
        # layer 0: input part precomputed, only the recurrent matmul is on the serial path
        pre0 = xg_ref[t].astype(f32) + jnp.dot(h0.astype(wdt), whh0,
                                               preferred_element_type=f32)
        i0, f0, g0, o0 = gates(pre0)
        c0n = f0 * c0 + i0 * g0
        h0n = o0 * jnp.tanh(c0n)
        # layer 1: single fused matmul on concat(h0_new, h1_old)  ->  [B, 2H] @ [2H, 4H]
        lhs1 = jnp.concatenate([h0n, h1], axis=1).astype(wdt)
        pre1 = jnp.dot(lhs1, w1, preferred_element_type=f32) + b1b
        i1, f1, g1, o1 = gates(pre1)
        c1n = f1 * c1 + i1 * g1
        h1n = o1 * jnp.tanh(c1n)
        hseq_ref[t] = h1n                        # top-layer output stays in VMEM
        return h0n, c0n, h1n, c1n

    z = jnp.zeros((B, H), f32)
    lax.fori_loop(0, T, step, (z, z, z, z),
                  unroll=True if T <= 16 else 8)  # partial unroll for long sequences

    # ---- attention epilogue (fused: no HBM round trip for the LSTM output) ----
    x = hseq_ref[...]                                             # [T, B, H] f32
    u = jnp.tanh(jnp.dot(x.reshape(T * B, H).astype(wdt), womega_ref[...],
                         preferred_element_type=f32)).reshape(T, B, H)
    att = jnp.sum(u * uomega_ref[...][None, :, :], axis=-1)       # [T, B]
    att_bt = att.T                                                # [B, T] (lane axis = T)
    aa_ref[...] = jax.nn.sigmoid(att_bt)                          # sigmoid of unmasked scores
    sm_bt = jax.nn.softmax(att_bt, axis=-1)                       # softmax over padded seq dim
    score = (sm_bt * mask_ref[...]).T                             # zero past each length, no renorm
    feat_ref[...] = jnp.sum(x * score[:, :, None], axis=0)        # [B, H] (lane-dense)


def _vmem_limit_bytes():
    """~3/4 of the chip's VMEM: ~96 MiB on v5e/v6e (128 MiB), ~48 MiB on v7x (64 MiB)."""
    cap = 64 * 1024 * 1024
    try:
        cap = int(getattr(pltpu.get_tpu_info(), "vmem_capacity_bytes", cap))
    except Exception:
        pass
    return max(32 * 1024 * 1024, (cap * 3) // 4)


def _build_call(T, B, E, H, tb, param_dtype, single_buffer_weights, vmem_limit):
    if single_buffer_weights:
        def wspec(shape):
            # grid-invariant blocks: double-buffering them is pure VMEM waste
            return pl.BlockSpec(shape, lambda b: (0, 0), pipeline_mode=pl.Buffered(1))
    else:
        def wspec(shape):
            return pl.BlockSpec(shape, lambda b: (0, 0))

    return pl.pallas_call(
        _encoder2_kernel,
        out_shape=(jax.ShapeDtypeStruct((B, H), jnp.float32),     # feat
                   jax.ShapeDtypeStruct((B, T), jnp.float32)),    # aa (lane-dense, T last)
        grid=(B // tb,),
        in_specs=[
            pl.BlockSpec((T, tb, E), lambda b: (0, b, 0)),        # x, seq-first
            wspec((E, 4 * H)),                                    # W_ih layer 0
            wspec((H, 4 * H)),                                    # W_hh layer 0
            wspec((1, 4 * H)),                                    # fused bias layer 0
            wspec((2 * H, 4 * H)),                                # [W_ih1 ; W_hh1] fused
            wspec((1, 4 * H)),                                    # fused bias layer 1
            wspec((H, H)),                                        # w_omega
            wspec((1, H)),                                        # u_omega (row)
            pl.BlockSpec((tb, T), lambda b: (b, 0)),              # mask, batch-major
        ],
        out_specs=(pl.BlockSpec((tb, H), lambda b: (b, 0)),
                   pl.BlockSpec((tb, T), lambda b: (b, 0))),
        scratch_shapes=[pltpu.VMEM((T, tb, 4 * H), param_dtype),  # xg: x@W_ih0 + b0 (all t)
                        pltpu.VMEM((T, tb, H), jnp.float32)],     # hseq: top-layer LSTM output
        compiler_params=pltpu.CompilerParams(
            dimension_semantics=("parallel",),                    # batch tiles -> v7x's 2 TCs
            vmem_limit_bytes=vmem_limit),
    )


def encoder2_forward(x_tbe, mask_bt, wih0_t, whh0_t, b0, w1cat, b1, w_omega,
                     u_omega_row, *, batch_tile=None, param_dtype=jnp.bfloat16):
    """Fused 2-layer LSTM + attention forward.  Returns (feat [B, H], aa [B, T])."""
    T, B, E = x_tbe.shape
    H = whh0_t.shape[0]
    tb = B if batch_tile is None else batch_tile
    assert B % tb == 0 and tb % 8 == 0, (B, tb)
    args = (x_tbe.astype(jnp.float32),
            wih0_t.astype(param_dtype), whh0_t.astype(param_dtype),
            b0.astype(jnp.float32),
            w1cat.astype(param_dtype),
            b1.astype(jnp.float32),
            w_omega.astype(param_dtype),
            u_omega_row.astype(jnp.float32),
            mask_bt.astype(jnp.float32))
    vmem_limit = _vmem_limit_bytes()
    try:
        return _build_call(T, B, E, H, tb, param_dtype, True, vmem_limit)(*args)
    except Exception:
        # Fallback for JAX builds that reject pl.Buffered(1) single-buffering.
        return _build_call(T, B, E, H, tb, param_dtype, False, vmem_limit)(*args)


# --------------------------- pure-JAX f32 reference ---------------------------------
def ref_forward(x_pad_bte, lens, wih0_t, whh0_t, b0, wih1_t, whh1_t, b1, w_omega, u_omega):
    with jax.default_matmul_precision("highest"):
        B, T, E = x_pad_bte.shape
        H = whh0_t.shape[0]
        h0 = jnp.zeros((B, H)); c0 = jnp.zeros((B, H))
        h1 = jnp.zeros((B, H)); c1 = jnp.zeros((B, H))

        def cell(x_in, h, c, wih, whh, b):
            g = x_in @ wih + h @ whh + b
            i = jax.nn.sigmoid(g[:, :H]); f = jax.nn.sigmoid(g[:, H:2 * H])
            gg = jnp.tanh(g[:, 2 * H:3 * H]); o = jax.nn.sigmoid(g[:, 3 * H:])
            c_new = f * c + i * gg
            return o * jnp.tanh(c_new), c_new

        outs = []
        for t in range(T):
            h0, c0 = cell(x_pad_bte[:, t, :], h0, c0, wih0_t, whh0_t, b0)
            h1, c1 = cell(h0, h1, c1, wih1_t, whh1_t, b1)
            outs.append(h1)
        x = jnp.stack(outs, axis=1)                               # [B, T, H]
        u = jnp.tanh(x @ w_omega)
        att = u @ u_omega                                         # [B, T, 1]
        aa = jax.nn.sigmoid(att)
        sm = jax.nn.softmax(att, axis=1)
        idx = jnp.arange(T)[None, :, None]
        mask = (idx < lens[:, None, None]).astype(jnp.float32)
        feat = jnp.sum(x * (sm * mask), axis=1)
        return feat, aa


# ------------------------------------ main -------------------------------------------
if __name__ == "__main__":
    EMB = 128    # emb_dim (512 in the original config; multiple of 128 for lane alignment)
    HID = 128    # hid_dim (512 in the original config; multiple of 128 for lane alignment)
    B_PAD = 16   # batch padded to 2 tiles of 8 -> 2 "parallel" grid steps (v7x: one per TC)
    BATCH_TILE = 8

    token_lenth = jnp.array([5, 8], dtype=jnp.int32)
    total = int(token_lenth.sum())
    B = int(token_lenth.shape[0])
    T = int(token_lenth.max())

    key = jax.random.PRNGKey(0)
    ks = jax.random.split(key, 11)

    def unif(k, shape, bound):
        return jax.random.uniform(k, shape, jnp.float32, -bound, bound)

    src = jax.random.normal(ks[0], (total, EMB), jnp.float32)

    bound = 1.0 / float(HID) ** 0.5   # PyTorch LSTM default init range
    wih0 = unif(ks[1], (4 * HID, EMB), bound)
    whh0 = unif(ks[2], (4 * HID, HID), bound)
    bih0 = unif(ks[3], (4 * HID,), bound)
    bhh0 = unif(ks[4], (4 * HID,), bound)
    wih1 = unif(ks[5], (4 * HID, HID), bound)
    whh1 = unif(ks[6], (4 * HID, HID), bound)
    bih1 = unif(ks[7], (4 * HID,), bound)
    bhh1 = unif(ks[8], (4 * HID,), bound)
    w_omega = unif(ks[9], (HID, HID), 0.1)    # nn.init.uniform_(-0.1, 0.1)
    u_omega = unif(ks[10], (HID, 1), 0.1)

    # pre-transpose weights, fuse the two biases per layer, concat layer-1 weights
    wih0_t, whh0_t = wih0.T, whh0.T
    wih1_t, whh1_t = wih1.T, whh1.T
    b0 = (bih0 + bhh0)[None, :]
    b1 = (bih1 + bhh1)[None, :]
    w1cat = jnp.concatenate([wih1_t, whh1_t], axis=0)             # [2H, 4H]

    # TODO(synk): the ragged split of flat src by token_lenth + zero-padding is data-dependent
    # packing with no clean single-kernel Pallas equivalent; done here as ONE vectorized gather.
    lens_pad = jnp.zeros((B_PAD,), jnp.int32).at[:B].set(token_lenth)
    offs = jnp.concatenate([jnp.zeros((1,), jnp.int32), jnp.cumsum(token_lenth)[:-1]])
    offs_pad = jnp.zeros((B_PAD,), jnp.int32).at[:B].set(offs)
    t_idx = jnp.arange(T, dtype=jnp.int32)
    valid = t_idx[:, None] < lens_pad[None, :]                    # [T, B_PAD]
    rows = jnp.where(valid, offs_pad[None, :] + t_idx[:, None], 0)
    x_tbe = jnp.where(valid[:, :, None], src[rows], 0.0)          # [T, B_PAD, EMB], seq-first
    mask_bt = jnp.transpose(valid).astype(jnp.float32)            # [B_PAD, T], batch-major

    feat_pad, aa_bt = encoder2_forward(
        x_tbe, mask_bt, wih0_t, whh0_t, b0, w1cat, b1, w_omega, u_omega.T,
        batch_tile=BATCH_TILE)

    feat = feat_pad[:B]                                           # [B, H]
    aa = aa_bt[:B][:, :, None]                                    # [B, T, 1] like PyTorch
    jax.block_until_ready((feat, aa))

    # f32 reference on the real (unpadded-batch) sequences; kernel uses bf16 weights -> loose tol
    x_pad_bte = jnp.transpose(x_tbe[:, :B, :], (1, 0, 2))         # [B, T, E]
    feat_ref, aa_ref = ref_forward(x_pad_bte, token_lenth, wih0_t, whh0_t, b0,
                                   wih1_t, whh1_t, b1, w_omega, u_omega)
    assert jnp.allclose(feat, feat_ref, atol=3e-2), float(jnp.max(jnp.abs(feat - feat_ref)))
    assert jnp.allclose(aa, aa_ref, atol=3e-2), float(jnp.max(jnp.abs(aa - aa_ref)))

    print("KERNEL_OK")
</pallas_src>

<mosaic_0001>
module attributes {stable_mosaic.version = 11 : i64} {
  func.func @_encoder2_kernel(%arg0: i32, %arg1: memref<8x8x128xf32, #tpu.memory_space<vmem>>, %arg2: memref<128x512xbf16, #tpu.memory_space<vmem>>, %arg3: memref<128x512xbf16, #tpu.memory_space<vmem>>, %arg4: memref<1x512xf32, #tpu.memory_space<vmem>>, %arg5: memref<256x512xbf16, #tpu.memory_space<vmem>>, %arg6: memref<1x512xf32, #tpu.memory_space<vmem>>, %arg7: memref<128x128xbf16, #tpu.memory_space<vmem>>, %arg8: memref<1x128xf32, #tpu.memory_space<vmem>>, %arg9: memref<8x8xf32, #tpu.memory_space<vmem>>, %arg10: memref<8x128xf32, #tpu.memory_space<vmem>>, %arg11: memref<8x8xf32, #tpu.memory_space<vmem>>, %arg12: memref<8x8x512xbf16, #tpu.memory_space<vmem>>, %arg13: memref<8x8x128xf32, #tpu.memory_space<vmem>>) attributes {dimension_semantics = [#tpu.dimension_semantics<parallel>], iteration_bounds = array<i64: 2>, scalar_prefetch = 0 : i64, scratch_operands = 2 : i64, tpu.core_type = #tpu.core_type<tc>, window_params = [{transform_indices = @transform_0, window_bounds = array<i64: 8, 8, 128>}, {pipeline_mode = #tpu.pipeline_mode<synchronous>, transform_indices = @transform_1, window_bounds = array<i64: 128, 512>}, {pipeline_mode = #tpu.pipeline_mode<synchronous>, transform_indices = @transform_2, window_bounds = array<i64: 128, 512>}, {pipeline_mode = #tpu.pipeline_mode<synchronous>, transform_indices = @transform_3, window_bounds = array<i64: 1, 512>}, {pipeline_mode = #tpu.pipeline_mode<synchronous>, transform_indices = @transform_4, window_bounds = array<i64: 256, 512>}, {pipeline_mode = #tpu.pipeline_mode<synchronous>, transform_indices = @transform_5, window_bounds = array<i64: 1, 512>}, {pipeline_mode = #tpu.pipeline_mode<synchronous>, transform_indices = @transform_6, window_bounds = array<i64: 128, 128>}, {pipeline_mode = #tpu.pipeline_mode<synchronous>, transform_indices = @transform_7, window_bounds = array<i64: 1, 128>}, {transform_indices = @transform_8, window_bounds = array<i64: 8, 8>}, {transform_indices = @transform_9, window_bounds = array<i64: 8, 128>}, {transform_indices = @transform_10, window_bounds = array<i64: 8, 8>}]} {
    %c0 = arith.constant 0 : index
    %c0_0 = arith.constant 0 : index
    %c0_1 = arith.constant 0 : index
    %0 = vector.load %arg1[%c0, %c0_0, %c0_1] : memref<8x8x128xf32, #tpu.memory_space<vmem>>, vector<8x8x128xf32>
    %1 = vector.shape_cast %0 : vector<8x8x128xf32> to vector<64x128xf32>
    %2 = arith.truncf %1 : vector<64x128xf32> to vector<64x128xbf16>
    %c0_2 = arith.constant 0 : index
    %c0_3 = arith.constant 0 : index
    %3 = vector.load %arg2[%c0_2, %c0_3] : memref<128x512xbf16, #tpu.memory_space<vmem>>, vector<128x512xbf16>
    %cst = arith.constant dense<0.000000e+00> : vector<64x512xf32>
    %4 = tpu.matmul %2, %3, %cst {dimension_numbers = #tpu.dot_dimension_numbers<[1], [0], [0], [1], [0, 0, 1, 1], [], []>} : vector<64x128xbf16>, vector<128x512xbf16>, vector<64x512xf32> -> vector<64x512xf32>
    %c0_4 = arith.constant 0 : index
    %c0_5 = arith.constant 0 : index
    %5 = vector.load %arg4[%c0_4, %c0_5] : memref<1x512xf32, #tpu.memory_space<vmem>>, vector<1x512xf32>
    %6 = vector.broadcast %5 : vector<1x512xf32> to vector<64x512xf32>
    %7 = arith.addf %4, %6 : vector<64x512xf32>
    %8 = vector.shape_cast %7 : vector<64x512xf32> to vector<8x8x512xf32>
    %9 = arith.truncf %8 : vector<8x8x512xf32> to vector<8x8x512xbf16>
    %c0_6 = arith.constant 0 : index
    %c0_7 = arith.constant 0 : index
    %c0_8 = arith.constant 0 : index
    %10 = vector.load %arg12[%c0_6, %c0_7, %c0_8] : memref<8x8x512xbf16, #tpu.memory_space<vmem>>, vector<8x8x512xbf16>
    tpu.vector_store %arg12[%c0_6, %c0_7, %c0_8], %9 {strides = array<i32>} : memref<8x8x512xbf16, #tpu.memory_space<vmem>>, vector<8x8x512xbf16>,
    %c0_9 = arith.constant 0 : index
    %c0_10 = arith.constant 0 : index
    %11 = vector.load %arg3[%c0_9, %c0_10] : memref<128x512xbf16, #tpu.memory_space<vmem>>, vector<128x512xbf16>
    %c0_11 = arith.constant 0 : index
    %c0_12 = arith.constant 0 : index
    %12 = vector.load %arg5[%c0_11, %c0_12] : memref<256x512xbf16, #tpu.memory_space<vmem>>, vector<256x512xbf16>
    %c0_13 = arith.constant 0 : index
    %c0_14 = arith.constant 0 : index
    %13 = vector.load %arg6[%c0_13, %c0_14] : memref<1x512xf32, #tpu.memory_space<vmem>>, vector<1x512xf32>
    %14 = vector.shape_cast %13 : vector<1x512xf32> to vector<1x512xf32>
    %15 = vector.broadcast %14 : vector<1x512xf32> to vector<8x512xf32>
    %cst_15 = arith.constant 0.000000e+00 : f32
    %16 = vector.broadcast %cst_15 : f32 to vector<8x128xf32>
    %c0_i32 = arith.constant 0 : i32
    %17 = arith.index_cast %c0_i32 : i32 to index
    %c0_16 = arith.constant 0 : index
    %c0_17 = arith.constant 0 : index
    %18 = vector.load %arg12[%17, %c0_16, %c0_17] : memref<8x8x512xbf16, #tpu.memory_space<vmem>>, vector<1x8x512xbf16>
    %19 = vector.shape_cast %18 : vector<1x8x512xbf16> to vector<8x512xbf16>
    %20 = arith.extf %19 : vector<8x512xbf16> to vector<8x512xf32>
    %21 = arith.truncf %16 : vector<8x128xf32> to vector<8x128xbf16>
    %cst_18 = arith.constant dense<0.000000e+00> : vector<8x512xf32>
    %22 = tpu.matmul %21, %11, %cst_18 {dimension_numbers = #tpu.dot_dimension_numbers<[1], [0], [0], [1], [0, 0, 1, 1], [], []>} : vector<8x128xbf16>, vector<128x512xbf16>, vector<8x512xf32> -> vector<8x512xf32>
    %23 = arith.addf %20, %22 : vector<8x512xf32>
    %24 = vector.extract_strided_slice %23 {offsets = [0, 0], sizes = [8, 128], strides = [1, 1]} : vector<8x512xf32> to vector<8x128xf32>
    %25 = arith.negf %24 : vector<8x128xf32>
    %26 = math.exp %25 : vector<8x128xf32>
    %cst_19 = arith.constant 1.000000e+00 : f32
    %27 = vector.broadcast %cst_19 : f32 to vector<8x128xf32>
    %28 = arith.addf %27, %26 : vector<8x128xf32>
    %29 = arith.divf %27, %28 : vector<8x128xf32>
    %30 = vector.extract_strided_slice %23 {offsets = [0, 128], sizes = [8, 128], strides = [1, 1]} : vector<8x512xf32> to vector<8x128xf32>
    %31 = arith.negf %30 : vector<8x128xf32>
    %32 = math.exp %31 : vector<8x128xf32>
    %cst_20 = arith.constant 1.000000e+00 : f32
    %33 = vector.broadcast %cst_20 : f32 to vector<8x128xf32>
    %34 = arith.addf %33, %32 : vector<8x128xf32>
    %35 = arith.divf %33, %34 : vector<8x128xf32>
    %36 = vector.extract_strided_slice %23 {offsets = [0, 256], sizes = [8, 128], strides = [1, 1]} : vector<8x512xf32> to vector<8x128xf32>
    %37 = math.tanh %36 : vector<8x128xf32>
    %38 = vector.extract_strided_slice %23 {offsets = [0, 384], sizes = [8, 128], strides = [1, 1]} : vector<8x512xf32> to vector<8x128xf32>
    %39 = arith.negf %38 : vector<8x128xf32>
    %40 = math.exp %39 : vector<8x128xf32>
    %cst_21 = arith.constant 1.000000e+00 : f32
    %41 = vector.broadcast %cst_21 : f32 to vector<8x128xf32>
    %42 = arith.addf %41, %40 : vector<8x128xf32>
    %43 = arith.divf %41, %42 : vector<8x128xf32>
    %44 = arith.mulf %35, %16 : vector<8x128xf32>
    %45 = arith.mulf %29, %37 : vector<8x128xf32>
    %46 = arith.addf %44, %45 : vector<8x128xf32>
    %47 = math.tanh %46 : vector<8x128xf32>
    %48 = arith.mulf %43, %47 : vector<8x128xf32>
    %49 = tpu.concatenate %48, %16 in 1 : vector<8x128xf32>, vector<8x128xf32> -> vector<8x256xf32>
    %50 = arith.truncf %49 : vector<8x256xf32> to vector<8x256xbf16>
    %cst_22 = arith.constant dense<0.000000e+00> : vector<8x512xf32>
    %51 = tpu.matmul %50, %12, %cst_22 {dimension_numbers = #tpu.dot_dimension_numbers<[1], [0], [0], [1], [0, 0, 1, 1], [], []>} : vector<8x256xbf16>, vector<256x512xbf16>, vector<8x512xf32> -> vector<8x512xf32>
    %52 = arith.addf %51, %15 : vector<8x512xf32>
    %53 = vector.extract_strided_slice %52 {offsets = [0, 0], sizes = [8, 128], strides = [1, 1]} : vector<8x512xf32> to vector<8x128xf32>
    %54 = arith.negf %53 : vector<8x128xf32>
    %55 = math.exp %54 : vector<8x128xf32>
    %cst_23 = arith.constant 1.000000e+00 : f32
    %56 = vector.broadcast %cst_23 : f32 to vector<8x128xf32>
    %57 = arith.addf %56, %55 : vector<8x128xf32>
    %58 = arith.divf %56, %57 : vector<8x128xf32>
    %59 = vector.extract_strided_slice %52 {offsets = [0, 128], sizes = [8, 128], strides = [1, 1]} : vector<8x512xf32> to vector<8x128xf32>
    %60 = arith.negf %59 : vector<8x128xf32>
    %61 = math.exp %60 : vector<8x128xf32>
    %cst_24 = arith.constant 1.000000e+00 : f32
    %62 = vector.broadcast %cst_24 : f32 to vector<8x128xf32>
    %63 = arith.addf %62, %61 : vector<8x128xf32>
    %64 = arith.divf %62, %63 : vector<8x128xf32>
    %65 = vector.extract_strided_slice %52 {offsets = [0, 256], sizes = [8, 128], strides = [1, 1]} : vector<8x512xf32> to vector<8x128xf32>
    %66 = math.tanh %65 : vector<8x128xf32>
    %67 = vector.extract_strided_slice %52 {offsets = [0, 384], sizes = [8, 128], strides = [1, 1]} : vector<8x512xf32> to vector<8x128xf32>
    %68 = arith.negf %67 : vector<8x128xf32>
    %69 = math.exp %68 : vector<8x128xf32>
    %cst_25 = arith.constant 1.000000e+00 : f32
    %70 = vector.broadcast %cst_25 : f32 to vector<8x128xf32>
    %71 = arith.addf %70, %69 : vector<8x128xf32>
    %72 = arith.divf %70, %71 : vector<8x128xf32>
    %73 = arith.mulf %64, %16 : vector<8x128xf32>
    %74 = arith.mulf %58, %66 : vector<8x128xf32>
    %75 = arith.addf %73, %74 : vector<8x128xf32>
    %76 = math.tanh %75 : vector<8x128xf32>
    %77 = arith.mulf %72, %76 : vector<8x128xf32>
    %78 = arith.index_cast %c0_i32 : i32 to index
    %c0_26 = arith.constant 0 : index
    %c0_27 = arith.constant 0 : index
    %79 = vector.load %arg13[%78, %c0_26, %c0_27] : memref<8x8x128xf32, #tpu.memory_space<vmem>>, vector<1x8x128xf32>
    %80 = vector.shape_cast %79 : vector<1x8x128xf32> to vector<8x128xf32>
    %81 = vector.shape_cast %77 : vector<8x128xf32> to vector<1x8x128xf32>
    tpu.vector_store %arg13[%78, %c0_26, %c0_27], %81 {strides = array<i32>} : memref<8x8x128xf32, #tpu.memory_space<vmem>>, vector<1x8x128xf32>,
    %c1_i32 = arith.constant 1 : i32
    %82 = arith.index_cast %c1_i32 : i32 to index
    %c0_28 = arith.constant 0 : index
    %c0_29 = arith.constant 0 : index
    %83 = vector.load %arg12[%82, %c0_28, %c0_29] : memref<8x8x512xbf16, #tpu.memory_space<vmem>>, vector<1x8x512xbf16>
    %84 = vector.shape_cast %83 : vector<1x8x512xbf16> to vector<8x512xbf16>
    %85 = arith.extf %84 : vector<8x512xbf16> to vector<8x512xf32>
    %86 = arith.truncf %48 : vector<8x128xf32> to vector<8x128xbf16>
    %cst_30 = arith.constant dense<0.000000e+00> : vector<8x512xf32>
    %87 = tpu.matmul %86, %11, %cst_30 {dimension_numbers = #tpu.dot_dimension_numbers<[1], [0], [0], [1], [0, 0, 1, 1], [], []>} : vector<8x128xbf16>, vector<128x512xbf16>, vector<8x512xf32> -> vector<8x512xf32>
    %88 = arith.addf %85, %87 : vector<8x512xf32>
    %89 = vector.extract_strided_slice %88 {offsets = [0, 0], sizes = [8, 128], strides = [1, 1]} : vector<8x512xf32> to vector<8x128xf32>
    %90 = arith.negf %89 : vector<8x128xf32>
    %91 = math.exp %90 : vector<8x128xf32>
    %cst_31 = arith.constant 1.000000e+00 : f32
    %92 = vector.broadcast %cst_31 : f32 to vector<8x128xf32>
    %93 = arith.addf %92, %91 : vector<8x128xf32>
    %94 = arith.divf %92, %93 : vector<8x128xf32>
    %95 = vector.extract_strided_slice %88 {offsets = [0, 128], sizes = [8, 128], strides = [1, 1]} : vector<8x512xf32> to vector<8x128xf32>
    %96 = arith.negf %95 : vector<8x128xf32>
    %97 = math.exp %96 : vector<8x128xf32>
    %cst_32 = arith.constant 1.000000e+00 : f32
    %98 = vector.broadcast %cst_32 : f32 to vector<8x128xf32>
    %99 = arith.addf %98, %97 : vector<8x128xf32>
    %100 = arith.divf %98, %99 : vector<8x128xf32>
    %101 = vector.extract_strided_slice %88 {offsets = [0, 256], sizes = [8, 128], strides = [1, 1]} : vector<8x512xf32> to vector<8x128xf32>
    %102 = math.tanh %101 : vector<8x128xf32>
    %103 = vector.extract_strided_slice %88 {offsets = [0, 384], sizes = [8, 128], strides = [1, 1]} : vector<8x512xf32> to vector<8x128xf32>
    %104 = arith.negf %103 : vector<8x128xf32>
    %105 = math.exp %104 : vector<8x128xf32>
    %cst_33 = arith.constant 1.000000e+00 : f32
    %106 = vector.broadcast %cst_33 : f32 to vector<8x128xf32>
    %107 = arith.addf %106, %105 : vector<8x128xf32>
    %108 = arith.divf %106, %107 : vector<8x128xf32>
    %109 = arith.mulf %100, %46 : vector<8x128xf32>
    %110 = arith.mulf %94, %102 : vector<8x128xf32>
    %111 = arith.addf %109, %110 : vector<8x128xf32>
    %112 = math.tanh %111 : vector<8x128xf32>
    %113 = arith.mulf %108, %112 : vector<8x128xf32>
    %114 = tpu.concatenate %113, %77 in 1 : vector<8x128xf32>, vector<8x128xf32> -> vector<8x256xf32>
    %115 = arith.truncf %114 : vector<8x256xf32> to vector<8x256xbf16>
    %cst_34 = arith.constant dense<0.000000e+00> : vector<8x512xf32>
    %116 = tpu.matmul %115, %12, %cst_34 {dimension_numbers = #tpu.dot_dimension_numbers<[1], [0], [0], [1], [0, 0, 1, 1], [], []>} : vector<8x256xbf16>, vector<256x512xbf16>, vector<8x512xf32> -> vector<8x512xf32>
    %117 = arith.addf %116, %15 : vector<8x512xf32>
    %118 = vector.extract_strided_slice %117 {offsets = [0, 0], sizes = [8, 128], strides = [1, 1]} : vector<8x512xf32> to vector<8x128xf32>
    %119 = arith.negf %118 : vector<8x128xf32>
    %120 = math.exp %119 : vector<8x128xf32>
    %cst_35 = arith.constant 1.000000e+00 : f32
    %121 = vector.broadcast %cst_35 : f32 to vector<8x128xf32>
    %122 = arith.addf %121, %120 : vector<8x128xf32>
    %123 = arith.divf %121, %122 : vector<8x128xf32>
    %124 = vector.extract_strided_slice %117 {offsets = [0, 128], sizes = [8, 128], strides = [1, 1]} : vector<8x512xf32> to vector<8x128xf32>
    %125 = arith.negf %124 : vector<8x128xf32>
    %126 = math.exp %125 : vector<8x128xf32>
    %cst_36 = arith.constant 1.000000e+00 : f32
    %127 = vector.broadcast %cst_36 : f32 to vector<8x128xf32>
    %128 = arith.addf %127, %126 : vector<8x128xf32>
    %129 = arith.divf %127, %128 : vector<8x128xf32>
    %130 = vector.extract_strided_slice %117 {offsets = [0, 256], sizes = [8, 128], strides = [1, 1]} : vector<8x512xf32> to vector<8x128xf32>
    %131 = math.tanh %130 : vector<8x128xf32>
    %132 = vector.extract_strided_slice %117 {offsets = [0, 384], sizes = [8, 128], strides = [1, 1]} : vector<8x512xf32> to vector<8x128xf32>
    %133 = arith.negf %132 : vector<8x128xf32>
    %134 = math.exp %133 : vector<8x128xf32>
    %cst_37 = arith.constant 1.000000e+00 : f32
    %135 = vector.broadcast %cst_37 : f32 to vector<8x128xf32>
    %136 = arith.addf %135, %134 : vector<8x128xf32>
    %137 = arith.divf %135, %136 : vector<8x128xf32>
    %138 = arith.mulf %129, %75 : vector<8x128xf32>
    %139 = arith.mulf %123, %131 : vector<8x128xf32>
    %140 = arith.addf %138, %139 : vector<8x128xf32>
    %141 = math.tanh %140 : vector<8x128xf32>
    %142 = arith.mulf %137, %141 : vector<8x128xf32>
    %143 = arith.index_cast %c1_i32 : i32 to index
    %c0_38 = arith.constant 0 : index
    %c0_39 = arith.constant 0 : index
    %144 = vector.load %arg13[%143, %c0_38, %c0_39] : memref<8x8x128xf32, #tpu.memory_space<vmem>>, vector<1x8x128xf32>
    %145 = vector.shape_cast %144 : vector<1x8x128xf32> to vector<8x128xf32>
    %146 = vector.shape_cast %142 : vector<8x128xf32> to vector<1x8x128xf32>
    tpu.vector_store %arg13[%143, %c0_38, %c0_39], %146 {strides = array<i32>} : memref<8x8x128xf32, #tpu.memory_space<vmem>>, vector<1x8x128xf32>,
    %c2_i32 = arith.constant 2 : i32
    %147 = arith.index_cast %c2_i32 : i32 to index
    %c0_40 = arith.constant 0 : index
    %c0_41 = arith.constant 0 : index
    %148 = vector.load %arg12[%147, %c0_40, %c0_41] : memref<8x8x512xbf16, #tpu.memory_space<vmem>>, vector<1x8x512xbf16>
    %149 = vector.shape_cast %148 : vector<1x8x512xbf16> to vector<8x512xbf16>
    %150 = arith.extf %149 : vector<8x512xbf16> to vector<8x512xf32>
    %151 = arith.truncf %113 : vector<8x128xf32> to vector<8x128xbf16>
    %cst_42 = arith.constant dense<0.000000e+00> : vector<8x512xf32>
    %152 = tpu.matmul %151, %11, %cst_42 {dimension_numbers = #tpu.dot_dimension_numbers<[1], [0], [0], [1], [0, 0, 1, 1], [], []>} : vector<8x128xbf16>, vector<128x512xbf16>, vector<8x512xf32> -> vector<8x512xf32>
    %153 = arith.addf %150, %152 : vector<8x512xf32>
    %154 = vector.extract_strided_slice %153 {offsets = [0, 0], sizes = [8, 128], strides = [1, 1]} : vector<8x512xf32> to vector<8x128xf32>
    %155 = arith.negf %154 : vector<8x128xf32>
    %156 = math.exp %155 : vector<8x128xf32>
    %cst_43 = arith.constant 1.000000e+00 : f32
    %157 = vector.broadcast %cst_43 : f32 to vector<8x128xf32>
    %158 = arith.addf %157, %156 : vector<8x128xf32>
    %159 = arith.divf %157, %158 : vector<8x128xf32>
    %160 = vector.extract_strided_slice %153 {offsets = [0, 128], sizes = [8, 128], strides = [1, 1]} : vector<8x512xf32> to vector<8x128xf32>
    %161 = arith.negf %160 : vector<8x128xf32>
    %162 = math.exp %161 : vector<8x128xf32>
    %cst_44 = arith.constant 1.000000e+00 : f32
    %163 = vector.broadcast %cst_44 : f32 to vector<8x128xf32>
    %164 = arith.addf %163, %162 : vector<8x128xf32>
    %165 = arith.divf %163, %164 : vector<8x128xf32>
    %166 = vector.extract_strided_slice %153 {offsets = [0, 256], sizes = [8, 128], strides = [1, 1]} : vector<8x512xf32> to vector<8x128xf32>
    %167 = math.tanh %166 : vector<8x128xf32>
    %168 = vector.extract_strided_slice %153 {offsets = [0, 384], sizes = [8, 128], strides = [1, 1]} : vector<8x512xf32> to vector<8x128xf32>
    %169 = arith.negf %168 : vector<8x128xf32>
    %170 = math.exp %169 : vector<8x128xf32>
    %cst_45 = arith.constant 1.000000e+00 : f32
    %171 = vector.broadcast %cst_45 : f32 to vector<8x128xf32>
    %172 = arith.addf %171, %170 : vector<8x128xf32>
    %173 = arith.divf %171, %172 : vector<8x128xf32>
    %174 = arith.mulf %165, %111 : vector<8x128xf32>
    %175 = arith.mulf %159, %167 : vector<8x128xf32>
    %176 = arith.addf %174, %175 : vector<8x128xf32>
    %177 = math.tanh %176 : vector<8x128xf32>
    %178 = arith.mulf %173, %177 : vector<8x128xf32>
    %179 = tpu.concatenate %178, %142 in 1 : vector<8x128xf32>, vector<8x128xf32> -> vector<8x256xf32>
    %180 = arith.truncf %179 : vector<8x256xf32> to vector<8x256xbf16>
    %cst_46 = arith.constant dense<0.000000e+00> : vector<8x512xf32>
    %181 = tpu.matmul %180, %12, %cst_46 {dimension_numbers = #tpu.dot_dimension_numbers<[1], [0], [0], [1], [0, 0, 1, 1], [], []>} : vector<8x256xbf16>, vector<256x512xbf16>, vector<8x512xf32> -> vector<8x512xf32>
    %182 = arith.addf %181, %15 : vector<8x512xf32>
    %183 = vector.extract_strided_slice %182 {offsets = [0, 0], sizes = [8, 128], strides = [1, 1]} : vector<8x512xf32> to vector<8x128xf32>
    %184 = arith.negf %183 : vector<8x128xf32>
    %185 = math.exp %184 : vector<8x128xf32>
    %cst_47 = arith.constant 1.000000e+00 : f32
    %186 = vector.broadcast %cst_47 : f32 to vector<8x128xf32>
    %187 = arith.addf %186, %185 : vector<8x128xf32>
    %188 = arith.divf %186, %187 : vector<8x128xf32>
    %189 = vector.extract_strided_slice %182 {offsets = [0, 128], sizes = [8, 128], strides = [1, 1]} : vector<8x512xf32> to vector<8x128xf32>
    %190 = arith.negf %189 : vector<8x128xf32>
    %191 = math.exp %190 : vector<8x128xf32>
    %cst_48 = arith.constant 1.000000e+00 : f32
    %192 = vector.broadcast %cst_48 : f32 to vector<8x128xf32>
    %193 = arith.addf %192, %191 : vector<8x128xf32>
    %194 = arith.divf %192, %193 : vector<8x128xf32>
    %195 = vector.extract_strided_slice %182 {offsets = [0, 256], sizes = [8, 128], strides = [1, 1]} : vector<8x512xf32> to vector<8x128xf32>
    %196 = math.tanh %195 : vector<8x128xf32>
    %197 = vector.extract_strided_slice %182 {offsets = [0, 384], sizes = [8, 128], strides = [1, 1]} : vector<8x512xf32> to vector<8x128xf32>
    %198 = arith.negf %197 : vector<8x128xf32>
    %199 = math.exp %198 : vector<8x128xf32>
    %cst_49 = arith.constant 1.000000e+00 : f32
    %200 = vector.broadcast %cst_49 : f32 to vector<8x128xf32>
    %201 = arith.addf %200, %199 : vector<8x128xf32>
    %202 = arith.divf %200, %201 : vector<8x128xf32>
    %203 = arith.mulf %194, %140 : vector<8x128xf32>
    %204 = arith.mulf %188, %196 : vector<8x128xf32>
    %205 = arith.addf %203, %204 : vector<8x128xf32>
    %206 = math.tanh %205 : vector<8x128xf32>
    %207 = arith.mulf %202, %206 : vector<8x128xf32>
    %208 = arith.index_cast %c2_i32 : i32 to index
    %c0_50 = arith.constant 0 : index
    %c0_51 = arith.constant 0 : index
    %209 = vector.load %arg13[%208, %c0_50, %c0_51] : memref<8x8x128xf32, #tpu.memory_space<vmem>>, vector<1x8x128xf32>
    %210 = vector.shape_cast %209 : vector<1x8x128xf32> to vector<8x128xf32>
    %211 = vector.shape_cast %207 : vector<8x128xf32> to vector<1x8x128xf32>
    tpu.vector_store %arg13[%208, %c0_50, %c0_51], %211 {strides = array<i32>} : memref<8x8x128xf32, #tpu.memory_space<vmem>>, vector<1x8x128xf32>,
    %c3_i32 = arith.constant 3 : i32
    %212 = arith.index_cast %c3_i32 : i32 to index
    %c0_52 = arith.constant 0 : index
    %c0_53 = arith.constant 0 : index
    %213 = vector.load %arg12[%212, %c0_52, %c0_53] : memref<8x8x512xbf16, #tpu.memory_space<vmem>>, vector<1x8x512xbf16>
    %214 = vector.shape_cast %213 : vector<1x8x512xbf16> to vector<8x512xbf16>
    %215 = arith.extf %214 : vector<8x512xbf16> to vector<8x512xf32>
    %216 = arith.truncf %178 : vector<8x128xf32> to vector<8x128xbf16>
    %cst_54 = arith.constant dense<0.000000e+00> : vector<8x512xf32>
    %217 = tpu.matmul %216, %11, %cst_54 {dimension_numbers = #tpu.dot_dimension_numbers<[1], [0], [0], [1], [0, 0, 1, 1], [], []>} : vector<8x128xbf16>, vector<128x512xbf16>, vector<8x512xf32> -> vector<8x512xf32>
    %218 = arith.addf %215, %217 : vector<8x512xf32>
    %219 = vector.extract_strided_slice %218 {offsets = [0, 0], sizes = [8, 128], strides = [1, 1]} : vector<8x512xf32> to vector<8x128xf32>
    %220 = arith.negf %219 : vector<8x128xf32>
    %221 = math.exp %220 : vector<8x128xf32>
    %cst_55 = arith.constant 1.000000e+00 : f32
    %222 = vector.broadcast %cst_55 : f32 to vector<8x128xf32>
    %223 = arith.addf %222, %221 : vector<8x128xf32>
    %224 = arith.divf %222, %223 : vector<8x128xf32>
    %225 = vector.extract_strided_slice %218 {offsets = [0, 128], sizes = [8, 128], strides = [1, 1]} : vector<8x512xf32> to vector<8x128xf32>
    %226 = arith.negf %225 : vector<8x128xf32>
    %227 = math.exp %226 : vector<8x128xf32>
    %cst_56 = arith.constant 1.000000e+00 : f32
    %228 = vector.broadcast %cst_56 : f32 to vector<8x128xf32>
    %229 = arith.addf %228, %227 : vector<8x128xf32>
    %230 = arith.divf %228, %229 : vector<8x128xf32>
    %231 = vector.extract_strided_slice %218 {offsets = [0, 256], sizes = [8, 128], strides = [1, 1]} : vector<8x512xf32> to vector<8x128xf32>
    %232 = math.tanh %231 : vector<8x128xf32>
    %233 = vector.extract_strided_slice %218 {offsets = [0, 384], sizes = [8, 128], strides = [1, 1]} : vector<8x512xf32> to vector<8x128xf32>
    %234 = arith.negf %233 : vector<8x128xf32>
    %235 = math.exp %234 : vector<8x128xf32>
    %cst_57 = arith.constant 1.000000e+00 : f32
    %236 = vector.broadcast %cst_57 : f32 to vector<8x128xf32>
    %237 = arith.addf %236, %235 : vector<8x128xf32>
    %238 = arith.divf %236, %237 : vector<8x128xf32>
    %239 = arith.mulf %230, %176 : vector<8x128xf32>
    %240 = arith.mulf %224, %232 : vector<8x128xf32>
    %241 = arith.addf %239, %240 : vector<8x128xf32>
    %242 = math.tanh %241 : vector<8x128xf32>
    %243 = arith.mulf %238, %242 : vector<8x128xf32>
    %244 = tpu.concatenate %243, %207 in 1 : vector<8x128xf32>, vector<8x128xf32> -> vector<8x256xf32>
    %245 = arith.truncf %244 : vector<8x256xf32> to vector<8x256xbf16>
    %cst_58 = arith.constant dense<0.000000e+00> : vector<8x512xf32>
    %246 = tpu.matmul %245, %12, %cst_58 {dimension_numbers = #tpu.dot_dimension_numbers<[1], [0], [0], [1], [0, 0, 1, 1], [], []>} : vector<8x256xbf16>, vector<256x512xbf16>, vector<8x512xf32> -> vector<8x512xf32>
    %247 = arith.addf %246, %15 : vector<8x512xf32>
    %248 = vector.extract_strided_slice %247 {offsets = [0, 0], sizes = [8, 128], strides = [1, 1]} : vector<8x512xf32> to vector<8x128xf32>
    %249 = arith.negf %248 : vector<8x128xf32>
    %250 = math.exp %249 : vector<8x128xf32>
    %cst_59 = arith.constant 1.000000e+00 : f32
    %251 = vector.broadcast %cst_59 : f32 to vector<8x128xf32>
    %252 = arith.addf %251, %250 : vector<8x128xf32>
    %253 = arith.divf %251, %252 : vector<8x128xf32>
    %254 = vector.extract_strided_slice %247 {offsets = [0, 128], sizes = [8, 128], strides = [1, 1]} : vector<8x512xf32> to vector<8x128xf32>
    %255 = arith.negf %254 : vector<8x128xf32>
    %256 = math.exp %255 : vector<8x128xf32>
    %cst_60 = arith.constant 1.000000e+00 : f32
    %257 = vector.broadcast %cst_60 : f32 to vector<8x128xf32>
    %258 = arith.addf %257, %256 : vector<8x128xf32>
    %259 = arith.divf %257, %258 : vector<8x128xf32>
    %260 = vector.extract_strided_slice %247 {offsets = [0, 256], sizes = [8, 128], strides = [1, 1]} : vector<8x512xf32> to vector<8x128xf32>
    %261 = math.tanh %260 : vector<8x128xf32>
    %262 = vector.extract_strided_slice %247 {offsets = [0, 384], sizes = [8, 128], strides = [1, 1]} : vector<8x512xf32> to vector<8x128xf32>
    %263 = arith.negf %262 : vector<8x128xf32>
    %264 = math.exp %263 : vector<8x128xf32>
    %cst_61 = arith.constant 1.000000e+00 : f32
    %265 = vector.broadcast %cst_61 : f32 to vector<8x128xf32>
    %266 = arith.addf %265, %264 : vector<8x128xf32>
    %267 = arith.divf %265, %266 : vector<8x128xf32>
    %268 = arith.mulf %259, %205 : vector<8x128xf32>
    %269 = arith.mulf %253, %261 : vector<8x128xf32>
    %270 = arith.addf %268, %269 : vector<8x128xf32>
    %271 = math.tanh %270 : vector<8x128xf32>
    %272 = arith.mulf %267, %271 : vector<8x128xf32>
    %273 = arith.index_cast %c3_i32 : i32 to index
    %c0_62 = arith.constant 0 : index
    %c0_63 = arith.constant 0 : index
    %274 = vector.load %arg13[%273, %c0_62, %c0_63] : memref<8x8x128xf32, #tpu.memory_space<vmem>>, vector<1x8x128xf32>
    %275 = vector.shape_cast %274 : vector<1x8x128xf32> to vector<8x128xf32>
    %276 = vector.shape_cast %272 : vector<8x128xf32> to vector<1x8x128xf32>
    tpu.vector_store %arg13[%273, %c0_62, %c0_63], %276 {strides = array<i32>} : memref<8x8x128xf32, #tpu.memory_space<vmem>>, vector<1x8x128xf32>,
    %c4_i32 = arith.constant 4 : i32
    %277 = arith.index_cast %c4_i32 : i32 to index
    %c0_64 = arith.constant 0 : index
    %c0_65 = arith.constant 0 : index
    %278 = vector.load %arg12[%277, %c0_64, %c0_65] : memref<8x8x512xbf16, #tpu.memory_space<vmem>>, vector<1x8x512xbf16>
    %279 = vector.shape_cast %278 : vector<1x8x512xbf16> to vector<8x512xbf16>
    %280 = arith.extf %279 : vector<8x512xbf16> to vector<8x512xf32>
    %281 = arith.truncf %243 : vector<8x128xf32> to vector<8x128xbf16>
    %cst_66 = arith.constant dense<0.000000e+00> : vector<8x512xf32>
    %282 = tpu.matmul %281, %11, %cst_66 {dimension_numbers = #tpu.dot_dimension_numbers<[1], [0], [0], [1], [0, 0, 1, 1], [], []>} : vector<8x128xbf16>, vector<128x512xbf16>, vector<8x512xf32> -> vector<8x512xf32>
    %283 = arith.addf %280, %282 : vector<8x512xf32>
    %284 = vector.extract_strided_slice %283 {offsets = [0, 0], sizes = [8, 128], strides = [1, 1]} : vector<8x512xf32> to vector<8x128xf32>
    %285 = arith.negf %284 : vector<8x128xf32>
    %286 = math.exp %285 : vector<8x128xf32>
    %cst_67 = arith.constant 1.000000e+00 : f32
    %287 = vector.broadcast %cst_67 : f32 to vector<8x128xf32>
    %288 = arith.addf %287, %286 : vector<8x128xf32>
    %289 = arith.divf %287, %288 : vector<8x128xf32>
    %290 = vector.extract_strided_slice %283 {offsets = [0, 128], sizes = [8, 128], strides = [1, 1]} : vector<8x512xf32> to vector<8x128xf32>
    %291 = arith.negf %290 : vector<8x128xf32>
    %292 = math.exp %291 : vector<8x128xf32>
    %cst_68 = arith.constant 1.000000e+00 : f32
    %293 = vector.broadcast %cst_68 : f32 to vector<8x128xf32>
    %294 = arith.addf %293, %292 : vector<8x128xf32>
    %295 = arith.divf %293, %294 : vector<8x128xf32>
    %296 = vector.extract_strided_slice %283 {offsets = [0, 256], sizes = [8, 128], strides = [1, 1]} : vector<8x512xf32> to vector<8x128xf32>
    %297 = math.tanh %296 : vector<8x128xf32>
    %298 = vector.extract_strided_slice %283 {offsets = [0, 384], sizes = [8, 128], strides = [1, 1]} : vector<8x512xf32> to vector<8x128xf32>
    %299 = arith.negf %298 : vector<8x128xf32>
    %300 = math.exp %299 : vector<8x128xf32>
    %cst_69 = arith.constant 1.000000e+00 : f32
    %301 = vector.broadcast %cst_69 : f32 to vector<8x128xf32>
    %302 = arith.addf %301, %300 : vector<8x128xf32>
    %303 = arith.divf %301, %302 : vector<8x128xf32>
    %304 = arith.mulf %295, %241 : vector<8x128xf32>
    %305 = arith.mulf %289, %297 : vector<8x128xf32>
    %306 = arith.addf %304, %305 : vector<8x128xf32>
    %307 = math.tanh %306 : vector<8x128xf32>
    %308 = arith.mulf %303, %307 : vector<8x128xf32>
    %309 = tpu.concatenate %308, %272 in 1 : vector<8x128xf32>, vector<8x128xf32> -> vector<8x256xf32>
    %310 = arith.truncf %309 : vector<8x256xf32> to vector<8x256xbf16>
    %cst_70 = arith.constant dense<0.000000e+00> : vector<8x512xf32>
    %311 = tpu.matmul %310, %12, %cst_70 {dimension_numbers = #tpu.dot_dimension_numbers<[1], [0], [0], [1], [0, 0, 1, 1], [], []>} : vector<8x256xbf16>, vector<256x512xbf16>, vector<8x512xf32> -> vector<8x512xf32>
    %312 = arith.addf %311, %15 : vector<8x512xf32>
    %313 = vector.extract_strided_slice %312 {offsets = [0, 0], sizes = [8, 128], strides = [1, 1]} : vector<8x512xf32> to vector<8x128xf32>
    %314 = arith.negf %313 : vector<8x128xf32>
    %315 = math.exp %314 : vector<8x128xf32>
    %cst_71 = arith.constant 1.000000e+00 : f32
    %316 = vector.broadcast %cst_71 : f32 to vector<8x128xf32>
    %317 = arith.addf %316, %315 : vector<8x128xf32>
    %318 = arith.divf %316, %317 : vector<8x128xf32>
    %319 = vector.extract_strided_slice %312 {offsets = [0, 128], sizes = [8, 128], strides = [1, 1]} : vector<8x512xf32> to vector<8x128xf32>
    %320 = arith.negf %319 : vector<8x128xf32>
    %321 = math.exp %320 : vector<8x128xf32>
    %cst_72 = arith.constant 1.000000e+00 : f32
    %322 = vector.broadcast %cst_72 : f32 to vector<8x128xf32>
    %323 = arith.addf %322, %321 : vector<8x128xf32>
    %324 = arith.divf %322, %323 : vector<8x128xf32>
    %325 = vector.extract_strided_slice %312 {offsets = [0, 256], sizes = [8, 128], strides = [1, 1]} : vector<8x512xf32> to vector<8x128xf32>
    %326 = math.tanh %325 : vector<8x128xf32>
    %327 = vector.extract_strided_slice %312 {offsets = [0, 384], sizes = [8, 128], strides = [1, 1]} : vector<8x512xf32> to vector<8x128xf32>
    %328 = arith.negf %327 : vector<8x128xf32>
    %329 = math.exp %328 : vector<8x128xf32>
    %cst_73 = arith.constant 1.000000e+00 : f32
    %330 = vector.broadcast %cst_73 : f32 to vector<8x128xf32>
    %331 = arith.addf %330, %329 : vector<8x128xf32>
    %332 = arith.divf %330, %331 : vector<8x128xf32>
    %333 = arith.mulf %324, %270 : vector<8x128xf32>
    %334 = arith.mulf %318, %326 : vector<8x128xf32>
    %335 = arith.addf %333, %334 : vector<8x128xf32>
    %336 = math.tanh %335 : vector<8x128xf32>
    %337 = arith.mulf %332, %336 : vector<8x128xf32>
    %338 = arith.index_cast %c4_i32 : i32 to index
    %c0_74 = arith.constant 0 : index
    %c0_75 = arith.constant 0 : index
    %339 = vector.load %arg13[%338, %c0_74, %c0_75] : memref<8x8x128xf32, #tpu.memory_space<vmem>>, vector<1x8x128xf32>
    %340 = vector.shape_cast %339 : vector<1x8x128xf32> to vector<8x128xf32>
    %341 = vector.shape_cast %337 : vector<8x128xf32> to vector<1x8x128xf32>
    tpu.vector_store %arg13[%338, %c0_74, %c0_75], %341 {strides = array<i32>} : memref<8x8x128xf32, #tpu.memory_space<vmem>>, vector<1x8x128xf32>,
    %c5_i32 = arith.constant 5 : i32
    %342 = arith.index_cast %c5_i32 : i32 to index
    %c0_76 = arith.constant 0 : index
    %c0_77 = arith.constant 0 : index
    %343 = vector.load %arg12[%342, %c0_76, %c0_77] : memref<8x8x512xbf16, #tpu.memory_space<vmem>>, vector<1x8x512xbf16>
    %344 = vector.shape_cast %343 : vector<1x8x512xbf16> to vector<8x512xbf16>
    %345 = arith.extf %344 : vector<8x512xbf16> to vector<8x512xf32>
    %346 = arith.truncf %308 : vector<8x128xf32> to vector<8x128xbf16>
    %cst_78 = arith.constant dense<0.000000e+00> : vector<8x512xf32>
    %347 = tpu.matmul %346, %11, %cst_78 {dimension_numbers = #tpu.dot_dimension_numbers<[1], [0], [0], [1], [0, 0, 1, 1], [], []>} : vector<8x128xbf16>, vector<128x512xbf16>, vector<8x512xf32> -> vector<8x512xf32>
    %348 = arith.addf %345, %347 : vector<8x512xf32>
    %349 = vector.extract_strided_slice %348 {offsets = [0, 0], sizes = [8, 128], strides = [1, 1]} : vector<8x512xf32> to vector<8x128xf32>
    %350 = arith.negf %349 : vector<8x128xf32>
    %351 = math.exp %350 : vector<8x128xf32>
    %cst_79 = arith.constant 1.000000e+00 : f32
    %352 = vector.broadcast %cst_79 : f32 to vector<8x128xf32>
    %353 = arith.addf %352, %351 : vector<8x128xf32>
    %354 = arith.divf %352, %353 : vector<8x128xf32>
    %355 = vector.extract_strided_slice %348 {offsets = [0, 128], sizes = [8, 128], strides = [1, 1]} : vector<8x512xf32> to vector<8x128xf32>
    %356 = arith.negf %355 : vector<8x128xf32>
    %357 = math.exp %356 : vector<8x128xf32>
    %cst_80 = arith.constant 1.000000e+00 : f32
    %358 = vector.broadcast %cst_80 : f32 to vector<8x128xf32>
    %359 = arith.addf %358, %357 : vector<8x128xf32>
    %360 = arith.divf %358, %359 : vector<8x128xf32>
    %361 = vector.extract_strided_slice %348 {offsets = [0, 256], sizes = [8, 128], strides = [1, 1]} : vector<8x512xf32> to vector<8x128xf32>
    %362 = math.tanh %361 : vector<8x128xf32>
    %363 = vector.extract_strided_slice %348 {offsets = [0, 384], sizes = [8, 128], strides = [1, 1]} : vector<8x512xf32> to vector<8x128xf32>
    %364 = arith.negf %363 : vector<8x128xf32>
    %365 = math.exp %364 : vector<8x128xf32>
    %cst_81 = arith.constant 1.000000e+00 : f32
    %366 = vector.broadcast %cst_81 : f32 to vector<8x128xf32>
    %367 = arith.addf %366, %365 : vector<8x128xf32>
    %368 = arith.divf %366, %367 : vector<8x128xf32>
    %369 = arith.mulf %360, %306 : vector<8x128xf32>
    %370 = arith.mulf %354, %362 : vector<8x128xf32>
    %371 = arith.addf %369, %370 : vector<8x128xf32>
    %372 = math.tanh %371 : vector<8x128xf32>
    %373 = arith.mulf %368, %372 : vector<8x128xf32>
    %374 = tpu.concatenate %373, %337 in 1 : vector<8x128xf32>, vector<8x128xf32> -> vector<8x256xf32>
    %375 = arith.truncf %374 : vector<8x256xf32> to vector<8x256xbf16>
    %cst_82 = arith.constant dense<0.000000e+00> : vector<8x512xf32>
    %376 = tpu.matmul %375, %12, %cst_82 {dimension_numbers = #tpu.dot_dimension_numbers<[1], [0], [0], [1], [0, 0, 1, 1], [], []>} : vector<8x256xbf16>, vector<256x512xbf16>, vector<8x512xf32> -> vector<8x512xf32>
    %377 = arith.addf %376, %15 : vector<8x512xf32>
    %378 = vector.extract_strided_slice %377 {offsets = [0, 0], sizes = [8, 128], strides = [1, 1]} : vector<8x512xf32> to vector<8x128xf32>
    %379 = arith.negf %378 : vector<8x128xf32>
    %380 = math.exp %379 : vector<8x128xf32>
    %cst_83 = arith.constant 1.000000e+00 : f32
    %381 = vector.broadcast %cst_83 : f32 to vector<8x128xf32>
    %382 = arith.addf %381, %380 : vector<8x128xf32>
    %383 = arith.divf %381, %382 : vector<8x128xf32>
    %384 = vector.extract_strided_slice %377 {offsets = [0, 128], sizes = [8, 128], strides = [1, 1]} : vector<8x512xf32> to vector<8x128xf32>
    %385 = arith.negf %384 : vector<8x128xf32>
    %386 = math.exp %385 : vector<8x128xf32>
    %cst_84 = arith.constant 1.000000e+00 : f32
    %387 = vector.broadcast %cst_84 : f32 to vector<8x128xf32>
    %388 = arith.addf %387, %386 : vector<8x128xf32>
    %389 = arith.divf %387, %388 : vector<8x128xf32>
    %390 = vector.extract_strided_slice %377 {offsets = [0, 256], sizes = [8, 128], strides = [1, 1]} : vector<8x512xf32> to vector<8x128xf32>
    %391 = math.tanh %390 : vector<8x128xf32>
    %392 = vector.extract_strided_slice %377 {offsets = [0, 384], sizes = [8, 128], strides = [1, 1]} : vector<8x512xf32> to vector<8x128xf32>
    %393 = arith.negf %392 : vector<8x128xf32>
    %394 = math.exp %393 : vector<8x128xf32>
    %cst_85 = arith.constant 1.000000e+00 : f32
    %395 = vector.broadcast %cst_85 : f32 to vector<8x128xf32>
    %396 = arith.addf %395, %394 : vector<8x128xf32>
    %397 = arith.divf %395, %396 : vector<8x128xf32>
    %398 = arith.mulf %389, %335 : vector<8x128xf32>
    %399 = arith.mulf %383, %391 : vector<8x128xf32>
    %400 = arith.addf %398, %399 : vector<8x128xf32>
    %401 = math.tanh %400 : vector<8x128xf32>
    %402 = arith.mulf %397, %401 : vector<8x128xf32>
    %403 = arith.index_cast %c5_i32 : i32 to index
    %c0_86 = arith.constant 0 : index
    %c0_87 = arith.constant 0 : index
    %404 = vector.load %arg13[%403, %c0_86, %c0_87] : memref<8x8x128xf32, #tpu.memory_space<vmem>>, vector<1x8x128xf32>
    %405 = vector.shape_cast %404 : vector<1x8x128xf32> to vector<8x128xf32>
    %406 = vector.shape_cast %402 : vector<8x128xf32> to vector<1x8x128xf32>
    tpu.vector_store %arg13[%403, %c0_86, %c0_87], %406 {strides = array<i32>} : memref<8x8x128xf32, #tpu.memory_space<vmem>>, vector<1x8x128xf32>,
    %c6_i32 = arith.constant 6 : i32
    %407 = arith.index_cast %c6_i32 : i32 to index
    %c0_88 = arith.constant 0 : index
    %c0_89 = arith.constant 0 : index
    %408 = vector.load %arg12[%407, %c0_88, %c0_89] : memref<8x8x512xbf16, #tpu.memory_space<vmem>>, vector<1x8x512xbf16>
    %409 = vector.shape_cast %408 : vector<1x8x512xbf16> to vector<8x512xbf16>
    %410 = arith.extf %409 : vector<8x512xbf16> to vector<8x512xf32>
    %411 = arith.truncf %373 : vector<8x128xf32> to vector<8x128xbf16>
    %cst_90 = arith.constant dense<0.000000e+00> : vector<8x512xf32>
    %412 = tpu.matmul %411, %11, %cst_90 {dimension_numbers = #tpu.dot_dimension_numbers<[1], [0], [0], [1], [0, 0, 1, 1], [], []>} : vector<8x128xbf16>, vector<128x512xbf16>, vector<8x512xf32> -> vector<8x512xf32>
    %413 = arith.addf %410, %412 : vector<8x512xf32>
    %414 = vector.extract_strided_slice %413 {offsets = [0, 0], sizes = [8, 128], strides = [1, 1]} : vector<8x512xf32> to vector<8x128xf32>
    %415 = arith.negf %414 : vector<8x128xf32>
    %416 = math.exp %415 : vector<8x128xf32>
    %cst_91 = arith.constant 1.000000e+00 : f32
    %417 = vector.broadcast %cst_91 : f32 to vector<8x128xf32>
    %418 = arith.addf %417, %416 : vector<8x128xf32>
    %419 = arith.divf %417, %418 : vector<8x128xf32>
    %420 = vector.extract_strided_slice %413 {offsets = [0, 128], sizes = [8, 128], strides = [1, 1]} : vector<8x512xf32> to vector<8x128xf32>
    %421 = arith.negf %420 : vector<8x128xf32>
    %422 = math.exp %421 : vector<8x128xf32>
    %cst_92 = arith.constant 1.000000e+00 : f32
    %423 = vector.broadcast %cst_92 : f32 to vector<8x128xf32>
    %424 = arith.addf %423, %422 : vector<8x128xf32>
    %425 = arith.divf %423, %424 : vector<8x128xf32>
    %426 = vector.extract_strided_slice %413 {offsets = [0, 256], sizes = [8, 128], strides = [1, 1]} : vector<8x512xf32> to vector<8x128xf32>
    %427 = math.tanh %426 : vector<8x128xf32>
    %428 = vector.extract_strided_slice %413 {offsets = [0, 384], sizes = [8, 128], strides = [1, 1]} : vector<8x512xf32> to vector<8x128xf32>
    %429 = arith.negf %428 : vector<8x128xf32>
    %430 = math.exp %429 : vector<8x128xf32>
    %cst_93 = arith.constant 1.000000e+00 : f32
    %431 = vector.broadcast %cst_93 : f32 to vector<8x128xf32>
    %432 = arith.addf %431, %430 : vector<8x128xf32>
    %433 = arith.divf %431, %432 : vector<8x128xf32>
    %434 = arith.mulf %425, %371 : vector<8x128xf32>
    %435 = arith.mulf %419, %427 : vector<8x128xf32>
    %436 = arith.addf %434, %435 : vector<8x128xf32>
    %437 = math.tanh %436 : vector<8x128xf32>
    %438 = arith.mulf %433, %437 : vector<8x128xf32>
    %439 = tpu.concatenate %438, %402 in 1 : vector<8x128xf32>, vector<8x128xf32> -> vector<8x256xf32>
    %440 = arith.truncf %439 : vector<8x256xf32> to vector<8x256xbf16>
    %cst_94 = arith.constant dense<0.000000e+00> : vector<8x512xf32>
    %441 = tpu.matmul %440, %12, %cst_94 {dimension_numbers = #tpu.dot_dimension_numbers<[1], [0], [0], [1], [0, 0, 1, 1], [], []>} : vector<8x256xbf16>, vector<256x512xbf16>, vector<8x512xf32> -> vector<8x512xf32>
    %442 = arith.addf %441, %15 : vector<8x512xf32>
    %443 = vector.extract_strided_slice %442 {offsets = [0, 0], sizes = [8, 128], strides = [1, 1]} : vector<8x512xf32> to vector<8x128xf32>
    %444 = arith.negf %443 : vector<8x128xf32>
    %445 = math.exp %444 : vector<8x128xf32>
    %cst_95 = arith.constant 1.000000e+00 : f32
    %446 = vector.broadcast %cst_95 : f32 to vector<8x128xf32>
    %447 = arith.addf %446, %445 : vector<8x128xf32>
    %448 = arith.divf %446, %447 : vector<8x128xf32>
    %449 = vector.extract_strided_slice %442 {offsets = [0, 128], sizes = [8, 128], strides = [1, 1]} : vector<8x512xf32> to vector<8x128xf32>
    %450 = arith.negf %449 : vector<8x128xf32>
    %451 = math.exp %450 : vector<8x128xf32>
    %cst_96 = arith.constant 1.000000e+00 : f32
    %452 = vector.broadcast %cst_96 : f32 to vector<8x128xf32>
    %453 = arith.addf %452, %451 : vector<8x128xf32>
    %454 = arith.divf %452, %453 : vector<8x128xf32>
    %455 = vector.extract_strided_slice %442 {offsets = [0, 256], sizes = [8, 128], strides = [1, 1]} : vector<8x512xf32> to vector<8x128xf32>
    %456 = math.tanh %455 : vector<8x128xf32>
    %457 = vector.extract_strided_slice %442 {offsets = [0, 384], sizes = [8, 128], strides = [1, 1]} : vector<8x512xf32> to vector<8x128xf32>
    %458 = arith.negf %457 : vector<8x128xf32>
    %459 = math.exp %458 : vector<8x128xf32>
    %cst_97 = arith.constant 1.000000e+00 : f32
    %460 = vector.broadcast %cst_97 : f32 to vector<8x128xf32>
    %461 = arith.addf %460, %459 : vector<8x128xf32>
    %462 = arith.divf %460, %461 : vector<8x128xf32>
    %463 = arith.mulf %454, %400 : vector<8x128xf32>
    %464 = arith.mulf %448, %456 : vector<8x128xf32>
    %465 = arith.addf %463, %464 : vector<8x128xf32>
    %466 = math.tanh %465 : vector<8x128xf32>
    %467 = arith.mulf %462, %466 : vector<8x128xf32>
    %468 = arith.index_cast %c6_i32 : i32 to index
    %c0_98 = arith.constant 0 : index
    %c0_99 = arith.constant 0 : index
    %469 = vector.load %arg13[%468, %c0_98, %c0_99] : memref<8x8x128xf32, #tpu.memory_space<vmem>>, vector<1x8x128xf32>
    %470 = vector.shape_cast %469 : vector<1x8x128xf32> to vector<8x128xf32>
    %471 = vector.shape_cast %467 : vector<8x128xf32> to vector<1x8x128xf32>
    tpu.vector_store %arg13[%468, %c0_98, %c0_99], %471 {strides = array<i32>} : memref<8x8x128xf32, #tpu.memory_space<vmem>>, vector<1x8x128xf32>,
    %c7_i32 = arith.constant 7 : i32
    %472 = arith.index_cast %c7_i32 : i32 to index
    %c0_100 = arith.constant 0 : index
    %c0_101 = arith.constant 0 : index
    %473 = vector.load %arg12[%472, %c0_100, %c0_101] : memref<8x8x512xbf16, #tpu.memory_space<vmem>>, vector<1x8x512xbf16>
    %474 = vector.shape_cast %473 : vector<1x8x512xbf16> to vector<8x512xbf16>
    %475 = arith.extf %474 : vector<8x512xbf16> to vector<8x512xf32>
    %476 = arith.truncf %438 : vector<8x128xf32> to vector<8x128xbf16>
    %cst_102 = arith.constant dense<0.000000e+00> : vector<8x512xf32>
    %477 = tpu.matmul %476, %11, %cst_102 {dimension_numbers = #tpu.dot_dimension_numbers<[1], [0], [0], [1], [0, 0, 1, 1], [], []>} : vector<8x128xbf16>, vector<128x512xbf16>, vector<8x512xf32> -> vector<8x512xf32>
    %478 = arith.addf %475, %477 : vector<8x512xf32>
    %479 = vector.extract_strided_slice %478 {offsets = [0, 0], sizes = [8, 128], strides = [1, 1]} : vector<8x512xf32> to vector<8x128xf32>
    %480 = arith.negf %479 : vector<8x128xf32>
    %481 = math.exp %480 : vector<8x128xf32>
    %cst_103 = arith.constant 1.000000e+00 : f32
    %482 = vector.broadcast %cst_103 : f32 to vector<8x128xf32>
    %483 = arith.addf %482, %481 : vector<8x128xf32>
    %484 = arith.divf %482, %483 : vector<8x128xf32>
    %485 = vector.extract_strided_slice %478 {offsets = [0, 128], sizes = [8, 128], strides = [1, 1]} : vector<8x512xf32> to vector<8x128xf32>
    %486 = arith.negf %485 : vector<8x128xf32>
    %487 = math.exp %486 : vector<8x128xf32>
    %cst_104 = arith.constant 1.000000e+00 : f32
    %488 = vector.broadcast %cst_104 : f32 to vector<8x128xf32>
    %489 = arith.addf %488, %487 : vector<8x128xf32>
    %490 = arith.divf %488, %489 : vector<8x128xf32>
    %491 = vector.extract_strided_slice %478 {offsets = [0, 256], sizes = [8, 128], strides = [1, 1]} : vector<8x512xf32> to vector<8x128xf32>
    %492 = math.tanh %491 : vector<8x128xf32>
    %493 = vector.extract_strided_slice %478 {offsets = [0, 384], sizes = [8, 128], strides = [1, 1]} : vector<8x512xf32> to vector<8x128xf32>
    %494 = arith.negf %493 : vector<8x128xf32>
    %495 = math.exp %494 : vector<8x128xf32>
    %cst_105 = arith.constant 1.000000e+00 : f32
    %496 = vector.broadcast %cst_105 : f32 to vector<8x128xf32>
    %497 = arith.addf %496, %495 : vector<8x128xf32>
    %498 = arith.divf %496, %497 : vector<8x128xf32>
    %499 = arith.mulf %490, %436 : vector<8x128xf32>
    %500 = arith.mulf %484, %492 : vector<8x128xf32>
    %501 = arith.addf %499, %500 : vector<8x128xf32>
    %502 = math.tanh %501 : vector<8x128xf32>
    %503 = arith.mulf %498, %502 : vector<8x128xf32>
    %504 = tpu.concatenate %503, %467 in 1 : vector<8x128xf32>, vector<8x128xf32> -> vector<8x256xf32>
    %505 = arith.truncf %504 : vector<8x256xf32> to vector<8x256xbf16>
    %cst_106 = arith.constant dense<0.000000e+00> : vector<8x512xf32>
    %506 = tpu.matmul %505, %12, %cst_106 {dimension_numbers = #tpu.dot_dimension_numbers<[1], [0], [0], [1], [0, 0, 1, 1], [], []>} : vector<8x256xbf16>, vector<256x512xbf16>, vector<8x512xf32> -> vector<8x512xf32>
    %507 = arith.addf %506, %15 : vector<8x512xf32>
    %508 = vector.extract_strided_slice %507 {offsets = [0, 0], sizes = [8, 128], strides = [1, 1]} : vector<8x512xf32> to vector<8x128xf32>
    %509 = arith.negf %508 : vector<8x128xf32>
    %510 = math.exp %509 : vector<8x128xf32>
    %cst_107 = arith.constant 1.000000e+00 : f32
    %511 = vector.broadcast %cst_107 : f32 to vector<8x128xf32>
    %512 = arith.addf %511, %510 : vector<8x128xf32>
    %513 = arith.divf %511, %512 : vector<8x128xf32>
    %514 = vector.extract_strided_slice %507 {offsets = [0, 128], sizes = [8, 128], strides = [1, 1]} : vector<8x512xf32> to vector<8x128xf32>
    %515 = arith.negf %514 : vector<8x128xf32>
    %516 = math.exp %515 : vector<8x128xf32>
    %cst_108 = arith.constant 1.000000e+00 : f32
    %517 = vector.broadcast %cst_108 : f32 to vector<8x128xf32>
    %518 = arith.addf %517, %516 : vector<8x128xf32>
    %519 = arith.divf %517, %518 : vector<8x128xf32>
    %520 = vector.extract_strided_slice %507 {offsets = [0, 256], sizes = [8, 128], strides = [1, 1]} : vector<8x512xf32> to vector<8x128xf32>
    %521 = math.tanh %520 : vector<8x128xf32>
    %522 = vector.extract_strided_slice %507 {offsets = [0, 384], sizes = [8, 128], strides = [1, 1]} : vector<8x512xf32> to vector<8x128xf32>
    %523 = arith.negf %522 : vector<8x128xf32>
    %524 = math.exp %523 : vector<8x128xf32>
    %cst_109 = arith.constant 1.000000e+00 : f32
    %525 = vector.broadcast %cst_109 : f32 to vector<8x128xf32>
    %526 = arith.addf %525, %524 : vector<8x128xf32>
    %527 = arith.divf %525, %526 : vector<8x128xf32>
    %528 = arith.mulf %519, %465 : vector<8x128xf32>
    %529 = arith.mulf %513, %521 : vector<8x128xf32>
    %530 = arith.addf %528, %529 : vector<8x128xf32>
    %531 = math.tanh %530 : vector<8x128xf32>
    %532 = arith.mulf %527, %531 : vector<8x128xf32>
    %533 = arith.index_cast %c7_i32 : i32 to index
    %c0_110 = arith.constant 0 : index
    %c0_111 = arith.constant 0 : index
    %534 = vector.load %arg13[%533, %c0_110, %c0_111] : memref<8x8x128xf32, #tpu.memory_space<vmem>>, vector<1x8x128xf32>
    %535 = vector.shape_cast %534 : vector<1x8x128xf32> to vector<8x128xf32>
    %536 = vector.shape_cast %532 : vector<8x128xf32> to vector<1x8x128xf32>
    tpu.vector_store %arg13[%533, %c0_110, %c0_111], %536 {strides = array<i32>} : memref<8x8x128xf32, #tpu.memory_space<vmem>>, vector<1x8x128xf32>,
    %c8_i32 = arith.constant 8 : i32
    %c0_112 = arith.constant 0 : index
    %c0_113 = arith.constant 0 : index
    %c0_114 = arith.constant 0 : index
    %537 = vector.load %arg13[%c0_112, %c0_113, %c0_114] : memref<8x8x128xf32, #tpu.memory_space<vmem>>, vector<8x8x128xf32>
    %538 = vector.shape_cast %537 : vector<8x8x128xf32> to vector<64x128xf32>
    %539 = arith.truncf %538 : vector<64x128xf32> to vector<64x128xbf16>
    %c0_115 = arith.constant 0 : index
    %c0_116 = arith.constant 0 : index
    %540 = vector.load %arg7[%c0_115, %c0_116] : memref<128x128xbf16, #tpu.memory_space<vmem>>, vector<128x128xbf16>
    %cst_117 = arith.constant dense<0.000000e+00> : vector<64x128xf32>
    %541 = tpu.matmul %539, %540, %cst_117 {dimension_numbers = #tpu.dot_dimension_numbers<[1], [0], [0], [1], [0, 0, 1, 1], [], []>} : vector<64x128xbf16>, vector<128x128xbf16>, vector<64x128xf32> -> vector<64x128xf32>
    %542 = math.tanh %541 : vector<64x128xf32>
    %543 = vector.shape_cast %542 : vector<64x128xf32> to vector<8x8x128xf32>
    %c0_118 = arith.constant 0 : index
    %c0_119 = arith.constant 0 : index
    %544 = vector.load %arg8[%c0_118, %c0_119] : memref<1x128xf32, #tpu.memory_space<vmem>>, vector<1x128xf32>
    %545 = vector.shape_cast %544 : vector<1x128xf32> to vector<1x1x128xf32>
    %546 = vector.broadcast %545 : vector<1x1x128xf32> to vector<8x8x128xf32>
    %547 = arith.mulf %543, %546 : vector<8x8x128xf32>
    %cst_120 = arith.constant dense<0.000000e+00> : vector<8x8xf32>
    %548 = vector.multi_reduction <add>, %547, %cst_120 [2] : vector<8x8x128xf32> to vector<8x8xf32>
    %549 = tpu.transpose %548, [1, 0] : vector<8x8xf32> -> vector<8x8xf32>
    %550 = arith.negf %549 : vector<8x8xf32>
    %551 = math.exp %550 : vector<8x8xf32>
    %cst_121 = arith.constant 1.000000e+00 : f32
    %552 = vector.broadcast %cst_121 : f32 to vector<8x8xf32>
    %553 = arith.addf %552, %551 : vector<8x8xf32>
    %554 = arith.divf %552, %553 : vector<8x8xf32>
    %c0_122 = arith.constant 0 : index
    %c0_123 = arith.constant 0 : index
    %555 = vector.load %arg11[%c0_122, %c0_123] : memref<8x8xf32, #tpu.memory_space<vmem>>, vector<8x8xf32>
    tpu.vector_store %arg11[%c0_122, %c0_123], %554 {strides = array<i32>} : memref<8x8xf32, #tpu.memory_space<vmem>>, vector<8x8xf32>,
    %cst_124 = arith.constant dense<0xFF800000> : vector<8xf32>
    %556 = vector.multi_reduction <maximumf>, %549, %cst_124 [1] : vector<8x8xf32> to vector<8xf32>
    %cst_125 = arith.constant 0xFF800000 : f32
    %557 = vector.broadcast %cst_125 : f32 to vector<8xf32>
    %558 = arith.maximumf %557, %556 : vector<8xf32>
    %559 = vector.shape_cast %558 : vector<8xf32> to vector<8x1xf32>
    %560 = vector.broadcast %559 : vector<8x1xf32> to vector<8x8xf32>
    %561 = arith.subf %549, %560 : vector<8x8xf32>
    %562 = math.exp %561 : vector<8x8xf32>
    %cst_126 = arith.constant dense<0.000000e+00> : vector<8xf32>
    %563 = vector.multi_reduction <add>, %562, %cst_126 [1] : vector<8x8xf32> to vector<8xf32>
    %564 = vector.shape_cast %563 : vector<8xf32> to vector<8x1xf32>
    %565 = vector.broadcast %564 : vector<8x1xf32> to vector<8x8xf32>
    %566 = arith.divf %562, %565 : vector<8x8xf32>
    %c0_127 = arith.constant 0 : index
    %c0_128 = arith.constant 0 : index
    %567 = vector.load %arg9[%c0_127, %c0_128] : memref<8x8xf32, #tpu.memory_space<vmem>>, vector<8x8xf32>
    %568 = arith.mulf %566, %567 : vector<8x8xf32>
    %569 = tpu.transpose %568, [1, 0] : vector<8x8xf32> -> vector<8x8xf32>
    %570 = vector.shape_cast %569 : vector<8x8xf32> to vector<8x8x1xf32>
    %571 = vector.broadcast %570 : vector<8x8x1xf32> to vector<8x8x128xf32>
    %572 = arith.mulf %537, %571 : vector<8x8x128xf32>
    %cst_129 = arith.constant dense<0.000000e+00> : vector<8x128xf32>
    %573 = vector.multi_reduction <add>, %572, %cst_129 [0] : vector<8x8x128xf32> to vector<8x128xf32>
    %c0_130 = arith.constant 0 : index
    %c0_131 = arith.constant 0 : index
    %574 = vector.load %arg10[%c0_130, %c0_131] : memref<8x128xf32, #tpu.memory_space<vmem>>, vector<8x128xf32>
    tpu.vector_store %arg10[%c0_130, %c0_131], %573 {strides = array<i32>} : memref<8x128xf32, #tpu.memory_space<vmem>>, vector<8x128xf32>,
    return
  }
  func.func @transform_0(%arg0: i32) -> (i32, i32, i32) {
    %c0_i32 = arith.constant 0 : i32
    %c0_i32_0 = arith.constant 0 : i32
    %c0_i32_1 = arith.constant 0 : i32
    return %c0_i32, %arg0, %c0_i32_0 : i32, i32, i32
  }
  func.func @transform_1(%arg0: i32) -> (i32, i32) {
    %c0_i32 = arith.constant 0 : i32
    %c0_i32_0 = arith.constant 0 : i32
    %c0_i32_1 = arith.constant 0 : i32
    return %c0_i32, %c0_i32_0 : i32, i32
  }
  func.func @transform_2(%arg0: i32) -> (i32, i32) {
    %c0_i32 = arith.constant 0 : i32
    %c0_i32_0 = arith.constant 0 : i32
    %c0_i32_1 = arith.constant 0 : i32
    return %c0_i32, %c0_i32_0 : i32, i32
  }
  func.func @transform_3(%arg0: i32) -> (i32, i32) {
    %c0_i32 = arith.constant 0 : i32
    %c0_i32_0 = arith.constant 0 : i32
    %c0_i32_1 = arith.constant 0 : i32
    return %c0_i32, %c0_i32_0 : i32, i32
  }
  func.func @transform_4(%arg0: i32) -> (i32, i32) {
    %c0_i32 = arith.constant 0 : i32
    %c0_i32_0 = arith.constant 0 : i32
    %c0_i32_1 = arith.constant 0 : i32
    return %c0_i32, %c0_i32_0 : i32, i32
  }
  func.func @transform_5(%arg0: i32) -> (i32, i32) {
    %c0_i32 = arith.constant 0 : i32
    %c0_i32_0 = arith.constant 0 : i32
    %c0_i32_1 = arith.constant 0 : i32
    return %c0_i32, %c0_i32_0 : i32, i32
  }
  func.func @transform_6(%arg0: i32) -> (i32, i32) {
    %c0_i32 = arith.constant 0 : i32
    %c0_i32_0 = arith.constant 0 : i32
    %c0_i32_1 = arith.constant 0 : i32
    return %c0_i32, %c0_i32_0 : i32, i32
  }
  func.func @transform_7(%arg0: i32) -> (i32, i32) {
    %c0_i32 = arith.constant 0 : i32
    %c0_i32_0 = arith.constant 0 : i32
    %c0_i32_1 = arith.constant 0 : i32
    return %c0_i32, %c0_i32_0 : i32, i32
  }
  func.func @transform_8(%arg0: i32) -> (i32, i32) {
    %c0_i32 = arith.constant 0 : i32
    %c0_i32_0 = arith.constant 0 : i32
    return %arg0, %c0_i32 : i32, i32
  }
  func.func @transform_9(%arg0: i32) -> (i32, i32) {
    %c0_i32 = arith.constant 0 : i32
    %c0_i32_0 = arith.constant 0 : i32
    return %arg0, %c0_i32 : i32, i32
  }
  func.func @transform_10(%arg0: i32) -> (i32, i32) {
    %c0_i32 = arith.constant 0 : i32
    %c0_i32_0 = arith.constant 0 : i32
    return %arg0, %c0_i32 : i32, i32
  }
}

module attributes {stable_mosaic.version = 11 : i64} {
  func.func @_encoder2_kernel(%arg0: i32, %arg1: memref<8x8x128xf32, #tpu.memory_space<vmem>>, %arg2: memref<128x512xbf16, #tpu.memory_space<vmem>>, %arg3: memref<128x512xbf16, #tpu.memory_space<vmem>>, %arg4: memref<1x512xf32, #tpu.memory_space<vmem>>, %arg5: memref<256x512xbf16, #tpu.memory_space<vmem>>, %arg6: memref<1x512xf32, #tpu.memory_space<vmem>>, %arg7: memref<128x128xbf16, #tpu.memory_space<vmem>>, %arg8: memref<1x128xf32, #tpu.memory_space<vmem>>, %arg9: memref<8x8xf32, #tpu.memory_space<vmem>>, %arg10: memref<8x128xf32, #tpu.memory_space<vmem>>, %arg11: memref<8x8xf32, #tpu.memory_space<vmem>>, %arg12: memref<8x8x512xbf16, #tpu.memory_space<vmem>>, %arg13: memref<8x8x128xf32, #tpu.memory_space<vmem>>) attributes {dimension_semantics = [#tpu.dimension_semantics<parallel>], iteration_bounds = array<i64: 2>, scalar_prefetch = 0 : i64, scratch_operands = 2 : i64, tpu.core_type = #tpu.core_type<tc>, window_params = [{transform_indices = @transform_0, window_bounds = array<i64: 8, 8, 128>}, {pipeline_mode = #tpu.pipeline_mode<synchronous>, transform_indices = @transform_1, window_bounds = array<i64: 128, 512>}, {pipeline_mode = #tpu.pipeline_mode<synchronous>, transform_indices = @transform_2, window_bounds = array<i64: 128, 512>}, {pipeline_mode = #tpu.pipeline_mode<synchronous>, transform_indices = @transform_3, window_bounds = array<i64: 1, 512>}, {pipeline_mode = #tpu.pipeline_mode<synchronous>, transform_indices = @transform_4, window_bounds = array<i64: 256, 512>}, {pipeline_mode = #tpu.pipeline_mode<synchronous>, transform_indices = @transform_5, window_bounds = array<i64: 1, 512>}, {pipeline_mode = #tpu.pipeline_mode<synchronous>, transform_indices = @transform_6, window_bounds = array<i64: 128, 128>}, {pipeline_mode = #tpu.pipeline_mode<synchronous>, transform_indices = @transform_7, window_bounds = array<i64: 1, 128>}, {transform_indices = @transform_8, window_bounds = array<i64: 8, 8>}, {transform_indices = @transform_9, window_bounds = array<i64: 8, 128>}, {transform_indices = @transform_10, window_bounds = array<i64: 8, 8>}]} {
    %c0 = arith.constant 0 : index
    %c0_0 = arith.constant 0 : index
    %c0_1 = arith.constant 0 : index
    %0 = vector.load %arg1[%c0, %c0_0, %c0_1] : memref<8x8x128xf32, #tpu.memory_space<vmem>>, vector<8x8x128xf32>
    %1 = vector.shape_cast %0 : vector<8x8x128xf32> to vector<64x128xf32>
    %2 = arith.truncf %1 : vector<64x128xf32> to vector<64x128xbf16>
    %c0_2 = arith.constant 0 : index
    %c0_3 = arith.constant 0 : index
    %3 = vector.load %arg2[%c0_2, %c0_3] : memref<128x512xbf16, #tpu.memory_space<vmem>>, vector<128x512xbf16>
    %cst = arith.constant dense<0.000000e+00> : vector<64x512xf32>
    %4 = tpu.matmul %2, %3, %cst {dimension_numbers = #tpu.dot_dimension_numbers<[1], [0], [0], [1], [0, 0, 1, 1], [], []>} : vector<64x128xbf16>, vector<128x512xbf16>, vector<64x512xf32> -> vector<64x512xf32>
    %c0_4 = arith.constant 0 : index
    %c0_5 = arith.constant 0 : index
    %5 = vector.load %arg4[%c0_4, %c0_5] : memref<1x512xf32, #tpu.memory_space<vmem>>, vector<1x512xf32>
    %6 = vector.broadcast %5 : vector<1x512xf32> to vector<64x512xf32>
    %7 = arith.addf %4, %6 : vector<64x512xf32>
    %8 = vector.shape_cast %7 : vector<64x512xf32> to vector<8x8x512xf32>
    %9 = arith.truncf %8 : vector<8x8x512xf32> to vector<8x8x512xbf16>
    %c0_6 = arith.constant 0 : index
    %c0_7 = arith.constant 0 : index
    %c0_8 = arith.constant 0 : index
    %10 = vector.load %arg12[%c0_6, %c0_7, %c0_8] : memref<8x8x512xbf16, #tpu.memory_space<vmem>>, vector<8x8x512xbf16>
    tpu.vector_store %arg12[%c0_6, %c0_7, %c0_8], %9 {strides = array<i32>} : memref<8x8x512xbf16, #tpu.memory_space<vmem>>, vector<8x8x512xbf16>,
    %c0_9 = arith.constant 0 : index
    %c0_10 = arith.constant 0 : index
    %11 = vector.load %arg3[%c0_9, %c0_10] : memref<128x512xbf16, #tpu.memory_space<vmem>>, vector<128x512xbf16>
    %c0_11 = arith.constant 0 : index
    %c0_12 = arith.constant 0 : index
    %12 = vector.load %arg5[%c0_11, %c0_12] : memref<256x512xbf16, #tpu.memory_space<vmem>>, vector<256x512xbf16>
    %c0_13 = arith.constant 0 : index
    %c0_14 = arith.constant 0 : index
    %13 = vector.load %arg6[%c0_13, %c0_14] : memref<1x512xf32, #tpu.memory_space<vmem>>, vector<1x512xf32>
    %14 = vector.shape_cast %13 : vector<1x512xf32> to vector<1x512xf32>
    %15 = vector.broadcast %14 : vector<1x512xf32> to vector<8x512xf32>
    %cst_15 = arith.constant 0.000000e+00 : f32
    %16 = vector.broadcast %cst_15 : f32 to vector<8x128xf32>
    %c0_i32 = arith.constant 0 : i32
    %17 = arith.index_cast %c0_i32 : i32 to index
    %c0_16 = arith.constant 0 : index
    %c0_17 = arith.constant 0 : index
    %18 = vector.load %arg12[%17, %c0_16, %c0_17] : memref<8x8x512xbf16, #tpu.memory_space<vmem>>, vector<1x8x512xbf16>
    %19 = vector.shape_cast %18 : vector<1x8x512xbf16> to vector<8x512xbf16>
    %20 = arith.extf %19 : vector<8x512xbf16> to vector<8x512xf32>
    %21 = arith.truncf %16 : vector<8x128xf32> to vector<8x128xbf16>
    %cst_18 = arith.constant dense<0.000000e+00> : vector<8x512xf32>
    %22 = tpu.matmul %21, %11, %cst_18 {dimension_numbers = #tpu.dot_dimension_numbers<[1], [0], [0], [1], [0, 0, 1, 1], [], []>} : vector<8x128xbf16>, vector<128x512xbf16>, vector<8x512xf32> -> vector<8x512xf32>
    %23 = arith.addf %20, %22 : vector<8x512xf32>
    %24 = vector.extract_strided_slice %23 {offsets = [0, 0], sizes = [8, 128], strides = [1, 1]} : vector<8x512xf32> to vector<8x128xf32>
    %25 = arith.negf %24 : vector<8x128xf32>
    %26 = math.exp %25 : vector<8x128xf32>
    %cst_19 = arith.constant 1.000000e+00 : f32
    %27 = vector.broadcast %cst_19 : f32 to vector<8x128xf32>
    %28 = arith.addf %27, %26 : vector<8x128xf32>
    %29 = arith.divf %27, %28 : vector<8x128xf32>
    %30 = vector.extract_strided_slice %23 {offsets = [0, 128], sizes = [8, 128], strides = [1, 1]} : vector<8x512xf32> to vector<8x128xf32>
    %31 = arith.negf %30 : vector<8x128xf32>
    %32 = math.exp %31 : vector<8x128xf32>
    %cst_20 = arith.constant 1.000000e+00 : f32
    %33 = vector.broadcast %cst_20 : f32 to vector<8x128xf32>
    %34 = arith.addf %33, %32 : vector<8x128xf32>
    %35 = arith.divf %33, %34 : vector<8x128xf32>
    %36 = vector.extract_strided_slice %23 {offsets = [0, 256], sizes = [8, 128], strides = [1, 1]} : vector<8x512xf32> to vector<8x128xf32>
    %37 = math.tanh %36 : vector<8x128xf32>
    %38 = vector.extract_strided_slice %23 {offsets = [0, 384], sizes = [8, 128], strides = [1, 1]} : vector<8x512xf32> to vector<8x128xf32>
    %39 = arith.negf %38 : vector<8x128xf32>
    %40 = math.exp %39 : vector<8x128xf32>
    %cst_21 = arith.constant 1.000000e+00 : f32
    %41 = vector.broadcast %cst_21 : f32 to vector<8x128xf32>
    %42 = arith.addf %41, %40 : vector<8x128xf32>
    %43 = arith.divf %41, %42 : vector<8x128xf32>
    %44 = arith.mulf %35, %16 : vector<8x128xf32>
    %45 = arith.mulf %29, %37 : vector<8x128xf32>
    %46 = arith.addf %44, %45 : vector<8x128xf32>
    %47 = math.tanh %46 : vector<8x128xf32>
    %48 = arith.mulf %43, %47 : vector<8x128xf32>
    %49 = tpu.concatenate %48, %16 in 1 : vector<8x128xf32>, vector<8x128xf32> -> vector<8x256xf32>
    %50 = arith.truncf %49 : vector<8x256xf32> to vector<8x256xbf16>
    %cst_22 = arith.constant dense<0.000000e+00> : vector<8x512xf32>
    %51 = tpu.matmul %50, %12, %cst_22 {dimension_numbers = #tpu.dot_dimension_numbers<[1], [0], [0], [1], [0, 0, 1, 1], [], []>} : vector<8x256xbf16>, vector<256x512xbf16>, vector<8x512xf32> -> vector<8x512xf32>
    %52 = arith.addf %51, %15 : vector<8x512xf32>
    %53 = vector.extract_strided_slice %52 {offsets = [0, 0], sizes = [8, 128], strides = [1, 1]} : vector<8x512xf32> to vector<8x128xf32>
    %54 = arith.negf %53 : vector<8x128xf32>
    %55 = math.exp %54 : vector<8x128xf32>
    %cst_23 = arith.constant 1.000000e+00 : f32
    %56 = vector.broadcast %cst_23 : f32 to vector<8x128xf32>
    %57 = arith.addf %56, %55 : vector<8x128xf32>
    %58 = arith.divf %56, %57 : vector<8x128xf32>
    %59 = vector.extract_strided_slice %52 {offsets = [0, 128], sizes = [8, 128], strides = [1, 1]} : vector<8x512xf32> to vector<8x128xf32>
    %60 = arith.negf %59 : vector<8x128xf32>
    %61 = math.exp %60 : vector<8x128xf32>
    %cst_24 = arith.constant 1.000000e+00 : f32
    %62 = vector.broadcast %cst_24 : f32 to vector<8x128xf32>
    %63 = arith.addf %62, %61 : vector<8x128xf32>
    %64 = arith.divf %62, %63 : vector<8x128xf32>
    %65 = vector.extract_strided_slice %52 {offsets = [0, 256], sizes = [8, 128], strides = [1, 1]} : vector<8x512xf32> to vector<8x128xf32>
    %66 = math.tanh %65 : vector<8x128xf32>
    %67 = vector.extract_strided_slice %52 {offsets = [0, 384], sizes = [8, 128], strides = [1, 1]} : vector<8x512xf32> to vector<8x128xf32>
    %68 = arith.negf %67 : vector<8x128xf32>
    %69 = math.exp %68 : vector<8x128xf32>
    %cst_25 = arith.constant 1.000000e+00 : f32
    %70 = vector.broadcast %cst_25 : f32 to vector<8x128xf32>
    %71 = arith.addf %70, %69 : vector<8x128xf32>
    %72 = arith.divf %70, %71 : vector<8x128xf32>
    %73 = arith.mulf %64, %16 : vector<8x128xf32>
    %74 = arith.mulf %58, %66 : vector<8x128xf32>
    %75 = arith.addf %73, %74 : vector<8x128xf32>
    %76 = math.tanh %75 : vector<8x128xf32>
    %77 = arith.mulf %72, %76 : vector<8x128xf32>
    %78 = arith.index_cast %c0_i32 : i32 to index
    %c0_26 = arith.constant 0 : index
    %c0_27 = arith.constant 0 : index
    %79 = vector.load %arg13[%78, %c0_26, %c0_27] : memref<8x8x128xf32, #tpu.memory_space<vmem>>, vector<1x8x128xf32>
    %80 = vector.shape_cast %79 : vector<1x8x128xf32> to vector<8x128xf32>
    %81 = vector.shape_cast %77 : vector<8x128xf32> to vector<1x8x128xf32>
    tpu.vector_store %arg13[%78, %c0_26, %c0_27], %81 {strides = array<i32>} : memref<8x8x128xf32, #tpu.memory_space<vmem>>, vector<1x8x128xf32>,
    %c1_i32 = arith.constant 1 : i32
    %82 = arith.index_cast %c1_i32 : i32 to index
    %c0_28 = arith.constant 0 : index
    %c0_29 = arith.constant 0 : index
    %83 = vector.load %arg12[%82, %c0_28, %c0_29] : memref<8x8x512xbf16, #tpu.memory_space<vmem>>, vector<1x8x512xbf16>
    %84 = vector.shape_cast %83 : vector<1x8x512xbf16> to vector<8x512xbf16>
    %85 = arith.extf %84 : vector<8x512xbf16> to vector<8x512xf32>
    %86 = arith.truncf %48 : vector<8x128xf32> to vector<8x128xbf16>
    %cst_30 = arith.constant dense<0.000000e+00> : vector<8x512xf32>
    %87 = tpu.matmul %86, %11, %cst_30 {dimension_numbers = #tpu.dot_dimension_numbers<[1], [0], [0], [1], [0, 0, 1, 1], [], []>} : vector<8x128xbf16>, vector<128x512xbf16>, vector<8x512xf32> -> vector<8x512xf32>
    %88 = arith.addf %85, %87 : vector<8x512xf32>
    %89 = vector.extract_strided_slice %88 {offsets = [0, 0], sizes = [8, 128], strides = [1, 1]} : vector<8x512xf32> to vector<8x128xf32>
    %90 = arith.negf %89 : vector<8x128xf32>
    %91 = math.exp %90 : vector<8x128xf32>
    %cst_31 = arith.constant 1.000000e+00 : f32
    %92 = vector.broadcast %cst_31 : f32 to vector<8x128xf32>
    %93 = arith.addf %92, %91 : vector<8x128xf32>
    %94 = arith.divf %92, %93 : vector<8x128xf32>
    %95 = vector.extract_strided_slice %88 {offsets = [0, 128], sizes = [8, 128], strides = [1, 1]} : vector<8x512xf32> to vector<8x128xf32>
    %96 = arith.negf %95 : vector<8x128xf32>
    %97 = math.exp %96 : vector<8x128xf32>
    %cst_32 = arith.constant 1.000000e+00 : f32
    %98 = vector.broadcast %cst_32 : f32 to vector<8x128xf32>
    %99 = arith.addf %98, %97 : vector<8x128xf32>
    %100 = arith.divf %98, %99 : vector<8x128xf32>
    %101 = vector.extract_strided_slice %88 {offsets = [0, 256], sizes = [8, 128], strides = [1, 1]} : vector<8x512xf32> to vector<8x128xf32>
    %102 = math.tanh %101 : vector<8x128xf32>
    %103 = vector.extract_strided_slice %88 {offsets = [0, 384], sizes = [8, 128], strides = [1, 1]} : vector<8x512xf32> to vector<8x128xf32>
    %104 = arith.negf %103 : vector<8x128xf32>
    %105 = math.exp %104 : vector<8x128xf32>
    %cst_33 = arith.constant 1.000000e+00 : f32
    %106 = vector.broadcast %cst_33 : f32 to vector<8x128xf32>
    %107 = arith.addf %106, %105 : vector<8x128xf32>
    %108 = arith.divf %106, %107 : vector<8x128xf32>
    %109 = arith.mulf %100, %46 : vector<8x128xf32>
    %110 = arith.mulf %94, %102 : vector<8x128xf32>
    %111 = arith.addf %109, %110 : vector<8x128xf32>
    %112 = math.tanh %111 : vector<8x128xf32>
    %113 = arith.mulf %108, %112 : vector<8x128xf32>
    %114 = tpu.concatenate %113, %77 in 1 : vector<8x128xf32>, vector<8x128xf32> -> vector<8x256xf32>
    %115 = arith.truncf %114 : vector<8x256xf32> to vector<8x256xbf16>
    %cst_34 = arith.constant dense<0.000000e+00> : vector<8x512xf32>
    %116 = tpu.matmul %115, %12, %cst_34 {dimension_numbers = #tpu.dot_dimension_numbers<[1], [0], [0], [1], [0, 0, 1, 1], [], []>} : vector<8x256xbf16>, vector<256x512xbf16>, vector<8x512xf32> -> vector<8x512xf32>
    %117 = arith.addf %116, %15 : vector<8x512xf32>
    %118 = vector.extract_strided_slice %117 {offsets = [0, 0], sizes = [8, 128], strides = [1, 1]} : vector<8x512xf32> to vector<8x128xf32>
    %119 = arith.negf %118 : vector<8x128xf32>
    %120 = math.exp %119 : vector<8x128xf32>
    %cst_35 = arith.constant 1.000000e+00 : f32
    %121 = vector.broadcast %cst_35 : f32 to vector<8x128xf32>
    %122 = arith.addf %121, %120 : vector<8x128xf32>
    %123 = arith.divf %121, %122 : vector<8x128xf32>
    %124 = vector.extract_strided_slice %117 {offsets = [0, 128], sizes = [8, 128], strides = [1, 1]} : vector<8x512xf32> to vector<8x128xf32>
    %125 = arith.negf %124 : vector<8x128xf32>
    %126 = math.exp %125 : vector<8x128xf32>
    %cst_36 = arith.constant 1.000000e+00 : f32
    %127 = vector.broadcast %cst_36 : f32 to vector<8x128xf32>
    %128 = arith.addf %127, %126 : vector<8x128xf32>
    %129 = arith.divf %127, %128 : vector<8x128xf32>
    %130 = vector.extract_strided_slice %117 {offsets = [0, 256], sizes = [8, 128], strides = [1, 1]} : vector<8x512xf32> to vector<8x128xf32>
    %131 = math.tanh %130 : vector<8x128xf32>
    %132 = vector.extract_strided_slice %117 {offsets = [0, 384], sizes = [8, 128], strides = [1, 1]} : vector<8x512xf32> to vector<8x128xf32>
    %133 = arith.negf %132 : vector<8x128xf32>
    %134 = math.exp %133 : vector<8x128xf32>
    %cst_37 = arith.constant 1.000000e+00 : f32
    %135 = vector.broadcast %cst_37 : f32 to vector<8x128xf32>
    %136 = arith.addf %135, %134 : vector<8x128xf32>
    %137 = arith.divf %135, %136 : vector<8x128xf32>
    %138 = arith.mulf %129, %75 : vector<8x128xf32>
    %139 = arith.mulf %123, %131 : vector<8x128xf32>
    %140 = arith.addf %138, %139 : vector<8x128xf32>
    %141 = math.tanh %140 : vector<8x128xf32>
    %142 = arith.mulf %137, %141 : vector<8x128xf32>
    %143 = arith.index_cast %c1_i32 : i32 to index
    %c0_38 = arith.constant 0 : index
    %c0_39 = arith.constant 0 : index
    %144 = vector.load %arg13[%143, %c0_38, %c0_39] : memref<8x8x128xf32, #tpu.memory_space<vmem>>, vector<1x8x128xf32>
    %145 = vector.shape_cast %144 : vector<1x8x128xf32> to vector<8x128xf32>
    %146 = vector.shape_cast %142 : vector<8x128xf32> to vector<1x8x128xf32>
    tpu.vector_store %arg13[%143, %c0_38, %c0_39], %146 {strides = array<i32>} : memref<8x8x128xf32, #tpu.memory_space<vmem>>, vector<1x8x128xf32>,
    %c2_i32 = arith.constant 2 : i32
    %147 = arith.index_cast %c2_i32 : i32 to index
    %c0_40 = arith.constant 0 : index
    %c0_41 = arith.constant 0 : index
    %148 = vector.load %arg12[%147, %c0_40, %c0_41] : memref<8x8x512xbf16, #tpu.memory_space<vmem>>, vector<1x8x512xbf16>
    %149 = vector.shape_cast %148 : vector<1x8x512xbf16> to vector<8x512xbf16>
    %150 = arith.extf %149 : vector<8x512xbf16> to vector<8x512xf32>
    %151 = arith.truncf %113 : vector<8x128xf32> to vector<8x128xbf16>
    %cst_42 = arith.constant dense<0.000000e+00> : vector<8x512xf32>
    %152 = tpu.matmul %151, %11, %cst_42 {dimension_numbers = #tpu.dot_dimension_numbers<[1], [0], [0], [1], [0, 0, 1, 1], [], []>} : vector<8x128xbf16>, vector<128x512xbf16>, vector<8x512xf32> -> vector<8x512xf32>
    %153 = arith.addf %150, %152 : vector<8x512xf32>
    %154 = vector.extract_strided_slice %153 {offsets = [0, 0], sizes = [8, 128], strides = [1, 1]} : vector<8x512xf32> to vector<8x128xf32>
    %155 = arith.negf %154 : vector<8x128xf32>
    %156 = math.exp %155 : vector<8x128xf32>
    %cst_43 = arith.constant 1.000000e+00 : f32
    %157 = vector.broadcast %cst_43 : f32 to vector<8x128xf32>
    %158 = arith.addf %157, %156 : vector<8x128xf32>
    %159 = arith.divf %157, %158 : vector<8x128xf32>
    %160 = vector.extract_strided_slice %153 {offsets = [0, 128], sizes = [8, 128], strides = [1, 1]} : vector<8x512xf32> to vector<8x128xf32>
    %161 = arith.negf %160 : vector<8x128xf32>
    %162 = math.exp %161 : vector<8x128xf32>
    %cst_44 = arith.constant 1.000000e+00 : f32
    %163 = vector.broadcast %cst_44 : f32 to vector<8x128xf32>
    %164 = arith.addf %163, %162 : vector<8x128xf32>
    %165 = arith.divf %163, %164 : vector<8x128xf32>
    %166 = vector.extract_strided_slice %153 {offsets = [0, 256], sizes = [8, 128], strides = [1, 1]} : vector<8x512xf32> to vector<8x128xf32>
    %167 = math.tanh %166 : vector<8x128xf32>
    %168 = vector.extract_strided_slice %153 {offsets = [0, 384], sizes = [8, 128], strides = [1, 1]} : vector<8x512xf32> to vector<8x128xf32>
    %169 = arith.negf %168 : vector<8x128xf32>
    %170 = math.exp %169 : vector<8x128xf32>
    %cst_45 = arith.constant 1.000000e+00 : f32
    %171 = vector.broadcast %cst_45 : f32 to vector<8x128xf32>
    %172 = arith.addf %171, %170 : vector<8x128xf32>
    %173 = arith.divf %171, %172 : vector<8x128xf32>
    %174 = arith.mulf %165, %111 : vector<8x128xf32>
    %175 = arith.mulf %159, %167 : vector<8x128xf32>
    %176 = arith.addf %174, %175 : vector<8x128xf32>
    %177 = math.tanh %176 : vector<8x128xf32>
    %178 = arith.mulf %173, %177 : vector<8x128xf32>
    %179 = tpu.concatenate %178, %142 in 1 : vector<8x128xf32>, vector<8x128xf32> -> vector<8x256xf32>
    %180 = arith.truncf %179 : vector<8x256xf32> to vector<8x256xbf16>
    %cst_46 = arith.constant dense<0.000000e+00> : vector<8x512xf32>
    %181 = tpu.matmul %180, %12, %cst_46 {dimension_numbers = #tpu.dot_dimension_numbers<[1], [0], [0], [1], [0, 0, 1, 1], [], []>} : vector<8x256xbf16>, vector<256x512xbf16>, vector<8x512xf32> -> vector<8x512xf32>
    %182 = arith.addf %181, %15 : vector<8x512xf32>
    %183 = vector.extract_strided_slice %182 {offsets = [0, 0], sizes = [8, 128], strides = [1, 1]} : vector<8x512xf32> to vector<8x128xf32>
    %184 = arith.negf %183 : vector<8x128xf32>
    %185 = math.exp %184 : vector<8x128xf32>
    %cst_47 = arith.constant 1.000000e+00 : f32
    %186 = vector.broadcast %cst_47 : f32 to vector<8x128xf32>
    %187 = arith.addf %186, %185 : vector<8x128xf32>
    %188 = arith.divf %186, %187 : vector<8x128xf32>
    %189 = vector.extract_strided_slice %182 {offsets = [0, 128], sizes = [8, 128], strides = [1, 1]} : vector<8x512xf32> to vector<8x128xf32>
    %190 = arith.negf %189 : vector<8x128xf32>
    %191 = math.exp %190 : vector<8x128xf32>
    %cst_48 = arith.constant 1.000000e+00 : f32
    %192 = vector.broadcast %cst_48 : f32 to vector<8x128xf32>
    %193 = arith.addf %192, %191 : vector<8x128xf32>
    %194 = arith.divf %192, %193 : vector<8x128xf32>
    %195 = vector.extract_strided_slice %182 {offsets = [0, 256], sizes = [8, 128], strides = [1, 1]} : vector<8x512xf32> to vector<8x128xf32>
    %196 = math.tanh %195 : vector<8x128xf32>
    %197 = vector.extract_strided_slice %182 {offsets = [0, 384], sizes = [8, 128], strides = [1, 1]} : vector<8x512xf32> to vector<8x128xf32>
    %198 = arith.negf %197 : vector<8x128xf32>
    %199 = math.exp %198 : vector<8x128xf32>
    %cst_49 = arith.constant 1.000000e+00 : f32
    %200 = vector.broadcast %cst_49 : f32 to vector<8x128xf32>
    %201 = arith.addf %200, %199 : vector<8x128xf32>
    %202 = arith.divf %200, %201 : vector<8x128xf32>
    %203 = arith.mulf %194, %140 : vector<8x128xf32>
    %204 = arith.mulf %188, %196 : vector<8x128xf32>
    %205 = arith.addf %203, %204 : vector<8x128xf32>
    %206 = math.tanh %205 : vector<8x128xf32>
    %207 = arith.mulf %202, %206 : vector<8x128xf32>
    %208 = arith.index_cast %c2_i32 : i32 to index
    %c0_50 = arith.constant 0 : index
    %c0_51 = arith.constant 0 : index
    %209 = vector.load %arg13[%208, %c0_50, %c0_51] : memref<8x8x128xf32, #tpu.memory_space<vmem>>, vector<1x8x128xf32>
    %210 = vector.shape_cast %209 : vector<1x8x128xf32> to vector<8x128xf32>
    %211 = vector.shape_cast %207 : vector<8x128xf32> to vector<1x8x128xf32>
    tpu.vector_store %arg13[%208, %c0_50, %c0_51], %211 {strides = array<i32>} : memref<8x8x128xf32, #tpu.memory_space<vmem>>, vector<1x8x128xf32>,
    %c3_i32 = arith.constant 3 : i32
    %212 = arith.index_cast %c3_i32 : i32 to index
    %c0_52 = arith.constant 0 : index
    %c0_53 = arith.constant 0 : index
    %213 = vector.load %arg12[%212, %c0_52, %c0_53] : memref<8x8x512xbf16, #tpu.memory_space<vmem>>, vector<1x8x512xbf16>
    %214 = vector.shape_cast %213 : vector<1x8x512xbf16> to vector<8x512xbf16>
    %215 = arith.extf %214 : vector<8x512xbf16> to vector<8x512xf32>
    %216 = arith.truncf %178 : vector<8x128xf32> to vector<8x128xbf16>
    %cst_54 = arith.constant dense<0.000000e+00> : vector<8x512xf32>
    %217 = tpu.matmul %216, %11, %cst_54 {dimension_numbers = #tpu.dot_dimension_numbers<[1], [0], [0], [1], [0, 0, 1, 1], [], []>} : vector<8x128xbf16>, vector<128x512xbf16>, vector<8x512xf32> -> vector<8x512xf32>
    %218 = arith.addf %215, %217 : vector<8x512xf32>
    %219 = vector.extract_strided_slice %218 {offsets = [0, 0], sizes = [8, 128], strides = [1, 1]} : vector<8x512xf32> to vector<8x128xf32>
    %220 = arith.negf %219 : vector<8x128xf32>
    %221 = math.exp %220 : vector<8x128xf32>
    %cst_55 = arith.constant 1.000000e+00 : f32
    %222 = vector.broadcast %cst_55 : f32 to vector<8x128xf32>
    %223 = arith.addf %222, %221 : vector<8x128xf32>
    %224 = arith.divf %222, %223 : vector<8x128xf32>
    %225 = vector.extract_strided_slice %218 {offsets = [0, 128], sizes = [8, 128], strides = [1, 1]} : vector<8x512xf32> to vector<8x128xf32>
    %226 = arith.negf %225 : vector<8x128xf32>
    %227 = math.exp %226 : vector<8x128xf32>
    %cst_56 = arith.constant 1.000000e+00 : f32
    %228 = vector.broadcast %cst_56 : f32 to vector<8x128xf32>
    %229 = arith.addf %228, %227 : vector<8x128xf32>
    %230 = arith.divf %228, %229 : vector<8x128xf32>
    %231 = vector.extract_strided_slice %218 {offsets = [0, 256], sizes = [8, 128], strides = [1, 1]} : vector<8x512xf32> to vector<8x128xf32>
    %232 = math.tanh %231 : vector<8x128xf32>
    %233 = vector.extract_strided_slice %218 {offsets = [0, 384], sizes = [8, 128], strides = [1, 1]} : vector<8x512xf32> to vector<8x128xf32>
    %234 = arith.negf %233 : vector<8x128xf32>
    %235 = math.exp %234 : vector<8x128xf32>
    %cst_57 = arith.constant 1.000000e+00 : f32
    %236 = vector.broadcast %cst_57 : f32 to vector<8x128xf32>
    %237 = arith.addf %236, %235 : vector<8x128xf32>
    %238 = arith.divf %236, %237 : vector<8x128xf32>
    %239 = arith.mulf %230, %176 : vector<8x128xf32>
    %240 = arith.mulf %224, %232 : vector<8x128xf32>
    %241 = arith.addf %239, %240 : vector<8x128xf32>
    %242 = math.tanh %241 : vector<8x128xf32>
    %243 = arith.mulf %238, %242 : vector<8x128xf32>
    %244 = tpu.concatenate %243, %207 in 1 : vector<8x128xf32>, vector<8x128xf32> -> vector<8x256xf32>
    %245 = arith.truncf %244 : vector<8x256xf32> to vector<8x256xbf16>
    %cst_58 = arith.constant dense<0.000000e+00> : vector<8x512xf32>
    %246 = tpu.matmul %245, %12, %cst_58 {dimension_numbers = #tpu.dot_dimension_numbers<[1], [0], [0], [1], [0, 0, 1, 1], [], []>} : vector<8x256xbf16>, vector<256x512xbf16>, vector<8x512xf32> -> vector<8x512xf32>
    %247 = arith.addf %246, %15 : vector<8x512xf32>
    %248 = vector.extract_strided_slice %247 {offsets = [0, 0], sizes = [8, 128], strides = [1, 1]} : vector<8x512xf32> to vector<8x128xf32>
    %249 = arith.negf %248 : vector<8x128xf32>
    %250 = math.exp %249 : vector<8x128xf32>
    %cst_59 = arith.constant 1.000000e+00 : f32
    %251 = vector.broadcast %cst_59 : f32 to vector<8x128xf32>
    %252 = arith.addf %251, %250 : vector<8x128xf32>
    %253 = arith.divf %251, %252 : vector<8x128xf32>
    %254 = vector.extract_strided_slice %247 {offsets = [0, 128], sizes = [8, 128], strides = [1, 1]} : vector<8x512xf32> to vector<8x128xf32>
    %255 = arith.negf %254 : vector<8x128xf32>
    %256 = math.exp %255 : vector<8x128xf32>
    %cst_60 = arith.constant 1.000000e+00 : f32
    %257 = vector.broadcast %cst_60 : f32 to vector<8x128xf32>
    %258 = arith.addf %257, %256 : vector<8x128xf32>
    %259 = arith.divf %257, %258 : vector<8x128xf32>
    %260 = vector.extract_strided_slice %247 {offsets = [0, 256], sizes = [8, 128], strides = [1, 1]} : vector<8x512xf32> to vector<8x128xf32>
    %261 = math.tanh %260 : vector<8x128xf32>
    %262 = vector.extract_strided_slice %247 {offsets = [0, 384], sizes = [8, 128], strides = [1, 1]} : vector<8x512xf32> to vector<8x128xf32>
    %263 = arith.negf %262 : vector<8x128xf32>
    %264 = math.exp %263 : vector<8x128xf32>
    %cst_61 = arith.constant 1.000000e+00 : f32
    %265 = vector.broadcast %cst_61 : f32 to vector<8x128xf32>
    %266 = arith.addf %265, %264 : vector<8x128xf32>
    %267 = arith.divf %265, %266 : vector<8x128xf32>
    %268 = arith.mulf %259, %205 : vector<8x128xf32>
    %269 = arith.mulf %253, %261 : vector<8x128xf32>
    %270 = arith.addf %268, %269 : vector<8x128xf32>
    %271 = math.tanh %270 : vector<8x128xf32>
    %272 = arith.mulf %267, %271 : vector<8x128xf32>
    %273 = arith.index_cast %c3_i32 : i32 to index
    %c0_62 = arith.constant 0 : index
    %c0_63 = arith.constant 0 : index
    %274 = vector.load %arg13[%273, %c0_62, %c0_63] : memref<8x8x128xf32, #tpu.memory_space<vmem>>, vector<1x8x128xf32>
    %275 = vector.shape_cast %274 : vector<1x8x128xf32> to vector<8x128xf32>
    %276 = vector.shape_cast %272 : vector<8x128xf32> to vector<1x8x128xf32>
    tpu.vector_store %arg13[%273, %c0_62, %c0_63], %276 {strides = array<i32>} : memref<8x8x128xf32, #tpu.memory_space<vmem>>, vector<1x8x128xf32>,
    %c4_i32 = arith.constant 4 : i32
    %277 = arith.index_cast %c4_i32 : i32 to index
    %c0_64 = arith.constant 0 : index
    %c0_65 = arith.constant 0 : index
    %278 = vector.load %arg12[%277, %c0_64, %c0_65] : memref<8x8x512xbf16, #tpu.memory_space<vmem>>, vector<1x8x512xbf16>
    %279 = vector.shape_cast %278 : vector<1x8x512xbf16> to vector<8x512xbf16>
    %280 = arith.extf %279 : vector<8x512xbf16> to vector<8x512xf32>
    %281 = arith.truncf %243 : vector<8x128xf32> to vector<8x128xbf16>
    %cst_66 = arith.constant dense<0.000000e+00> : vector<8x512xf32>
    %282 = tpu.matmul %281, %11, %cst_66 {dimension_numbers = #tpu.dot_dimension_numbers<[1], [0], [0], [1], [0, 0, 1, 1], [], []>} : vector<8x128xbf16>, vector<128x512xbf16>, vector<8x512xf32> -> vector<8x512xf32>
    %283 = arith.addf %280, %282 : vector<8x512xf32>
    %284 = vector.extract_strided_slice %283 {offsets = [0, 0], sizes = [8, 128], strides = [1, 1]} : vector<8x512xf32> to vector<8x128xf32>
    %285 = arith.negf %284 : vector<8x128xf32>
    %286 = math.exp %285 : vector<8x128xf32>
    %cst_67 = arith.constant 1.000000e+00 : f32
    %287 = vector.broadcast %cst_67 : f32 to vector<8x128xf32>
    %288 = arith.addf %287, %286 : vector<8x128xf32>
    %289 = arith.divf %287, %288 : vector<8x128xf32>
    %290 = vector.extract_strided_slice %283 {offsets = [0, 128], sizes = [8, 128], strides = [1, 1]} : vector<8x512xf32> to vector<8x128xf32>
    %291 = arith.negf %290 : vector<8x128xf32>
    %292 = math.exp %291 : vector<8x128xf32>
    %cst_68 = arith.constant 1.000000e+00 : f32
    %293 = vector.broadcast %cst_68 : f32 to vector<8x128xf32>
    %294 = arith.addf %293, %292 : vector<8x128xf32>
    %295 = arith.divf %293, %294 : vector<8x128xf32>
    %296 = vector.extract_strided_slice %283 {offsets = [0, 256], sizes = [8, 128], strides = [1, 1]} : vector<8x512xf32> to vector<8x128xf32>
    %297 = math.tanh %296 : vector<8x128xf32>
    %298 = vector.extract_strided_slice %283 {offsets = [0, 384], sizes = [8, 128], strides = [1, 1]} : vector<8x512xf32> to vector<8x128xf32>
    %299 = arith.negf %298 : vector<8x128xf32>
    %300 = math.exp %299 : vector<8x128xf32>
    %cst_69 = arith.constant 1.000000e+00 : f32
    %301 = vector.broadcast %cst_69 : f32 to vector<8x128xf32>
    %302 = arith.addf %301, %300 : vector<8x128xf32>
    %303 = arith.divf %301, %302 : vector<8x128xf32>
    %304 = arith.mulf %295, %241 : vector<8x128xf32>
    %305 = arith.mulf %289, %297 : vector<8x128xf32>
    %306 = arith.addf %304, %305 : vector<8x128xf32>
    %307 = math.tanh %306 : vector<8x128xf32>
    %308 = arith.mulf %303, %307 : vector<8x128xf32>
    %309 = tpu.concatenate %308, %272 in 1 : vector<8x128xf32>, vector<8x128xf32> -> vector<8x256xf32>
    %310 = arith.truncf %309 : vector<8x256xf32> to vector<8x256xbf16>
    %cst_70 = arith.constant dense<0.000000e+00> : vector<8x512xf32>
    %311 = tpu.matmul %310, %12, %cst_70 {dimension_numbers = #tpu.dot_dimension_numbers<[1], [0], [0], [1], [0, 0, 1, 1], [], []>} : vector<8x256xbf16>, vector<256x512xbf16>, vector<8x512xf32> -> vector<8x512xf32>
    %312 = arith.addf %311, %15 : vector<8x512xf32>
    %313 = vector.extract_strided_slice %312 {offsets = [0, 0], sizes = [8, 128], strides = [1, 1]} : vector<8x512xf32> to vector<8x128xf32>
    %314 = arith.negf %313 : vector<8x128xf32>
    %315 = math.exp %314 : vector<8x128xf32>
    %cst_71 = arith.constant 1.000000e+00 : f32
    %316 = vector.broadcast %cst_71 : f32 to vector<8x128xf32>
    %317 = arith.addf %316, %315 : vector<8x128xf32>
    %318 = arith.divf %316, %317 : vector<8x128xf32>
    %319 = vector.extract_strided_slice %312 {offsets = [0, 128], sizes = [8, 128], strides = [1, 1]} : vector<8x512xf32> to vector<8x128xf32>
    %320 = arith.negf %319 : vector<8x128xf32>
    %321 = math.exp %320 : vector<8x128xf32>
    %cst_72 = arith.constant 1.000000e+00 : f32
    %322 = vector.broadcast %cst_72 : f32 to vector<8x128xf32>
    %323 = arith.addf %322, %321 : vector<8x128xf32>
    %324 = arith.divf %322, %323 : vector<8x128xf32>
    %325 = vector.extract_strided_slice %312 {offsets = [0, 256], sizes = [8, 128], strides = [1, 1]} : vector<8x512xf32> to vector<8x128xf32>
    %326 = math.tanh %325 : vector<8x128xf32>
    %327 = vector.extract_strided_slice %312 {offsets = [0, 384], sizes = [8, 128], strides = [1, 1]} : vector<8x512xf32> to vector<8x128xf32>
    %328 = arith.negf %327 : vector<8x128xf32>
    %329 = math.exp %328 : vector<8x128xf32>
    %cst_73 = arith.constant 1.000000e+00 : f32
    %330 = vector.broadcast %cst_73 : f32 to vector<8x128xf32>
    %331 = arith.addf %330, %329 : vector<8x128xf32>
    %332 = arith.divf %330, %331 : vector<8x128xf32>
    %333 = arith.mulf %324, %270 : vector<8x128xf32>
    %334 = arith.mulf %318, %326 : vector<8x128xf32>
    %335 = arith.addf %333, %334 : vector<8x128xf32>
    %336 = math.tanh %335 : vector<8x128xf32>
    %337 = arith.mulf %332, %336 : vector<8x128xf32>
    %338 = arith.index_cast %c4_i32 : i32 to index
    %c0_74 = arith.constant 0 : index
    %c0_75 = arith.constant 0 : index
    %339 = vector.load %arg13[%338, %c0_74, %c0_75] : memref<8x8x128xf32, #tpu.memory_space<vmem>>, vector<1x8x128xf32>
    %340 = vector.shape_cast %339 : vector<1x8x128xf32> to vector<8x128xf32>
    %341 = vector.shape_cast %337 : vector<8x128xf32> to vector<1x8x128xf32>
    tpu.vector_store %arg13[%338, %c0_74, %c0_75], %341 {strides = array<i32>} : memref<8x8x128xf32, #tpu.memory_space<vmem>>, vector<1x8x128xf32>,
    %c5_i32 = arith.constant 5 : i32
    %342 = arith.index_cast %c5_i32 : i32 to index
    %c0_76 = arith.constant 0 : index
    %c0_77 = arith.constant 0 : index
    %343 = vector.load %arg12[%342, %c0_76, %c0_77] : memref<8x8x512xbf16, #tpu.memory_space<vmem>>, vector<1x8x512xbf16>
    %344 = vector.shape_cast %343 : vector<1x8x512xbf16> to vector<8x512xbf16>
    %345 = arith.extf %344 : vector<8x512xbf16> to vector<8x512xf32>
    %346 = arith.truncf %308 : vector<8x128xf32> to vector<8x128xbf16>
    %cst_78 = arith.constant dense<0.000000e+00> : vector<8x512xf32>
    %347 = tpu.matmul %346, %11, %cst_78 {dimension_numbers = #tpu.dot_dimension_numbers<[1], [0], [0], [1], [0, 0, 1, 1], [], []>} : vector<8x128xbf16>, vector<128x512xbf16>, vector<8x512xf32> -> vector<8x512xf32>
    %348 = arith.addf %345, %347 : vector<8x512xf32>
    %349 = vector.extract_strided_slice %348 {offsets = [0, 0], sizes = [8, 128], strides = [1, 1]} : vector<8x512xf32> to vector<8x128xf32>
    %350 = arith.negf %349 : vector<8x128xf32>
    %351 = math.exp %350 : vector<8x128xf32>
    %cst_79 = arith.constant 1.000000e+00 : f32
    %352 = vector.broadcast %cst_79 : f32 to vector<8x128xf32>
    %353 = arith.addf %352, %351 : vector<8x128xf32>
    %354 = arith.divf %352, %353 : vector<8x128xf32>
    %355 = vector.extract_strided_slice %348 {offsets = [0, 128], sizes = [8, 128], strides = [1, 1]} : vector<8x512xf32> to vector<8x128xf32>
    %356 = arith.negf %355 : vector<8x128xf32>
    %357 = math.exp %356 : vector<8x128xf32>
    %cst_80 = arith.constant 1.000000e+00 : f32
    %358 = vector.broadcast %cst_80 : f32 to vector<8x128xf32>
    %359 = arith.addf %358, %357 : vector<8x128xf32>
    %360 = arith.divf %358, %359 : vector<8x128xf32>
    %361 = vector.extract_strided_slice %348 {offsets = [0, 256], sizes = [8, 128], strides = [1, 1]} : vector<8x512xf32> to vector<8x128xf32>
    %362 = math.tanh %361 : vector<8x128xf32>
    %363 = vector.extract_strided_slice %348 {offsets = [0, 384], sizes = [8, 128], strides = [1, 1]} : vector<8x512xf32> to vector<8x128xf32>
    %364 = arith.negf %363 : vector<8x128xf32>
    %365 = math.exp %364 : vector<8x128xf32>
    %cst_81 = arith.constant 1.000000e+00 : f32
    %366 = vector.broadcast %cst_81 : f32 to vector<8x128xf32>
    %367 = arith.addf %366, %365 : vector<8x128xf32>
    %368 = arith.divf %366, %367 : vector<8x128xf32>
    %369 = arith.mulf %360, %306 : vector<8x128xf32>
    %370 = arith.mulf %354, %362 : vector<8x128xf32>
    %371 = arith.addf %369, %370 : vector<8x128xf32>
    %372 = math.tanh %371 : vector<8x128xf32>
    %373 = arith.mulf %368, %372 : vector<8x128xf32>
    %374 = tpu.concatenate %373, %337 in 1 : vector<8x128xf32>, vector<8x128xf32> -> vector<8x256xf32>
    %375 = arith.truncf %374 : vector<8x256xf32> to vector<8x256xbf16>
    %cst_82 = arith.constant dense<0.000000e+00> : vector<8x512xf32>
    %376 = tpu.matmul %375, %12, %cst_82 {dimension_numbers = #tpu.dot_dimension_numbers<[1], [0], [0], [1], [0, 0, 1, 1], [], []>} : vector<8x256xbf16>, vector<256x512xbf16>, vector<8x512xf32> -> vector<8x512xf32>
    %377 = arith.addf %376, %15 : vector<8x512xf32>
    %378 = vector.extract_strided_slice %377 {offsets = [0, 0], sizes = [8, 128], strides = [1, 1]} : vector<8x512xf32> to vector<8x128xf32>
    %379 = arith.negf %378 : vector<8x128xf32>
    %380 = math.exp %379 : vector<8x128xf32>
    %cst_83 = arith.constant 1.000000e+00 : f32
    %381 = vector.broadcast %cst_83 : f32 to vector<8x128xf32>
    %382 = arith.addf %381, %380 : vector<8x128xf32>
    %383 = arith.divf %381, %382 : vector<8x128xf32>
    %384 = vector.extract_strided_slice %377 {offsets = [0, 128], sizes = [8, 128], strides = [1, 1]} : vector<8x512xf32> to vector<8x128xf32>
    %385 = arith.negf %384 : vector<8x128xf32>
    %386 = math.exp %385 : vector<8x128xf32>
    %cst_84 = arith.constant 1.000000e+00 : f32
    %387 = vector.broadcast %cst_84 : f32 to vector<8x128xf32>
    %388 = arith.addf %387, %386 : vector<8x128xf32>
    %389 = arith.divf %387, %388 : vector<8x128xf32>
    %390 = vector.extract_strided_slice %377 {offsets = [0, 256], sizes = [8, 128], strides = [1, 1]} : vector<8x512xf32> to vector<8x128xf32>
    %391 = math.tanh %390 : vector<8x128xf32>
    %392 = vector.extract_strided_slice %377 {offsets = [0, 384], sizes = [8, 128], strides = [1, 1]} : vector<8x512xf32> to vector<8x128xf32>
    %393 = arith.negf %392 : vector<8x128xf32>
    %394 = math.exp %393 : vector<8x128xf32>
    %cst_85 = arith.constant 1.000000e+00 : f32
    %395 = vector.broadcast %cst_85 : f32 to vector<8x128xf32>
    %396 = arith.addf %395, %394 : vector<8x128xf32>
    %397 = arith.divf %395, %396 : vector<8x128xf32>
    %398 = arith.mulf %389, %335 : vector<8x128xf32>
    %399 = arith.mulf %383, %391 : vector<8x128xf32>
    %400 = arith.addf %398, %399 : vector<8x128xf32>
    %401 = math.tanh %400 : vector<8x128xf32>
    %402 = arith.mulf %397, %401 : vector<8x128xf32>
    %403 = arith.index_cast %c5_i32 : i32 to index
    %c0_86 = arith.constant 0 : index
    %c0_87 = arith.constant 0 : index
    %404 = vector.load %arg13[%403, %c0_86, %c0_87] : memref<8x8x128xf32, #tpu.memory_space<vmem>>, vector<1x8x128xf32>
    %405 = vector.shape_cast %404 : vector<1x8x128xf32> to vector<8x128xf32>
    %406 = vector.shape_cast %402 : vector<8x128xf32> to vector<1x8x128xf32>
    tpu.vector_store %arg13[%403, %c0_86, %c0_87], %406 {strides = array<i32>} : memref<8x8x128xf32, #tpu.memory_space<vmem>>, vector<1x8x128xf32>,
    %c6_i32 = arith.constant 6 : i32
    %407 = arith.index_cast %c6_i32 : i32 to index
    %c0_88 = arith.constant 0 : index
    %c0_89 = arith.constant 0 : index
    %408 = vector.load %arg12[%407, %c0_88, %c0_89] : memref<8x8x512xbf16, #tpu.memory_space<vmem>>, vector<1x8x512xbf16>
    %409 = vector.shape_cast %408 : vector<1x8x512xbf16> to vector<8x512xbf16>
    %410 = arith.extf %409 : vector<8x512xbf16> to vector<8x512xf32>
    %411 = arith.truncf %373 : vector<8x128xf32> to vector<8x128xbf16>
    %cst_90 = arith.constant dense<0.000000e+00> : vector<8x512xf32>
    %412 = tpu.matmul %411, %11, %cst_90 {dimension_numbers = #tpu.dot_dimension_numbers<[1], [0], [0], [1], [0, 0, 1, 1], [], []>} : vector<8x128xbf16>, vector<128x512xbf16>, vector<8x512xf32> -> vector<8x512xf32>
    %413 = arith.addf %410, %412 : vector<8x512xf32>
    %414 = vector.extract_strided_slice %413 {offsets = [0, 0], sizes = [8, 128], strides = [1, 1]} : vector<8x512xf32> to vector<8x128xf32>
    %415 = arith.negf %414 : vector<8x128xf32>
    %416 = math.exp %415 : vector<8x128xf32>
    %cst_91 = arith.constant 1.000000e+00 : f32
    %417 = vector.broadcast %cst_91 : f32 to vector<8x128xf32>
    %418 = arith.addf %417, %416 : vector<8x128xf32>
    %419 = arith.divf %417, %418 : vector<8x128xf32>
    %420 = vector.extract_strided_slice %413 {offsets = [0, 128], sizes = [8, 128], strides = [1, 1]} : vector<8x512xf32> to vector<8x128xf32>
    %421 = arith.negf %420 : vector<8x128xf32>
    %422 = math.exp %421 : vector<8x128xf32>
    %cst_92 = arith.constant 1.000000e+00 : f32
    %423 = vector.broadcast %cst_92 : f32 to vector<8x128xf32>
    %424 = arith.addf %423, %422 : vector<8x128xf32>
    %425 = arith.divf %423, %424 : vector<8x128xf32>
    %426 = vector.extract_strided_slice %413 {offsets = [0, 256], sizes = [8, 128], strides = [1, 1]} : vector<8x512xf32> to vector<8x128xf32>
    %427 = math.tanh %426 : vector<8x128xf32>
    %428 = vector.extract_strided_slice %413 {offsets = [0, 384], sizes = [8, 128], strides = [1, 1]} : vector<8x512xf32> to vector<8x128xf32>
    %429 = arith.negf %428 : vector<8x128xf32>
    %430 = math.exp %429 : vector<8x128xf32>
    %cst_93 = arith.constant 1.000000e+00 : f32
    %431 = vector.broadcast %cst_93 : f32 to vector<8x128xf32>
    %432 = arith.addf %431, %430 : vector<8x128xf32>
    %433 = arith.divf %431, %432 : vector<8x128xf32>
    %434 = arith.mulf %425, %371 : vector<8x128xf32>
    %435 = arith.mulf %419, %427 : vector<8x128xf32>
    %436 = arith.addf %434, %435 : vector<8x128xf32>
    %437 = math.tanh %436 : vector<8x128xf32>
    %438 = arith.mulf %433, %437 : vector<8x128xf32>
    %439 = tpu.concatenate %438, %402 in 1 : vector<8x128xf32>, vector<8x128xf32> -> vector<8x256xf32>
    %440 = arith.truncf %439 : vector<8x256xf32> to vector<8x256xbf16>
    %cst_94 = arith.constant dense<0.000000e+00> : vector<8x512xf32>
    %441 = tpu.matmul %440, %12, %cst_94 {dimension_numbers = #tpu.dot_dimension_numbers<[1], [0], [0], [1], [0, 0, 1, 1], [], []>} : vector<8x256xbf16>, vector<256x512xbf16>, vector<8x512xf32> -> vector<8x512xf32>
    %442 = arith.addf %441, %15 : vector<8x512xf32>
    %443 = vector.extract_strided_slice %442 {offsets = [0, 0], sizes = [8, 128], strides = [1, 1]} : vector<8x512xf32> to vector<8x128xf32>
    %444 = arith.negf %443 : vector<8x128xf32>
    %445 = math.exp %444 : vector<8x128xf32>
    %cst_95 = arith.constant 1.000000e+00 : f32
    %446 = vector.broadcast %cst_95 : f32 to vector<8x128xf32>
    %447 = arith.addf %446, %445 : vector<8x128xf32>
    %448 = arith.divf %446, %447 : vector<8x128xf32>
    %449 = vector.extract_strided_slice %442 {offsets = [0, 128], sizes = [8, 128], strides = [1, 1]} : vector<8x512xf32> to vector<8x128xf32>
    %450 = arith.negf %449 : vector<8x128xf32>
    %451 = math.exp %450 : vector<8x128xf32>
    %cst_96 = arith.constant 1.000000e+00 : f32
    %452 = vector.broadcast %cst_96 : f32 to vector<8x128xf32>
    %453 = arith.addf %452, %451 : vector<8x128xf32>
    %454 = arith.divf %452, %453 : vector<8x128xf32>
    %455 = vector.extract_strided_slice %442 {offsets = [0, 256], sizes = [8, 128], strides = [1, 1]} : vector<8x512xf32> to vector<8x128xf32>
    %456 = math.tanh %455 : vector<8x128xf32>
    %457 = vector.extract_strided_slice %442 {offsets = [0, 384], sizes = [8, 128], strides = [1, 1]} : vector<8x512xf32> to vector<8x128xf32>
    %458 = arith.negf %457 : vector<8x128xf32>
    %459 = math.exp %458 : vector<8x128xf32>
    %cst_97 = arith.constant 1.000000e+00 : f32
    %460 = vector.broadcast %cst_97 : f32 to vector<8x128xf32>
    %461 = arith.addf %460, %459 : vector<8x128xf32>
    %462 = arith.divf %460, %461 : vector<8x128xf32>
    %463 = arith.mulf %454, %400 : vector<8x128xf32>
    %464 = arith.mulf %448, %456 : vector<8x128xf32>
    %465 = arith.addf %463, %464 : vector<8x128xf32>
    %466 = math.tanh %465 : vector<8x128xf32>
    %467 = arith.mulf %462, %466 : vector<8x128xf32>
    %468 = arith.index_cast %c6_i32 : i32 to index
    %c0_98 = arith.constant 0 : index
    %c0_99 = arith.constant 0 : index
    %469 = vector.load %arg13[%468, %c0_98, %c0_99] : memref<8x8x128xf32, #tpu.memory_space<vmem>>, vector<1x8x128xf32>
    %470 = vector.shape_cast %469 : vector<1x8x128xf32> to vector<8x128xf32>
    %471 = vector.shape_cast %467 : vector<8x128xf32> to vector<1x8x128xf32>
    tpu.vector_store %arg13[%468, %c0_98, %c0_99], %471 {strides = array<i32>} : memref<8x8x128xf32, #tpu.memory_space<vmem>>, vector<1x8x128xf32>,
    %c7_i32 = arith.constant 7 : i32
    %472 = arith.index_cast %c7_i32 : i32 to index
    %c0_100 = arith.constant 0 : index
    %c0_101 = arith.constant 0 : index
    %473 = vector.load %arg12[%472, %c0_100, %c0_101] : memref<8x8x512xbf16, #tpu.memory_space<vmem>>, vector<1x8x512xbf16>
    %474 = vector.shape_cast %473 : vector<1x8x512xbf16> to vector<8x512xbf16>
    %475 = arith.extf %474 : vector<8x512xbf16> to vector<8x512xf32>
    %476 = arith.truncf %438 : vector<8x128xf32> to vector<8x128xbf16>
    %cst_102 = arith.constant dense<0.000000e+00> : vector<8x512xf32>
    %477 = tpu.matmul %476, %11, %cst_102 {dimension_numbers = #tpu.dot_dimension_numbers<[1], [0], [0], [1], [0, 0, 1, 1], [], []>} : vector<8x128xbf16>, vector<128x512xbf16>, vector<8x512xf32> -> vector<8x512xf32>
    %478 = arith.addf %475, %477 : vector<8x512xf32>
    %479 = vector.extract_strided_slice %478 {offsets = [0, 0], sizes = [8, 128], strides = [1, 1]} : vector<8x512xf32> to vector<8x128xf32>
    %480 = arith.negf %479 : vector<8x128xf32>
    %481 = math.exp %480 : vector<8x128xf32>
    %cst_103 = arith.constant 1.000000e+00 : f32
    %482 = vector.broadcast %cst_103 : f32 to vector<8x128xf32>
    %483 = arith.addf %482, %481 : vector<8x128xf32>
    %484 = arith.divf %482, %483 : vector<8x128xf32>
    %485 = vector.extract_strided_slice %478 {offsets = [0, 128], sizes = [8, 128], strides = [1, 1]} : vector<8x512xf32> to vector<8x128xf32>
    %486 = arith.negf %485 : vector<8x128xf32>
    %487 = math.exp %486 : vector<8x128xf32>
    %cst_104 = arith.constant 1.000000e+00 : f32
    %488 = vector.broadcast %cst_104 : f32 to vector<8x128xf32>
    %489 = arith.addf %488, %487 : vector<8x128xf32>
    %490 = arith.divf %488, %489 : vector<8x128xf32>
    %491 = vector.extract_strided_slice %478 {offsets = [0, 256], sizes = [8, 128], strides = [1, 1]} : vector<8x512xf32> to vector<8x128xf32>
    %492 = math.tanh %491 : vector<8x128xf32>
    %493 = vector.extract_strided_slice %478 {offsets = [0, 384], sizes = [8, 128], strides = [1, 1]} : vector<8x512xf32> to vector<8x128xf32>
    %494 = arith.negf %493 : vector<8x128xf32>
    %495 = math.exp %494 : vector<8x128xf32>
    %cst_105 = arith.constant 1.000000e+00 : f32
    %496 = vector.broadcast %cst_105 : f32 to vector<8x128xf32>
    %497 = arith.addf %496, %495 : vector<8x128xf32>
    %498 = arith.divf %496, %497 : vector<8x128xf32>
    %499 = arith.mulf %490, %436 : vector<8x128xf32>
    %500 = arith.mulf %484, %492 : vector<8x128xf32>
    %501 = arith.addf %499, %500 : vector<8x128xf32>
    %502 = math.tanh %501 : vector<8x128xf32>
    %503 = arith.mulf %498, %502 : vector<8x128xf32>
    %504 = tpu.concatenate %503, %467 in 1 : vector<8x128xf32>, vector<8x128xf32> -> vector<8x256xf32>
    %505 = arith.truncf %504 : vector<8x256xf32> to vector<8x256xbf16>
    %cst_106 = arith.constant dense<0.000000e+00> : vector<8x512xf32>
    %506 = tpu.matmul %505, %12, %cst_106 {dimension_numbers = #tpu.dot_dimension_numbers<[1], [0], [0], [1], [0, 0, 1, 1], [], []>} : vector<8x256xbf16>, vector<256x512xbf16>, vector<8x512xf32> -> vector<8x512xf32>
    %507 = arith.addf %506, %15 : vector<8x512xf32>
    %508 = vector.extract_strided_slice %507 {offsets = [0, 0], sizes = [8, 128], strides = [1, 1]} : vector<8x512xf32> to vector<8x128xf32>
    %509 = arith.negf %508 : vector<8x128xf32>
    %510 = math.exp %509 : vector<8x128xf32>
    %cst_107 = arith.constant 1.000000e+00 : f32
    %511 = vector.broadcast %cst_107 : f32 to vector<8x128xf32>
    %512 = arith.addf %511, %510 : vector<8x128xf32>
    %513 = arith.divf %511, %512 : vector<8x128xf32>
    %514 = vector.extract_strided_slice %507 {offsets = [0, 128], sizes = [8, 128], strides = [1, 1]} : vector<8x512xf32> to vector<8x128xf32>
    %515 = arith.negf %514 : vector<8x128xf32>
    %516 = math.exp %515 : vector<8x128xf32>
    %cst_108 = arith.constant 1.000000e+00 : f32
    %517 = vector.broadcast %cst_108 : f32 to vector<8x128xf32>
    %518 = arith.addf %517, %516 : vector<8x128xf32>
    %519 = arith.divf %517, %518 : vector<8x128xf32>
    %520 = vector.extract_strided_slice %507 {offsets = [0, 256], sizes = [8, 128], strides = [1, 1]} : vector<8x512xf32> to vector<8x128xf32>
    %521 = math.tanh %520 : vector<8x128xf32>
    %522 = vector.extract_strided_slice %507 {offsets = [0, 384], sizes = [8, 128], strides = [1, 1]} : vector<8x512xf32> to vector<8x128xf32>
    %523 = arith.negf %522 : vector<8x128xf32>
    %524 = math.exp %523 : vector<8x128xf32>
    %cst_109 = arith.constant 1.000000e+00 : f32
    %525 = vector.broadcast %cst_109 : f32 to vector<8x128xf32>
    %526 = arith.addf %525, %524 : vector<8x128xf32>
    %527 = arith.divf %525, %526 : vector<8x128xf32>
    %528 = arith.mulf %519, %465 : vector<8x128xf32>
    %529 = arith.mulf %513, %521 : vector<8x128xf32>
    %530 = arith.addf %528, %529 : vector<8x128xf32>
    %531 = math.tanh %530 : vector<8x128xf32>
    %532 = arith.mulf %527, %531 : vector<8x128xf32>
    %533 = arith.index_cast %c7_i32 : i32 to index
    %c0_110 = arith.constant 0 : index
    %c0_111 = arith.constant 0 : index
    %534 = vector.load %arg13[%533, %c0_110, %c0_111] : memref<8x8x128xf32, #tpu.memory_space<vmem>>, vector<1x8x128xf32>
    %535 = vector.shape_cast %534 : vector<1x8x128xf32> to vector<8x128xf32>
    %536 = vector.shape_cast %532 : vector<8x128xf32> to vector<1x8x128xf32>
    tpu.vector_store %arg13[%533, %c0_110, %c0_111], %536 {strides = array<i32>} : memref<8x8x128xf32, #tpu.memory_space<vmem>>, vector<1x8x128xf32>,
    %c8_i32 = arith.constant 8 : i32
    %c0_112 = arith.constant 0 : index
    %c0_113 = arith.constant 0 : index
    %c0_114 = arith.constant 0 : index
    %537 = vector.load %arg13[%c0_112, %c0_113, %c0_114] : memref<8x8x128xf32, #tpu.memory_space<vmem>>, vector<8x8x128xf32>
    %538 = vector.shape_cast %537 : vector<8x8x128xf32> to vector<64x128xf32>
    %539 = arith.truncf %538 : vector<64x128xf32> to vector<64x128xbf16>
    %c0_115 = arith.constant 0 : index
    %c0_116 = arith.constant 0 : index
    %540 = vector.load %arg7[%c0_115, %c0_116] : memref<128x128xbf16, #tpu.memory_space<vmem>>, vector<128x128xbf16>
    %cst_117 = arith.constant dense<0.000000e+00> : vector<64x128xf32>
    %541 = tpu.matmul %539, %540, %cst_117 {dimension_numbers = #tpu.dot_dimension_numbers<[1], [0], [0], [1], [0, 0, 1, 1], [], []>} : vector<64x128xbf16>, vector<128x128xbf16>, vector<64x128xf32> -> vector<64x128xf32>
    %542 = math.tanh %541 : vector<64x128xf32>
    %543 = vector.shape_cast %542 : vector<64x128xf32> to vector<8x8x128xf32>
    %c0_118 = arith.constant 0 : index
    %c0_119 = arith.constant 0 : index
    %544 = vector.load %arg8[%c0_118, %c0_119] : memref<1x128xf32, #tpu.memory_space<vmem>>, vector<1x128xf32>
    %545 = vector.shape_cast %544 : vector<1x128xf32> to vector<1x1x128xf32>
    %546 = vector.broadcast %545 : vector<1x1x128xf32> to vector<8x8x128xf32>
    %547 = arith.mulf %543, %546 : vector<8x8x128xf32>
    %cst_120 = arith.constant dense<0.000000e+00> : vector<8x8xf32>
    %548 = vector.multi_reduction <add>, %547, %cst_120 [2] : vector<8x8x128xf32> to vector<8x8xf32>
    %549 = tpu.transpose %548, [1, 0] : vector<8x8xf32> -> vector<8x8xf32>
    %550 = arith.negf %549 : vector<8x8xf32>
    %551 = math.exp %550 : vector<8x8xf32>
    %cst_121 = arith.constant 1.000000e+00 : f32
    %552 = vector.broadcast %cst_121 : f32 to vector<8x8xf32>
    %553 = arith.addf %552, %551 : vector<8x8xf32>
    %554 = arith.divf %552, %553 : vector<8x8xf32>
    %c0_122 = arith.constant 0 : index
    %c0_123 = arith.constant 0 : index
    %555 = vector.load %arg11[%c0_122, %c0_123] : memref<8x8xf32, #tpu.memory_space<vmem>>, vector<8x8xf32>
    tpu.vector_store %arg11[%c0_122, %c0_123], %554 {strides = array<i32>} : memref<8x8xf32, #tpu.memory_space<vmem>>, vector<8x8xf32>,
    %cst_124 = arith.constant dense<0xFF800000> : vector<8xf32>
    %556 = vector.multi_reduction <maximumf>, %549, %cst_124 [1] : vector<8x8xf32> to vector<8xf32>
    %cst_125 = arith.constant 0xFF800000 : f32
    %557 = vector.broadcast %cst_125 : f32 to vector<8xf32>
    %558 = arith.maximumf %557, %556 : vector<8xf32>
    %559 = vector.shape_cast %558 : vector<8xf32> to vector<8x1xf32>
    %560 = vector.broadcast %559 : vector<8x1xf32> to vector<8x8xf32>
    %561 = arith.subf %549, %560 : vector<8x8xf32>
    %562 = math.exp %561 : vector<8x8xf32>
    %cst_126 = arith.constant dense<0.000000e+00> : vector<8xf32>
    %563 = vector.multi_reduction <add>, %562, %cst_126 [1] : vector<8x8xf32> to vector<8xf32>
    %564 = vector.shape_cast %563 : vector<8xf32> to vector<8x1xf32>
    %565 = vector.broadcast %564 : vector<8x1xf32> to vector<8x8xf32>
    %566 = arith.divf %562, %565 : vector<8x8xf32>
    %c0_127 = arith.constant 0 : index
    %c0_128 = arith.constant 0 : index
    %567 = vector.load %arg9[%c0_127, %c0_128] : memref<8x8xf32, #tpu.memory_space<vmem>>, vector<8x8xf32>
    %568 = arith.mulf %566, %567 : vector<8x8xf32>
    %569 = tpu.transpose %568, [1, 0] : vector<8x8xf32> -> vector<8x8xf32>
    %570 = vector.shape_cast %569 : vector<8x8xf32> to vector<8x8x1xf32>
    %571 = vector.broadcast %570 : vector<8x8x1xf32> to vector<8x8x128xf32>
    %572 = arith.mulf %537, %571 : vector<8x8x128xf32>
    %cst_129 = arith.constant dense<0.000000e+00> : vector<8x128xf32>
    %573 = vector.multi_reduction <add>, %572, %cst_129 [0] : vector<8x8x128xf32> to vector<8x128xf32>
    %c0_130 = arith.constant 0 : index
    %c0_131 = arith.constant 0 : index
    %574 = vector.load %arg10[%c0_130, %c0_131] : memref<8x128xf32, #tpu.memory_space<vmem>>, vector<8x128xf32>
    tpu.vector_store %arg10[%c0_130, %c0_131], %573 {strides = array<i32>} : memref<8x128xf32, #tpu.memory_space<vmem>>, vector<8x128xf32>,
    return
  }
  func.func @transform_0(%arg0: i32) -> (i32, i32, i32) {
    %c0_i32 = arith.constant 0 : i32
    %c0_i32_0 = arith.constant 0 : i32
    %c0_i32_1 = arith.constant 0 : i32
    return %c0_i32, %arg0, %c0_i32_0 : i32, i32, i32
  }
  func.func @transform_1(%arg0: i32) -> (i32, i32) {
    %c0_i32 = arith.constant 0 : i32
    %c0_i32_0 = arith.constant 0 : i32
    %c0_i32_1 = arith.constant 0 : i32
    return %c0_i32, %c0_i32_0 : i32, i32
  }
  func.func @transform_2(%arg0: i32) -> (i32, i32) {
    %c0_i32 = arith.constant 0 : i32
    %c0_i32_0 = arith.constant 0 : i32
    %c0_i32_1 = arith.constant 0 : i32
    return %c0_i32, %c0_i32_0 : i32, i32
  }
  func.func @transform_3(%arg0: i32) -> (i32, i32) {
    %c0_i32 = arith.constant 0 : i32
    %c0_i32_0 = arith.constant 0 : i32
    %c0_i32_1 = arith.constant 0 : i32
    return %c0_i32, %c0_i32_0 : i32, i32
  }
  func.func @transform_4(%arg0: i32) -> (i32, i32) {
    %c0_i32 = arith.constant 0 : i32
    %c0_i32_0 = arith.constant 0 : i32
    %c0_i32_1 = arith.constant 0 : i32
    return %c0_i32, %c0_i32_0 : i32, i32
  }
  func.func @transform_5(%arg0: i32) -> (i32, i32) {
    %c0_i32 = arith.constant 0 : i32
    %c0_i32_0 = arith.constant 0 : i32
    %c0_i32_1 = arith.constant 0 : i32
    return %c0_i32, %c0_i32_0 : i32, i32
  }
  func.func @transform_6(%arg0: i32) -> (i32, i32) {
    %c0_i32 = arith.constant 0 : i32
    %c0_i32_0 = arith.constant 0 : i32
    %c0_i32_1 = arith.constant 0 : i32
    return %c0_i32, %c0_i32_0 : i32, i32
  }
  func.func @transform_7(%arg0: i32) -> (i32, i32) {
    %c0_i32 = arith.constant 0 : i32
    %c0_i32_0 = arith.constant 0 : i32
    %c0_i32_1 = arith.constant 0 : i32
    return %c0_i32, %c0_i32_0 : i32, i32
  }
  func.func @transform_8(%arg0: i32) -> (i32, i32) {
    %c0_i32 = arith.constant 0 : i32
    %c0_i32_0 = arith.constant 0 : i32
    return %arg0, %c0_i32 : i32, i32
  }
  func.func @transform_9(%arg0: i32) -> (i32, i32) {
    %c0_i32 = arith.constant 0 : i32
    %c0_i32_0 = arith.constant 0 : i32
    return %arg0, %c0_i32 : i32, i32
  }
  func.func @transform_10(%arg0: i32) -> (i32, i32) {
    %c0_i32 = arith.constant 0 : i32
    %c0_i32_0 = arith.constant 0 : i32
    return %arg0, %c0_i32 : i32, i32
  }
}

</mosaic_0001>

<bundles_post_ra>
// kernel: tpu_custom_call.1
= control target key start
LH: loop header
LB: loop body
LE: loop exit
PB: predicated region body
PF: predicated region fallthrough
CT: control target
= control target key end

     0   :  { %s7071_s0 = inlined_call_operand.hbm [shape: f32[8,16,128], index: 0, kind: input, shape index: {}]   ;;  %s7072_s1 = inlined_call_operand.hbm [shape: bf16[128,512], index: 1, kind: input, shape index: {}]   ;;  %s7073_s2 = inlined_call_operand.hbm [shape: bf16[128,512], index: 2, kind: input, shape index: {}]   ;;  %s7074_s3 = inlined_call_operand.vmem [shape: f32[1,512], index: 3, kind: input, shape index: {}]   ;;  %s7075_s4 = inlined_call_operand.hbm [shape: bf16[256,512], index: 4, kind: input, shape index: {}]   ;;  %s7076_s5 = inlined_call_operand.vmem [shape: f32[1,512], index: 5, kind: input, shape index: {}]   ;;  %s7077_s6 = inlined_call_operand.hbm [shape: bf16[128,128], index: 6, kind: input, shape index: {}]   ;;  %s7078_s7 = inlined_call_operand.vmem [shape: f32[1,128], index: 7, kind: input, shape index: {}]   ;;  %s7079_s8 = inlined_call_operand.vmem [shape: f32[16,8], index: 8, kind: input, shape index: {}]   ;;  %s7080_s9 = inlined_call_operand.hbm [shape: f32[16,128], index: 9, kind: output, shape index: {0}]   ;;  %s7081_s10 = inlined_call_operand.vmem [shape: f32[16,8], index: 10, kind: output, shape index: {1}]  }
   0x1   :  { %7370 = sst [smem:[#allocation89_spill]] %s7072_s1 }
   0x2   :  { %7371 = sst [smem:[#allocation90_spill]] %s7073_s2 }
   0x3   :  { %7372 = sst [smem:[#allocation91_spill]] %s7075_s4 }
   0x4   :  { %7373 = sst [smem:[#allocation92_spill]] %s7077_s6 }
   0x5   :  { %16 = vsyncpa [#allocation5], 0 }
   0x6   :  { %18 = vsyncpa [#allocation5 + $0x1], 0 }
   0x7   :  { %19 = vsyncpa [#allocation8], 0 }
   0x8   :  { %20 = vsyncpa [#allocation11], 0 }
   0x9   :  { %21 = vsyncpa [#allocation6], 0 }
   0xa   :  { %23 = vsyncpa [#allocation6 + $0x1], 0  ;;  %s5282_s13 = smov 0   ;;  %s5284_s14 = smov 0  }
   0xb   :  { %s5286_s15 = smov 0   ;;  %s5288_s16 = smov 0  }
   0xc LB: > { %s5303_s17 = sadd.s32 4294967295, %s5211_s16   ;;  %s3951_s18 = sadd.s32 4294967294, %s5211_s16   ;;  %s5211_s16 = sphi %s5288_s16, %s7841_s16   ;;  %s5207_s15 = sphi %s5286_s15, %s7840_s15   ;;  %s5203_s14 = sphi %s5284_s14, %s7839_s14   ;;  %s5199_s13 = sphi %s5282_s13, %s7838_s13  }
   0xd   : > { %p49_p0 = scmp.ne.s32.totalorder %s5203_s14, %s5199_s13  ;;  %p7082_p1 = scmp.eq.s32.totalorder %s5303_s17, 0 }
   0xe   : > { %p252_p3 = scmp.eq.s32.totalorder %s3951_s18, 1  ;;  %p3952_p5 = scmp.ge.s32.totalorder %s5211_s16, 1 }
   0xf   : > { %p5312_p4 = por %p7082_p1, %p49_p0  ;;  %p285_p7 = scmp.lt.s32.totalorder %s5211_s16, 3 }
  0x10   : > { %p5317_p6 = por %p252_p3, %p49_p0  ;;  %s5213_s22 = smov [#allocation7]  }
  0x11   : > { %s7374_s19 = scalar_select %p5312_p4, 1, 0 }
  0x12   : > { %s7375_s20 = scalar_select %p5317_p6, 1, 0 }
  0x13   : > { %p5322_p8 = pnand %p3952_p5, %p285_p7  ;;  %s297_s23 = sshll.u32 %s5213_s22, 4  ;;  %s298_s23 = int_to_ptr.vmem [resolvable:$true] %s297_s23 }
  0x14   : > { %s5214_s25 = smov [#allocation10]   ;;  %s5215_s27 = smov [#allocation9]  }
  0x15   : > { %s7376_s21 = scalar_select %p5322_p8, 1, 0 }
  0x16   : > { %p4247_p9 = pneg %p5322_p8  ;;  %s326_s26 = sshll.u32 %s5214_s25, 4  ;;  %s327_s26 = int_to_ptr.vmem [resolvable:$true] %s326_s26 }
  0x17   : > { %s310_s28 = sshll.u32 %s5215_s27, 4  ;;  %s5018_s29 = scalar_lea.vmem %s298_s23, 4096  ;;  %s311_s28 = int_to_ptr.vmem [resolvable:$true] %s310_s28 }
  0x18   : > { %p5331_p11 = pnand %p4247_p9, %p7082_p1  ;;  %p5019_p13 = scmp.ne.s32.totalorder %s298_s23, %s5018_s29 }
  0x19   : > { %p5026_p5 = scmp.lt.s32.totalorder %s298_s23, %s298_s23  ;;  %p5027_p7 = scmp.lt.s32.totalorder %s5018_s29, %s5018_s29 }
  0x1a   : > { %p5009_p12 = pneg %p5331_p11 }
  0x1b   : > { %p5028_p9 = por %p5027_p7, %p5026_p5 }
  0x1c   : > { %p5021_p0 = pnand %p5019_p13, %p5009_p12 }
  0x1e   : > { %p5022_p3 = pneg %p5021_p0 }
  0x20   : > { %p5029_p10 = pnand %p5028_p9, %p5022_p3 }
  0x22   : > { %5032 = shalt.err (!%p5029_p10)
}
  0x23   : > { %s7083_s30 = smov 256   ;;  %s5217_s11 = smov 16  }
  0x24   : > { %s7378_s1 = sld [smem:[#allocation89_spill]]  ;;  %s5044_s22 = scalar_lea.vmem %s327_s26, 8192 }
  0x25   : > { %p5045_p1 = scmp.ne.s32.totalorder %s327_s26, %s5044_s22  ;;  %p5052_p5 = scmp.lt.s32.totalorder %s327_s26, %s327_s26 }
  0x26   : > { %p5053_p3 = scmp.lt.s32.totalorder %s5044_s22, %s5044_s22 }
  0x27   : > { %p5047_p13 = pnand %p5045_p1, %p5009_p12 }
  0x28   : > { %p5054_p10 = por %p5053_p3, %p5052_p5 }
  0x29   : > { %p5048_p0 = pneg %p5047_p13 }
  0x2a   : > { %4250 = dma.hbm_to_vmem [thread:$0]  (!%p5331_p11), %s7378_s1, 4096, %s298_s23, [#allocation8], %s7083_s30, %s7083_s30, %s5217_s11  }
  0x2b   : > { %p5055_p7 = pnand %p5054_p10, %p5048_p0 }
  0x2d   : > { %5058 = shalt.err (!%p5055_p7)
}
  0x2e   : > { %s7379_s4 = sld [smem:[#allocation91_spill]]  ;;  %s5070_s23 = scalar_lea.vmem %s311_s28, 4096 }
  0x2f   : > { %p5071_p9 = scmp.ne.s32.totalorder %s311_s28, %s5070_s23  ;;  %p5078_p2 = scmp.lt.s32.totalorder %s311_s28, %s311_s28 }
  0x30   : > { %p5079_p5 = scmp.lt.s32.totalorder %s5070_s23, %s5070_s23 }
  0x31   : > { %p5073_p1 = pnand %p5071_p9, %p5009_p12 }
  0x32   : > { %p5080_p0 = por %p5079_p5, %p5078_p2 }
  0x33   : > { %p5074_p13 = pneg %p5073_p1 }
  0x34   : > { %4256 = dma.hbm_to_vmem [thread:$0]  (!%p5331_p11), %s7379_s4, 8192, %s327_s26, [#allocation11], %s7083_s30, %s7083_s30, %s5217_s11  }
  0x35   : > { %p5081_p3 = pnand %p5080_p0, %p5074_p13 }
  0x37   : > { %5084 = shalt.err (!%p5081_p3)
}
  0x38   : > { %s7380_s2 = sld [smem:[#allocation90_spill]]  ;;  %s5218_s26 = smov [#allocation12]  }
  0x39   : > { %s342_s18 = sshll.u32 %s5218_s26, 4  ;;  %s343_s18 = int_to_ptr.vmem [resolvable:$true] %s342_s18 }
  0x3a   : > { %s5096_s22 = scalar_lea.vmem %s343_s18, 1024  ;;  %p5104_p9 = scmp.lt.s32.totalorder %s343_s18, %s343_s18 }
  0x3b   : > { %p5097_p10 = scmp.ne.s32.totalorder %s343_s18, %s5096_s22  ;;  %p5105_p1 = scmp.lt.s32.totalorder %s5096_s22, %s5096_s22 }
  0x3d   : > { %p5099_p7 = pnand %p5097_p10, %p5009_p12  ;;  %p5106_p13 = por %p5105_p1, %p5104_p9 }
  0x3e   : > { %4253 = dma.hbm_to_vmem [thread:$0]  (!%p5331_p11), %s7380_s2, 4096, %s311_s28, [#allocation8], %s7083_s30, %s7083_s30, %s5217_s11  }
  0x3f   : > { %p5100_p2 = pneg %p5099_p7 }
  0x41   : > { %p5107_p5 = pnand %p5106_p13, %p5100_p2 }
  0x43   : > { %5110 = shalt.err (!%p5107_p5)
}
  0x44   : > { %s5219_s25 = smov 64   ;;  %s5220_s28 = smov 4  }
  0x45   : > { %s7381_s6 = sld [smem:[#allocation92_spill]]  ;;  %s5376_s23 = sadd.s32 1, %s5211_s16  }
  0x46   : > { %s33_s29 = ssub.s32 %s5211_s16, %s5376_s23  ;;  %s36_s12 = sadd.s32 1, %s5207_s15 }
  0x47   : > { %p34_p12 = scmp.eq.s32.totalorder %s33_s29, 0  ;;  %p43_p0 = scmp.ne.s32.totalorder %s5207_s15, %s5203_s14 }
  0x48   : > { %p44_p3 = scmp.eq.s32.totalorder %s5211_s16, 0  ;;  %p7382_p7 = scmp.eq.s32.totalorder %s5303_s17, 1 }
  0x49   : > { %s5385_s26 = scalar_select %p34_p12, %s5207_s15, %s36_s12  }
  0x4a   : > { %p45_p10 = por %p44_p3, %p43_p0  ;;  %p5389_p2 = por %p7382_p7, %p43_p0 }
  0x4b   : > { %4259 = dma.hbm_to_vmem [thread:$0]  (!%p5331_p11), %s7381_s6, 1024, %s343_s18, [#allocation11], %s5219_s25, %s5219_s25, %s5220_s28  }
  0x4c   : > { %s7383_s22 = scalar_select %p5389_p2, 1, 0 }
  0x4d   : > { %p4272_p9 = scmp.lt.s32.totalorder %s5211_s16, 2  ;;  %s359_s24 = sand.u32 1, %s5207_s15  }
  0x4e   : > { %s3958_s11 = sshll.u32 %s359_s24, 6  ;;  %s3959_s18 = sshll.u32 %s5211_s16, 7 }
  0x4f   : > { %s5399_s27 = scalar_lea.hbm %s7071_s0, %s3959_s18  ;;  %s363_s29 = scalar_lea.vmem [#allocation4], %s3958_s11 }
  0x50   : > { %s369_s12 = sshll.u32 %s363_s29, 4  ;;  %p5403_p11 = pnand %p4272_p9, %p45_p10  ;;  %s5401_s12 = int_to_ptr.vmem [resolvable:$true] %s369_s12 }
  0x51   : > { %s5407_s1 = scalar_lea.sflag [#allocation5], %s359_s24  ;;  %s5111_s2 = scalar_lea.hbm %s5399_s27, 1024 }
  0x52   : > { %p5112_p1 = scmp.ne.s32.totalorder %s5399_s27, %s5111_s2  ;;  %p5113_p13 = pneg %p5403_p11 }
  0x53   : > { %s5116_s11 = scalar_lea.hbm %s7071_s0, 2048  ;;  %p5117_p0 = scmp.lt.s32.totalorder %s5399_s27, %s7071_s0 }
  0x54   : > { %p5114_p5 = pnand %p5113_p13, %p5112_p1  ;;  %p5118_p3 = scmp.lt.s32.totalorder %s5116_s11, %s5111_s2 }
  0x56   : > { %p5115_p12 = pneg %p5114_p5  ;;  %p5119_p10 = por %p5118_p3, %p5117_p0 }
  0x58   : > { %p5120_p7 = pnand %p5119_p10, %p5115_p12 }
  0x5a   : > { %5123 = shalt.err (!%p5120_p7)
}
  0x5b   : > { %s5124_s24 = scalar_lea.vmem %s5401_s12, 1024  ;;  %s5221_s4 = smov [#allocation4]  }
  0x5c   : > { %p5125_p9 = scmp.ne.s32.totalorder %s5401_s12, %s5124_s24  ;;  %s5129_s6 = sshll.u32 %s5221_s4, 4  ;;  %s5130_s6 = int_to_ptr.vmem [resolvable:$false] %s5129_s6 }
  0x5d   : > { %s5131_s18 = scalar_lea.vmem %s5130_s6, 2048  ;;  %p5132_p5 = scmp.lt.s32.totalorder %s5401_s12, %s5130_s6 }
  0x5e   : > { %p5127_p6 = pnand %p5125_p9, %p5113_p13  ;;  %p5133_p2 = scmp.lt.s32.totalorder %s5131_s18, %s5124_s24 }
  0x60   : > { %p5128_p1 = pneg %p5127_p6  ;;  %p5134_p4 = por %p5133_p2, %p5132_p5 }
  0x62   : > { %p5135_p8 = pnand %p5134_p4, %p5128_p1 }
  0x64   : > { %5138 = shalt.err (!%p5135_p8)
}
  0x65   : > { %s5222_s2 = smov 128   ;;  %s5223_s25 = smov 8  }
  0x66   : > { %s7385_s11 = smov 256   ;;  %p7386_p6 = scmp.ne.s32.totalorder %s7376_s21, 0 }
  0x67   : > { %4263 = dma.hbm_to_vmem [thread:$0]  (!%p5403_p11), %s5399_s27, 1024, %s5401_s12, %s5407_s1, %s7385_s11, %s5222_s2, %s5223_s25  }
  0x68   : > { %388 = sbr.rel (%p7386_p6) target bundleno = 3755 (0xeab), region = 56 }
  0x6d   : > { %s5432_s4 = sand.u32 1, %s5203_s14   ;;  %p7387_p4 = scmp.ne.s32.totalorder %s7374_s19, 0 }
  0x6e   : > { %s3961_s6 = sshll.u32 %s5432_s4, 6  ;;  %s391_s28 = scalar_lea.sflag [#allocation5], %s5432_s4 }
  0x6f   : > { %s5436_s29 = scalar_lea.vmem [#allocation4], %s3961_s6 }
  0x70   : > { %5182 = dma.done.wait (%p7387_p4), %s391_s28, 1024  }
  0x71   : > { %5184 = vsyncadd (%p7387_p4), %s391_s28, 4294966272  ;;  %p7388_p8 = scmp.eq.s32.totalorder %s5303_s17, 0 }
  0x73   : > { %5186 = dma.done.wait (%p7388_p8), [#allocation8], 8192   ;;  %p7389_p2 = pmov %p7388_p8 }
  0x75   : > { %5188 = vsyncadd (%p7389_p2), [#allocation8], 4294959104  ;;  %p7390_p11 = pmov %p7389_p2 }
  0x76   : > { %p7391_p13 = pmov %p7389_p2 }
  0x77   : > { %5190 = dma.done.wait (%p7390_p11), [#allocation11], 9216  }
  0x78   : > { %5192 = vsyncadd (%p7391_p13), [#allocation11], 4294958080  ;;  %v7087_v0 = vmov 0   ;;  %v4323_v1 = vld [vmem:[#allocation7 + $0xe4] ss:$16 sps:$4 sm:$0xff]   ;;  %v465_v32 = vld [vmem:[%s5436_s29 + $0x8] sm:$0xff] }
  0x79   : > { %722 = vmatprep.mubr.bf16.mxu1 %v7087_v0  ;;  %1296 = vmatprep.mubr.bf16.mxu0 %v7087_v0  ;;  %v4325_v2 = vld [vmem:[#allocation7 + $0xe0] ss:$16 sps:$4 sm:$0xff]   ;;  %v4326_v3 = vld [vmem:[#allocation7 + $0xc4] ss:$16 sps:$4 sm:$0xff]   ;;  %v4370_v34 = vld [vmem:[#allocation7 + $0xec] ss:$16 sps:$4 sm:$0xff]  }
  0x7a   : > { %690 = vmatprep.subr.bf16.mxu1 %v4323_v1  ;;  %v4328_v4 = vld [vmem:[#allocation7 + $0xc0] ss:$16 sps:$4 sm:$0xff]   ;;  %v5452_v5 = vld [vmem:[#allocation9 + $0xe4] ss:$16 sps:$4 sm:$0xff]   ;;  %v4368_v37 = vld [vmem:[#allocation7 + $0xe8] ss:$16 sps:$4 sm:$0xff]  }
  0x7b   : > { %691 = vmatpush1.bf16.msra.mxu1 %v4325_v2  ;;  %v4331_v6 = vld [vmem:[#allocation9 + $0xe0] ss:$16 sps:$4 sm:$0xff]   ;;  %v4332_v7 = vld [vmem:[#allocation7 + $0xa4] ss:$16 sps:$4 sm:$0xff]   ;;  %1264 = vmatprep.subr.bf16.mxu0 %v5452_v5  ;;  %v4376_v38 = vld [vmem:[#allocation7 + $0xcc] ss:$16 sps:$4 sm:$0xff]  }
  0x7c   : > { %692 = vmatprep.subr.bf16.mxu1 %v4326_v3  ;;  %1265 = vmatpush1.bf16.msra.mxu0 %v4331_v6  ;;  %v4335_v8 = vld [vmem:[#allocation9 + $0xc4] ss:$16 sps:$4 sm:$0xff]   ;;  %v4337_v9 = vld [vmem:[#allocation9 + $0xc0] ss:$16 sps:$4 sm:$0xff]   ;;  %v4374_v39 = vld [vmem:[#allocation7 + $0xc8] ss:$16 sps:$4 sm:$0xff]  }
  0x7d   : > { %v4334_v10 = vld [vmem:[#allocation7 + $0xa0] ss:$16 sps:$4 sm:$0xff]   ;;  %v4338_v11 = vld [vmem:[#allocation7 + $0x84] ss:$16 sps:$4 sm:$0xff]   ;;  %1266 = vmatprep.subr.bf16.mxu0 %v4335_v8  ;;  %v467_v41 = vld [vmem:[%s5436_s29 + $0x18] sm:$0xff]  ;;  %vm3614_vm0 = vcmask 1041409  }
  0x7e   : > { %v4341_v12 = vld [vmem:[#allocation9 + $0xa4] ss:$16 sps:$4 sm:$0xff]   ;;  %v4343_v13 = vld [vmem:[#allocation9 + $0xa0] ss:$16 sps:$4 sm:$0xff]   ;;  %v4379_v42 = vld [vmem:[#allocation7 + $0xac] ss:$16 sps:$4 sm:$0xff]  }
  0x7f   : > { %693 = vmatpush1.bf16.msra.mxu1 %v4328_v4  ;;  %v4340_v14 = vld [vmem:[#allocation7 + $0x80] ss:$16 sps:$4 sm:$0xff]   ;;  %v4347_v15 = vld [vmem:[#allocation9 + $0x84] ss:$16 sps:$4 sm:$0xff]   ;;  %v4377_v44 = vld [vmem:[#allocation7 + $0xa8] ss:$16 sps:$4 sm:$0xff]  }
  0x80   : > { %694 = vmatprep.subr.bf16.mxu1 %v4332_v7  ;;  %1267 = vmatpush1.bf16.msra.mxu0 %v4337_v9  ;;  %v4344_v16 = vld [vmem:[#allocation7 + $0x64] ss:$16 sps:$4 sm:$0xff]   ;;  %v4349_v17 = vld [vmem:[#allocation9 + $0x80] ss:$16 sps:$4 sm:$0xff]   ;;  %v4382_v45 = vld [vmem:[#allocation7 + $0x8c] ss:$16 sps:$4 sm:$0xff]  }
  0x81   : > { %1268 = vmatprep.subr.bf16.mxu0 %v4341_v12  ;;  %v4346_v18 = vld [vmem:[#allocation7 + $0x60] ss:$16 sps:$4 sm:$0xff]   ;;  %v4353_v19 = vld [vmem:[#allocation9 + $0x64] ss:$16 sps:$4 sm:$0xff]   ;;  %v4380_v46 = vld [vmem:[#allocation7 + $0x88] ss:$16 sps:$4 sm:$0xff]  }
  0x82   : > { %v4350_v20 = vld [vmem:[#allocation7 + $0x44] ss:$16 sps:$4 sm:$0xff]   ;;  %v4355_v21 = vld [vmem:[#allocation9 + $0x60] ss:$16 sps:$4 sm:$0xff]   ;;  %v469_v48 = vld [vmem:[%s5436_s29 + $0x28] sm:$0xff]  ;;  %vm3616_vm1 = vcmask 1042434  }
  0x83   : > { %695 = vmatpush1.bf16.msra.mxu1 %v4334_v10  ;;  %v4352_v22 = vld [vmem:[#allocation7 + $0x40] ss:$16 sps:$4 sm:$0xff]   ;;  %v4359_v23 = vld [vmem:[#allocation9 + $0x44] ss:$16 sps:$4 sm:$0xff]   ;;  %v4385_v49 = vld [vmem:[#allocation7 + $0x6c] ss:$16 sps:$4 sm:$0xff]  }
  0x84   : > { %696 = vmatprep.subr.bf16.mxu1 %v4338_v11  ;;  %1269 = vmatpush1.bf16.msra.mxu0 %v4343_v13  ;;  %v4356_v24 = vld [vmem:[#allocation7 + $0x24] ss:$16 sps:$4 sm:$0xff]   ;;  %v4358_v25 = vld [vmem:[#allocation7 + $0x20] ss:$16 sps:$4 sm:$0xff]   ;;  %v4383_v50 = vld [vmem:[#allocation7 + $0x68] ss:$16 sps:$4 sm:$0xff]  }
  0x85   : > { %1270 = vmatprep.subr.bf16.mxu0 %v4347_v15  ;;  %v4361_v26 = vld [vmem:[#allocation9 + $0x40] ss:$16 sps:$4 sm:$0xff]   ;;  %v4365_v27 = vld [vmem:[#allocation9 + $0x24] ss:$16 sps:$4 sm:$0xff]   ;;  %v4388_v52 = vld [vmem:[#allocation7 + $0x4c] ss:$16 sps:$4 sm:$0xff]  }
  0x86   : > { %v4362_v28 = vld [vmem:[#allocation7 + $0x4] ss:$16 sps:$4 sm:$0xff]   ;;  %v4364_v29 = vld [vmem:[#allocation7] ss:$16 sps:$4 sm:$0xff]   ;;  %v4386_v53 = vld [vmem:[#allocation7 + $0x48] ss:$16 sps:$4 sm:$0xff]  }
  0x87   : > { %697 = vmatpush1.bf16.msra.mxu1 %v4340_v14  ;;  %v5455_v30 = vld [vmem:[#allocation9 + $0x20] ss:$16 sps:$4 sm:$0xff]   ;;  %v5459_v33 = vld [vmem:[#allocation9 + $0x4] ss:$16 sps:$4 sm:$0xff]   ;;  %v471_v55 = vld [vmem:[%s5436_s29 + $0x38] sm:$0xff]  ;;  %vm3618_vm2 = vcmask 1043459  }
  0x88   : > { %698 = vmatprep.subr.bf16.mxu1 %v4344_v16  ;;  %1271 = vmatpush1.bf16.msra.mxu0 %v4349_v17  ;;  %v464_v31 = vld [vmem:[%s5436_s29] sm:$0xff]  ;;  %v466_v40 = vld [vmem:[%s5436_s29 + $0x10] sm:$0xff]  ;;  %v4391_v56 = vld [vmem:[#allocation7 + $0x2c] ss:$16 sps:$4 sm:$0xff]   ;;  %vm3620_vm3 = vcmask 1044484   ;;  %vm3622_vm4 = vcmask 1045509  }
  0x89   : > { %1272 = vmatprep.subr.bf16.mxu0 %v4353_v19  ;;  %v472_v35 = vpack.c.bf16 %v465_v32, %v464_v31  ;;  %v5462_v36 = vld [vmem:[#allocation9] ss:$16 sps:$4 sm:$0xff]   ;;  %v473_v43 = vpack.c.bf16 %v467_v41, %v466_v40  ;;  %v4389_v57 = vld [vmem:[#allocation7 + $0x28] ss:$16 sps:$4 sm:$0xff]   ;;  %v4394_v59 = vld [vmem:[#allocation7 + $0xc] ss:$16 sps:$4 sm:$0xff]  }
  0x8a   : > { %v468_v47 = vld [vmem:[%s5436_s29 + $0x20] sm:$0xff]  ;;  %v470_v54 = vld [vmem:[%s5436_s29 + $0x30] sm:$0xff]  ;;  %v4392_v60 = vld [vmem:[#allocation7 + $0x8] ss:$16 sps:$4 sm:$0xff]   ;;  %vm3624_vm5 = vcmask 1046534   ;;  %vm3626_vm6 = vcmask 1047559  }
  0x8b   : > { %699 = vmatpush1.bf16.msra.mxu1 %v4346_v18  ;;  %v474_v51 = vpack.c.bf16 %v469_v48, %v468_v47  ;;  %v475_v58 = vpack.c.bf16 %v471_v55, %v470_v54  ;;  %v5476_v61 = vld [vmem:[#allocation9 + $0xec] ss:$16 sps:$4 sm:$0xff]   ;;  %v5479_v62 = vld [vmem:[#allocation9 + $0xe8] ss:$16 sps:$4 sm:$0xff]   ;;  %v5530_v15 = vld [vmem:[#allocation10 + $0xe4] ss:$16 sps:$4 sm:$0xff]  }
  0x8c   : > { %700 = vmatprep.subr.bf16.mxu1 %v4350_v20  ;;  %1273 = vmatpush1.bf16.msra.mxu0 %v4355_v21  ;;  %7392 = vst [vmem:[#allocation18_spill] sm:$0xff] %v5476_v61  ;;  %v5481_v63 = vld [vmem:[#allocation9 + $0xcc] ss:$16 sps:$4 sm:$0xff]   ;;  %v5484_v1 = vld [vmem:[#allocation9 + $0xc8] ss:$16 sps:$4 sm:$0xff]   ;;  %vm3667_vm7 = vcmask 64512  }
  0x8d   : > { %1274 = vmatprep.subr.bf16.mxu0 %v4359_v23  ;;  %v5486_v2 = vld [vmem:[#allocation9 + $0xac] ss:$16 sps:$4 sm:$0xff]   ;;  %v5491_v3 = vld [vmem:[#allocation9 + $0xa8] ss:$16 sps:$4 sm:$0xff]   ;;  %v5534_v17 = vld [vmem:[#allocation10 + $0xe0] ss:$16 sps:$4 sm:$0xff]  }
  0x8e   : > { %v5495_v4 = vld [vmem:[#allocation9 + $0x8c] ss:$16 sps:$4 sm:$0xff]   ;;  %v5498_v6 = vld [vmem:[#allocation9 + $0x88] ss:$16 sps:$4 sm:$0xff]   ;;  %v5542_v19 = vld [vmem:[#allocation10 + $0xc4] ss:$16 sps:$4 sm:$0xff]  }
  0x8f   : > { %701 = vmatpush1.bf16.msra.mxu1 %v4352_v22  ;;  %v5502_v7 = vld [vmem:[#allocation9 + $0x6c] ss:$16 sps:$4 sm:$0xff]   ;;  %v5505_v8 = vld [vmem:[#allocation9 + $0x68] ss:$16 sps:$4 sm:$0xff]   ;;  %v5546_v21 = vld [vmem:[#allocation10 + $0xc0] ss:$16 sps:$4 sm:$0xff]  }
  0x90   : > { %702 = vmatprep.subr.bf16.mxu1 %v4356_v24  ;;  %1275 = vmatpush1.bf16.msra.mxu0 %v4361_v26  ;;  %v5508_v9 = vld [vmem:[#allocation9 + $0x4c] ss:$16 sps:$4 sm:$0xff]   ;;  %v5511_v10 = vld [vmem:[#allocation9 + $0x48] ss:$16 sps:$4 sm:$0xff]   ;;  %v5554_v23 = vld [vmem:[#allocation10 + $0xa4] ss:$16 sps:$4 sm:$0xff]  }
  0x91   : > { %1276 = vmatprep.subr.bf16.mxu0 %v4365_v27  ;;  %v5515_v11 = vld [vmem:[#allocation9 + $0x2c] ss:$16 sps:$4 sm:$0xff]   ;;  %v5518_v12 = vld [vmem:[#allocation9 + $0x28] ss:$16 sps:$4 sm:$0xff]   ;;  %v5566_v27 = vld [vmem:[#allocation10 + $0x84] ss:$16 sps:$4 sm:$0xff]  }
  0x92   : > { %v5521_v13 = vld [vmem:[#allocation9 + $0xc] ss:$16 sps:$4 sm:$0xff]   ;;  %v5524_v14 = vld [vmem:[#allocation9 + $0x8] ss:$16 sps:$4 sm:$0xff]   ;;  %v5578_v32 = vld [vmem:[#allocation10 + $0x64] ss:$16 sps:$4 sm:$0xff]  }
  0x93   : > { %703 = vmatpush1.bf16.msra.mxu1 %v4358_v25  ;;  %v5532_v16 = vld [vmem:[#allocation10 + $0xec] ss:$16 sps:$4 sm:$0xff]   ;;  %v5536_v18 = vld [vmem:[#allocation10 + $0xe8] ss:$16 sps:$4 sm:$0xff]   ;;  %v5558_v25 = vld [vmem:[#allocation10 + $0xa0] ss:$16 sps:$4 sm:$0xff]  }
  0x94   : > { %704 = vmatprep.subr.bf16.mxu1 %v4362_v28  ;;  %1277 = vmatpush1.bf16.msra.mxu0 %v5455_v30  ;;  %v5544_v20 = vld [vmem:[#allocation10 + $0xcc] ss:$16 sps:$4 sm:$0xff]   ;;  %v5548_v22 = vld [vmem:[#allocation10 + $0xc8] ss:$16 sps:$4 sm:$0xff]   ;;  %7393 = vst [vmem:[#allocation19_spill] sm:$0xff] %v5578_v32  ;;  %p455_p12 = scmp.lt.s32.totalorder %s5303_s17, 1 }
  0x95   : > { %1278 = vmatprep.subr.bf16.mxu0 %v5459_v33  ;;  %v5556_v24 = vld [vmem:[#allocation10 + $0xac] ss:$16 sps:$4 sm:$0xff]   ;;  %v5560_v26 = vld [vmem:[#allocation10 + $0xa8] ss:$16 sps:$4 sm:$0xff]   ;;  %v5594_v40 = vld [vmem:[#allocation10 + $0x40] ss:$16 sps:$4 sm:$0xff]  }
  0x96   : > { %v5568_v28 = vld [vmem:[#allocation10 + $0x8c] ss:$16 sps:$4 sm:$0xff]   ;;  %v5572_v31 = vld [vmem:[#allocation10 + $0x88] ss:$16 sps:$4 sm:$0xff]   ;;  %7399 = vst [vmem:[#allocation25_spill] sm:$0xff] %v5594_v40  ;;  %s456_s24 = scalar_select %p455_p12, %s5303_s17, 1 }
  0x97   : > { %705 = vmatpush1.bf16.msra.mxu1 %v4364_v29  ;;  %v5570_v29 = vld [vmem:[#allocation10 + $0x80] ss:$16 sps:$4 sm:$0xff]   ;;  %v5596_v41 = vld [vmem:[#allocation10 + $0x48] ss:$16 sps:$4 sm:$0xff]   ;;  %v5616_v47 = vld [vmem:[#allocation10 + $0xc] ss:$16 sps:$4 sm:$0xff]  }
  0x98   : > { %763 = vmatprep.subr.bf16.mxu1 %v4370_v34  ;;  %1279 = vmatpush1.bf16.msra.mxu0 %v5462_v36  ;;  %v5580_v34 = vld [vmem:[#allocation10 + $0x6c] ss:$16 sps:$4 sm:$0xff]   ;;  %7400 = vst [vmem:[#allocation26_spill] sm:$0xff] %v5596_v41  ;;  %7406 = vst [vmem:[#allocation32_spill] sm:$0xff] %v5616_v47  ;;  %v5618_v48 = vld [vmem:[#allocation10] ss:$16 sps:$4 sm:$0xff]  }
  0x99   : > { %1696 = vmatprep.subr.bf16.mxu0 %v5530_v15  ;;  %7394 = vst [vmem:[#allocation20_spill] sm:$0xff] %v5580_v34  ;;  %7407 = vst [vmem:[#allocation33_spill] sm:$0xff] %v5618_v48  ;;  %v5638_v54 = vld [vmem:[#allocation10 + $0x1c4] ss:$16 sps:$4 sm:$0xff]   ;;  %v5640_v55 = vld [vmem:[#allocation10 + $0x1cc] ss:$16 sps:$4 sm:$0xff]  }
  0x9a   : > { %723 = vmatmul.mubr.bf16.vlgmr.msra.gmra.mxu1 %v472_v35  ;;  %7413 = vst [vmem:[#allocation39_spill] sm:$0xff] %v5638_v54  ;;  %7414 = vst [vmem:[#allocation40_spill] sm:$0xff] %v5640_v55  ;;  %s3967_s18 = sshll.u32 %s456_s24, 3  ;;  %s3966_s1 = sshll.u32 %s5432_s4, 3 }
  0x9b   : > { %764 = vmatpush1.bf16.msra.mxu1 %v4368_v37  ;;  %732 = vmatprep.mubr.bf16.mxu1 %v7087_v0  ;;  %v5584_v37 = vld [vmem:[#allocation10 + $0x68] ss:$16 sps:$4 sm:$0xff]   ;;  %s462_s11 = scalar_lea.vmem %s7081_s10, %s3967_s18  ;;  %s458_s29 = scalar_lea.vmem %s7079_s8, %s3967_s18 }
  0x9c   : > { %765 = vmatprep.subr.bf16.mxu1 %v4376_v38  ;;  %1297 = vmatmul.mubr.bf16.vlgmr.msra.gmra.mxu0 %v7087_v0  ;;  %7396 = vst [vmem:[#allocation22_spill] sm:$0xff] %v5584_v37  ;;  %v5590_v38 = vld [vmem:[#allocation10 + $0x44] ss:$16 sps:$4 sm:$0xff]   ;;  %s4172_s19 = sshll.u32 %s5303_s17, 7  ;;  %s448_s21 = scalar_lea.vmem [#allocation13], %s3966_s1 }
  0x9d   : > { %1697 = vmatpush1.bf16.msra.mxu0 %v5534_v17  ;;  %7397 = vst [vmem:[#allocation23_spill] sm:$0xff] %v5590_v38  ;;  %s3804_s30 = sshll.u32 %s448_s21, 4  ;;  %s3802_s24 = scalar_lea.hbm %s7080_s9, %s4172_s19  ;;  %s3805_s30 = int_to_ptr.vmem [resolvable:$true] %s3804_s30 }
  0x9e   : > { %1698 = vmatprep.subr.bf16.mxu0 %v5542_v19  ;;  %s3787_s18 = scalar_lea.sflag [#allocation6], %s5432_s4  ;;  %s5139_s2 = scalar_lea.vmem %s3805_s30, 128 }
  0x9f   : > { %766 = vmatpush1.bf16.msra.mxu1 %v4374_v39  ;;  %v5592_v39 = vld [vmem:[#allocation10 + $0x4c] ss:$16 sps:$4 sm:$0xff]   ;;  %p5140_p0 = scmp.ne.s32.totalorder %s3805_s30, %s5139_s2  ;;  %p7835_p3 = scmp.ne.s32.totalorder %s7383_s22, 0 }
  0xa0   : > { %767 = vmatprep.subr.bf16.mxu1 %v4379_v42  ;;  %7398 = vst [vmem:[#allocation24_spill] sm:$0xff] %v5592_v39  ;;  %v5602_v42 = vld [vmem:[#allocation10 + $0x24] ss:$16 sps:$4 sm:$0xff]   ;;  %s5226_s25 = smov [#allocation13]  }
  0xa1   : > { %1699 = vmatpush1.bf16.msra.mxu0 %v5546_v21  ;;  %7401 = vst [vmem:[#allocation27_spill] sm:$0xff] %v5602_v42  ;;  %p5141_p10 = pnand %p5140_p0, %p7835_p3  ;;  %s5143_s17 = sshll.u32 %s5226_s25, 4  ;;  %s5144_s17 = int_to_ptr.vmem [resolvable:$false] %s5143_s17 }
  0xa2   : > { %733 = vmatmul.mubr.bf16.gmra.mxu1 %v473_v43  ;;  %1700 = vmatprep.subr.bf16.mxu0 %v5554_v23  ;;  %p5146_p9 = scmp.lt.s32.totalorder %s3805_s30, %s5144_s17 }
  0xa3   : > { %768 = vmatpush1.bf16.msra.mxu1 %v4377_v44  ;;  %742 = vmatprep.mubr.bf16.mxu1 %v7087_v0  ;;  %v5606_v44 = vld [vmem:[#allocation10 + $0x20] ss:$16 sps:$4 sm:$0xff]   ;;  %p5142_p7 = pneg %p5141_p10 }
  0xa4   : > { %769 = vmatprep.subr.bf16.mxu1 %v4382_v45  ;;  %7403 = vst [vmem:[#allocation29_spill] sm:$0xff] %v5606_v44  ;;  %v5608_v45 = vld [vmem:[#allocation10 + $0x28] ss:$16 sps:$4 sm:$0xff]  }
  0xa5   : > { %1701 = vmatpush1.bf16.msra.mxu0 %v5558_v25  ;;  %7404 = vst [vmem:[#allocation30_spill] sm:$0xff] %v5608_v45 }
  0xa6   : > { %1702 = vmatprep.subr.bf16.mxu0 %v5566_v27 }
  0xa7   : > { %770 = vmatpush1.bf16.msra.mxu1 %v4380_v46  ;;  %v5614_v46 = vld [vmem:[#allocation10 + $0x4] ss:$16 sps:$4 sm:$0xff]  }
  0xa8   : > { %771 = vmatprep.subr.bf16.mxu1 %v4385_v49  ;;  %7405 = vst [vmem:[#allocation31_spill] sm:$0xff] %v5614_v46  ;;  %v5620_v49 = vld [vmem:[#allocation10 + $0x8] ss:$16 sps:$4 sm:$0xff]  }
  0xa9   : > { %1703 = vmatpush1.bf16.msra.mxu0 %v5570_v29  ;;  %7408 = vst [vmem:[#allocation34_spill] sm:$0xff] %v5620_v49 }
  0xaa   : > { %743 = vmatmul.mubr.bf16.gmra.mxu1 %v474_v51  ;;  %1704 = vmatprep.subr.bf16.mxu0 %v5578_v32 }
  0xab   : > { %772 = vmatpush1.bf16.msra.mxu1 %v4383_v50  ;;  %752 = vmatprep.mubr.bf16.mxu1 %v7087_v0  ;;  %v5626_v50 = vld [vmem:[#allocation10 + $0x1e4] ss:$16 sps:$4 sm:$0xff]  }
  0xac   : > { %773 = vmatprep.subr.bf16.mxu1 %v4388_v52  ;;  %7409 = vst [vmem:[#allocation35_spill] sm:$0xff] %v5626_v50  ;;  %v5630_v52 = vld [vmem:[#allocation10 + $0x1e0] ss:$16 sps:$4 sm:$0xff]  }
  0xad   : > { %7411 = vst [vmem:[#allocation37_spill] sm:$0xff] %v5630_v52 }
  0xaf   : > { %774 = vmatpush1.bf16.msra.mxu1 %v4386_v53  ;;  %v5632_v53 = vld [vmem:[#allocation10 + $0x1e8] ss:$16 sps:$4 sm:$0xff]  }
  0xb0   : > { %775 = vmatprep.subr.bf16.mxu1 %v4391_v56  ;;  %7412 = vst [vmem:[#allocation38_spill] sm:$0xff] %v5632_v53  ;;  %v5642_v56 = vld [vmem:[#allocation10 + $0x1c0] ss:$16 sps:$4 sm:$0xff]  }
  0xb1   : > { %7415 = vst [vmem:[#allocation41_spill] sm:$0xff] %v5642_v56 }
  0xb2   : > { %753 = vmatmul.mubr.bf16.gmra.mxu1 %v475_v58 }
  0xb3   : > { %776 = vmatpush1.bf16.msra.mxu1 %v4389_v57  ;;  %795 = vmatprep.mubr.bf16.mxu1 %v7087_v0  ;;  %v5644_v57 = vld [vmem:[#allocation10 + $0x1c8] ss:$16 sps:$4 sm:$0xff]  }
  0xb4   : > { %777 = vmatprep.subr.bf16.mxu1 %v4394_v59  ;;  %7416 = vst [vmem:[#allocation42_spill] sm:$0xff] %v5644_v57  ;;  %v5652_v59 = vld [vmem:[#allocation10 + $0x1ac] ss:$16 sps:$4 sm:$0xff]  }
  0xb5   : > { %7418 = vst [vmem:[#allocation44_spill] sm:$0xff] %v5652_v59 }
  0xb7   : > { %778 = vmatpush1.bf16.msra.mxu1 %v4392_v60  ;;  %v5654_v60 = vld [vmem:[#allocation10 + $0x1a0] ss:$16 sps:$4 sm:$0xff]  }
  0xb8   : > { %1305 = vmatprep.subr.bf16.mxu1 %v5476_v61  ;;  %7419 = vst [vmem:[#allocation45_spill] sm:$0xff] %v5654_v60 }
  0xba   : > { %796 = vmatmul.mubr.bf16.vlgmr.msra.gmra.mxu1 %v472_v35  ;;  %v5582_v35 = vld [vmem:[#allocation10 + $0x60] ss:$16 sps:$4 sm:$0xff]  }
  0xbb   : > { %1306 = vmatpush1.bf16.msra.mxu1 %v5479_v62  ;;  %805 = vmatprep.mubr.bf16.mxu1 %v7087_v0  ;;  %7395 = vst [vmem:[#allocation21_spill] sm:$0xff] %v5582_v35 }
  0xbc   : > { %1307 = vmatprep.subr.bf16.mxu1 %v5481_v63  ;;  %1705 = vmatpush1.bf16.msra.mxu0 %v5582_v35 }
  0xbd   : > { %1706 = vmatprep.subr.bf16.mxu0 %v5590_v38 }
  0xbf   : > { %1308 = vmatpush1.bf16.msra.mxu1 %v5484_v1 }
  0xc0   : > { %1309 = vmatprep.subr.bf16.mxu1 %v5486_v2  ;;  %1707 = vmatpush1.bf16.msra.mxu0 %v5594_v40 }
  0xc1   : > { %1708 = vmatprep.subr.bf16.mxu0 %v5602_v42 }
  0xc2   : > { %806 = vmatmul.mubr.bf16.gmra.mxu1 %v473_v43  ;;  %v5604_v43 = vld [vmem:[#allocation10 + $0x2c] ss:$16 sps:$4 sm:$0xff]  }
  0xc3   : > { %1310 = vmatpush1.bf16.msra.mxu1 %v5491_v3  ;;  %815 = vmatprep.mubr.bf16.mxu1 %v7087_v0  ;;  %7402 = vst [vmem:[#allocation28_spill] sm:$0xff] %v5604_v43 }
  0xc4   : > { %1311 = vmatprep.subr.bf16.mxu1 %v5495_v4  ;;  %1709 = vmatpush1.bf16.msra.mxu0 %v5606_v44 }
  0xc5   : > { %1710 = vmatprep.subr.bf16.mxu0 %v5614_v46 }
  0xc7   : > { %1312 = vmatpush1.bf16.msra.mxu1 %v5498_v6 }
  0xc8   : > { %1313 = vmatprep.subr.bf16.mxu1 %v5502_v7  ;;  %1711 = vmatpush1.bf16.msra.mxu0 %v5618_v48 }
  0xc9   : > { %1712 = vmatprep.subr.bf16.mxu0 %v5626_v50 }
  0xca   : > { %816 = vmatmul.mubr.bf16.gmra.mxu1 %v474_v51  ;;  %v5628_v51 = vld [vmem:[#allocation10 + $0x1ec] ss:$16 sps:$4 sm:$0xff]  }
  0xcb   : > { %1314 = vmatpush1.bf16.msra.mxu1 %v5505_v8  ;;  %825 = vmatprep.mubr.bf16.mxu1 %v7087_v0  ;;  %7410 = vst [vmem:[#allocation36_spill] sm:$0xff] %v5628_v51 }
  0xcc   : > { %1315 = vmatprep.subr.bf16.mxu1 %v5508_v9  ;;  %1713 = vmatpush2.bf16.msra.mxu0 %v5630_v52  ;;  %v5684_v52 = vld [vmem:[#allocation10 + $0x14c] ss:$16 sps:$4 sm:$0xff]  }
  0xcd   : > { %1714 = vmatprep.subr.bf16.mxu0 %v5638_v54  ;;  %v5668_v54 = vld [vmem:[#allocation10 + $0x188] ss:$16 sps:$4 sm:$0xff]   ;;  %7430 = vst [vmem:[#allocation56_spill] sm:$0xff] %v5684_v52 }
  0xce   : > { %7424 = vst [vmem:[#allocation50_spill] sm:$0xff] %v5668_v54 }
  0xcf   : > { %1316 = vmatpush1.bf16.msra.mxu1 %v5511_v10 }
  0xd0   : > { %1317 = vmatprep.subr.bf16.mxu1 %v5515_v11  ;;  %1715 = vmatpush2.bf16.msra.mxu0 %v5642_v56  ;;  %v5664_v56 = vld [vmem:[#allocation10 + $0x18c] ss:$16 sps:$4 sm:$0xff]  }
  0xd1   : > { %7422 = vst [vmem:[#allocation48_spill] sm:$0xff] %v5664_v56 }
  0xd2   : > { %826 = vmatmul.mubr.bf16.gmra.mxu1 %v475_v58  ;;  %v5650_v58 = vld [vmem:[#allocation10 + $0x1a4] ss:$16 sps:$4 sm:$0xff]  }
  0xd3   : > { %1318 = vmatpush1.bf16.msra.mxu1 %v5518_v12  ;;  %1337 = vmatprep.mubr.bf16.mxu1 %v7087_v0  ;;  %7417 = vst [vmem:[#allocation43_spill] sm:$0xff] %v5650_v58 }
  0xd4   : > { %1319 = vmatprep.subr.bf16.mxu1 %v5521_v13  ;;  %1716 = vmatprep.subr.bf16.mxu0 %v5650_v58  ;;  %v5680_v58 = vld [vmem:[#allocation10 + $0x168] ss:$16 sps:$4 sm:$0xff]  }
  0xd5   : > { %1717 = vmatpush2.bf16.msra.mxu0 %v5654_v60  ;;  %v5676_v60 = vld [vmem:[#allocation10 + $0x16c] ss:$16 sps:$4 sm:$0xff]   ;;  %7428 = vst [vmem:[#allocation54_spill] sm:$0xff] %v5680_v58 }
  0xd6   : > { %7426 = vst [vmem:[#allocation52_spill] sm:$0xff] %v5676_v60 }
  0xd7   : > { %1320 = vmatpush1.bf16.msra.mxu1 %v5524_v14 }
  0xd8   : > { %1737 = vmatprep.subr.bf16.mxu1 %v5532_v16 }
  0xda   : > { %1338 = vmatmul.mubr.bf16.vlgmr.msra.gmra.mxu1 %v7087_v0  ;;  %v5656_v0 = vld [vmem:[#allocation10 + $0x1a8] ss:$16 sps:$4 sm:$0xff]  }
  0xdb   : > { %1738 = vmatpush1.bf16.msra.mxu1 %v5536_v18  ;;  %7420 = vst [vmem:[#allocation46_spill] sm:$0xff] %v5656_v0 }
  0xdc   : > { %1739 = vmatprep.subr.bf16.mxu1 %v5544_v20 }
  0xdf   : > { %1740 = vmatpush1.bf16.msra.mxu1 %v5548_v22 }
  0xe0   : > { %1741 = vmatprep.subr.bf16.mxu1 %v5556_v24 }
  0xe3   : > { %1742 = vmatpush1.bf16.msra.mxu1 %v5560_v26 }
  0xe4   : > { %1743 = vmatprep.subr.bf16.mxu1 %v5568_v28 }
  0xe7   : > { %1744 = vmatpush1.bf16.msra.mxu1 %v5572_v31 }
  0xe8   : > { %1745 = vmatprep.subr.bf16.mxu1 %v5580_v34 }
  0xeb   : > { %1746 = vmatpush1.bf16.msra.mxu1 %v5584_v37 }
  0xec   : > { %1747 = vmatprep.subr.bf16.mxu1 %v5592_v39 }
  0xef   : > { %1748 = vmatpush1.bf16.msra.mxu1 %v5596_v41 }
  0xf0   : > { %1749 = vmatprep.subr.bf16.mxu1 %v5604_v43 }
  0xf3   : > { %1750 = vmatpush1.bf16.msra.mxu1 %v5608_v45 }
  0xf4   : > { %1751 = vmatprep.subr.bf16.mxu1 %v5616_v47 }
  0xf7   : > { %1752 = vmatpush1.bf16.msra.mxu1 %v5620_v49 }
  0xf8   : > { %1753 = vmatprep.subr.bf16.mxu1 %v5628_v51  ;;  %v5225_v51 = vmov 0.0|0.0  }
  0xf9   : > { %1728 = vmatprep.mubr.bf16.mxu0 %v5225_v51  ;;  %1769 = vmatprep.mubr.bf16.mxu1 %v5225_v51  ;;  %v5714_v51 = vld [vmem:[#allocation10 + $0x100] ss:$16 sps:$4 sm:$0xff]  }
  0xfa   : > { %7439 = vst [vmem:[#allocation65_spill] sm:$0xff] %v5714_v51 }
  0xfb   : > { %1754 = vmatpush2.bf16.msra.mxu1 %v5632_v53  ;;  %v5682_v53 = vld [vmem:[#allocation10 + $0x144] ss:$16 sps:$4 sm:$0xff]  }
  0xfc   : > { %1755 = vmatprep.subr.bf16.mxu1 %v5640_v55  ;;  %v5662_v55 = vld [vmem:[#allocation10 + $0x184] ss:$16 sps:$4 sm:$0xff]   ;;  %7429 = vst [vmem:[#allocation55_spill] sm:$0xff] %v5682_v53 }
  0xfd   : > { %7421 = vst [vmem:[#allocation47_spill] sm:$0xff] %v5662_v55  ;;  %1718 = vmatprep.subr.bf16.mxu0 %v5662_v55  ;;  %v5698_v55 = vld [vmem:[#allocation10 + $0x12c] ss:$16 sps:$4 sm:$0xff]  }
  0xfe   : > { %7434 = vst [vmem:[#allocation60_spill] sm:$0xff] %v5698_v55 }
  0xff   : > { %1756 = vmatpush2.bf16.msra.mxu1 %v5644_v57  ;;  %v5666_v57 = vld [vmem:[#allocation10 + $0x180] ss:$16 sps:$4 sm:$0xff]  }
 0x100   : > { %1757 = vmatprep.subr.bf16.mxu1 %v5652_v59  ;;  %7423 = vst [vmem:[#allocation49_spill] sm:$0xff] %v5666_v57  ;;  %1719 = vmatpush2.bf16.msra.mxu0 %v5666_v57  ;;  %v5674_v59 = vld [vmem:[#allocation10 + $0x164] ss:$16 sps:$4 sm:$0xff]   ;;  %v5692_v57 = vld [vmem:[#allocation10 + $0x148] ss:$16 sps:$4 sm:$0xff]  }
 0x101   : > { %7425 = vst [vmem:[#allocation51_spill] sm:$0xff] %v5674_v59  ;;  %1720 = vmatprep.subr.bf16.mxu0 %v5674_v59  ;;  %7432 = vst [vmem:[#allocation58_spill] sm:$0xff] %v5692_v57 }
 0x103   : > { %1758 = vmatpush2.bf16.msra.mxu1 %v5656_v0  ;;  %v5678_v0 = vld [vmem:[#allocation10 + $0x160] ss:$16 sps:$4 sm:$0xff]  }
 0x104   : > { %1759 = vmatprep.subr.bf16.mxu1 %v5664_v56  ;;  %7427 = vst [vmem:[#allocation53_spill] sm:$0xff] %v5678_v0  ;;  %1721 = vmatpush2.bf16.msra.mxu0 %v5678_v0  ;;  %v5696_v56 = vld [vmem:[#allocation10 + $0x124] ss:$16 sps:$4 sm:$0xff]   ;;  %v5704_v0 = vld [vmem:[#allocation10 + $0x128] ss:$16 sps:$4 sm:$0xff]  }
 0x105   : > { %1722 = vmatprep.subr.bf16.mxu0 %v5682_v53  ;;  %7433 = vst [vmem:[#allocation59_spill] sm:$0xff] %v5696_v56  ;;  %7436 = vst [vmem:[#allocation62_spill] sm:$0xff] %v5704_v0  ;;  %v5710_v53 = vld [vmem:[#allocation10 + $0x10c] ss:$16 sps:$4 sm:$0xff]  }
 0x106   : > { %7438 = vst [vmem:[#allocation64_spill] sm:$0xff] %v5710_v53 }
 0x107   : > { %1760 = vmatpush2.bf16.msra.mxu1 %v5668_v54  ;;  %v5690_v54 = vld [vmem:[#allocation10 + $0x140] ss:$16 sps:$4 sm:$0xff]  }
 0x108   : > { %1761 = vmatprep.subr.bf16.mxu1 %v5676_v60  ;;  %7431 = vst [vmem:[#allocation57_spill] sm:$0xff] %v5690_v54  ;;  %1723 = vmatpush2.bf16.msra.mxu0 %v5690_v54  ;;  %v5716_v54 = vld [vmem:[#allocation10 + $0x108] ss:$16 sps:$4 sm:$0xff]  }
 0x109   : > { %1724 = vmatprep.subr.bf16.mxu0 %v5696_v56  ;;  %7440 = vst [vmem:[#allocation66_spill] sm:$0xff] %v5716_v54 }
 0x10b   : > { %1762 = vmatpush2.bf16.msra.mxu1 %v5680_v58  ;;  %v5702_v58 = vld [vmem:[#allocation10 + $0x120] ss:$16 sps:$4 sm:$0xff]  }
 0x10c   : > { %1763 = vmatprep.subr.bf16.mxu1 %v5684_v52  ;;  %7435 = vst [vmem:[#allocation61_spill] sm:$0xff] %v5702_v58  ;;  %v5708_v52 = vld [vmem:[#allocation10 + $0x104] ss:$16 sps:$4 sm:$0xff]   ;;  %1725 = vmatpush2.bf16.msra.mxu0 %v5702_v58 }
 0x10d   : > { %7437 = vst [vmem:[#allocation63_spill] sm:$0xff] %v5708_v52  ;;  %1726 = vmatprep.subr.bf16.mxu0 %v5708_v52  ;;  %v508_v52 = vld [vmem:[%s7074_s3] sm:$0xf] }
 0x10f   : > { %1764 = vmatpush2.bf16.msra.mxu1 %v5692_v57 }
 0x110   : > { %1765 = vmatprep.subr.bf16.mxu1 %v5698_v55  ;;  %1727 = vmatpush2.bf16.msra.mxu0 %v5714_v51  ;;  %v7148_v55 = vlaneseq }
 0x111   : > { %1810 = vmatprep.subr.bf16.mxu0 %v5452_v5 }
 0x112   : > { %v5725_v58 = vshrl.u32 %v7148_v55, 7 }
 0x113   : > { %1766 = vmatpush2.bf16.msra.mxu1 %v5704_v0 }
 0x114   : > { %1767 = vmatprep.subr.bf16.mxu1 %v5710_v53  ;;  %7441 = vst [vmem:[#allocation67_spill] sm:$0xff] %v5725_v58  ;;  %v5728_v0 = vsub.s32 0, %v5725_v58  ;;  %v5734_v51 = vsub.s32 1, %v5725_v58 }
 0x116   : > { %7442 = vst [vmem:[#allocation68_spill] sm:$0xff] %v5728_v0  ;;  %7443 = vst [vmem:[#allocation69_spill] sm:$0xff] %v5734_v51  ;;  %v513_v5 = vrot.slane %v508_v52, %v5728_v0  ;;  %v517_v57 = vrot.slane %v508_v52, %v5734_v51 }
 0x117   : > { %1768 = vmatpush2.bf16.msra.mxu1 %v5716_v54 }
 0x118   : > { %1851 = vmatprep.subr.bf16.mxu1 %v5476_v61 }
 0x15a   : > { %v724_v53 = vpop.f32.mrf.mxu1 }
 0x15c   : > { %v726_v54 = vpop.f32.mrf.mxu1  ;;  %v1298_v56 = vpop.f32.mrf.mxu0 }
 0x15e   : > { %v728_v61 = vpop.f32.mrf.mxu1  ;;  %v1300_v60 = vpop.f32.mrf.mxu0 }
 0x15f   : > { %v729_v55 = vadd.f32 %v728_v61, %v513_v5 }
 0x160   : > { %v730_v59 = vpop.f32.mrf.mxu1  ;;  %v1302_v49 = vpop.f32.mrf.mxu0 }
 0x161   : > { %v731_v50 = vadd.f32 %v730_v59, %v517_v57 }
 0x162   : > { %v734_v48 = vpop.f32.mrf.mxu1  ;;  %v1303_v45 = vpop.f32.mrf.mxu0 }
 0x163   : > { %v5738_v47 = vpack.c.bf16 %v731_v50, %v729_v55  ;;  %v735_v46 = vadd.f32 %v734_v48, %v513_v5 }
 0x164   : > { %v736_v44 = vpop.f32.mrf.mxu1 }
 0x165   : > { %7444 = vst [vmem:[#allocation70_spill] sm:$0xff] %v5738_v47  ;;  %v737_v43 = vadd.f32 %v736_v44, %v517_v57  ;;  %v727_v44 = vadd.f32 %v726_v54, %v517_v57  ;;  %v5756_v54 = vsub.s32 3, %v5725_v58 }
 0x166   : > { %v738_v42 = vpop.f32.mrf.mxu1 }
 0x167   : > { %v5740_v41 = vpack.c.bf16 %v737_v43, %v735_v46  ;;  %v739_v0 = vadd.f32 %v738_v42, %v513_v5  ;;  %v725_v46 = vadd.f32 %v724_v53, %v513_v5  ;;  %7452 = vst [vmem:[#allocation78_spill] sm:$0xff] %v5756_v54 }
 0x168   : > { %v740_v40 = vpop.f32.mrf.mxu1 }
 0x169   : > { %7445 = vst [vmem:[#allocation71_spill] sm:$0xff] %v5740_v41  ;;  %v741_v39 = vadd.f32 %v740_v40, %v517_v57 }
 0x16a   : > { %v744_v38 = vpop.f32.mrf.mxu1 }
 0x16b   : > { %v5742_v51 = vpack.c.bf16 %v741_v39, %v739_v0  ;;  %v745_v61 = vadd.f32 %v744_v38, %v513_v5  ;;  %v4175_v0 = vpack.c.bf16 %v727_v44, %v725_v46 }
 0x16c   : > { %v746_v37 = vpop.f32.mrf.mxu1 }
 0x16d   : > { %7446 = vst [vmem:[#allocation72_spill] sm:$0xff] %v5742_v51  ;;  %v747_v59 = vadd.f32 %v746_v37, %v517_v57 }
 0x16e   : > { %v748_v49 = vpop.f32.mrf.mxu1 }
 0x16f   : > { %v5744_v35 = vpack.c.bf16 %v747_v59, %v745_v61  ;;  %v749_v50 = vadd.f32 %v748_v49, %v513_v5  ;;  %v5751_v61 = vsub.s32 2, %v5725_v58  ;;  %v1101_v49 = vunpack.c.h.bf16 %v4175_v0 }
 0x170   : > { %v750_v48 = vpop.f32.mrf.mxu1 }
 0x171   : > { %7447 = vst [vmem:[#allocation73_spill] sm:$0xff] %v5744_v35  ;;  %v751_v45 = vadd.f32 %v750_v48, %v517_v57  ;;  %7450 = vst [vmem:[#allocation76_spill] sm:$0xff] %v5751_v61  ;;  %v1347_v44 = vadd.f32 %v1300_v60, %v1101_v49 }
 0x172   : > { %v754_v55 = vpop.f32.mrf.mxu1 }
 0x173   : > { %v5746_v47 = vpack.c.bf16 %v751_v45, %v749_v50  ;;  %v755_v43 = vadd.f32 %v754_v55, %v513_v5  ;;  %v1100_v50 = vunpack.c.l.bf16 %v4175_v0  ;;  %v521_v45 = vrot.slane %v508_v52, %v5751_v61 }
 0x174   : > { %v756_v42 = vpop.f32.mrf.mxu1 }
 0x175   : > { %7448 = vst [vmem:[#allocation74_spill] sm:$0xff] %v5746_v47  ;;  %v757_v40 = vadd.f32 %v756_v42, %v517_v57 }
 0x176   : > { %v758_v41 = vpop.f32.mrf.mxu1 }
 0x177   : > { %v5748_v39 = vpack.c.bf16 %v757_v40, %v755_v43  ;;  %v759_v38 = vadd.f32 %v758_v41, %v513_v5  ;;  %v525_v41 = vrot.slane %v508_v52, %v5756_v54  ;;  %v4050_v40 = vmul.f32 -1.442695, %v1347_v44 }
 0x178   : > { %v760_v37 = vpop.f32.mrf.mxu1 }
 0x179   : > { %7449 = vst [vmem:[#allocation75_spill] sm:$0xff] %v5748_v39  ;;  %v761_v51 = vadd.f32 %v760_v37, %v517_v57  ;;  %v1346_v57 = vadd.f32 %v1298_v56, %v1100_v50  ;;  %4523 = vpow2.f32 %v4050_v40 }
 0x17a   : > { %v797_v59 = vpop.f32.mrf.mxu1 }
 0x17b   : > { %v5753_v48 = vpack.c.bf16 %v761_v51, %v759_v38  ;;  %v4049_v38 = vmul.f32 -1.442695, %v1346_v57 }
 0x17c   : > { %v799_v53 = vpop.f32.mrf.mxu1 }
 0x17d   : > { %7451 = vst [vmem:[#allocation77_spill] sm:$0xff] %v5753_v48  ;;  %4525 = vpow2.f32 %v4049_v38 }
 0x17e   : > { %v801_v55 = vpop.f32.mrf.mxu1 }
 0x17f   : > { %v802_v5 = vadd.f32 %v801_v55, %v521_v45 }
 0x180   : > { %v803_v43 = vpop.f32.mrf.mxu1 }
 0x181   : > { %v804_v42 = vadd.f32 %v803_v43, %v525_v41 }
 0x182   : > { %v807_v46 = vpop.f32.mrf.mxu1 }
 0x183   : > { %v5760_v37 = vpack.c.bf16 %v804_v42, %v802_v5  ;;  %v808_v51 = vadd.f32 %v807_v46, %v521_v45 }
 0x184   : > { %v809_v58 = vpop.f32.mrf.mxu1 }
 0x185   : > { %v810_v48 = vadd.f32 %v809_v58, %v525_v41  ;;  %v800_v58 = vadd.f32 %v799_v53, %v525_v41 }
 0x186   : > { %v811_v0 = vpop.f32.mrf.mxu1 }
 0x187   : > { %v5762_v39 = vpack.c.bf16 %v810_v48, %v808_v51  ;;  %v812_v47 = vadd.f32 %v811_v0, %v521_v45  ;;  %v798_v48 = vadd.f32 %v797_v59, %v521_v45  ;;  %v4524_v0 = vpop.eup %4523 }
 0x188   : > { %v813_v60 = vpop.f32.mrf.mxu1 }
 0x189   : > { %7453 = vst [vmem:[#allocation79_spill] sm:$0xff] %v5762_v39  ;;  %v814_v52 = vadd.f32 %v813_v60, %v525_v41  ;;  %v7478_v39 = vld [vmem:[#allocation39_spill] sm:$0xff] }
 0x18a   : > { %v817_v49 = vpop.f32.mrf.mxu1  ;;  %v4526_v35 = vpop.eup %4525 }
 0x18b   : > { %v5764_v56 = vpack.c.bf16 %v814_v52, %v812_v47  ;;  %v818_v50 = vadd.f32 %v817_v49, %v521_v45  ;;  %v4176_v47 = vpack.c.bf16 %v800_v58, %v798_v48 }
 0x18c   : > { %v819_v55 = vpop.f32.mrf.mxu1 }
 0x18d   : > { %7454 = vst [vmem:[#allocation80_spill] sm:$0xff] %v5764_v56  ;;  %v820_v44 = vadd.f32 %v819_v55, %v525_v41  ;;  %v1359_v56 = vadd.f32 1.0, %v4524_v0  ;;  %v1102_v53 = vunpack.c.l.bf16 %v4176_v47 }
 0x18e   : > { %v821_v5 = vpop.f32.mrf.mxu1 }
 0x18f   : > { %v5766_v43 = vpack.c.bf16 %v820_v44, %v818_v50  ;;  %v822_v57 = vadd.f32 %v821_v5, %v521_v45  ;;  %v1353_v44 = vadd.f32 1.0, %v4526_v35  ;;  %4527 = vrcp.f32 %v1359_v56 }
 0x190   : > { %v823_v42 = vpop.f32.mrf.mxu1 }
 0x191   : > { %7455 = vst [vmem:[#allocation81_spill] sm:$0xff] %v5766_v43  ;;  %v824_v46 = vadd.f32 %v823_v42, %v525_v41  ;;  %4529 = vrcp.f32 %v1353_v44 }
 0x192   : > { %v827_v40 = vpop.f32.mrf.mxu1 }
 0x193   : > { %v5768_v51 = vpack.c.bf16 %v824_v46, %v822_v57  ;;  %v828_v38 = vadd.f32 %v827_v40, %v521_v45  ;;  %v1103_v46 = vunpack.c.h.bf16 %v4176_v47 }
 0x194   : > { %v829_v60 = vpop.f32.mrf.mxu1 }
 0x195   : > { %7456 = vst [vmem:[#allocation82_spill] sm:$0xff] %v5768_v51  ;;  %v830_v52 = vadd.f32 %v829_v60, %v525_v41  ;;  %v7477_v51 = vld [vmem:[#allocation38_spill] sm:$0xff] }
 0x196   : > { %v831_v49 = vpop.f32.mrf.mxu1 }
 0x197   : > { %v5770_v55 = vpack.c.bf16 %v830_v52, %v828_v38  ;;  %v832_v50 = vadd.f32 %v831_v49, %v521_v45 }
 0x198   : > { %v833_v5 = vpop.f32.mrf.mxu1 }
 0x199   : > { %7457 = vst [vmem:[#allocation83_spill] sm:$0xff] %v5770_v55  ;;  %v834_v43 = vadd.f32 %v833_v5, %v525_v41  ;;  %v7476_v55 = vld [vmem:[#allocation37_spill] sm:$0xff] }
 0x19a   : > { %v1339_v42 = vpop.f32.mrf.mxu1 }
 0x19b   : > { %v5772_v59 = vpack.c.bf16 %v834_v43, %v832_v50  ;;  %v1348_v57 = vadd.f32 %v1339_v42, %v1102_v53  ;;  %v5777_v53 = vld [vmem:[#allocation9 + $0xe0] ss:$16 sps:$4 sm:$0xff]   ;;  %v5781_v42 = vld [vmem:[#allocation9 + $0xc4] ss:$16 sps:$4 sm:$0xff]  }
 0x19c   : > { %v1341_v40 = vpop.f32.mrf.mxu1  ;;  %v4528_v38 = vpop.eup %4527 }
 0x19d   : > { %7458 = vst [vmem:[#allocation84_spill] sm:$0xff] %v5772_v59  ;;  %4531 = vtanh.f32 %v1348_v57  ;;  %v1349_v58 = vadd.f32 %v1341_v40, %v1103_v46  ;;  %v1369_v52 = vmul.f32 0.0, %v4528_v38  ;;  %v7459_v57 = vmov 0   ;;  %v5787_v46 = vld [vmem:[#allocation9 + $0xc0] ss:$16 sps:$4 sm:$0xff]   ;;  %v7464_v38 = vld [vmem:[#allocation25_spill] sm:$0xff] }
 0x19e   : > { %v1343_v48 = vpop.f32.mrf.mxu1  ;;  %v4530_v45 = vpop.eup %4529  ;;  %v5791_v40 = vld [vmem:[#allocation9 + $0xa4] ss:$16 sps:$4 sm:$0xff]  }
 0x19f   : > { %v4051_v60 = vmul.f32 -1.442695, %v1349_v58  ;;  %v5803_v58 = vld [vmem:[#allocation9 + $0x80] ss:$16 sps:$4 sm:$0xff]  }
 0x1a0   : > { %v1344_v0 = vpop.f32.mrf.mxu1  ;;  %v5819_v48 = vld [vmem:[#allocation9 + $0x40] ss:$16 sps:$4 sm:$0xff]  }
 0x1a1   : > { %4533 = vpow2.f32 %v4051_v60  ;;  %v5823_v60 = vld [vmem:[#allocation9 + $0x24] ss:$16 sps:$4 sm:$0xff]  }
 0x1a2   : > { %v7463_v0 = vld [vmem:[#allocation24_spill] sm:$0xff] }
 0x1a3   : > { %v7475_v59 = vld [vmem:[#allocation36_spill] sm:$0xff] }
 0x1aa   : > { %v4532_v35 = vpop.eup %4531 }
 0x1ab   : > { %v1370_v41 = vmul.f32 %v4532_v35, %v4530_v45  ;;  %v7465_v45 = vld [vmem:[#allocation26_spill] sm:$0xff]  ;;  %v7466_v35 = vld [vmem:[#allocation27_spill] sm:$0xff] }
 0x1ad   : > { %v5774_v49 = vadd.f32 %v1370_v41, %v1369_v52  ;;  %v7467_v52 = vld [vmem:[#allocation28_spill] sm:$0xff]  ;;  %v7468_v41 = vld [vmem:[#allocation29_spill] sm:$0xff] }
 0x1ae   : > { %v4534_v56 = vpop.eup %4533 }
 0x1af   : > { %v1366_v43 = vadd.f32 1.0, %v4534_v56  ;;  %4535 = vtanh.f32 %v5774_v49  ;;  %v7469_v56 = vld [vmem:[#allocation30_spill] sm:$0xff] }
 0x1b1   : > { %4537 = vrcp.f32 %v1366_v43  ;;  %v7470_v43 = vld [vmem:[#allocation31_spill] sm:$0xff] }
 0x1bc   : > { %v4536_v47 = vpop.eup %4535 }
 0x1be   : > { %v4538_v50 = vpop.eup %4537 }
 0x1bf   : > { %v1373_v44 = vmul.f32 %v4538_v50, %v4536_v47  ;;  %v7471_v47 = vld [vmem:[#allocation32_spill] sm:$0xff]  ;;  %v7472_v50 = vld [vmem:[#allocation33_spill] sm:$0xff] }
 0x1c1   : > { %v1374_v5 = vpack.c.bf16 %v1373_v44, %v1373_v44  ;;  %v7473_v44 = vld [vmem:[#allocation34_spill] sm:$0xff] }
 0x1c3   : > { %1729 = vmatmul.mubr.bf16.vlgmr.msra.gmra.mxu0 %v1374_v5  ;;  %1770 = vmatmul.mubr.bf16.vlgmr.msra.gmra.mxu1 %v1374_v5 }
 0x1c4   : > { %1811 = vmatpush1.bf16.msra.mxu0 %v5777_v53  ;;  %1852 = vmatpush1.bf16.msra.mxu1 %v5479_v62  ;;  %v5795_v62 = vld [vmem:[#allocation9 + $0xa0] ss:$16 sps:$4 sm:$0xff]  }
 0x1c5   : > { %1812 = vmatprep.subr.bf16.mxu0 %v5781_v42  ;;  %1853 = vmatprep.subr.bf16.mxu1 %v5481_v63  ;;  %v5799_v63 = vld [vmem:[#allocation9 + $0x84] ss:$16 sps:$4 sm:$0xff]  }
 0x1c6   : > { %1842 = vmatprep.mubr.bf16.mxu0 %v7459_v57  ;;  %1883 = vmatprep.mubr.bf16.mxu1 %v7459_v57 }
 0x1c8   : > { %1813 = vmatpush1.bf16.msra.mxu0 %v5787_v46  ;;  %1854 = vmatpush1.bf16.msra.mxu1 %v5484_v1  ;;  %v5807_v1 = vld [vmem:[#allocation9 + $0x64] ss:$16 sps:$4 sm:$0xff]  }
 0x1c9   : > { %1814 = vmatprep.subr.bf16.mxu0 %v5791_v40  ;;  %1855 = vmatprep.subr.bf16.mxu1 %v5486_v2  ;;  %v5811_v2 = vld [vmem:[#allocation9 + $0x60] ss:$16 sps:$4 sm:$0xff]  }
 0x1cc   : > { %1815 = vmatpush1.bf16.msra.mxu0 %v5795_v62  ;;  %1856 = vmatpush1.bf16.msra.mxu1 %v5491_v3  ;;  %v5815_v3 = vld [vmem:[#allocation9 + $0x44] ss:$16 sps:$4 sm:$0xff]  }
 0x1cd   : > { %1816 = vmatprep.subr.bf16.mxu0 %v5799_v63  ;;  %1857 = vmatprep.subr.bf16.mxu1 %v5495_v4 }
 0x1d0   : > { %1817 = vmatpush1.bf16.msra.mxu0 %v5803_v58  ;;  %1858 = vmatpush1.bf16.msra.mxu1 %v5498_v6 }
 0x1d1   : > { %1818 = vmatprep.subr.bf16.mxu0 %v5807_v1  ;;  %1859 = vmatprep.subr.bf16.mxu1 %v5502_v7 }
 0x1d4   : > { %1819 = vmatpush1.bf16.msra.mxu0 %v5811_v2  ;;  %1860 = vmatpush1.bf16.msra.mxu1 %v5505_v8 }
 0x1d5   : > { %1820 = vmatprep.subr.bf16.mxu0 %v5815_v3  ;;  %1861 = vmatprep.subr.bf16.mxu1 %v5508_v9 }
 0x1d8   : > { %1821 = vmatpush1.bf16.msra.mxu0 %v5819_v48  ;;  %1862 = vmatpush1.bf16.msra.mxu1 %v5511_v10 }
 0x1d9   : > { %1822 = vmatprep.subr.bf16.mxu0 %v5823_v60  ;;  %1863 = vmatprep.subr.bf16.mxu1 %v5515_v11 }
 0x1dc   : > { %1823 = vmatpush1.bf16.msra.mxu0 %v5455_v30  ;;  %1864 = vmatpush1.bf16.msra.mxu1 %v5518_v12  ;;  %v7460_v30 = vld [vmem:[#allocation21_spill] sm:$0xff] }
 0x1dd   : > { %1824 = vmatprep.subr.bf16.mxu0 %v5459_v33  ;;  %1865 = vmatprep.subr.bf16.mxu1 %v5521_v13  ;;  %v7461_v33 = vld [vmem:[#allocation22_spill] sm:$0xff] }
 0x1e0   : > { %1825 = vmatpush1.bf16.msra.mxu0 %v5462_v36  ;;  %1866 = vmatpush1.bf16.msra.mxu1 %v5524_v14  ;;  %v7462_v36 = vld [vmem:[#allocation23_spill] sm:$0xff] }
 0x1e1   : > { %1922 = vmatprep.subr.bf16.mxu0 %v5530_v15  ;;  %1963 = vmatprep.subr.bf16.mxu1 %v5532_v16 }
 0x1e3   : > { %1843 = vmatmul.mubr.bf16.vlgmr.msra.gmra.mxu0 %v1374_v5  ;;  %1884 = vmatmul.mubr.bf16.vlgmr.msra.gmra.mxu1 %v1374_v5  ;;  %v7474_v5 = vld [vmem:[#allocation35_spill] sm:$0xff] }
 0x1e4   : > { %1923 = vmatpush1.bf16.msra.mxu0 %v5534_v17  ;;  %1964 = vmatpush1.bf16.msra.mxu1 %v5536_v18 }
 0x1e5   : > { %1924 = vmatprep.subr.bf16.mxu0 %v5542_v19  ;;  %1965 = vmatprep.subr.bf16.mxu1 %v5544_v20 }
 0x1e8   : > { %1925 = vmatpush1.bf16.msra.mxu0 %v5546_v21  ;;  %1966 = vmatpush1.bf16.msra.mxu1 %v5548_v22 }
 0x1e9   : > { %1926 = vmatprep.subr.bf16.mxu0 %v5554_v23  ;;  %1967 = vmatprep.subr.bf16.mxu1 %v5556_v24 }
 0x1ec   : > { %1927 = vmatpush1.bf16.msra.mxu0 %v5558_v25  ;;  %1968 = vmatpush1.bf16.msra.mxu1 %v5560_v26 }
 0x1ed   : > { %1928 = vmatprep.subr.bf16.mxu0 %v5566_v27  ;;  %1969 = vmatprep.subr.bf16.mxu1 %v5568_v28 }
 0x1f0   : > { %1929 = vmatpush1.bf16.msra.mxu0 %v5570_v29  ;;  %1970 = vmatpush1.bf16.msra.mxu1 %v5572_v31 }
 0x1f1   : > { %1930 = vmatprep.subr.bf16.mxu0 %v5578_v32  ;;  %1971 = vmatprep.subr.bf16.mxu1 %v5580_v34 }
 0x1f4   : > { %1931 = vmatpush1.bf16.msra.mxu0 %v7460_v30  ;;  %1972 = vmatpush1.bf16.msra.mxu1 %v7461_v33 }
 0x1f5   : > { %1932 = vmatprep.subr.bf16.mxu0 %v7462_v36  ;;  %1973 = vmatprep.subr.bf16.mxu1 %v7463_v0 }
 0x1f8   : > { %1933 = vmatpush1.bf16.msra.mxu0 %v7464_v38  ;;  %1974 = vmatpush1.bf16.msra.mxu1 %v7465_v45 }
 0x1f9   : > { %1934 = vmatprep.subr.bf16.mxu0 %v7466_v35  ;;  %1975 = vmatprep.subr.bf16.mxu1 %v7467_v52 }
 0x1fc   : > { %1935 = vmatpush1.bf16.msra.mxu0 %v7468_v41  ;;  %1976 = vmatpush1.bf16.msra.mxu1 %v7469_v56  ;;  %v7479_v41 = vld [vmem:[#allocation40_spill] sm:$0xff]  ;;  %v7480_v56 = vld [vmem:[#allocation41_spill] sm:$0xff] }
 0x1fd   : > { %1936 = vmatprep.subr.bf16.mxu0 %v7470_v43  ;;  %1977 = vmatprep.subr.bf16.mxu1 %v7471_v47  ;;  %v7481_v43 = vld [vmem:[#allocation42_spill] sm:$0xff]  ;;  %v7482_v47 = vld [vmem:[#allocation43_spill] sm:$0xff] }
 0x200   : > { %1937 = vmatpush1.bf16.msra.mxu0 %v7472_v50  ;;  %1978 = vmatpush1.bf16.msra.mxu1 %v7473_v44  ;;  %v7483_v50 = vld [vmem:[#allocation44_spill] sm:$0xff]  ;;  %v7484_v44 = vld [vmem:[#allocation45_spill] sm:$0xff] }
 0x201   : > { %1938 = vmatprep.subr.bf16.mxu0 %v7474_v5  ;;  %1979 = vmatprep.subr.bf16.mxu1 %v7475_v59  ;;  %v7485_v5 = vld [vmem:[#allocation46_spill] sm:$0xff]  ;;  %v7486_v59 = vld [vmem:[#allocation47_spill] sm:$0xff] }
 0x204   : > { %1939 = vmatpush2.bf16.msra.mxu0 %v7476_v55  ;;  %1980 = vmatpush2.bf16.msra.mxu1 %v7477_v51  ;;  %v7487_v55 = vld [vmem:[#allocation48_spill] sm:$0xff]  ;;  %v7488_v51 = vld [vmem:[#allocation49_spill] sm:$0xff] }
 0x205   : > { %1940 = vmatprep.subr.bf16.mxu0 %v7478_v39  ;;  %1981 = vmatprep.subr.bf16.mxu1 %v7479_v41  ;;  %v7489_v39 = vld [vmem:[#allocation50_spill] sm:$0xff]  ;;  %v7490_v41 = vld [vmem:[#allocation51_spill] sm:$0xff] }
 0x208   : > { %1941 = vmatpush2.bf16.msra.mxu0 %v7480_v56  ;;  %1982 = vmatpush2.bf16.msra.mxu1 %v7481_v43  ;;  %v7491_v56 = vld [vmem:[#allocation52_spill] sm:$0xff]  ;;  %v7492_v43 = vld [vmem:[#allocation53_spill] sm:$0xff] }
 0x209   : > { %1942 = vmatprep.subr.bf16.mxu0 %v7482_v47  ;;  %1983 = vmatprep.subr.bf16.mxu1 %v7483_v50  ;;  %v7493_v47 = vld [vmem:[#allocation54_spill] sm:$0xff]  ;;  %v7494_v50 = vld [vmem:[#allocation55_spill] sm:$0xff] }
 0x20c   : > { %1943 = vmatpush2.bf16.msra.mxu0 %v7484_v44  ;;  %1984 = vmatpush2.bf16.msra.mxu1 %v7485_v5  ;;  %v7495_v44 = vld [vmem:[#allocation56_spill] sm:$0xff]  ;;  %v7496_v5 = vld [vmem:[#allocation57_spill] sm:$0xff] }
 0x20d   : > { %1944 = vmatprep.subr.bf16.mxu0 %v7486_v59  ;;  %1985 = vmatprep.subr.bf16.mxu1 %v7487_v55  ;;  %v7497_v59 = vld [vmem:[#allocation58_spill] sm:$0xff]  ;;  %v7498_v55 = vld [vmem:[#allocation59_spill] sm:$0xff] }
 0x210   : > { %1945 = vmatpush2.bf16.msra.mxu0 %v7488_v51  ;;  %1986 = vmatpush2.bf16.msra.mxu1 %v7489_v39  ;;  %v7499_v51 = vld [vmem:[#allocation60_spill] sm:$0xff]  ;;  %v7500_v39 = vld [vmem:[#allocation61_spill] sm:$0xff] }
 0x211   : > { %1946 = vmatprep.subr.bf16.mxu0 %v7490_v41  ;;  %1987 = vmatprep.subr.bf16.mxu1 %v7491_v56  ;;  %v7501_v41 = vld [vmem:[#allocation62_spill] sm:$0xff]  ;;  %v7502_v56 = vld [vmem:[#allocation63_spill] sm:$0xff] }
 0x214   : > { %1947 = vmatpush2.bf16.msra.mxu0 %v7492_v43  ;;  %1988 = vmatpush2.bf16.msra.mxu1 %v7493_v47  ;;  %v7503_v43 = vld [vmem:[#allocation64_spill] sm:$0xff]  ;;  %v7504_v47 = vld [vmem:[#allocation65_spill] sm:$0xff] }
 0x215   : > { %1948 = vmatprep.subr.bf16.mxu0 %v7494_v50  ;;  %1989 = vmatprep.subr.bf16.mxu1 %v7495_v44  ;;  %v7505_v50 = vld [vmem:[#allocation66_spill] sm:$0xff] }
 0x216   : > { %v5897_v44 = vld [vmem:[#allocation9 + $0xe4] ss:$16 sps:$4 sm:$0xff]  }
 0x217   : > { %7506 = vst [vmem:[#allocation85_spill] sm:$0xff] %v5897_v44 }
 0x218   : > { %1949 = vmatpush2.bf16.msra.mxu0 %v7496_v5  ;;  %1990 = vmatpush2.bf16.msra.mxu1 %v7497_v59  ;;  %v7507_v59 = vld [vmem:[#allocation18_spill] sm:$0xff] }
 0x219   : > { %1950 = vmatprep.subr.bf16.mxu0 %v7498_v55  ;;  %1991 = vmatprep.subr.bf16.mxu1 %v7499_v51  ;;  %v7508_v51 = vld [vmem:[#allocation68_spill] sm:$0xff] }
 0x21c   : > { %1951 = vmatpush2.bf16.msra.mxu0 %v7500_v39  ;;  %1992 = vmatpush2.bf16.msra.mxu1 %v7501_v41  ;;  %v1076_v39 = vld [vmem:[%s7076_s5] sm:$0xf] }
 0x21d   : > { %1952 = vmatprep.subr.bf16.mxu0 %v7502_v56  ;;  %1993 = vmatprep.subr.bf16.mxu1 %v7503_v43  ;;  %v5905_v41 = vrot.slane %v1076_v39, %v7508_v51  ;;  %v7510_v56 = vld [vmem:[#allocation69_spill] sm:$0xff]  ;;  %v5913_v51 = vrot.slane %v1076_v39, %v5756_v54  ;;  %v5917_v33 = vrot.slane %v1076_v39, %v5751_v61 }
 0x21e   : > { %v5908_v55 = vrot.slane %v1076_v39, %v7510_v56 }
 0x21f   : > { %7509 = vst [vmem:[#allocation18_spill] sm:$0xff] %v5905_v41  ;;  %7512 = vst [vmem:[#allocation87_spill] sm:$0xff] %v5913_v51 }
 0x220   : > { %1953 = vmatpush2.bf16.msra.mxu0 %v7504_v47  ;;  %1994 = vmatpush2.bf16.msra.mxu1 %v7505_v50  ;;  %7511 = vst [vmem:[#allocation86_spill] sm:$0xff] %v5908_v55  ;;  %7513 = vst [vmem:[#allocation88_spill] sm:$0xff] %v5917_v33 }
 0x221   : > { %2037 = vmatprep.subr.bf16.mxu0 %v5897_v44  ;;  %2078 = vmatprep.subr.bf16.mxu1 %v7507_v59 }
 0x283   : > { %v1730_v43 = vpop.f32.mrf.mxu0  ;;  %v1771_v47 = vpop.f32.mrf.mxu1 }
 0x284   : > { %v1731_v50 = vadd.f32 %v1730_v43, %v5905_v41 }
 0x285   : > { %v1732_v5 = vpop.f32.mrf.mxu0  ;;  %v1773_v52 = vpop.f32.mrf.mxu1 }
 0x286   : > { %v4116_v35 = vmul.f32 -1.442695, %v1731_v50  ;;  %v1733_v44 = vadd.f32 %v1732_v5, %v5908_v55  ;;  %v1774_v56 = vadd.f32 %v1773_v52, %v5913_v51  ;;  %v1772_v50 = vadd.f32 %v1771_v47, %v5917_v33 }
 0x287   : > { %v1734_v59 = vpop.f32.mrf.mxu0  ;;  %v1775_v45 = vpop.f32.mrf.mxu1 }
 0x288   : > { %4539 = vpow2.f32 %v4116_v35  ;;  %v4117_v38 = vmul.f32 -1.442695, %v1733_v44  ;;  %v4118_v43 = vmul.f32 -1.442695, %v1774_v56 }
 0x289   : > { %v1735_v0 = vpop.f32.mrf.mxu0  ;;  %v1776_v36 = vpop.f32.mrf.mxu1 }
 0x28a   : > { %4541 = vpow2.f32 %v4117_v38  ;;  %v7514_v36 = vld [vmem:[#allocation70_spill] sm:$0xff] }
 0x28b   : > { %4543 = vpow2.f32 %v4118_v43  ;;  %v1806_v0 = vunpack.c.l.bf16 %v7514_v36  ;;  %v1807_v39 = vunpack.c.h.bf16 %v7514_v36  ;;  %v1809_v36 = vunpack.c.h.bf16 %v5760_v37 }
 0x295   : > { %v4540_v41 = vpop.eup %4539 }
 0x296   : > { %v1781_v5 = vadd.f32 1.0, %v4540_v41 }
 0x297   : > { %v4542_v59 = vpop.eup %4541 }
 0x298   : > { %4545 = vrcp.f32 %v1781_v5  ;;  %v1787_v45 = vadd.f32 1.0, %v4542_v59  ;;  %v4544_v44 = vpop.eup %4543 }
 0x299   : > { %4547 = vtanh.f32 %v1772_v50  ;;  %v1794_v43 = vadd.f32 1.0, %v4544_v44 }
 0x29a   : > { %4549 = vrcp.f32 %v1787_v45 }
 0x2a3   : > { %v1844_v38 = vpop.f32.mrf.mxu0  ;;  %v1885_v35 = vpop.f32.mrf.mxu1 }
 0x2a4   : > { %v1892_v52 = vadd.f32 %v1844_v38, %v1806_v0  ;;  %v1808_v38 = vunpack.c.l.bf16 %v5760_v37 }
 0x2a5   : > { %v4546_v61 = vpop.eup %4545  ;;  %v1846_v56 = vpop.f32.mrf.mxu0 }
 0x2a6   : > { %v1887_v54 = vpop.f32.mrf.mxu1  ;;  %v4548_v51 = vpop.eup %4547  ;;  %v4119_v47 = vmul.f32 -1.442695, %v1892_v52  ;;  %v1893_v41 = vadd.f32 %v1846_v56, %v1807_v39  ;;  %v1894_v44 = vadd.f32 %v1885_v35, %v1808_v38  ;;  %v5936_v38 = vld [vmem:[#allocation9 + $0xe8] ss:$16 sps:$4 sm:$0xff]  }
 0x2a7   : > { %v4550_v33 = vpop.eup %4549  ;;  %v1848_v5 = vpop.f32.mrf.mxu0  ;;  %v1798_v45 = vmul.f32 %v4548_v51, %v4546_v61  ;;  %v1895_v0 = vadd.f32 %v1887_v54, %v1809_v36 }
 0x2a8   : > { %v1889_v59 = vpop.f32.mrf.mxu1  ;;  %v1797_v50 = vmul.f32 0.0, %v4550_v33  ;;  %4551 = vpow2.f32 %v4119_v47  ;;  %v4120_v55 = vmul.f32 -1.442695, %v1893_v41 }
 0x2a9   : > { %v1849_v30 = vpop.f32.mrf.mxu0  ;;  %v4121_v52 = vmul.f32 -1.442695, %v1895_v0 }
 0x2aa   : > { %v1890_v34 = vpop.f32.mrf.mxu1  ;;  %v5922_v32 = vadd.f32 %v1798_v45, %v1797_v50  ;;  %4553 = vpow2.f32 %v4120_v55 }
 0x2ab   : > { %4555 = vrcp.f32 %v1794_v43 }
 0x2ac   : > { %4557 = vtanh.f32 %v5922_v32 }
 0x2ad   : > { %4559 = vtanh.f32 %v1894_v44  ;;  %v5946_v44 = vld [vmem:[#allocation9 + $0xc8] ss:$16 sps:$4 sm:$0xff]  }
 0x2ae   : > { %4561 = vpow2.f32 %v4121_v52  ;;  %v5950_v52 = vld [vmem:[#allocation9 + $0xac] ss:$16 sps:$4 sm:$0xff]  }
 0x2b5   : > { %v4552_v39 = vpop.eup %4551 }
 0x2b6   : > { %v1899_v33 = vadd.f32 1.0, %v4552_v39  ;;  %v5954_v39 = vld [vmem:[#allocation9 + $0xa8] ss:$16 sps:$4 sm:$0xff]  }
 0x2b7   : > { %v4554_v61 = vpop.eup %4553 }
 0x2b8   : > { %v4556_v51 = vpop.eup %4555  ;;  %4563 = vrcp.f32 %v1899_v33  ;;  %v1905_v34 = vadd.f32 1.0, %v4554_v61  ;;  %v7539_v33 = vld [vmem:[#allocation42_spill] sm:$0xff]  ;;  %v7540_v61 = vld [vmem:[#allocation43_spill] sm:$0xff] }
 0x2b9   : > { %v4558_v30 = vpop.eup %4557 }
 0x2ba   : > { %4565 = vrcp.f32 %v1905_v34  ;;  %v5927_v55 = vmul.f32 %v4558_v30, %v4556_v51  ;;  %v4560_v54 = vpop.eup %4559  ;;  %v7541_v51 = vld [vmem:[#allocation44_spill] sm:$0xff]  ;;  %v7542_v34 = vld [vmem:[#allocation45_spill] sm:$0xff]  ;;  %v7543_v30 = vld [vmem:[#allocation46_spill] sm:$0xff] }
 0x2bb   : > { %v4562_v37 = vpop.eup %4561 }
 0x2bc   : > { %7515 = vst [vmem:[#allocation70_spill] sm:$0xff] %v5927_v55  ;;  %v1921_v56 = vpack.c.bf16 %v5927_v55, %v5927_v55  ;;  %v1912_v43 = vadd.f32 1.0, %v4562_v37  ;;  %v7546_v37 = vld [vmem:[#allocation49_spill] sm:$0xff]  ;;  %v6231_v55 = vld [vmem:[#allocation10 + $0x1c4] ss:$16 sps:$4 sm:$0xff]  }
 0x2be   : > { %1954 = vmatprep.mubr.bf16.mxu0 %v1921_v56  ;;  %1995 = vmatprep.mubr.bf16.mxu1 %v1921_v56  ;;  %4567 = vrcp.f32 %v1912_v43  ;;  %v7544_v56 = vld [vmem:[#allocation47_spill] sm:$0xff]  ;;  %v7550_v43 = vld [vmem:[#allocation53_spill] sm:$0xff] }
 0x2c5   : > { %v4564_v35 = vpop.eup %4563 }
 0x2c6   : > { %v1916_v47 = vmul.f32 %v4564_v35, %v4560_v54  ;;  %v7545_v54 = vld [vmem:[#allocation48_spill] sm:$0xff]  ;;  %v7547_v35 = vld [vmem:[#allocation50_spill] sm:$0xff] }
 0x2c7   : > { %v4566_v41 = vpop.eup %4565 }
 0x2c8   : > { %v1915_v5 = vmul.f32 %v4566_v41, %v5774_v49  ;;  %v5940_v49 = vld [vmem:[#allocation9 + $0xcc] ss:$16 sps:$4 sm:$0xff]   ;;  %v7549_v41 = vld [vmem:[#allocation52_spill] sm:$0xff] }
 0x2ca   : > { %v5932_v59 = vadd.f32 %v1916_v47, %v1915_v5  ;;  %v7548_v47 = vld [vmem:[#allocation51_spill] sm:$0xff]  ;;  %v7551_v5 = vld [vmem:[#allocation54_spill] sm:$0xff] }
 0x2cb   : > { %v4568_v50 = vpop.eup %4567 }
 0x2cc   : > { %4569 = vtanh.f32 %v5932_v59 }
 0x2d9   : > { %v4570_v45 = vpop.eup %4569 }
 0x2da   : > { %v1919_v36 = vmul.f32 %v4570_v45, %v4568_v50  ;;  %v7552_v50 = vld [vmem:[#allocation55_spill] sm:$0xff]  ;;  %v7553_v45 = vld [vmem:[#allocation56_spill] sm:$0xff] }
 0x2dc   : > { %v1920_v0 = vpack.c.bf16 %v1919_v36, %v1919_v36  ;;  %v7554_v36 = vld [vmem:[#allocation57_spill] sm:$0xff] }
 0x2de   : > { %1955 = vmatmul.mubr.bf16.vlgmr.msra.gmra.mxu0 %v1920_v0  ;;  %1996 = vmatmul.mubr.bf16.vlgmr.msra.gmra.mxu1 %v1920_v0 }
 0x2df   : > { %2038 = vmatpush1.bf16.msra.mxu0 %v5777_v53  ;;  %2079 = vmatpush1.bf16.msra.mxu1 %v5936_v38 }
 0x2e0   : > { %2039 = vmatprep.subr.bf16.mxu0 %v5781_v42  ;;  %2080 = vmatprep.subr.bf16.mxu1 %v5940_v49 }
 0x2e1   : > { %2069 = vmatprep.mubr.bf16.mxu0 %v7459_v57  ;;  %2110 = vmatprep.mubr.bf16.mxu1 %v7459_v57 }
 0x2e3   : > { %2040 = vmatpush1.bf16.msra.mxu0 %v5787_v46  ;;  %2081 = vmatpush1.bf16.msra.mxu1 %v5946_v44 }
 0x2e4   : > { %2041 = vmatprep.subr.bf16.mxu0 %v5791_v40  ;;  %2082 = vmatprep.subr.bf16.mxu1 %v5950_v52 }
 0x2e7   : > { %2042 = vmatpush1.bf16.msra.mxu0 %v5795_v62  ;;  %2083 = vmatpush1.bf16.msra.mxu1 %v5954_v39 }
 0x2e8   : > { %2043 = vmatprep.subr.bf16.mxu0 %v5799_v63  ;;  %2084 = vmatprep.subr.bf16.mxu1 %v5495_v4  ;;  %v5971_v4 = vld [vmem:[#allocation9 + $0x20] ss:$16 sps:$4 sm:$0xff]  }
 0x2eb   : > { %2044 = vmatpush1.bf16.msra.mxu0 %v5803_v58  ;;  %2085 = vmatpush1.bf16.msra.mxu1 %v5498_v6  ;;  %v5975_v6 = vld [vmem:[#allocation9 + $0x4] ss:$16 sps:$4 sm:$0xff]  }
 0x2ec   : > { %2045 = vmatprep.subr.bf16.mxu0 %v5807_v1  ;;  %2086 = vmatprep.subr.bf16.mxu1 %v5502_v7  ;;  %v5979_v7 = vld [vmem:[#allocation9] ss:$16 sps:$4 sm:$0xff]  }
 0x2ef   : > { %2046 = vmatpush1.bf16.msra.mxu0 %v5811_v2  ;;  %2087 = vmatpush1.bf16.msra.mxu1 %v5505_v8  ;;  %v7516_v8 = vld [vmem:[#allocation19_spill] sm:$0xff] }
 0x2f0   : > { %2047 = vmatprep.subr.bf16.mxu0 %v5815_v3  ;;  %2088 = vmatprep.subr.bf16.mxu1 %v5508_v9  ;;  %v7517_v9 = vld [vmem:[#allocation20_spill] sm:$0xff] }
 0x2f3   : > { %2048 = vmatpush1.bf16.msra.mxu0 %v5819_v48  ;;  %2089 = vmatpush1.bf16.msra.mxu1 %v5511_v10  ;;  %v7518_v10 = vld [vmem:[#allocation21_spill] sm:$0xff] }
 0x2f4   : > { %2049 = vmatprep.subr.bf16.mxu0 %v5823_v60  ;;  %2090 = vmatprep.subr.bf16.mxu1 %v5515_v11  ;;  %v7519_v11 = vld [vmem:[#allocation22_spill] sm:$0xff] }
 0x2f7   : > { %2050 = vmatpush1.bf16.msra.mxu0 %v5971_v4  ;;  %2091 = vmatpush1.bf16.msra.mxu1 %v5518_v12  ;;  %v7520_v12 = vld [vmem:[#allocation23_spill] sm:$0xff] }
 0x2f8   : > { %2051 = vmatprep.subr.bf16.mxu0 %v5975_v6  ;;  %2092 = vmatprep.subr.bf16.mxu1 %v5521_v13  ;;  %v7521_v13 = vld [vmem:[#allocation24_spill] sm:$0xff] }
 0x2fb   : > { %2052 = vmatpush1.bf16.msra.mxu0 %v5979_v7  ;;  %2093 = vmatpush1.bf16.msra.mxu1 %v5524_v14  ;;  %v7522_v14 = vld [vmem:[#allocation25_spill] sm:$0xff] }
 0x2fc   : > { %2149 = vmatprep.subr.bf16.mxu0 %v5530_v15  ;;  %2190 = vmatprep.subr.bf16.mxu1 %v5532_v16  ;;  %v7523_v15 = vld [vmem:[#allocation26_spill] sm:$0xff]  ;;  %v7524_v16 = vld [vmem:[#allocation27_spill] sm:$0xff] }
 0x2fe   : > { %2070 = vmatmul.mubr.bf16.vlgmr.msra.gmra.mxu0 %v1920_v0  ;;  %2111 = vmatmul.mubr.bf16.vlgmr.msra.gmra.mxu1 %v1920_v0  ;;  %v7555_v0 = vld [vmem:[#allocation58_spill] sm:$0xff] }
 0x2ff   : > { %2150 = vmatpush1.bf16.msra.mxu0 %v5534_v17  ;;  %2191 = vmatpush1.bf16.msra.mxu1 %v5536_v18  ;;  %v7525_v17 = vld [vmem:[#allocation28_spill] sm:$0xff]  ;;  %v7526_v18 = vld [vmem:[#allocation29_spill] sm:$0xff] }
 0x300   : > { %2151 = vmatprep.subr.bf16.mxu0 %v5542_v19  ;;  %2192 = vmatprep.subr.bf16.mxu1 %v5544_v20  ;;  %v7527_v19 = vld [vmem:[#allocation30_spill] sm:$0xff]  ;;  %v7528_v20 = vld [vmem:[#allocation31_spill] sm:$0xff] }
 0x303   : > { %2152 = vmatpush1.bf16.msra.mxu0 %v5546_v21  ;;  %2193 = vmatpush1.bf16.msra.mxu1 %v5548_v22  ;;  %v7529_v21 = vld [vmem:[#allocation32_spill] sm:$0xff]  ;;  %v7530_v22 = vld [vmem:[#allocation33_spill] sm:$0xff] }
 0x304   : > { %2153 = vmatprep.subr.bf16.mxu0 %v5554_v23  ;;  %2194 = vmatprep.subr.bf16.mxu1 %v5556_v24  ;;  %v7531_v23 = vld [vmem:[#allocation34_spill] sm:$0xff]  ;;  %v7532_v24 = vld [vmem:[#allocation35_spill] sm:$0xff] }
 0x307   : > { %2154 = vmatpush1.bf16.msra.mxu0 %v5558_v25  ;;  %2195 = vmatpush1.bf16.msra.mxu1 %v5560_v26  ;;  %v7533_v25 = vld [vmem:[#allocation36_spill] sm:$0xff]  ;;  %v7534_v26 = vld [vmem:[#allocation37_spill] sm:$0xff] }
 0x308   : > { %2155 = vmatprep.subr.bf16.mxu0 %v5566_v27  ;;  %2196 = vmatprep.subr.bf16.mxu1 %v5568_v28  ;;  %v7535_v27 = vld [vmem:[#allocation38_spill] sm:$0xff]  ;;  %v7536_v28 = vld [vmem:[#allocation39_spill] sm:$0xff] }
 0x30b   : > { %2156 = vmatpush1.bf16.msra.mxu0 %v5570_v29  ;;  %2197 = vmatpush1.bf16.msra.mxu1 %v5572_v31  ;;  %v7537_v29 = vld [vmem:[#allocation40_spill] sm:$0xff]  ;;  %v7538_v31 = vld [vmem:[#allocation41_spill] sm:$0xff] }
 0x30c   : > { %2157 = vmatprep.subr.bf16.mxu0 %v7516_v8  ;;  %2198 = vmatprep.subr.bf16.mxu1 %v7517_v9  ;;  %v7556_v8 = vld [vmem:[#allocation59_spill] sm:$0xff]  ;;  %v7557_v9 = vld [vmem:[#allocation60_spill] sm:$0xff]  ;;  %7592 = vst [vmem:[#allocation40_spill] sm:$0xff] %v6231_v55 }
 0x30f   : > { %2158 = vmatpush1.bf16.msra.mxu0 %v7518_v10  ;;  %2199 = vmatpush1.bf16.msra.mxu1 %v7519_v11  ;;  %v7558_v10 = vld [vmem:[#allocation61_spill] sm:$0xff]  ;;  %v7559_v11 = vld [vmem:[#allocation62_spill] sm:$0xff] }
 0x310   : > { %2159 = vmatprep.subr.bf16.mxu0 %v7520_v12  ;;  %2200 = vmatprep.subr.bf16.mxu1 %v7521_v13  ;;  %v7560_v12 = vld [vmem:[#allocation63_spill] sm:$0xff]  ;;  %v7561_v13 = vld [vmem:[#allocation64_spill] sm:$0xff] }
 0x313   : > { %2160 = vmatpush1.bf16.msra.mxu0 %v7522_v14  ;;  %2201 = vmatpush1.bf16.msra.mxu1 %v7523_v15  ;;  %v7562_v14 = vld [vmem:[#allocation65_spill] sm:$0xff]  ;;  %v7563_v15 = vld [vmem:[#allocation66_spill] sm:$0xff] }
 0x314   : > { %2161 = vmatprep.subr.bf16.mxu0 %v7524_v16  ;;  %2202 = vmatprep.subr.bf16.mxu1 %v7525_v17  ;;  %v7564_v16 = vld [vmem:[#allocation85_spill] sm:$0xff] }
 0x315   : > { %v6048_v17 = vld [vmem:[#allocation9 + $0xec] ss:$16 sps:$4 sm:$0xff]  }
 0x316   : > { %7565 = vst [vmem:[#allocation19_spill] sm:$0xff] %v6048_v17 }
 0x317   : > { %2162 = vmatpush1.bf16.msra.mxu0 %v7526_v18  ;;  %2203 = vmatpush1.bf16.msra.mxu1 %v7527_v19 }
 0x318   : > { %2163 = vmatprep.subr.bf16.mxu0 %v7528_v20  ;;  %2204 = vmatprep.subr.bf16.mxu1 %v7529_v21  ;;  %v7566_v20 = vld [vmem:[#allocation18_spill] sm:$0xff] }
 0x31b   : > { %2164 = vmatpush1.bf16.msra.mxu0 %v7530_v22  ;;  %2205 = vmatpush1.bf16.msra.mxu1 %v7531_v23 }
 0x31c   : > { %2165 = vmatprep.subr.bf16.mxu0 %v7532_v24  ;;  %2206 = vmatprep.subr.bf16.mxu1 %v7533_v25  ;;  %v7567_v25 = vld [vmem:[#allocation86_spill] sm:$0xff] }
 0x31f   : > { %2166 = vmatpush2.bf16.msra.mxu0 %v7534_v26  ;;  %2207 = vmatpush2.bf16.msra.mxu1 %v7535_v27 }
 0x320   : > { %2167 = vmatprep.subr.bf16.mxu0 %v7536_v28  ;;  %2208 = vmatprep.subr.bf16.mxu1 %v7537_v29 }
 0x323   : > { %2168 = vmatpush2.bf16.msra.mxu0 %v7538_v31  ;;  %2209 = vmatpush2.bf16.msra.mxu1 %v7539_v33 }
 0x324   : > { %2169 = vmatprep.subr.bf16.mxu0 %v7540_v61  ;;  %2210 = vmatprep.subr.bf16.mxu1 %v7541_v51  ;;  %v7568_v61 = vld [vmem:[#allocation87_spill] sm:$0xff] }
 0x327   : > { %2170 = vmatpush2.bf16.msra.mxu0 %v7542_v34  ;;  %2211 = vmatpush2.bf16.msra.mxu1 %v7543_v30 }
 0x328   : > { %2171 = vmatprep.subr.bf16.mxu0 %v7544_v56  ;;  %2212 = vmatprep.subr.bf16.mxu1 %v7545_v54  ;;  %v7569_v56 = vld [vmem:[#allocation88_spill] sm:$0xff] }
 0x32b   : > { %2172 = vmatpush2.bf16.msra.mxu0 %v7546_v37  ;;  %2213 = vmatpush2.bf16.msra.mxu1 %v7547_v35 }
 0x32c   : > { %2173 = vmatprep.subr.bf16.mxu0 %v7548_v47  ;;  %2214 = vmatprep.subr.bf16.mxu1 %v7549_v41  ;;  %v7570_v41 = vld [vmem:[#allocation71_spill] sm:$0xff] }
 0x32f   : > { %2174 = vmatpush2.bf16.msra.mxu0 %v7550_v43  ;;  %2215 = vmatpush2.bf16.msra.mxu1 %v7551_v5  ;;  %v2033_v43 = vunpack.c.l.bf16 %v7570_v41 }
 0x330   : > { %2175 = vmatprep.subr.bf16.mxu0 %v7552_v50  ;;  %2216 = vmatprep.subr.bf16.mxu1 %v7553_v45 }
 0x333   : > { %2176 = vmatpush2.bf16.msra.mxu0 %v7554_v36  ;;  %2217 = vmatpush2.bf16.msra.mxu1 %v7555_v0  ;;  %v2034_v0 = vunpack.c.h.bf16 %v7570_v41 }
 0x334   : > { %2177 = vmatprep.subr.bf16.mxu0 %v7556_v8  ;;  %2218 = vmatprep.subr.bf16.mxu1 %v7557_v9 }
 0x337   : > { %2178 = vmatpush2.bf16.msra.mxu0 %v7558_v10  ;;  %2219 = vmatpush2.bf16.msra.mxu1 %v7559_v11 }
 0x338   : > { %2179 = vmatprep.subr.bf16.mxu0 %v7560_v12  ;;  %2220 = vmatprep.subr.bf16.mxu1 %v7561_v13 }
 0x33b   : > { %2180 = vmatpush2.bf16.msra.mxu0 %v7562_v14  ;;  %2221 = vmatpush2.bf16.msra.mxu1 %v7563_v15 }
 0x33c   : > { %2264 = vmatprep.subr.bf16.mxu0 %v7564_v16  ;;  %2305 = vmatprep.subr.bf16.mxu1 %v6048_v17 }
 0x39e   : > { %v1956_v18 = vpop.f32.mrf.mxu0  ;;  %v1997_v19 = vpop.f32.mrf.mxu1 }
 0x39f   : > { %v1957_v21 = vadd.f32 %v1956_v18, %v7566_v20  ;;  %v1998_v54 = vadd.f32 %v1997_v19, %v7569_v56 }
 0x3a0   : > { %v1958_v22 = vpop.f32.mrf.mxu0  ;;  %v1999_v23 = vpop.f32.mrf.mxu1 }
 0x3a1   : > { %v4122_v24 = vmul.f32 -1.442695, %v1957_v21  ;;  %v1959_v26 = vadd.f32 %v1958_v22, %v7567_v25  ;;  %v2000_v51 = vadd.f32 %v1999_v23, %v7568_v61 }
 0x3a2   : > { %v1960_v27 = vpop.f32.mrf.mxu0  ;;  %v2001_v28 = vpop.f32.mrf.mxu1 }
 0x3a3   : > { %4571 = vpow2.f32 %v4122_v24  ;;  %v4123_v29 = vmul.f32 -1.442695, %v1959_v26  ;;  %v4124_v34 = vmul.f32 -1.442695, %v2000_v51  ;;  %v7571_v28 = vld [vmem:[#allocation79_spill] sm:$0xff] }
 0x3a4   : > { %v1961_v31 = vpop.f32.mrf.mxu0  ;;  %v2002_v33 = vpop.f32.mrf.mxu1 }
 0x3a5   : > { %4573 = vpow2.f32 %v4123_v29  ;;  %v2036_v29 = vunpack.c.h.bf16 %v7571_v28  ;;  %v2035_v33 = vunpack.c.l.bf16 %v7571_v28  ;;  %v6156_v28 = vld [vmem:[#allocation10 + $0xa8] ss:$16 sps:$4 sm:$0xff]  }
 0x3a6   : > { %4575 = vpow2.f32 %v4124_v34 }
 0x3b0   : > { %v4572_v30 = vpop.eup %4571 }
 0x3b1   : > { %v2007_v37 = vadd.f32 1.0, %v4572_v30 }
 0x3b2   : > { %v4574_v35 = vpop.eup %4573 }
 0x3b3   : > { %4577 = vrcp.f32 %v2007_v37  ;;  %v2013_v47 = vadd.f32 1.0, %v4574_v35  ;;  %v4576_v45 = vpop.eup %4575 }
 0x3b4   : > { %4579 = vtanh.f32 %v1998_v54  ;;  %v2020_v15 = vadd.f32 1.0, %v4576_v45 }
 0x3b5   : > { %4581 = vrcp.f32 %v2013_v47 }
 0x3be   : > { %v2071_v5 = vpop.f32.mrf.mxu0  ;;  %v2112_v50 = vpop.f32.mrf.mxu1 }
 0x3bf   : > { %v2119_v36 = vadd.f32 %v2071_v5, %v2033_v43  ;;  %v2121_v51 = vadd.f32 %v2112_v50, %v2035_v33  ;;  %v6165_v33 = vld [vmem:[#allocation10 + $0x80] ss:$16 sps:$4 sm:$0xff]  }
 0x3c0   : > { %v4578_v8 = vpop.eup %4577  ;;  %v2073_v9 = vpop.f32.mrf.mxu0 }
 0x3c1   : > { %v2114_v10 = vpop.f32.mrf.mxu1  ;;  %v4580_v11 = vpop.eup %4579  ;;  %v4125_v12 = vmul.f32 -1.442695, %v2119_v36  ;;  %v2120_v13 = vadd.f32 %v2073_v9, %v2034_v0 }
 0x3c2   : > { %v4582_v14 = vpop.eup %4581  ;;  %v2075_v18 = vpop.f32.mrf.mxu0  ;;  %v2024_v21 = vmul.f32 %v4580_v11, %v4578_v8  ;;  %v2122_v31 = vadd.f32 %v2114_v10, %v2036_v29  ;;  %v6159_v29 = vld [vmem:[#allocation10 + $0x84] ss:$16 sps:$4 sm:$0xff]  }
 0x3c3   : > { %v2116_v19 = vpop.f32.mrf.mxu1  ;;  %v2023_v22 = vmul.f32 %v4582_v14, %v5922_v32  ;;  %4583 = vpow2.f32 %v4125_v12  ;;  %v4126_v23 = vmul.f32 -1.442695, %v2120_v13  ;;  %v6135_v18 = vld [vmem:[#allocation10 + $0xc4] ss:$16 sps:$4 sm:$0xff]  }
 0x3c4   : > { %v2076_v24 = vpop.f32.mrf.mxu0  ;;  %v4127_v34 = vmul.f32 -1.442695, %v2122_v31  ;;  %v6138_v19 = vld [vmem:[#allocation10 + $0xcc] ss:$16 sps:$4 sm:$0xff]  }
 0x3c5   : > { %v2117_v26 = vpop.f32.mrf.mxu1  ;;  %v6058_v27 = vadd.f32 %v2024_v21, %v2023_v22  ;;  %4585 = vpow2.f32 %v4126_v23  ;;  %v6141_v21 = vld [vmem:[#allocation10 + $0xc0] ss:$16 sps:$4 sm:$0xff]   ;;  %v6144_v22 = vld [vmem:[#allocation10 + $0xc8] ss:$16 sps:$4 sm:$0xff]   ;;  %v6147_v23 = vld [vmem:[#allocation10 + $0xa4] ss:$16 sps:$4 sm:$0xff]  }
 0x3c6   : > { %4587 = vrcp.f32 %v2020_v15  ;;  %v6132_v15 = vld [vmem:[#allocation10 + $0xe8] ss:$16 sps:$4 sm:$0xff]   ;;  %v6150_v24 = vld [vmem:[#allocation10 + $0xac] ss:$16 sps:$4 sm:$0xff]   ;;  %v6153_v26 = vld [vmem:[#allocation10 + $0xa0] ss:$16 sps:$4 sm:$0xff]  }
 0x3c7   : > { %4589 = vtanh.f32 %v6058_v27  ;;  %v6162_v31 = vld [vmem:[#allocation10 + $0x8c] ss:$16 sps:$4 sm:$0xff]  }
 0x3c8   : > { %4591 = vtanh.f32 %v2121_v51  ;;  %v6168_v51 = vld [vmem:[#allocation10 + $0x88] ss:$16 sps:$4 sm:$0xff]  }
 0x3c9   : > { %4593 = vpow2.f32 %v4127_v34  ;;  %v6171_v34 = vld [vmem:[#allocation10 + $0x64] ss:$16 sps:$4 sm:$0xff]  }
 0x3d0   : > { %v4584_v30 = vpop.eup %4583 }
 0x3d1   : > { %v2126_v54 = vadd.f32 1.0, %v4584_v30  ;;  %v6174_v30 = vld [vmem:[#allocation10 + $0x6c] ss:$16 sps:$4 sm:$0xff]  }
 0x3d2   : > { %v4586_v32 = vpop.eup %4585  ;;  %7573 = vst [vmem:[#allocation21_spill] sm:$0xff] %v6174_v30 }
 0x3d3   : > { %v4588_v37 = vpop.eup %4587  ;;  %4595 = vrcp.f32 %v2126_v54  ;;  %v2132_v35 = vadd.f32 1.0, %v4586_v32  ;;  %v6177_v54 = vld [vmem:[#allocation10 + $0x60] ss:$16 sps:$4 sm:$0xff]   ;;  %v6180_v32 = vld [vmem:[#allocation10 + $0x68] ss:$16 sps:$4 sm:$0xff]  }
 0x3d4   : > { %v4590_v47 = vpop.eup %4589  ;;  %7574 = vst [vmem:[#allocation22_spill] sm:$0xff] %v6177_v54  ;;  %7575 = vst [vmem:[#allocation23_spill] sm:$0xff] %v6180_v32 }
 0x3d5   : > { %4597 = vrcp.f32 %v2132_v35  ;;  %v6063_v41 = vmul.f32 %v4590_v47, %v4588_v37  ;;  %v4592_v5 = vpop.eup %4591  ;;  %v6183_v37 = vld [vmem:[#allocation10 + $0x44] ss:$16 sps:$4 sm:$0xff]   ;;  %v6186_v35 = vld [vmem:[#allocation10 + $0x4c] ss:$16 sps:$4 sm:$0xff]   ;;  %v6189_v47 = vld [vmem:[#allocation10 + $0x40] ss:$16 sps:$4 sm:$0xff]  }
 0x3d6   : > { %v4594_v50 = vpop.eup %4593  ;;  %7576 = vst [vmem:[#allocation24_spill] sm:$0xff] %v6183_v37  ;;  %7577 = vst [vmem:[#allocation25_spill] sm:$0xff] %v6186_v35 }
 0x3d7   : > { %7572 = vst [vmem:[#allocation20_spill] sm:$0xff] %v6063_v41  ;;  %v2148_v43 = vpack.c.bf16 %v6063_v41, %v6063_v41  ;;  %v2139_v8 = vadd.f32 1.0, %v4594_v50  ;;  %7578 = vst [vmem:[#allocation26_spill] sm:$0xff] %v6189_v47  ;;  %v6198_v50 = vld [vmem:[#allocation10 + $0x2c] ss:$16 sps:$4 sm:$0xff]  }
 0x3d8   : > { %7581 = vst [vmem:[#allocation29_spill] sm:$0xff] %v6198_v50  ;;  %v6228_v41 = vld [vmem:[#allocation10 + $0x1e8] ss:$16 sps:$4 sm:$0xff]  }
 0x3d9   : > { %2181 = vmatprep.mubr.bf16.mxu0 %v2148_v43  ;;  %2222 = vmatprep.mubr.bf16.mxu1 %v2148_v43  ;;  %4599 = vrcp.f32 %v2139_v8  ;;  %v6192_v43 = vld [vmem:[#allocation10 + $0x48] ss:$16 sps:$4 sm:$0xff]   ;;  %v6210_v8 = vld [vmem:[#allocation10 + $0xc] ss:$16 sps:$4 sm:$0xff]   ;;  %7591 = vst [vmem:[#allocation39_spill] sm:$0xff] %v6228_v41 }
 0x3da   : > { %7579 = vst [vmem:[#allocation27_spill] sm:$0xff] %v6192_v43  ;;  %7585 = vst [vmem:[#allocation33_spill] sm:$0xff] %v6210_v8 }
 0x3e0   : > { %v4596_v45 = vpop.eup %4595 }
 0x3e1   : > { %v2143_v36 = vmul.f32 %v4596_v45, %v4592_v5  ;;  %v6195_v5 = vld [vmem:[#allocation10 + $0x24] ss:$16 sps:$4 sm:$0xff]   ;;  %v6201_v45 = vld [vmem:[#allocation10 + $0x20] ss:$16 sps:$4 sm:$0xff]  }
 0x3e2   : > { %v4598_v0 = vpop.eup %4597  ;;  %7580 = vst [vmem:[#allocation28_spill] sm:$0xff] %v6195_v5  ;;  %7582 = vst [vmem:[#allocation30_spill] sm:$0xff] %v6201_v45 }
 0x3e3   : > { %v2142_v9 = vmul.f32 %v4598_v0, %v5932_v59  ;;  %v6129_v59 = vld [vmem:[#allocation10 + $0xe0] ss:$16 sps:$4 sm:$0xff]   ;;  %v6207_v0 = vld [vmem:[#allocation10 + $0x4] ss:$16 sps:$4 sm:$0xff]  }
 0x3e4   : > { %7584 = vst [vmem:[#allocation32_spill] sm:$0xff] %v6207_v0 }
 0x3e5   : > { %v6068_v10 = vadd.f32 %v2143_v36, %v2142_v9  ;;  %v6204_v36 = vld [vmem:[#allocation10 + $0x28] ss:$16 sps:$4 sm:$0xff]   ;;  %v6213_v9 = vld [vmem:[#allocation10] ss:$16 sps:$4 sm:$0xff]  }
 0x3e6   : > { %v4600_v11 = vpop.eup %4599  ;;  %7583 = vst [vmem:[#allocation31_spill] sm:$0xff] %v6204_v36  ;;  %7586 = vst [vmem:[#allocation34_spill] sm:$0xff] %v6213_v9 }
 0x3e7   : > { %4601 = vtanh.f32 %v6068_v10 }
 0x3f4   : > { %v4602_v12 = vpop.eup %4601 }
 0x3f5   : > { %v2146_v13 = vmul.f32 %v4602_v12, %v4600_v11  ;;  %v6216_v11 = vld [vmem:[#allocation10 + $0x8] ss:$16 sps:$4 sm:$0xff]   ;;  %v6219_v12 = vld [vmem:[#allocation10 + $0x1e4] ss:$16 sps:$4 sm:$0xff]  }
 0x3f6   : > { %7587 = vst [vmem:[#allocation35_spill] sm:$0xff] %v6216_v11  ;;  %7588 = vst [vmem:[#allocation36_spill] sm:$0xff] %v6219_v12 }
 0x3f7   : > { %v2147_v14 = vpack.c.bf16 %v2146_v13, %v2146_v13  ;;  %v6222_v13 = vld [vmem:[#allocation10 + $0x1ec] ss:$16 sps:$4 sm:$0xff]  }
 0x3f8   : > { %7589 = vst [vmem:[#allocation37_spill] sm:$0xff] %v6222_v13 }
 0x3f9   : > { %2182 = vmatmul.mubr.bf16.vlgmr.msra.gmra.mxu0 %v2147_v14  ;;  %2223 = vmatmul.mubr.bf16.vlgmr.msra.gmra.mxu1 %v2147_v14 }
 0x3fa   : > { %2265 = vmatpush1.bf16.msra.mxu0 %v5777_v53  ;;  %2306 = vmatpush1.bf16.msra.mxu1 %v5936_v38  ;;  %v6084_v53 = vld [vmem:[#allocation9 + $0x8c] ss:$16 sps:$4 sm:$0xff]  }
 0x3fb   : > { %2266 = vmatprep.subr.bf16.mxu0 %v5781_v42  ;;  %2307 = vmatprep.subr.bf16.mxu1 %v5940_v49  ;;  %v6088_v42 = vld [vmem:[#allocation9 + $0x88] ss:$16 sps:$4 sm:$0xff]  }
 0x3fc   : > { %2296 = vmatprep.mubr.bf16.mxu0 %v7459_v57  ;;  %2337 = vmatprep.mubr.bf16.mxu1 %v7459_v57 }
 0x3fe   : > { %2267 = vmatpush1.bf16.msra.mxu0 %v5787_v46  ;;  %2308 = vmatpush1.bf16.msra.mxu1 %v5946_v44  ;;  %v6092_v46 = vld [vmem:[#allocation9 + $0x6c] ss:$16 sps:$4 sm:$0xff]  }
 0x3ff   : > { %2268 = vmatprep.subr.bf16.mxu0 %v5791_v40  ;;  %2309 = vmatprep.subr.bf16.mxu1 %v5950_v52  ;;  %v6096_v40 = vld [vmem:[#allocation9 + $0x68] ss:$16 sps:$4 sm:$0xff]  }
 0x402   : > { %2269 = vmatpush1.bf16.msra.mxu0 %v5795_v62  ;;  %2310 = vmatpush1.bf16.msra.mxu1 %v5954_v39  ;;  %v6100_v62 = vld [vmem:[#allocation9 + $0x4c] ss:$16 sps:$4 sm:$0xff]  }
 0x403   : > { %2270 = vmatprep.subr.bf16.mxu0 %v5799_v63  ;;  %2311 = vmatprep.subr.bf16.mxu1 %v6084_v53  ;;  %v6104_v63 = vld [vmem:[#allocation9 + $0x48] ss:$16 sps:$4 sm:$0xff]  }
 0x406   : > { %2271 = vmatpush1.bf16.msra.mxu0 %v5803_v58  ;;  %2312 = vmatpush1.bf16.msra.mxu1 %v6088_v42  ;;  %v6108_v58 = vld [vmem:[#allocation9 + $0x2c] ss:$16 sps:$4 sm:$0xff]  }
 0x407   : > { %2272 = vmatprep.subr.bf16.mxu0 %v5807_v1  ;;  %2313 = vmatprep.subr.bf16.mxu1 %v6092_v46  ;;  %v6112_v1 = vld [vmem:[#allocation9 + $0x28] ss:$16 sps:$4 sm:$0xff]  }
 0x40a   : > { %2273 = vmatpush1.bf16.msra.mxu0 %v5811_v2  ;;  %2314 = vmatpush1.bf16.msra.mxu1 %v6096_v40  ;;  %v6116_v2 = vld [vmem:[#allocation9 + $0xc] ss:$16 sps:$4 sm:$0xff]  }
 0x40b   : > { %2274 = vmatprep.subr.bf16.mxu0 %v5815_v3  ;;  %2315 = vmatprep.subr.bf16.mxu1 %v6100_v62  ;;  %v6120_v3 = vld [vmem:[#allocation9 + $0x8] ss:$16 sps:$4 sm:$0xff]  }
 0x40e   : > { %2275 = vmatpush1.bf16.msra.mxu0 %v5819_v48  ;;  %2316 = vmatpush1.bf16.msra.mxu1 %v6104_v63  ;;  %v6123_v48 = vld [vmem:[#allocation10 + $0xe4] ss:$16 sps:$4 sm:$0xff]  }
 0x40f   : > { %2276 = vmatprep.subr.bf16.mxu0 %v5823_v60  ;;  %2317 = vmatprep.subr.bf16.mxu1 %v6108_v58  ;;  %v6126_v60 = vld [vmem:[#allocation10 + $0xec] ss:$16 sps:$4 sm:$0xff]  }
 0x412   : > { %2277 = vmatpush1.bf16.msra.mxu0 %v5971_v4  ;;  %2318 = vmatpush1.bf16.msra.mxu1 %v6112_v1 }
 0x413   : > { %2278 = vmatprep.subr.bf16.mxu0 %v5975_v6  ;;  %2319 = vmatprep.subr.bf16.mxu1 %v6116_v2 }
 0x416   : > { %2279 = vmatpush1.bf16.msra.mxu0 %v5979_v7  ;;  %2320 = vmatpush1.bf16.msra.mxu1 %v6120_v3 }
 0x417   : > { %2376 = vmatprep.subr.bf16.mxu0 %v6123_v48  ;;  %2417 = vmatprep.subr.bf16.mxu1 %v6126_v60 }
 0x419   : > { %2297 = vmatmul.mubr.bf16.vlgmr.msra.gmra.mxu0 %v2147_v14  ;;  %2338 = vmatmul.mubr.bf16.vlgmr.msra.gmra.mxu1 %v2147_v14  ;;  %v6225_v14 = vld [vmem:[#allocation10 + $0x1e0] ss:$16 sps:$4 sm:$0xff]  }
 0x41a   : > { %2377 = vmatpush1.bf16.msra.mxu0 %v6129_v59  ;;  %2418 = vmatpush1.bf16.msra.mxu1 %v6132_v15  ;;  %7590 = vst [vmem:[#allocation38_spill] sm:$0xff] %v6225_v14 }
 0x41b   : > { %2378 = vmatprep.subr.bf16.mxu0 %v6135_v18  ;;  %2419 = vmatprep.subr.bf16.mxu1 %v6138_v19 }
 0x41e   : > { %2379 = vmatpush1.bf16.msra.mxu0 %v6141_v21  ;;  %2420 = vmatpush1.bf16.msra.mxu1 %v6144_v22 }
 0x41f   : > { %2380 = vmatprep.subr.bf16.mxu0 %v6147_v23  ;;  %2421 = vmatprep.subr.bf16.mxu1 %v6150_v24 }
 0x422   : > { %2381 = vmatpush1.bf16.msra.mxu0 %v6153_v26  ;;  %2422 = vmatpush1.bf16.msra.mxu1 %v6156_v28 }
 0x423   : > { %2382 = vmatprep.subr.bf16.mxu0 %v6159_v29  ;;  %2423 = vmatprep.subr.bf16.mxu1 %v6162_v31 }
 0x426   : > { %2383 = vmatpush1.bf16.msra.mxu0 %v6165_v33  ;;  %2424 = vmatpush1.bf16.msra.mxu1 %v6168_v51 }
 0x427   : > { %2384 = vmatprep.subr.bf16.mxu0 %v6171_v34  ;;  %2425 = vmatprep.subr.bf16.mxu1 %v6174_v30 }
 0x42a   : > { %2385 = vmatpush1.bf16.msra.mxu0 %v6177_v54  ;;  %2426 = vmatpush1.bf16.msra.mxu1 %v6180_v32 }
 0x42b   : > { %2386 = vmatprep.subr.bf16.mxu0 %v6183_v37  ;;  %2427 = vmatprep.subr.bf16.mxu1 %v6186_v35 }
 0x42e   : > { %2387 = vmatpush1.bf16.msra.mxu0 %v6189_v47  ;;  %2428 = vmatpush1.bf16.msra.mxu1 %v6192_v43 }
 0x42f   : > { %2388 = vmatprep.subr.bf16.mxu0 %v6195_v5  ;;  %2429 = vmatprep.subr.bf16.mxu1 %v6198_v50 }
 0x432   : > { %2389 = vmatpush1.bf16.msra.mxu0 %v6201_v45  ;;  %2430 = vmatpush1.bf16.msra.mxu1 %v6204_v36 }
 0x433   : > { %2390 = vmatprep.subr.bf16.mxu0 %v6207_v0  ;;  %2431 = vmatprep.subr.bf16.mxu1 %v6210_v8 }
 0x436   : > { %2391 = vmatpush1.bf16.msra.mxu0 %v6213_v9  ;;  %2432 = vmatpush1.bf16.msra.mxu1 %v6216_v11  ;;  %v6234_v11 = vld [vmem:[#allocation10 + $0x1cc] ss:$16 sps:$4 sm:$0xff]  }
 0x437   : > { %2392 = vmatprep.subr.bf16.mxu0 %v6219_v12  ;;  %2433 = vmatprep.subr.bf16.mxu1 %v6222_v13  ;;  %7593 = vst [vmem:[#allocation41_spill] sm:$0xff] %v6234_v11  ;;  %v6237_v12 = vld [vmem:[#allocation10 + $0x1c0] ss:$16 sps:$4 sm:$0xff]   ;;  %v6240_v13 = vld [vmem:[#allocation10 + $0x1c8] ss:$16 sps:$4 sm:$0xff]  }
 0x438   : > { %7594 = vst [vmem:[#allocation42_spill] sm:$0xff] %v6237_v12  ;;  %7595 = vst [vmem:[#allocation43_spill] sm:$0xff] %v6240_v13 }
 0x43a   : > { %2393 = vmatpush2.bf16.msra.mxu0 %v6225_v14  ;;  %2434 = vmatpush2.bf16.msra.mxu1 %v6228_v41  ;;  %v6243_v14 = vld [vmem:[#allocation10 + $0x1a4] ss:$16 sps:$4 sm:$0xff]   ;;  %v6246_v41 = vld [vmem:[#allocation10 + $0x1ac] ss:$16 sps:$4 sm:$0xff]  }
 0x43b   : > { %2394 = vmatprep.subr.bf16.mxu0 %v6231_v55  ;;  %2435 = vmatprep.subr.bf16.mxu1 %v6234_v11  ;;  %7596 = vst [vmem:[#allocation44_spill] sm:$0xff] %v6243_v14  ;;  %7597 = vst [vmem:[#allocation45_spill] sm:$0xff] %v6246_v41  ;;  %v6249_v55 = vld [vmem:[#allocation10 + $0x1a0] ss:$16 sps:$4 sm:$0xff]   ;;  %v6252_v11 = vld [vmem:[#allocation10 + $0x1a8] ss:$16 sps:$4 sm:$0xff]  }
 0x43c   : > { %7598 = vst [vmem:[#allocation46_spill] sm:$0xff] %v6249_v55  ;;  %7599 = vst [vmem:[#allocation47_spill] sm:$0xff] %v6252_v11 }
 0x43e   : > { %2395 = vmatpush2.bf16.msra.mxu0 %v6237_v12  ;;  %2436 = vmatpush2.bf16.msra.mxu1 %v6240_v13  ;;  %v6255_v12 = vld [vmem:[#allocation10 + $0x184] ss:$16 sps:$4 sm:$0xff]   ;;  %v6258_v13 = vld [vmem:[#allocation10 + $0x18c] ss:$16 sps:$4 sm:$0xff]  }
 0x43f   : > { %2396 = vmatprep.subr.bf16.mxu0 %v6243_v14  ;;  %2437 = vmatprep.subr.bf16.mxu1 %v6246_v41  ;;  %7600 = vst [vmem:[#allocation48_spill] sm:$0xff] %v6255_v12  ;;  %7601 = vst [vmem:[#allocation49_spill] sm:$0xff] %v6258_v13  ;;  %v6261_v14 = vld [vmem:[#allocation10 + $0x180] ss:$16 sps:$4 sm:$0xff]   ;;  %v6264_v41 = vld [vmem:[#allocation10 + $0x188] ss:$16 sps:$4 sm:$0xff]  }
 0x440   : > { %7602 = vst [vmem:[#allocation50_spill] sm:$0xff] %v6261_v14  ;;  %7603 = vst [vmem:[#allocation51_spill] sm:$0xff] %v6264_v41 }
 0x442   : > { %2397 = vmatpush2.bf16.msra.mxu0 %v6249_v55  ;;  %2438 = vmatpush2.bf16.msra.mxu1 %v6252_v11  ;;  %v6267_v55 = vld [vmem:[#allocation10 + $0x164] ss:$16 sps:$4 sm:$0xff]   ;;  %v6270_v11 = vld [vmem:[#allocation10 + $0x16c] ss:$16 sps:$4 sm:$0xff]  }
 0x443   : > { %2398 = vmatprep.subr.bf16.mxu0 %v6255_v12  ;;  %2439 = vmatprep.subr.bf16.mxu1 %v6258_v13  ;;  %7604 = vst [vmem:[#allocation52_spill] sm:$0xff] %v6267_v55  ;;  %7605 = vst [vmem:[#allocation53_spill] sm:$0xff] %v6270_v11  ;;  %v6273_v12 = vld [vmem:[#allocation10 + $0x160] ss:$16 sps:$4 sm:$0xff]   ;;  %v6276_v13 = vld [vmem:[#allocation10 + $0x168] ss:$16 sps:$4 sm:$0xff]  }
 0x444   : > { %7606 = vst [vmem:[#allocation54_spill] sm:$0xff] %v6273_v12  ;;  %7607 = vst [vmem:[#allocation55_spill] sm:$0xff] %v6276_v13 }
 0x446   : > { %2399 = vmatpush2.bf16.msra.mxu0 %v6261_v14  ;;  %2440 = vmatpush2.bf16.msra.mxu1 %v6264_v41  ;;  %v6279_v14 = vld [vmem:[#allocation10 + $0x144] ss:$16 sps:$4 sm:$0xff]   ;;  %v6282_v41 = vld [vmem:[#allocation10 + $0x14c] ss:$16 sps:$4 sm:$0xff]  }
 0x447   : > { %2400 = vmatprep.subr.bf16.mxu0 %v6267_v55  ;;  %2441 = vmatprep.subr.bf16.mxu1 %v6270_v11  ;;  %7608 = vst [vmem:[#allocation56_spill] sm:$0xff] %v6279_v14  ;;  %7609 = vst [vmem:[#allocation57_spill] sm:$0xff] %v6282_v41  ;;  %v6285_v55 = vld [vmem:[#allocation10 + $0x140] ss:$16 sps:$4 sm:$0xff]   ;;  %v6288_v11 = vld [vmem:[#allocation10 + $0x148] ss:$16 sps:$4 sm:$0xff]  }
 0x448   : > { %7610 = vst [vmem:[#allocation58_spill] sm:$0xff] %v6285_v55  ;;  %7611 = vst [vmem:[#allocation59_spill] sm:$0xff] %v6288_v11 }
 0x44a   : > { %2401 = vmatpush2.bf16.msra.mxu0 %v6273_v12  ;;  %2442 = vmatpush2.bf16.msra.mxu1 %v6276_v13  ;;  %v6291_v12 = vld [vmem:[#allocation10 + $0x124] ss:$16 sps:$4 sm:$0xff]   ;;  %v6294_v13 = vld [vmem:[#allocation10 + $0x12c] ss:$16 sps:$4 sm:$0xff]  }
 0x44b   : > { %2402 = vmatprep.subr.bf16.mxu0 %v6279_v14  ;;  %2443 = vmatprep.subr.bf16.mxu1 %v6282_v41  ;;  %7612 = vst [vmem:[#allocation60_spill] sm:$0xff] %v6291_v12  ;;  %7613 = vst [vmem:[#allocation61_spill] sm:$0xff] %v6294_v13  ;;  %v6297_v14 = vld [vmem:[#allocation10 + $0x120] ss:$16 sps:$4 sm:$0xff]   ;;  %v6300_v41 = vld [vmem:[#allocation10 + $0x128] ss:$16 sps:$4 sm:$0xff]  }
 0x44c   : > { %7614 = vst [vmem:[#allocation62_spill] sm:$0xff] %v6297_v14  ;;  %7615 = vst [vmem:[#allocation63_spill] sm:$0xff] %v6300_v41 }
 0x44e   : > { %2403 = vmatpush2.bf16.msra.mxu0 %v6285_v55  ;;  %2444 = vmatpush2.bf16.msra.mxu1 %v6288_v11  ;;  %v6303_v55 = vld [vmem:[#allocation10 + $0x104] ss:$16 sps:$4 sm:$0xff]   ;;  %v6306_v11 = vld [vmem:[#allocation10 + $0x10c] ss:$16 sps:$4 sm:$0xff]  }
 0x44f   : > { %2404 = vmatprep.subr.bf16.mxu0 %v6291_v12  ;;  %2445 = vmatprep.subr.bf16.mxu1 %v6294_v13  ;;  %7616 = vst [vmem:[#allocation64_spill] sm:$0xff] %v6303_v55  ;;  %7617 = vst [vmem:[#allocation65_spill] sm:$0xff] %v6306_v11  ;;  %v6309_v12 = vld [vmem:[#allocation10 + $0x100] ss:$16 sps:$4 sm:$0xff]   ;;  %v6312_v13 = vld [vmem:[#allocation10 + $0x108] ss:$16 sps:$4 sm:$0xff]  }
 0x450   : > { %7618 = vst [vmem:[#allocation66_spill] sm:$0xff] %v6309_v12  ;;  %7619 = vst [vmem:[#allocation85_spill] sm:$0xff] %v6312_v13 }
 0x452   : > { %2405 = vmatpush2.bf16.msra.mxu0 %v6297_v14  ;;  %2446 = vmatpush2.bf16.msra.mxu1 %v6300_v41 }
 0x453   : > { %2406 = vmatprep.subr.bf16.mxu0 %v6303_v55  ;;  %2447 = vmatprep.subr.bf16.mxu1 %v6306_v11 }
 0x456   : > { %2407 = vmatpush2.bf16.msra.mxu0 %v6309_v12  ;;  %2448 = vmatpush2.bf16.msra.mxu1 %v6312_v13 }
 0x457   : > { %2491 = vmatprep.subr.bf16.mxu0 %v7564_v16  ;;  %2532 = vmatprep.subr.bf16.mxu1 %v6048_v17 }
 0x4b9   : > { %v2183_v41 = vpop.f32.mrf.mxu0  ;;  %v2224_v14 = vpop.f32.mrf.mxu1 }
 0x4ba   : > { %v2184_v55 = vadd.f32 %v2183_v41, %v7566_v20  ;;  %v2225_v43 = vadd.f32 %v2224_v14, %v7569_v56 }
 0x4bb   : > { %v2185_v9 = vpop.f32.mrf.mxu0  ;;  %v2226_v8 = vpop.f32.mrf.mxu1 }
 0x4bc   : > { %v4128_v0 = vmul.f32 -1.442695, %v2184_v55  ;;  %v2186_v11 = vadd.f32 %v2185_v9, %v7567_v25  ;;  %v2227_v16 = vadd.f32 %v2226_v8, %v7568_v61 }
 0x4bd   : > { %v2187_v36 = vpop.f32.mrf.mxu0  ;;  %v2228_v45 = vpop.f32.mrf.mxu1 }
 0x4be   : > { %4603 = vpow2.f32 %v4128_v0  ;;  %v4129_v12 = vmul.f32 -1.442695, %v2186_v11  ;;  %v4130_v13 = vmul.f32 -1.442695, %v2227_v16  ;;  %v7620_v36 = vld [vmem:[#allocation72_spill] sm:$0xff] }
 0x4bf   : > { %v2188_v50 = vpop.f32.mrf.mxu0  ;;  %v2229_v5 = vpop.f32.mrf.mxu1  ;;  %v2260_v45 = vunpack.c.l.bf16 %v7620_v36  ;;  %v2261_v11 = vunpack.c.h.bf16 %v7620_v36  ;;  %v7621_v36 = vld [vmem:[#allocation80_spill] sm:$0xff] }
 0x4c0   : > { %4605 = vpow2.f32 %v4129_v12 }
 0x4c1   : > { %4607 = vpow2.f32 %v4130_v13 }
 0x4cb   : > { %v4604_v17 = vpop.eup %4603 }
 0x4cc   : > { %v2234_v47 = vadd.f32 1.0, %v4604_v17 }
 0x4cd   : > { %v4606_v41 = vpop.eup %4605 }
 0x4ce   : > { %4609 = vrcp.f32 %v2234_v47  ;;  %v2240_v55 = vadd.f32 1.0, %v4606_v41  ;;  %v4608_v50 = vpop.eup %4607 }
 0x4cf   : > { %4611 = vtanh.f32 %v2225_v43  ;;  %v2247_v13 = vadd.f32 1.0, %v4608_v50  ;;  %v2262_v50 = vunpack.c.l.bf16 %v7621_v36 }
 0x4d0   : > { %4613 = vrcp.f32 %v2240_v55 }
 0x4d9   : > { %v2298_v0 = vpop.f32.mrf.mxu0  ;;  %v2339_v9 = vpop.f32.mrf.mxu1 }
 0x4da   : > { %v2346_v5 = vadd.f32 %v2298_v0, %v2260_v45  ;;  %v2263_v0 = vunpack.c.h.bf16 %v7621_v36 }
 0x4db   : > { %v4610_v8 = vpop.eup %4609  ;;  %v2300_v12 = vpop.f32.mrf.mxu0 }
 0x4dc   : > { %v2341_v16 = vpop.f32.mrf.mxu1  ;;  %v4612_v61 = vpop.eup %4611  ;;  %v4131_v14 = vmul.f32 -1.442695, %v2346_v5  ;;  %v2347_v17 = vadd.f32 %v2300_v12, %v2261_v11  ;;  %v2348_v11 = vadd.f32 %v2339_v9, %v2262_v50 }
 0x4dd   : > { %v4614_v56 = vpop.eup %4613  ;;  %v2302_v47 = vpop.f32.mrf.mxu0  ;;  %v2251_v43 = vmul.f32 %v4612_v61, %v4610_v8  ;;  %v2349_v5 = vadd.f32 %v2341_v16, %v2263_v0 }
 0x4de   : > { %v2343_v41 = vpop.f32.mrf.mxu1  ;;  %v2250_v55 = vmul.f32 %v4614_v56, %v6058_v27  ;;  %4615 = vpow2.f32 %v4131_v14  ;;  %v4132_v25 = vmul.f32 -1.442695, %v2347_v17 }
 0x4df   : > { %v2303_v20 = vpop.f32.mrf.mxu0  ;;  %v4133_v12 = vmul.f32 -1.442695, %v2349_v5 }
 0x4e0   : > { %v2344_v35 = vpop.f32.mrf.mxu1  ;;  %v6324_v45 = vadd.f32 %v2251_v43, %v2250_v55  ;;  %4617 = vpow2.f32 %v4132_v25 }
 0x4e1   : > { %4619 = vrcp.f32 %v2247_v13 }
 0x4e2   : > { %4621 = vtanh.f32 %v6324_v45 }
 0x4e3   : > { %4623 = vtanh.f32 %v2348_v11  ;;  %v6337_v11 = vld [vmem:[#allocation9 + $0xe0] ss:$16 sps:$4 sm:$0xff]  }
 0x4e4   : > { %4625 = vpow2.f32 %v4133_v12  ;;  %v6341_v12 = vld [vmem:[#allocation9 + $0xc4] ss:$16 sps:$4 sm:$0xff]  }
 0x4eb   : > { %v4616_v61 = vpop.eup %4615 }
 0x4ec   : > { %v2353_v8 = vadd.f32 1.0, %v4616_v61  ;;  %v6351_v61 = vld [vmem:[#allocation9 + $0xa4] ss:$16 sps:$4 sm:$0xff]  }
 0x4ed   : > { %v4618_v56 = vpop.eup %4617 }
 0x4ee   : > { %v4620_v20 = vpop.eup %4619  ;;  %4627 = vrcp.f32 %v2353_v8  ;;  %v2359_v27 = vadd.f32 1.0, %v4618_v56  ;;  %v6363_v8 = vld [vmem:[#allocation9 + $0x80] ss:$16 sps:$4 sm:$0xff]  }
 0x4ef   : > { %v4622_v35 = vpop.eup %4621  ;;  %v6379_v56 = vld [vmem:[#allocation9 + $0x40] ss:$16 sps:$4 sm:$0xff]  }
 0x4f0   : > { %4629 = vrcp.f32 %v2359_v27  ;;  %v6329_v25 = vmul.f32 %v4622_v35, %v4620_v20  ;;  %v4624_v16 = vpop.eup %4623  ;;  %v6383_v20 = vld [vmem:[#allocation9 + $0x24] ss:$16 sps:$4 sm:$0xff]   ;;  %v7627_v35 = vld [vmem:[#allocation29_spill] sm:$0xff] }
 0x4f1   : > { %v4626_v9 = vpop.eup %4625  ;;  %v7626_v27 = vld [vmem:[#allocation28_spill] sm:$0xff] }
 0x4f2   : > { %7622 = vst [vmem:[#allocation71_spill] sm:$0xff] %v6329_v25  ;;  %v2375_v14 = vpack.c.bf16 %v6329_v25, %v6329_v25  ;;  %v2366_v41 = vadd.f32 1.0, %v4626_v9  ;;  %v7630_v9 = vld [vmem:[#allocation32_spill] sm:$0xff]  ;;  %v7640_v25 = vld [vmem:[#allocation42_spill] sm:$0xff] }
 0x4f4   : > { %2408 = vmatprep.mubr.bf16.mxu0 %v2375_v14  ;;  %2449 = vmatprep.mubr.bf16.mxu1 %v2375_v14  ;;  %4631 = vrcp.f32 %v2366_v41  ;;  %v7628_v14 = vld [vmem:[#allocation30_spill] sm:$0xff]  ;;  %v7634_v41 = vld [vmem:[#allocation36_spill] sm:$0xff] }
 0x4fb   : > { %v4628_v17 = vpop.eup %4627 }
 0x4fc   : > { %v2370_v13 = vmul.f32 %v4628_v17, %v4624_v16  ;;  %v7629_v16 = vld [vmem:[#allocation31_spill] sm:$0xff]  ;;  %v7631_v17 = vld [vmem:[#allocation33_spill] sm:$0xff] }
 0x4fd   : > { %v4630_v47 = vpop.eup %4629 }
 0x4fe   : > { %v2369_v43 = vmul.f32 %v4630_v47, %v6068_v10  ;;  %v6347_v10 = vld [vmem:[#allocation9 + $0xc0] ss:$16 sps:$4 sm:$0xff]   ;;  %v7633_v47 = vld [vmem:[#allocation35_spill] sm:$0xff] }
 0x500   : > { %v6334_v55 = vadd.f32 %v2370_v13, %v2369_v43  ;;  %v7632_v13 = vld [vmem:[#allocation34_spill] sm:$0xff]  ;;  %v7635_v43 = vld [vmem:[#allocation37_spill] sm:$0xff] }
 0x501   : > { %v4632_v36 = vpop.eup %4631 }
 0x502   : > { %4633 = vtanh.f32 %v6334_v55 }
 0x50f   : > { %v4634_v0 = vpop.eup %4633 }
 0x510   : > { %v2373_v5 = vmul.f32 %v4634_v0, %v4632_v36  ;;  %v7636_v36 = vld [vmem:[#allocation38_spill] sm:$0xff]  ;;  %v7637_v0 = vld [vmem:[#allocation39_spill] sm:$0xff] }
 0x512   : > { %v2374_v50 = vpack.c.bf16 %v2373_v5, %v2373_v5  ;;  %v7638_v5 = vld [vmem:[#allocation40_spill] sm:$0xff] }
 0x514   : > { %2409 = vmatmul.mubr.bf16.vlgmr.msra.gmra.mxu0 %v2374_v50  ;;  %2450 = vmatmul.mubr.bf16.vlgmr.msra.gmra.mxu1 %v2374_v50 }
 0x515   : > { %2492 = vmatpush1.bf16.msra.mxu0 %v6337_v11  ;;  %2533 = vmatpush1.bf16.msra.mxu1 %v5936_v38  ;;  %v6355_v38 = vld [vmem:[#allocation9 + $0xa0] ss:$16 sps:$4 sm:$0xff]  }
 0x516   : > { %2493 = vmatprep.subr.bf16.mxu0 %v6341_v12  ;;  %2534 = vmatprep.subr.bf16.mxu1 %v5940_v49  ;;  %v6359_v49 = vld [vmem:[#allocation9 + $0x84] ss:$16 sps:$4 sm:$0xff]  }
 0x517   : > { %2523 = vmatprep.mubr.bf16.mxu0 %v7459_v57  ;;  %2564 = vmatprep.mubr.bf16.mxu1 %v7459_v57 }
 0x519   : > { %2494 = vmatpush1.bf16.msra.mxu0 %v6347_v10  ;;  %2535 = vmatpush1.bf16.msra.mxu1 %v5946_v44  ;;  %v6367_v44 = vld [vmem:[#allocation9 + $0x64] ss:$16 sps:$4 sm:$0xff]  }
 0x51a   : > { %2495 = vmatprep.subr.bf16.mxu0 %v6351_v61  ;;  %2536 = vmatprep.subr.bf16.mxu1 %v5950_v52  ;;  %v6371_v52 = vld [vmem:[#allocation9 + $0x60] ss:$16 sps:$4 sm:$0xff]  }
 0x51d   : > { %2496 = vmatpush1.bf16.msra.mxu0 %v6355_v38  ;;  %2537 = vmatpush1.bf16.msra.mxu1 %v5954_v39  ;;  %v6375_v39 = vld [vmem:[#allocation9 + $0x44] ss:$16 sps:$4 sm:$0xff]  }
 0x51e   : > { %2497 = vmatprep.subr.bf16.mxu0 %v6359_v49  ;;  %2538 = vmatprep.subr.bf16.mxu1 %v6084_v53 }
 0x521   : > { %2498 = vmatpush1.bf16.msra.mxu0 %v6363_v8  ;;  %2539 = vmatpush1.bf16.msra.mxu1 %v6088_v42 }
 0x522   : > { %2499 = vmatprep.subr.bf16.mxu0 %v6367_v44  ;;  %2540 = vmatprep.subr.bf16.mxu1 %v6092_v46 }
 0x525   : > { %2500 = vmatpush1.bf16.msra.mxu0 %v6371_v52  ;;  %2541 = vmatpush1.bf16.msra.mxu1 %v6096_v40 }
 0x526   : > { %2501 = vmatprep.subr.bf16.mxu0 %v6375_v39  ;;  %2542 = vmatprep.subr.bf16.mxu1 %v6100_v62 }
 0x529   : > { %2502 = vmatpush1.bf16.msra.mxu0 %v6379_v56  ;;  %2543 = vmatpush1.bf16.msra.mxu1 %v6104_v63 }
 0x52a   : > { %2503 = vmatprep.subr.bf16.mxu0 %v6383_v20  ;;  %2544 = vmatprep.subr.bf16.mxu1 %v6108_v58 }
 0x52d   : > { %2504 = vmatpush1.bf16.msra.mxu0 %v5971_v4  ;;  %2545 = vmatpush1.bf16.msra.mxu1 %v6112_v1  ;;  %v7623_v4 = vld [vmem:[#allocation25_spill] sm:$0xff] }
 0x52e   : > { %2505 = vmatprep.subr.bf16.mxu0 %v5975_v6  ;;  %2546 = vmatprep.subr.bf16.mxu1 %v6116_v2  ;;  %v7624_v6 = vld [vmem:[#allocation26_spill] sm:$0xff] }
 0x531   : > { %2506 = vmatpush1.bf16.msra.mxu0 %v5979_v7  ;;  %2547 = vmatpush1.bf16.msra.mxu1 %v6120_v3  ;;  %v7625_v7 = vld [vmem:[#allocation27_spill] sm:$0xff] }
 0x532   : > { %2603 = vmatprep.subr.bf16.mxu0 %v6123_v48  ;;  %2644 = vmatprep.subr.bf16.mxu1 %v6126_v60 }
 0x534   : > { %2524 = vmatmul.mubr.bf16.vlgmr.msra.gmra.mxu0 %v2374_v50  ;;  %2565 = vmatmul.mubr.bf16.vlgmr.msra.gmra.mxu1 %v2374_v50  ;;  %v7639_v50 = vld [vmem:[#allocation41_spill] sm:$0xff] }
 0x535   : > { %2604 = vmatpush1.bf16.msra.mxu0 %v6129_v59  ;;  %2645 = vmatpush1.bf16.msra.mxu1 %v6132_v15 }
 0x536   : > { %2605 = vmatprep.subr.bf16.mxu0 %v6135_v18  ;;  %2646 = vmatprep.subr.bf16.mxu1 %v6138_v19 }
 0x539   : > { %2606 = vmatpush1.bf16.msra.mxu0 %v6141_v21  ;;  %2647 = vmatpush1.bf16.msra.mxu1 %v6144_v22 }
 0x53a   : > { %2607 = vmatprep.subr.bf16.mxu0 %v6147_v23  ;;  %2648 = vmatprep.subr.bf16.mxu1 %v6150_v24 }
 0x53d   : > { %2608 = vmatpush1.bf16.msra.mxu0 %v6153_v26  ;;  %2649 = vmatpush1.bf16.msra.mxu1 %v6156_v28 }
 0x53e   : > { %2609 = vmatprep.subr.bf16.mxu0 %v6159_v29  ;;  %2650 = vmatprep.subr.bf16.mxu1 %v6162_v31 }
 0x541   : > { %2610 = vmatpush1.bf16.msra.mxu0 %v6165_v33  ;;  %2651 = vmatpush1.bf16.msra.mxu1 %v6168_v51 }
 0x542   : > { %2611 = vmatprep.subr.bf16.mxu0 %v6171_v34  ;;  %2652 = vmatprep.subr.bf16.mxu1 %v6174_v30 }
 0x545   : > { %2612 = vmatpush1.bf16.msra.mxu0 %v6177_v54  ;;  %2653 = vmatpush1.bf16.msra.mxu1 %v6180_v32 }
 0x546   : > { %2613 = vmatprep.subr.bf16.mxu0 %v6183_v37  ;;  %2654 = vmatprep.subr.bf16.mxu1 %v7623_v4  ;;  %v7671_v37 = vld [vmem:[#allocation88_spill] sm:$0xff] }
 0x549   : > { %2614 = vmatpush1.bf16.msra.mxu0 %v7624_v6  ;;  %2655 = vmatpush1.bf16.msra.mxu1 %v7625_v7  ;;  %v7670_v6 = vld [vmem:[#allocation87_spill] sm:$0xff] }
 0x54a   : > { %2615 = vmatprep.subr.bf16.mxu0 %v7626_v27  ;;  %2656 = vmatprep.subr.bf16.mxu1 %v7627_v35 }
 0x54d   : > { %2616 = vmatpush1.bf16.msra.mxu0 %v7628_v14  ;;  %2657 = vmatpush1.bf16.msra.mxu1 %v7629_v16 }
 0x54e   : > { %2617 = vmatprep.subr.bf16.mxu0 %v7630_v9  ;;  %2658 = vmatprep.subr.bf16.mxu1 %v7631_v17  ;;  %v7641_v9 = vld [vmem:[#allocation43_spill] sm:$0xff]  ;;  %v7642_v17 = vld [vmem:[#allocation44_spill] sm:$0xff] }
 0x551   : > { %2618 = vmatpush1.bf16.msra.mxu0 %v7632_v13  ;;  %2659 = vmatpush1.bf16.msra.mxu1 %v7633_v47  ;;  %v7643_v13 = vld [vmem:[#allocation45_spill] sm:$0xff]  ;;  %v7644_v47 = vld [vmem:[#allocation46_spill] sm:$0xff] }
 0x552   : > { %2619 = vmatprep.subr.bf16.mxu0 %v7634_v41  ;;  %2660 = vmatprep.subr.bf16.mxu1 %v7635_v43  ;;  %v7645_v41 = vld [vmem:[#allocation47_spill] sm:$0xff]  ;;  %v7646_v43 = vld [vmem:[#allocation48_spill] sm:$0xff] }
 0x555   : > { %2620 = vmatpush2.bf16.msra.mxu0 %v7636_v36  ;;  %2661 = vmatpush2.bf16.msra.mxu1 %v7637_v0  ;;  %v7647_v36 = vld [vmem:[#allocation49_spill] sm:$0xff]  ;;  %v7648_v0 = vld [vmem:[#allocation50_spill] sm:$0xff] }
 0x556   : > { %2621 = vmatprep.subr.bf16.mxu0 %v7638_v5  ;;  %2662 = vmatprep.subr.bf16.mxu1 %v7639_v50  ;;  %v7649_v5 = vld [vmem:[#allocation51_spill] sm:$0xff]  ;;  %v7650_v50 = vld [vmem:[#allocation52_spill] sm:$0xff] }
 0x559   : > { %2622 = vmatpush2.bf16.msra.mxu0 %v7640_v25  ;;  %2663 = vmatpush2.bf16.msra.mxu1 %v7641_v9  ;;  %v7651_v25 = vld [vmem:[#allocation53_spill] sm:$0xff]  ;;  %v7652_v9 = vld [vmem:[#allocation54_spill] sm:$0xff] }
 0x55a   : > { %2623 = vmatprep.subr.bf16.mxu0 %v7642_v17  ;;  %2664 = vmatprep.subr.bf16.mxu1 %v7643_v13  ;;  %v7653_v17 = vld [vmem:[#allocation55_spill] sm:$0xff]  ;;  %v7654_v13 = vld [vmem:[#allocation56_spill] sm:$0xff] }
 0x55d   : > { %2624 = vmatpush2.bf16.msra.mxu0 %v7644_v47  ;;  %2665 = vmatpush2.bf16.msra.mxu1 %v7645_v41  ;;  %v7655_v47 = vld [vmem:[#allocation57_spill] sm:$0xff]  ;;  %v7656_v41 = vld [vmem:[#allocation58_spill] sm:$0xff] }
 0x55e   : > { %2625 = vmatprep.subr.bf16.mxu0 %v7646_v43  ;;  %2666 = vmatprep.subr.bf16.mxu1 %v7647_v36  ;;  %v7657_v43 = vld [vmem:[#allocation59_spill] sm:$0xff]  ;;  %v7658_v36 = vld [vmem:[#allocation60_spill] sm:$0xff] }
 0x561   : > { %2626 = vmatpush2.bf16.msra.mxu0 %v7648_v0  ;;  %2667 = vmatpush2.bf16.msra.mxu1 %v7649_v5  ;;  %v7659_v0 = vld [vmem:[#allocation61_spill] sm:$0xff]  ;;  %v7660_v5 = vld [vmem:[#allocation62_spill] sm:$0xff] }
 0x562   : > { %2627 = vmatprep.subr.bf16.mxu0 %v7650_v50  ;;  %2668 = vmatprep.subr.bf16.mxu1 %v7651_v25  ;;  %v7661_v50 = vld [vmem:[#allocation63_spill] sm:$0xff]  ;;  %v7662_v25 = vld [vmem:[#allocation64_spill] sm:$0xff] }
 0x565   : > { %2628 = vmatpush2.bf16.msra.mxu0 %v7652_v9  ;;  %2669 = vmatpush2.bf16.msra.mxu1 %v7653_v17  ;;  %v7663_v9 = vld [vmem:[#allocation65_spill] sm:$0xff]  ;;  %v7664_v17 = vld [vmem:[#allocation66_spill] sm:$0xff] }
 0x566   : > { %2629 = vmatprep.subr.bf16.mxu0 %v7654_v13  ;;  %2670 = vmatprep.subr.bf16.mxu1 %v7655_v47  ;;  %v7665_v13 = vld [vmem:[#allocation85_spill] sm:$0xff]  ;;  %v6457_v47 = vld [vmem:[#allocation9 + $0xe4] ss:$16 sps:$4 sm:$0xff]  }
 0x567   : > { %7666 = vst [vmem:[#allocation79_spill] sm:$0xff] %v6457_v47 }
 0x569   : > { %2630 = vmatpush2.bf16.msra.mxu0 %v7656_v41  ;;  %2671 = vmatpush2.bf16.msra.mxu1 %v7657_v43  ;;  %v7667_v43 = vld [vmem:[#allocation19_spill] sm:$0xff]  ;;  %v7668_v41 = vld [vmem:[#allocation18_spill] sm:$0xff] }
 0x56a   : > { %2631 = vmatprep.subr.bf16.mxu0 %v7658_v36  ;;  %2672 = vmatprep.subr.bf16.mxu1 %v7659_v0 }
 0x56d   : > { %2632 = vmatpush2.bf16.msra.mxu0 %v7660_v5  ;;  %2673 = vmatpush2.bf16.msra.mxu1 %v7661_v50 }
 0x56e   : > { %2633 = vmatprep.subr.bf16.mxu0 %v7662_v25  ;;  %2674 = vmatprep.subr.bf16.mxu1 %v7663_v9  ;;  %v7669_v25 = vld [vmem:[#allocation86_spill] sm:$0xff] }
 0x571   : > { %2634 = vmatpush2.bf16.msra.mxu0 %v7664_v17  ;;  %2675 = vmatpush2.bf16.msra.mxu1 %v7665_v13 }
 0x572   : > { %2718 = vmatprep.subr.bf16.mxu0 %v6457_v47  ;;  %2759 = vmatprep.subr.bf16.mxu1 %v7667_v43 }
 0x5d4   : > { %v2410_v36 = vpop.f32.mrf.mxu0  ;;  %v2451_v0 = vpop.f32.mrf.mxu1 }
 0x5d5   : > { %v2411_v5 = vadd.f32 %v2410_v36, %v7668_v41  ;;  %v2452_v32 = vadd.f32 %v2451_v0, %v7671_v37 }
 0x5d6   : > { %v2412_v16 = vpop.f32.mrf.mxu0  ;;  %v2453_v50 = vpop.f32.mrf.mxu1 }
 0x5d7   : > { %v4134_v14 = vmul.f32 -1.442695, %v2411_v5  ;;  %v2413_v35 = vadd.f32 %v2412_v16, %v7669_v25  ;;  %v2454_v47 = vadd.f32 %v2453_v50, %v7670_v6  ;;  %v7672_v16 = vld [vmem:[#allocation73_spill] sm:$0xff] }
 0x5d8   : > { %v2414_v9 = vpop.f32.mrf.mxu0  ;;  %v2455_v27 = vpop.f32.mrf.mxu1 }
 0x5d9   : > { %4635 = vpow2.f32 %v4134_v14  ;;  %v4135_v17 = vmul.f32 -1.442695, %v2413_v35  ;;  %v4136_v4 = vmul.f32 -1.442695, %v2454_v47  ;;  %v2487_v27 = vunpack.c.l.bf16 %v7672_v16 }
 0x5da   : > { %v2415_v13 = vpop.f32.mrf.mxu0  ;;  %v2456_v7 = vpop.f32.mrf.mxu1 }
 0x5db   : > { %4637 = vpow2.f32 %v4135_v17  ;;  %v2488_v17 = vunpack.c.h.bf16 %v7672_v16  ;;  %v7673_v16 = vld [vmem:[#allocation81_spill] sm:$0xff] }
 0x5dc   : > { %4639 = vpow2.f32 %v4136_v4 }
 0x5e6   : > { %v4636_v43 = vpop.eup %4635 }
 0x5e7   : > { %v2461_v54 = vadd.f32 1.0, %v4636_v43 }
 0x5e8   : > { %v4638_v36 = vpop.eup %4637 }
 0x5e9   : > { %4641 = vrcp.f32 %v2461_v54  ;;  %v2467_v5 = vadd.f32 1.0, %v4638_v36  ;;  %v4640_v9 = vpop.eup %4639 }
 0x5ea   : > { %4643 = vtanh.f32 %v2452_v32  ;;  %v2474_v4 = vadd.f32 1.0, %v4640_v9  ;;  %v2489_v9 = vunpack.c.l.bf16 %v7673_v16 }
 0x5eb   : > { %4645 = vrcp.f32 %v2467_v5 }
 0x5f4   : > { %v2525_v14 = vpop.f32.mrf.mxu0  ;;  %v2566_v35 = vpop.f32.mrf.mxu1 }
 0x5f5   : > { %v2573_v7 = vadd.f32 %v2525_v14, %v2487_v27  ;;  %v2490_v14 = vunpack.c.h.bf16 %v7673_v16 }
 0x5f6   : > { %v4642_v13 = vpop.eup %4641  ;;  %v2527_v47 = vpop.f32.mrf.mxu0 }
 0x5f7   : > { %v2568_v50 = vpop.f32.mrf.mxu1  ;;  %v4644_v6 = vpop.eup %4643  ;;  %v4137_v0 = vmul.f32 -1.442695, %v2573_v7  ;;  %v2574_v43 = vadd.f32 %v2527_v47, %v2488_v17  ;;  %v2575_v17 = vadd.f32 %v2566_v35, %v2489_v9 }
 0x5f8   : > { %v4646_v37 = vpop.eup %4645  ;;  %v2529_v54 = vpop.f32.mrf.mxu0  ;;  %v2478_v32 = vmul.f32 %v4644_v6, %v4642_v13  ;;  %v2576_v7 = vadd.f32 %v2568_v50, %v2490_v14 }
 0x5f9   : > { %v2570_v36 = vpop.f32.mrf.mxu1  ;;  %v2477_v5 = vmul.f32 %v4646_v37, %v6324_v45  ;;  %4647 = vpow2.f32 %v4137_v0  ;;  %v4138_v25 = vmul.f32 -1.442695, %v2574_v43 }
 0x5fa   : > { %v2530_v41 = vpop.f32.mrf.mxu0  ;;  %v4139_v47 = vmul.f32 -1.442695, %v2576_v7 }
 0x5fb   : > { %v2571_v30 = vpop.f32.mrf.mxu1  ;;  %v6468_v27 = vadd.f32 %v2478_v32, %v2477_v5  ;;  %4649 = vpow2.f32 %v4138_v25 }
 0x5fc   : > { %4651 = vrcp.f32 %v2474_v4 }
 0x5fd   : > { %4653 = vtanh.f32 %v6468_v27 }
 0x5fe   : > { %4655 = vtanh.f32 %v2575_v17  ;;  %v6482_v17 = vld [vmem:[#allocation9 + $0xe8] ss:$16 sps:$4 sm:$0xff]  }
 0x5ff   : > { %4657 = vpow2.f32 %v4139_v47  ;;  %v6492_v47 = vld [vmem:[#allocation9 + $0xc8] ss:$16 sps:$4 sm:$0xff]  }
 0x606   : > { %v4648_v6 = vpop.eup %4647 }
 0x607   : > { %v2580_v13 = vadd.f32 1.0, %v4648_v6  ;;  %v6496_v6 = vld [vmem:[#allocation9 + $0xac] ss:$16 sps:$4 sm:$0xff]  }
 0x608   : > { %v4650_v37 = vpop.eup %4649 }
 0x609   : > { %v4652_v45 = vpop.eup %4651  ;;  %4659 = vrcp.f32 %v2580_v13  ;;  %v2586_v30 = vadd.f32 1.0, %v4650_v37  ;;  %v6500_v13 = vld [vmem:[#allocation9 + $0xa8] ss:$16 sps:$4 sm:$0xff]  }
 0x60a   : > { %v4654_v41 = vpop.eup %4653  ;;  %v7699_v37 = vld [vmem:[#allocation45_spill] sm:$0xff] }
 0x60b   : > { %4661 = vrcp.f32 %v2586_v30  ;;  %v6473_v25 = vmul.f32 %v4654_v41, %v4652_v45  ;;  %v4656_v50 = vpop.eup %4655  ;;  %v7700_v45 = vld [vmem:[#allocation46_spill] sm:$0xff]  ;;  %v7701_v30 = vld [vmem:[#allocation47_spill] sm:$0xff]  ;;  %v7702_v41 = vld [vmem:[#allocation48_spill] sm:$0xff] }
 0x60c   : > { %v4658_v35 = vpop.eup %4657 }
 0x60d   : > { %7674 = vst [vmem:[#allocation72_spill] sm:$0xff] %v6473_v25  ;;  %v2602_v0 = vpack.c.bf16 %v6473_v25, %v6473_v25  ;;  %v2593_v36 = vadd.f32 1.0, %v4658_v35  ;;  %v7705_v35 = vld [vmem:[#allocation51_spill] sm:$0xff]  ;;  %v6777_v25 = vld [vmem:[#allocation10 + $0x1c4] ss:$16 sps:$4 sm:$0xff]  }
 0x60f   : > { %2635 = vmatprep.mubr.bf16.mxu0 %v2602_v0  ;;  %2676 = vmatprep.mubr.bf16.mxu1 %v2602_v0  ;;  %4663 = vrcp.f32 %v2593_v36  ;;  %v7703_v0 = vld [vmem:[#allocation49_spill] sm:$0xff]  ;;  %v7709_v36 = vld [vmem:[#allocation55_spill] sm:$0xff] }
 0x616   : > { %v4660_v43 = vpop.eup %4659 }
 0x617   : > { %v2597_v4 = vmul.f32 %v4660_v43, %v4656_v50  ;;  %v7704_v50 = vld [vmem:[#allocation50_spill] sm:$0xff]  ;;  %v7706_v43 = vld [vmem:[#allocation52_spill] sm:$0xff] }
 0x618   : > { %v4662_v54 = vpop.eup %4661 }
 0x619   : > { %v2596_v32 = vmul.f32 %v4662_v54, %v6334_v55  ;;  %v6486_v55 = vld [vmem:[#allocation9 + $0xcc] ss:$16 sps:$4 sm:$0xff]   ;;  %v7708_v54 = vld [vmem:[#allocation54_spill] sm:$0xff] }
 0x61b   : > { %v6478_v5 = vadd.f32 %v2597_v4, %v2596_v32  ;;  %v7707_v4 = vld [vmem:[#allocation53_spill] sm:$0xff]  ;;  %v7710_v32 = vld [vmem:[#allocation56_spill] sm:$0xff] }
 0x61c   : > { %v4664_v16 = vpop.eup %4663 }
 0x61d   : > { %4665 = vtanh.f32 %v6478_v5 }
 0x62a   : > { %v4666_v14 = vpop.eup %4665 }
 0x62b   : > { %v2600_v7 = vmul.f32 %v4666_v14, %v4664_v16  ;;  %v7711_v16 = vld [vmem:[#allocation57_spill] sm:$0xff]  ;;  %v7712_v14 = vld [vmem:[#allocation58_spill] sm:$0xff] }
 0x62d   : > { %v2601_v9 = vpack.c.bf16 %v2600_v7, %v2600_v7  ;;  %v7713_v7 = vld [vmem:[#allocation59_spill] sm:$0xff] }
 0x62f   : > { %2636 = vmatmul.mubr.bf16.vlgmr.msra.gmra.mxu0 %v2601_v9  ;;  %2677 = vmatmul.mubr.bf16.vlgmr.msra.gmra.mxu1 %v2601_v9 }
 0x630   : > { %2719 = vmatpush1.bf16.msra.mxu0 %v6337_v11  ;;  %2760 = vmatpush1.bf16.msra.mxu1 %v6482_v17 }
 0x631   : > { %2720 = vmatprep.subr.bf16.mxu0 %v6341_v12  ;;  %2761 = vmatprep.subr.bf16.mxu1 %v6486_v55 }
 0x632   : > { %2750 = vmatprep.mubr.bf16.mxu0 %v7459_v57  ;;  %2791 = vmatprep.mubr.bf16.mxu1 %v7459_v57 }
 0x634   : > { %2721 = vmatpush1.bf16.msra.mxu0 %v6347_v10  ;;  %2762 = vmatpush1.bf16.msra.mxu1 %v6492_v47 }
 0x635   : > { %2722 = vmatprep.subr.bf16.mxu0 %v6351_v61  ;;  %2763 = vmatprep.subr.bf16.mxu1 %v6496_v6 }
 0x638   : > { %2723 = vmatpush1.bf16.msra.mxu0 %v6355_v38  ;;  %2764 = vmatpush1.bf16.msra.mxu1 %v6500_v13 }
 0x639   : > { %2724 = vmatprep.subr.bf16.mxu0 %v6359_v49  ;;  %2765 = vmatprep.subr.bf16.mxu1 %v6084_v53  ;;  %v6517_v53 = vld [vmem:[#allocation9 + $0x20] ss:$16 sps:$4 sm:$0xff]  }
 0x63c   : > { %2725 = vmatpush1.bf16.msra.mxu0 %v6363_v8  ;;  %2766 = vmatpush1.bf16.msra.mxu1 %v6088_v42  ;;  %v6521_v42 = vld [vmem:[#allocation9 + $0x4] ss:$16 sps:$4 sm:$0xff]  }
 0x63d   : > { %2726 = vmatprep.subr.bf16.mxu0 %v6367_v44  ;;  %2767 = vmatprep.subr.bf16.mxu1 %v6092_v46  ;;  %v6525_v46 = vld [vmem:[#allocation9] ss:$16 sps:$4 sm:$0xff]  }
 0x640   : > { %2727 = vmatpush1.bf16.msra.mxu0 %v6371_v52  ;;  %2768 = vmatpush1.bf16.msra.mxu1 %v6096_v40  ;;  %v7675_v40 = vld [vmem:[#allocation21_spill] sm:$0xff] }
 0x641   : > { %2728 = vmatprep.subr.bf16.mxu0 %v6375_v39  ;;  %2769 = vmatprep.subr.bf16.mxu1 %v6100_v62  ;;  %v7676_v62 = vld [vmem:[#allocation22_spill] sm:$0xff] }
 0x644   : > { %2729 = vmatpush1.bf16.msra.mxu0 %v6379_v56  ;;  %2770 = vmatpush1.bf16.msra.mxu1 %v6104_v63  ;;  %v7677_v63 = vld [vmem:[#allocation23_spill] sm:$0xff] }
 0x645   : > { %2730 = vmatprep.subr.bf16.mxu0 %v6383_v20  ;;  %2771 = vmatprep.subr.bf16.mxu1 %v6108_v58  ;;  %v7678_v58 = vld [vmem:[#allocation24_spill] sm:$0xff] }
 0x648   : > { %2731 = vmatpush1.bf16.msra.mxu0 %v6517_v53  ;;  %2772 = vmatpush1.bf16.msra.mxu1 %v6112_v1  ;;  %v7679_v1 = vld [vmem:[#allocation25_spill] sm:$0xff] }
 0x649   : > { %2732 = vmatprep.subr.bf16.mxu0 %v6521_v42  ;;  %2773 = vmatprep.subr.bf16.mxu1 %v6116_v2  ;;  %v7680_v2 = vld [vmem:[#allocation26_spill] sm:$0xff] }
 0x64c   : > { %2733 = vmatpush1.bf16.msra.mxu0 %v6525_v46  ;;  %2774 = vmatpush1.bf16.msra.mxu1 %v6120_v3  ;;  %v7681_v3 = vld [vmem:[#allocation27_spill] sm:$0xff] }
 0x64d   : > { %2830 = vmatprep.subr.bf16.mxu0 %v6123_v48  ;;  %2871 = vmatprep.subr.bf16.mxu1 %v6126_v60  ;;  %v7682_v48 = vld [vmem:[#allocation28_spill] sm:$0xff]  ;;  %v7683_v60 = vld [vmem:[#allocation29_spill] sm:$0xff] }
 0x64f   : > { %2751 = vmatmul.mubr.bf16.vlgmr.msra.gmra.mxu0 %v2601_v9  ;;  %2792 = vmatmul.mubr.bf16.vlgmr.msra.gmra.mxu1 %v2601_v9  ;;  %v7714_v9 = vld [vmem:[#allocation60_spill] sm:$0xff] }
 0x650   : > { %2831 = vmatpush1.bf16.msra.mxu0 %v6129_v59  ;;  %2872 = vmatpush1.bf16.msra.mxu1 %v6132_v15  ;;  %v7684_v59 = vld [vmem:[#allocation30_spill] sm:$0xff]  ;;  %v7685_v15 = vld [vmem:[#allocation31_spill] sm:$0xff] }
 0x651   : > { %2832 = vmatprep.subr.bf16.mxu0 %v6135_v18  ;;  %2873 = vmatprep.subr.bf16.mxu1 %v6138_v19  ;;  %v7686_v18 = vld [vmem:[#allocation32_spill] sm:$0xff]  ;;  %v7687_v19 = vld [vmem:[#allocation33_spill] sm:$0xff] }
 0x652   : > { %7745 = vst [vmem:[#allocation33_spill] sm:$0xff] %v6777_v25 }
 0x654   : > { %2833 = vmatpush1.bf16.msra.mxu0 %v6141_v21  ;;  %2874 = vmatpush1.bf16.msra.mxu1 %v6144_v22  ;;  %v7688_v21 = vld [vmem:[#allocation34_spill] sm:$0xff]  ;;  %v7689_v22 = vld [vmem:[#allocation35_spill] sm:$0xff] }
 0x655   : > { %2834 = vmatprep.subr.bf16.mxu0 %v6147_v23  ;;  %2875 = vmatprep.subr.bf16.mxu1 %v6150_v24  ;;  %v7690_v23 = vld [vmem:[#allocation36_spill] sm:$0xff]  ;;  %v7691_v24 = vld [vmem:[#allocation37_spill] sm:$0xff] }
 0x658   : > { %2835 = vmatpush1.bf16.msra.mxu0 %v6153_v26  ;;  %2876 = vmatpush1.bf16.msra.mxu1 %v6156_v28  ;;  %v7692_v26 = vld [vmem:[#allocation38_spill] sm:$0xff]  ;;  %v7693_v28 = vld [vmem:[#allocation39_spill] sm:$0xff] }
 0x659   : > { %2836 = vmatprep.subr.bf16.mxu0 %v6159_v29  ;;  %2877 = vmatprep.subr.bf16.mxu1 %v6162_v31  ;;  %v7694_v29 = vld [vmem:[#allocation40_spill] sm:$0xff]  ;;  %v7695_v31 = vld [vmem:[#allocation41_spill] sm:$0xff] }
 0x65c   : > { %2837 = vmatpush1.bf16.msra.mxu0 %v6165_v33  ;;  %2878 = vmatpush1.bf16.msra.mxu1 %v6168_v51  ;;  %v7696_v33 = vld [vmem:[#allocation42_spill] sm:$0xff]  ;;  %v7697_v51 = vld [vmem:[#allocation43_spill] sm:$0xff] }
 0x65d   : > { %2838 = vmatprep.subr.bf16.mxu0 %v6171_v34  ;;  %2879 = vmatprep.subr.bf16.mxu1 %v7675_v40  ;;  %v7698_v34 = vld [vmem:[#allocation44_spill] sm:$0xff]  ;;  %v7715_v40 = vld [vmem:[#allocation61_spill] sm:$0xff] }
 0x660   : > { %2839 = vmatpush1.bf16.msra.mxu0 %v7676_v62  ;;  %2880 = vmatpush1.bf16.msra.mxu1 %v7677_v63  ;;  %v7716_v62 = vld [vmem:[#allocation62_spill] sm:$0xff]  ;;  %v7717_v63 = vld [vmem:[#allocation63_spill] sm:$0xff] }
 0x661   : > { %2840 = vmatprep.subr.bf16.mxu0 %v7678_v58  ;;  %2881 = vmatprep.subr.bf16.mxu1 %v7679_v1  ;;  %v7718_v58 = vld [vmem:[#allocation64_spill] sm:$0xff]  ;;  %v7719_v1 = vld [vmem:[#allocation65_spill] sm:$0xff] }
 0x664   : > { %2841 = vmatpush1.bf16.msra.mxu0 %v7680_v2  ;;  %2882 = vmatpush1.bf16.msra.mxu1 %v7681_v3  ;;  %v7720_v2 = vld [vmem:[#allocation66_spill] sm:$0xff]  ;;  %v7721_v3 = vld [vmem:[#allocation85_spill] sm:$0xff] }
 0x665   : > { %2842 = vmatprep.subr.bf16.mxu0 %v7682_v48  ;;  %2883 = vmatprep.subr.bf16.mxu1 %v7683_v60  ;;  %v7722_v48 = vld [vmem:[#allocation79_spill] sm:$0xff] }
 0x666   : > { %v6594_v60 = vld [vmem:[#allocation9 + $0xec] ss:$16 sps:$4 sm:$0xff]  }
 0x668   : > { %2843 = vmatpush1.bf16.msra.mxu0 %v7684_v59  ;;  %2884 = vmatpush1.bf16.msra.mxu1 %v7685_v15 }
 0x669   : > { %2844 = vmatprep.subr.bf16.mxu0 %v7686_v18  ;;  %2885 = vmatprep.subr.bf16.mxu1 %v7687_v19  ;;  %v7723_v18 = vld [vmem:[#allocation18_spill] sm:$0xff] }
 0x66c   : > { %2845 = vmatpush1.bf16.msra.mxu0 %v7688_v21  ;;  %2886 = vmatpush1.bf16.msra.mxu1 %v7689_v22 }
 0x66d   : > { %2846 = vmatprep.subr.bf16.mxu0 %v7690_v23  ;;  %2887 = vmatprep.subr.bf16.mxu1 %v7691_v24  ;;  %v7724_v24 = vld [vmem:[#allocation86_spill] sm:$0xff] }
 0x670   : > { %2847 = vmatpush2.bf16.msra.mxu0 %v7692_v26  ;;  %2888 = vmatpush2.bf16.msra.mxu1 %v7693_v28 }
 0x671   : > { %2848 = vmatprep.subr.bf16.mxu0 %v7694_v29  ;;  %2889 = vmatprep.subr.bf16.mxu1 %v7695_v31 }
 0x674   : > { %2849 = vmatpush2.bf16.msra.mxu0 %v7696_v33  ;;  %2890 = vmatpush2.bf16.msra.mxu1 %v7697_v51 }
 0x675   : > { %2850 = vmatprep.subr.bf16.mxu0 %v7698_v34  ;;  %2891 = vmatprep.subr.bf16.mxu1 %v7699_v37  ;;  %v7725_v34 = vld [vmem:[#allocation87_spill] sm:$0xff] }
 0x678   : > { %2851 = vmatpush2.bf16.msra.mxu0 %v7700_v45  ;;  %2892 = vmatpush2.bf16.msra.mxu1 %v7701_v30 }
 0x679   : > { %2852 = vmatprep.subr.bf16.mxu0 %v7702_v41  ;;  %2893 = vmatprep.subr.bf16.mxu1 %v7703_v0  ;;  %v7726_v41 = vld [vmem:[#allocation88_spill] sm:$0xff] }
 0x67c   : > { %2853 = vmatpush2.bf16.msra.mxu0 %v7704_v50  ;;  %2894 = vmatpush2.bf16.msra.mxu1 %v7705_v35 }
 0x67d   : > { %2854 = vmatprep.subr.bf16.mxu0 %v7706_v43  ;;  %2895 = vmatprep.subr.bf16.mxu1 %v7707_v4  ;;  %v7727_v4 = vld [vmem:[#allocation74_spill] sm:$0xff] }
 0x680   : > { %2855 = vmatpush2.bf16.msra.mxu0 %v7708_v54  ;;  %2896 = vmatpush2.bf16.msra.mxu1 %v7709_v36  ;;  %v2714_v54 = vunpack.c.l.bf16 %v7727_v4 }
 0x681   : > { %2856 = vmatprep.subr.bf16.mxu0 %v7710_v32  ;;  %2897 = vmatprep.subr.bf16.mxu1 %v7711_v16 }
 0x684   : > { %2857 = vmatpush2.bf16.msra.mxu0 %v7712_v14  ;;  %2898 = vmatpush2.bf16.msra.mxu1 %v7713_v7  ;;  %v2715_v7 = vunpack.c.h.bf16 %v7727_v4 }
 0x685   : > { %2858 = vmatprep.subr.bf16.mxu0 %v7714_v9  ;;  %2899 = vmatprep.subr.bf16.mxu1 %v7715_v40 }
 0x688   : > { %2859 = vmatpush2.bf16.msra.mxu0 %v7716_v62  ;;  %2900 = vmatpush2.bf16.msra.mxu1 %v7717_v63 }
 0x689   : > { %2860 = vmatprep.subr.bf16.mxu0 %v7718_v58  ;;  %2901 = vmatprep.subr.bf16.mxu1 %v7719_v1 }
 0x68c   : > { %2861 = vmatpush2.bf16.msra.mxu0 %v7720_v2  ;;  %2902 = vmatpush2.bf16.msra.mxu1 %v7721_v3 }
 0x68d   : > { %2945 = vmatprep.subr.bf16.mxu0 %v7722_v48  ;;  %2986 = vmatprep.subr.bf16.mxu1 %v6594_v60 }
 0x6ef   : > { %v2637_v59 = vpop.f32.mrf.mxu0  ;;  %v2678_v15 = vpop.f32.mrf.mxu1 }
 0x6f0   : > { %v2638_v19 = vadd.f32 %v2637_v59, %v7723_v18  ;;  %v2679_v0 = vadd.f32 %v2678_v15, %v7726_v41 }
 0x6f1   : > { %v2639_v21 = vpop.f32.mrf.mxu0  ;;  %v2680_v22 = vpop.f32.mrf.mxu1 }
 0x6f2   : > { %v4140_v23 = vmul.f32 -1.442695, %v2638_v19  ;;  %v2640_v26 = vadd.f32 %v2639_v21, %v7724_v24  ;;  %v2681_v37 = vadd.f32 %v2680_v22, %v7725_v34 }
 0x6f3   : > { %v2641_v28 = vpop.f32.mrf.mxu0  ;;  %v2682_v29 = vpop.f32.mrf.mxu1 }
 0x6f4   : > { %4667 = vpow2.f32 %v4140_v23  ;;  %v4141_v31 = vmul.f32 -1.442695, %v2640_v26  ;;  %v4142_v45 = vmul.f32 -1.442695, %v2681_v37  ;;  %v7728_v29 = vld [vmem:[#allocation82_spill] sm:$0xff] }
 0x6f5   : > { %v2642_v33 = vpop.f32.mrf.mxu0  ;;  %v2683_v51 = vpop.f32.mrf.mxu1 }
 0x6f6   : > { %4669 = vpow2.f32 %v4141_v31  ;;  %v2717_v31 = vunpack.c.h.bf16 %v7728_v29  ;;  %v2716_v51 = vunpack.c.l.bf16 %v7728_v29  ;;  %v6702_v29 = vld [vmem:[#allocation10 + $0xa8] ss:$16 sps:$4 sm:$0xff]  }
 0x6f7   : > { %4671 = vpow2.f32 %v4142_v45 }
 0x701   : > { %v4668_v30 = vpop.eup %4667 }
 0x702   : > { %v2688_v50 = vadd.f32 1.0, %v4668_v30 }
 0x703   : > { %v4670_v35 = vpop.eup %4669 }
 0x704   : > { %4673 = vrcp.f32 %v2688_v50  ;;  %v2694_v43 = vadd.f32 1.0, %v4670_v35  ;;  %v4672_v16 = vpop.eup %4671 }
 0x705   : > { %4675 = vtanh.f32 %v2679_v0  ;;  %v2701_v3 = vadd.f32 1.0, %v4672_v16 }
 0x706   : > { %4677 = vrcp.f32 %v2694_v43 }
 0x70f   : > { %v2752_v36 = vpop.f32.mrf.mxu0  ;;  %v2793_v32 = vpop.f32.mrf.mxu1 }
 0x710   : > { %v2800_v14 = vadd.f32 %v2752_v36, %v2714_v54  ;;  %v2802_v37 = vadd.f32 %v2793_v32, %v2716_v51  ;;  %v6711_v51 = vld [vmem:[#allocation10 + $0x80] ss:$16 sps:$4 sm:$0xff]  }
 0x711   : > { %v4674_v9 = vpop.eup %4673  ;;  %v2754_v40 = vpop.f32.mrf.mxu0 }
 0x712   : > { %v2795_v62 = vpop.f32.mrf.mxu1  ;;  %v4676_v63 = vpop.eup %4675  ;;  %v4143_v58 = vmul.f32 -1.442695, %v2800_v14  ;;  %v2801_v1 = vadd.f32 %v2754_v40, %v2715_v7 }
 0x713   : > { %v4678_v2 = vpop.eup %4677  ;;  %v2756_v59 = vpop.f32.mrf.mxu0  ;;  %v2705_v19 = vmul.f32 %v4676_v63, %v4674_v9  ;;  %v2803_v33 = vadd.f32 %v2795_v62, %v2717_v31  ;;  %v6705_v31 = vld [vmem:[#allocation10 + $0x84] ss:$16 sps:$4 sm:$0xff]  }
 0x714   : > { %v2797_v15 = vpop.f32.mrf.mxu1  ;;  %v2704_v21 = vmul.f32 %v4678_v2, %v6468_v27  ;;  %4679 = vpow2.f32 %v4143_v58  ;;  %v4144_v22 = vmul.f32 -1.442695, %v2801_v1  ;;  %v6681_v59 = vld [vmem:[#allocation10 + $0xc4] ss:$16 sps:$4 sm:$0xff]  }
 0x715   : > { %v2757_v23 = vpop.f32.mrf.mxu0  ;;  %v4145_v45 = vmul.f32 -1.442695, %v2803_v33  ;;  %v6684_v15 = vld [vmem:[#allocation10 + $0xcc] ss:$16 sps:$4 sm:$0xff]  }
 0x716   : > { %v2798_v26 = vpop.f32.mrf.mxu1  ;;  %v6604_v28 = vadd.f32 %v2705_v19, %v2704_v21  ;;  %4681 = vpow2.f32 %v4144_v22  ;;  %v6687_v19 = vld [vmem:[#allocation10 + $0xc0] ss:$16 sps:$4 sm:$0xff]   ;;  %v6690_v21 = vld [vmem:[#allocation10 + $0xc8] ss:$16 sps:$4 sm:$0xff]   ;;  %v6693_v22 = vld [vmem:[#allocation10 + $0xa4] ss:$16 sps:$4 sm:$0xff]  }
 0x717   : > { %4683 = vrcp.f32 %v2701_v3  ;;  %v6678_v3 = vld [vmem:[#allocation10 + $0xe8] ss:$16 sps:$4 sm:$0xff]   ;;  %v6696_v23 = vld [vmem:[#allocation10 + $0xac] ss:$16 sps:$4 sm:$0xff]   ;;  %v6699_v26 = vld [vmem:[#allocation10 + $0xa0] ss:$16 sps:$4 sm:$0xff]  }
 0x718   : > { %4685 = vtanh.f32 %v6604_v28  ;;  %v6708_v33 = vld [vmem:[#allocation10 + $0x8c] ss:$16 sps:$4 sm:$0xff]  }
 0x719   : > { %4687 = vtanh.f32 %v2802_v37  ;;  %v6714_v37 = vld [vmem:[#allocation10 + $0x88] ss:$16 sps:$4 sm:$0xff]  }
 0x71a   : > { %4689 = vpow2.f32 %v4145_v45  ;;  %v6717_v45 = vld [vmem:[#allocation10 + $0x64] ss:$16 sps:$4 sm:$0xff]  }
 0x721   : > { %v4680_v30 = vpop.eup %4679 }
 0x722   : > { %v2807_v0 = vadd.f32 1.0, %v4680_v30  ;;  %v6720_v30 = vld [vmem:[#allocation10 + $0x6c] ss:$16 sps:$4 sm:$0xff]  }
 0x723   : > { %v4682_v27 = vpop.eup %4681 }
 0x724   : > { %v4684_v50 = vpop.eup %4683  ;;  %4691 = vrcp.f32 %v2807_v0  ;;  %v2813_v35 = vadd.f32 1.0, %v4682_v27  ;;  %v6723_v0 = vld [vmem:[#allocation10 + $0x60] ss:$16 sps:$4 sm:$0xff]   ;;  %v6726_v27 = vld [vmem:[#allocation10 + $0x68] ss:$16 sps:$4 sm:$0xff]  }
 0x725   : > { %v4686_v43 = vpop.eup %4685 }
 0x726   : > { %4693 = vrcp.f32 %v2813_v35  ;;  %v6609_v4 = vmul.f32 %v4686_v43, %v4684_v50  ;;  %v4688_v36 = vpop.eup %4687  ;;  %v6729_v50 = vld [vmem:[#allocation10 + $0x44] ss:$16 sps:$4 sm:$0xff]   ;;  %v6732_v35 = vld [vmem:[#allocation10 + $0x4c] ss:$16 sps:$4 sm:$0xff]   ;;  %v6735_v43 = vld [vmem:[#allocation10 + $0x40] ss:$16 sps:$4 sm:$0xff]  }
 0x727   : > { %v4690_v32 = vpop.eup %4689  ;;  %7730 = vst [vmem:[#allocation19_spill] sm:$0xff] %v6732_v35  ;;  %7731 = vst [vmem:[#allocation73_spill] sm:$0xff] %v6735_v43 }
 0x728   : > { %7729 = vst [vmem:[#allocation80_spill] sm:$0xff] %v6609_v4  ;;  %v2829_v54 = vpack.c.bf16 %v6609_v4, %v6609_v4  ;;  %v2820_v9 = vadd.f32 1.0, %v4690_v32  ;;  %v6744_v32 = vld [vmem:[#allocation10 + $0x2c] ss:$16 sps:$4 sm:$0xff]   ;;  %v6774_v4 = vld [vmem:[#allocation10 + $0x1e8] ss:$16 sps:$4 sm:$0xff]  }
 0x729   : > { %7734 = vst [vmem:[#allocation22_spill] sm:$0xff] %v6744_v32  ;;  %7744 = vst [vmem:[#allocation32_spill] sm:$0xff] %v6774_v4 }
 0x72a   : > { %2862 = vmatprep.mubr.bf16.mxu0 %v2829_v54  ;;  %2903 = vmatprep.mubr.bf16.mxu1 %v2829_v54  ;;  %4695 = vrcp.f32 %v2820_v9  ;;  %v6738_v54 = vld [vmem:[#allocation10 + $0x48] ss:$16 sps:$4 sm:$0xff]   ;;  %v6756_v9 = vld [vmem:[#allocation10 + $0xc] ss:$16 sps:$4 sm:$0xff]  }
 0x72b   : > { %7732 = vst [vmem:[#allocation81_spill] sm:$0xff] %v6738_v54  ;;  %7738 = vst [vmem:[#allocation26_spill] sm:$0xff] %v6756_v9 }
 0x731   : > { %v4692_v16 = vpop.eup %4691 }
 0x732   : > { %v2824_v14 = vmul.f32 %v4692_v16, %v4688_v36  ;;  %v6741_v36 = vld [vmem:[#allocation10 + $0x24] ss:$16 sps:$4 sm:$0xff]   ;;  %v6747_v16 = vld [vmem:[#allocation10 + $0x20] ss:$16 sps:$4 sm:$0xff]  }
 0x733   : > { %v4694_v7 = vpop.eup %4693  ;;  %7733 = vst [vmem:[#allocation21_spill] sm:$0xff] %v6741_v36  ;;  %7735 = vst [vmem:[#allocation23_spill] sm:$0xff] %v6747_v16 }
 0x734   : > { %v2823_v40 = vmul.f32 %v4694_v7, %v6478_v5  ;;  %v6675_v5 = vld [vmem:[#allocation10 + $0xe0] ss:$16 sps:$4 sm:$0xff]   ;;  %v6753_v7 = vld [vmem:[#allocation10 + $0x4] ss:$16 sps:$4 sm:$0xff]  }
 0x735   : > { %7737 = vst [vmem:[#allocation25_spill] sm:$0xff] %v6753_v7 }
 0x736   : > { %v6614_v62 = vadd.f32 %v2824_v14, %v2823_v40  ;;  %v6750_v14 = vld [vmem:[#allocation10 + $0x28] ss:$16 sps:$4 sm:$0xff]   ;;  %v6759_v40 = vld [vmem:[#allocation10] ss:$16 sps:$4 sm:$0xff]  }
 0x737   : > { %v4696_v63 = vpop.eup %4695  ;;  %7736 = vst [vmem:[#allocation24_spill] sm:$0xff] %v6750_v14  ;;  %7739 = vst [vmem:[#allocation27_spill] sm:$0xff] %v6759_v40 }
 0x738   : > { %4697 = vtanh.f32 %v6614_v62 }
 0x745   : > { %v4698_v58 = vpop.eup %4697 }
 0x746   : > { %v2827_v1 = vmul.f32 %v4698_v58, %v4696_v63  ;;  %v6762_v63 = vld [vmem:[#allocation10 + $0x8] ss:$16 sps:$4 sm:$0xff]   ;;  %v6765_v58 = vld [vmem:[#allocation10 + $0x1e4] ss:$16 sps:$4 sm:$0xff]  }
 0x747   : > { %7740 = vst [vmem:[#allocation28_spill] sm:$0xff] %v6762_v63  ;;  %7741 = vst [vmem:[#allocation29_spill] sm:$0xff] %v6765_v58 }
 0x748   : > { %v2828_v2 = vpack.c.bf16 %v2827_v1, %v2827_v1  ;;  %v6768_v1 = vld [vmem:[#allocation10 + $0x1ec] ss:$16 sps:$4 sm:$0xff]  }
 0x749   : > { %7742 = vst [vmem:[#allocation30_spill] sm:$0xff] %v6768_v1 }
 0x74a   : > { %2863 = vmatmul.mubr.bf16.vlgmr.msra.gmra.mxu0 %v2828_v2  ;;  %2904 = vmatmul.mubr.bf16.vlgmr.msra.gmra.mxu1 %v2828_v2 }
 0x74b   : > { %2946 = vmatpush1.bf16.msra.mxu0 %v6337_v11  ;;  %2987 = vmatpush1.bf16.msra.mxu1 %v6482_v17  ;;  %v6630_v11 = vld [vmem:[#allocation9 + $0x8c] ss:$16 sps:$4 sm:$0xff]  }
 0x74c   : > { %2947 = vmatprep.subr.bf16.mxu0 %v6341_v12  ;;  %2988 = vmatprep.subr.bf16.mxu1 %v6486_v55  ;;  %v6634_v12 = vld [vmem:[#allocation9 + $0x88] ss:$16 sps:$4 sm:$0xff]  }
 0x74d   : > { %2977 = vmatprep.mubr.bf16.mxu0 %v7459_v57  ;;  %3018 = vmatprep.mubr.bf16.mxu1 %v7459_v57 }
 0x74f   : > { %2948 = vmatpush1.bf16.msra.mxu0 %v6347_v10  ;;  %2989 = vmatpush1.bf16.msra.mxu1 %v6492_v47  ;;  %v6638_v10 = vld [vmem:[#allocation9 + $0x6c] ss:$16 sps:$4 sm:$0xff]  }
 0x750   : > { %2949 = vmatprep.subr.bf16.mxu0 %v6351_v61  ;;  %2990 = vmatprep.subr.bf16.mxu1 %v6496_v6  ;;  %v6642_v61 = vld [vmem:[#allocation9 + $0x68] ss:$16 sps:$4 sm:$0xff]  }
 0x753   : > { %2950 = vmatpush1.bf16.msra.mxu0 %v6355_v38  ;;  %2991 = vmatpush1.bf16.msra.mxu1 %v6500_v13  ;;  %v6646_v38 = vld [vmem:[#allocation9 + $0x4c] ss:$16 sps:$4 sm:$0xff]  }
 0x754   : > { %2951 = vmatprep.subr.bf16.mxu0 %v6359_v49  ;;  %2992 = vmatprep.subr.bf16.mxu1 %v6630_v11  ;;  %v6650_v49 = vld [vmem:[#allocation9 + $0x48] ss:$16 sps:$4 sm:$0xff]  }
 0x757   : > { %2952 = vmatpush1.bf16.msra.mxu0 %v6363_v8  ;;  %2993 = vmatpush1.bf16.msra.mxu1 %v6634_v12  ;;  %v6654_v8 = vld [vmem:[#allocation9 + $0x2c] ss:$16 sps:$4 sm:$0xff]  }
 0x758   : > { %2953 = vmatprep.subr.bf16.mxu0 %v6367_v44  ;;  %2994 = vmatprep.subr.bf16.mxu1 %v6638_v10  ;;  %v6658_v44 = vld [vmem:[#allocation9 + $0x28] ss:$16 sps:$4 sm:$0xff]  }
 0x75b   : > { %2954 = vmatpush1.bf16.msra.mxu0 %v6371_v52  ;;  %2995 = vmatpush1.bf16.msra.mxu1 %v6642_v61  ;;  %v6662_v52 = vld [vmem:[#allocation9 + $0xc] ss:$16 sps:$4 sm:$0xff]  }
 0x75c   : > { %2955 = vmatprep.subr.bf16.mxu0 %v6375_v39  ;;  %2996 = vmatprep.subr.bf16.mxu1 %v6646_v38  ;;  %v6666_v39 = vld [vmem:[#allocation9 + $0x8] ss:$16 sps:$4 sm:$0xff]  }
 0x75f   : > { %2956 = vmatpush1.bf16.msra.mxu0 %v6379_v56  ;;  %2997 = vmatpush1.bf16.msra.mxu1 %v6650_v49  ;;  %v6669_v56 = vld [vmem:[#allocation10 + $0xe4] ss:$16 sps:$4 sm:$0xff]  }
 0x760   : > { %2957 = vmatprep.subr.bf16.mxu0 %v6383_v20  ;;  %2998 = vmatprep.subr.bf16.mxu1 %v6654_v8  ;;  %v6672_v20 = vld [vmem:[#allocation10 + $0xec] ss:$16 sps:$4 sm:$0xff]  }
 0x763   : > { %2958 = vmatpush1.bf16.msra.mxu0 %v6517_v53  ;;  %2999 = vmatpush1.bf16.msra.mxu1 %v6658_v44 }
 0x764   : > { %2959 = vmatprep.subr.bf16.mxu0 %v6521_v42  ;;  %3000 = vmatprep.subr.bf16.mxu1 %v6662_v52 }
 0x767   : > { %2960 = vmatpush1.bf16.msra.mxu0 %v6525_v46  ;;  %3001 = vmatpush1.bf16.msra.mxu1 %v6666_v39 }
 0x768   : > { %3057 = vmatprep.subr.bf16.mxu0 %v6669_v56  ;;  %3098 = vmatprep.subr.bf16.mxu1 %v6672_v20 }
 0x76a   : > { %2978 = vmatmul.mubr.bf16.vlgmr.msra.gmra.mxu0 %v2828_v2  ;;  %3019 = vmatmul.mubr.bf16.vlgmr.msra.gmra.mxu1 %v2828_v2  ;;  %v6771_v2 = vld [vmem:[#allocation10 + $0x1e0] ss:$16 sps:$4 sm:$0xff]  }
 0x76b   : > { %3058 = vmatpush1.bf16.msra.mxu0 %v6675_v5  ;;  %3099 = vmatpush1.bf16.msra.mxu1 %v6678_v3  ;;  %7743 = vst [vmem:[#allocation31_spill] sm:$0xff] %v6771_v2 }
 0x76c   : > { %3059 = vmatprep.subr.bf16.mxu0 %v6681_v59  ;;  %3100 = vmatprep.subr.bf16.mxu1 %v6684_v15 }
 0x76f   : > { %3060 = vmatpush1.bf16.msra.mxu0 %v6687_v19  ;;  %3101 = vmatpush1.bf16.msra.mxu1 %v6690_v21 }
 0x770   : > { %3061 = vmatprep.subr.bf16.mxu0 %v6693_v22  ;;  %3102 = vmatprep.subr.bf16.mxu1 %v6696_v23 }
 0x773   : > { %3062 = vmatpush1.bf16.msra.mxu0 %v6699_v26  ;;  %3103 = vmatpush1.bf16.msra.mxu1 %v6702_v29 }
 0x774   : > { %3063 = vmatprep.subr.bf16.mxu0 %v6705_v31  ;;  %3104 = vmatprep.subr.bf16.mxu1 %v6708_v33 }
 0x777   : > { %3064 = vmatpush1.bf16.msra.mxu0 %v6711_v51  ;;  %3105 = vmatpush1.bf16.msra.mxu1 %v6714_v37 }
 0x778   : > { %3065 = vmatprep.subr.bf16.mxu0 %v6717_v45  ;;  %3106 = vmatprep.subr.bf16.mxu1 %v6720_v30 }
 0x77b   : > { %3066 = vmatpush1.bf16.msra.mxu0 %v6723_v0  ;;  %3107 = vmatpush1.bf16.msra.mxu1 %v6726_v27 }
 0x77c   : > { %3067 = vmatprep.subr.bf16.mxu0 %v6729_v50  ;;  %3108 = vmatprep.subr.bf16.mxu1 %v6732_v35 }
 0x77f   : > { %3068 = vmatpush1.bf16.msra.mxu0 %v6735_v43  ;;  %3109 = vmatpush1.bf16.msra.mxu1 %v6738_v54 }
 0x780   : > { %3069 = vmatprep.subr.bf16.mxu0 %v6741_v36  ;;  %3110 = vmatprep.subr.bf16.mxu1 %v6744_v32 }
 0x783   : > { %3070 = vmatpush1.bf16.msra.mxu0 %v6747_v16  ;;  %3111 = vmatpush1.bf16.msra.mxu1 %v6750_v14 }
 0x784   : > { %3071 = vmatprep.subr.bf16.mxu0 %v6753_v7  ;;  %3112 = vmatprep.subr.bf16.mxu1 %v6756_v9 }
 0x787   : > { %3072 = vmatpush1.bf16.msra.mxu0 %v6759_v40  ;;  %3113 = vmatpush1.bf16.msra.mxu1 %v6762_v63  ;;  %v6780_v63 = vld [vmem:[#allocation10 + $0x1cc] ss:$16 sps:$4 sm:$0xff]  }
 0x788   : > { %3073 = vmatprep.subr.bf16.mxu0 %v6765_v58  ;;  %3114 = vmatprep.subr.bf16.mxu1 %v6768_v1  ;;  %7746 = vst [vmem:[#allocation34_spill] sm:$0xff] %v6780_v63  ;;  %v6783_v58 = vld [vmem:[#allocation10 + $0x1c0] ss:$16 sps:$4 sm:$0xff]   ;;  %v6786_v1 = vld [vmem:[#allocation10 + $0x1c8] ss:$16 sps:$4 sm:$0xff]  }
 0x789   : > { %7747 = vst [vmem:[#allocation35_spill] sm:$0xff] %v6783_v58  ;;  %7748 = vst [vmem:[#allocation36_spill] sm:$0xff] %v6786_v1 }
 0x78b   : > { %3074 = vmatpush2.bf16.msra.mxu0 %v6771_v2  ;;  %3115 = vmatpush2.bf16.msra.mxu1 %v6774_v4  ;;  %v6789_v2 = vld [vmem:[#allocation10 + $0x1a4] ss:$16 sps:$4 sm:$0xff]   ;;  %v6792_v4 = vld [vmem:[#allocation10 + $0x1ac] ss:$16 sps:$4 sm:$0xff]  }
 0x78c   : > { %3075 = vmatprep.subr.bf16.mxu0 %v6777_v25  ;;  %3116 = vmatprep.subr.bf16.mxu1 %v6780_v63  ;;  %7749 = vst [vmem:[#allocation37_spill] sm:$0xff] %v6789_v2  ;;  %7750 = vst [vmem:[#allocation38_spill] sm:$0xff] %v6792_v4  ;;  %v6795_v25 = vld [vmem:[#allocation10 + $0x1a0] ss:$16 sps:$4 sm:$0xff]   ;;  %v6798_v63 = vld [vmem:[#allocation10 + $0x1a8] ss:$16 sps:$4 sm:$0xff]  }
 0x78d   : > { %7751 = vst [vmem:[#allocation39_spill] sm:$0xff] %v6795_v25  ;;  %7752 = vst [vmem:[#allocation40_spill] sm:$0xff] %v6798_v63 }
 0x78f   : > { %3076 = vmatpush2.bf16.msra.mxu0 %v6783_v58  ;;  %3117 = vmatpush2.bf16.msra.mxu1 %v6786_v1  ;;  %v6801_v58 = vld [vmem:[#allocation10 + $0x184] ss:$16 sps:$4 sm:$0xff]   ;;  %v6804_v1 = vld [vmem:[#allocation10 + $0x18c] ss:$16 sps:$4 sm:$0xff]  }
 0x790   : > { %3077 = vmatprep.subr.bf16.mxu0 %v6789_v2  ;;  %3118 = vmatprep.subr.bf16.mxu1 %v6792_v4  ;;  %7753 = vst [vmem:[#allocation41_spill] sm:$0xff] %v6801_v58  ;;  %7754 = vst [vmem:[#allocation42_spill] sm:$0xff] %v6804_v1  ;;  %v6807_v2 = vld [vmem:[#allocation10 + $0x180] ss:$16 sps:$4 sm:$0xff]   ;;  %v6810_v4 = vld [vmem:[#allocation10 + $0x188] ss:$16 sps:$4 sm:$0xff]  }
 0x791   : > { %7755 = vst [vmem:[#allocation43_spill] sm:$0xff] %v6807_v2  ;;  %7756 = vst [vmem:[#allocation44_spill] sm:$0xff] %v6810_v4 }
 0x793   : > { %3078 = vmatpush2.bf16.msra.mxu0 %v6795_v25  ;;  %3119 = vmatpush2.bf16.msra.mxu1 %v6798_v63  ;;  %v6813_v25 = vld [vmem:[#allocation10 + $0x164] ss:$16 sps:$4 sm:$0xff]   ;;  %v6816_v63 = vld [vmem:[#allocation10 + $0x16c] ss:$16 sps:$4 sm:$0xff]  }
 0x794   : > { %3079 = vmatprep.subr.bf16.mxu0 %v6801_v58  ;;  %3120 = vmatprep.subr.bf16.mxu1 %v6804_v1  ;;  %7757 = vst [vmem:[#allocation45_spill] sm:$0xff] %v6813_v25  ;;  %7758 = vst [vmem:[#allocation46_spill] sm:$0xff] %v6816_v63  ;;  %v6819_v58 = vld [vmem:[#allocation10 + $0x160] ss:$16 sps:$4 sm:$0xff]   ;;  %v6822_v1 = vld [vmem:[#allocation10 + $0x168] ss:$16 sps:$4 sm:$0xff]  }
 0x795   : > { %7759 = vst [vmem:[#allocation47_spill] sm:$0xff] %v6819_v58  ;;  %7760 = vst [vmem:[#allocation48_spill] sm:$0xff] %v6822_v1 }
 0x797   : > { %3080 = vmatpush2.bf16.msra.mxu0 %v6807_v2  ;;  %3121 = vmatpush2.bf16.msra.mxu1 %v6810_v4  ;;  %v6825_v2 = vld [vmem:[#allocation10 + $0x144] ss:$16 sps:$4 sm:$0xff]   ;;  %v6828_v4 = vld [vmem:[#allocation10 + $0x14c] ss:$16 sps:$4 sm:$0xff]  }
 0x798   : > { %3081 = vmatprep.subr.bf16.mxu0 %v6813_v25  ;;  %3122 = vmatprep.subr.bf16.mxu1 %v6816_v63  ;;  %7761 = vst [vmem:[#allocation49_spill] sm:$0xff] %v6825_v2  ;;  %7762 = vst [vmem:[#allocation50_spill] sm:$0xff] %v6828_v4  ;;  %v6831_v25 = vld [vmem:[#allocation10 + $0x140] ss:$16 sps:$4 sm:$0xff]   ;;  %v6834_v63 = vld [vmem:[#allocation10 + $0x148] ss:$16 sps:$4 sm:$0xff]  }
 0x799   : > { %7763 = vst [vmem:[#allocation51_spill] sm:$0xff] %v6831_v25  ;;  %7764 = vst [vmem:[#allocation52_spill] sm:$0xff] %v6834_v63 }
 0x79b   : > { %3082 = vmatpush2.bf16.msra.mxu0 %v6819_v58  ;;  %3123 = vmatpush2.bf16.msra.mxu1 %v6822_v1  ;;  %v6837_v58 = vld [vmem:[#allocation10 + $0x124] ss:$16 sps:$4 sm:$0xff]   ;;  %v6840_v1 = vld [vmem:[#allocation10 + $0x12c] ss:$16 sps:$4 sm:$0xff]  }
 0x79c   : > { %3083 = vmatprep.subr.bf16.mxu0 %v6825_v2  ;;  %3124 = vmatprep.subr.bf16.mxu1 %v6828_v4  ;;  %7765 = vst [vmem:[#allocation53_spill] sm:$0xff] %v6837_v58  ;;  %7766 = vst [vmem:[#allocation54_spill] sm:$0xff] %v6840_v1  ;;  %v6843_v2 = vld [vmem:[#allocation10 + $0x120] ss:$16 sps:$4 sm:$0xff]   ;;  %v6846_v4 = vld [vmem:[#allocation10 + $0x128] ss:$16 sps:$4 sm:$0xff]  }
 0x79d   : > { %7767 = vst [vmem:[#allocation55_spill] sm:$0xff] %v6843_v2  ;;  %7768 = vst [vmem:[#allocation56_spill] sm:$0xff] %v6846_v4 }
 0x79f   : > { %3084 = vmatpush2.bf16.msra.mxu0 %v6831_v25  ;;  %3125 = vmatpush2.bf16.msra.mxu1 %v6834_v63  ;;  %v6849_v25 = vld [vmem:[#allocation10 + $0x104] ss:$16 sps:$4 sm:$0xff]   ;;  %v6852_v63 = vld [vmem:[#allocation10 + $0x10c] ss:$16 sps:$4 sm:$0xff]  }
 0x7a0   : > { %3085 = vmatprep.subr.bf16.mxu0 %v6837_v58  ;;  %3126 = vmatprep.subr.bf16.mxu1 %v6840_v1  ;;  %7769 = vst [vmem:[#allocation57_spill] sm:$0xff] %v6849_v25  ;;  %7770 = vst [vmem:[#allocation58_spill] sm:$0xff] %v6852_v63  ;;  %v6855_v58 = vld [vmem:[#allocation10 + $0x100] ss:$16 sps:$4 sm:$0xff]   ;;  %v6858_v1 = vld [vmem:[#allocation10 + $0x108] ss:$16 sps:$4 sm:$0xff]  }
 0x7a1   : > { %7771 = vst [vmem:[#allocation59_spill] sm:$0xff] %v6855_v58  ;;  %7772 = vst [vmem:[#allocation60_spill] sm:$0xff] %v6858_v1 }
 0x7a3   : > { %3086 = vmatpush2.bf16.msra.mxu0 %v6843_v2  ;;  %3127 = vmatpush2.bf16.msra.mxu1 %v6846_v4 }
 0x7a4   : > { %3087 = vmatprep.subr.bf16.mxu0 %v6849_v25  ;;  %3128 = vmatprep.subr.bf16.mxu1 %v6852_v63 }
 0x7a7   : > { %3088 = vmatpush2.bf16.msra.mxu0 %v6855_v58  ;;  %3129 = vmatpush2.bf16.msra.mxu1 %v6858_v1 }
 0x7a8   : > { %3172 = vmatprep.subr.bf16.mxu0 %v7722_v48  ;;  %3213 = vmatprep.subr.bf16.mxu1 %v6594_v60 }
 0x80a   : > { %v2864_v4 = vpop.f32.mrf.mxu0  ;;  %v2905_v2 = vpop.f32.mrf.mxu1 }
 0x80b   : > { %v2865_v25 = vadd.f32 %v2864_v4, %v7723_v18  ;;  %v2906_v54 = vadd.f32 %v2905_v2, %v7726_v41 }
 0x80c   : > { %v2866_v40 = vpop.f32.mrf.mxu0  ;;  %v2907_v9 = vpop.f32.mrf.mxu1 }
 0x80d   : > { %v4146_v7 = vmul.f32 -1.442695, %v2865_v25  ;;  %v2867_v63 = vadd.f32 %v2866_v40, %v7724_v24  ;;  %v2908_v48 = vadd.f32 %v2907_v9, %v7725_v34 }
 0x80e   : > { %v2868_v14 = vpop.f32.mrf.mxu0  ;;  %v2909_v16 = vpop.f32.mrf.mxu1 }
 0x80f   : > { %4699 = vpow2.f32 %v4146_v7  ;;  %v4147_v58 = vmul.f32 -1.442695, %v2867_v63  ;;  %v4148_v1 = vmul.f32 -1.442695, %v2908_v48  ;;  %v7773_v14 = vld [vmem:[#allocation75_spill] sm:$0xff] }
 0x810   : > { %v2869_v32 = vpop.f32.mrf.mxu0  ;;  %v2910_v36 = vpop.f32.mrf.mxu1  ;;  %v2941_v16 = vunpack.c.l.bf16 %v7773_v14  ;;  %v2942_v63 = vunpack.c.h.bf16 %v7773_v14  ;;  %v7774_v14 = vld [vmem:[#allocation83_spill] sm:$0xff] }
 0x811   : > { %4701 = vpow2.f32 %v4147_v58 }
 0x812   : > { %4703 = vpow2.f32 %v4148_v1 }
 0x81c   : > { %v4700_v60 = vpop.eup %4699 }
 0x81d   : > { %v2915_v43 = vadd.f32 1.0, %v4700_v60 }
 0x81e   : > { %v4702_v4 = vpop.eup %4701 }
 0x81f   : > { %4705 = vrcp.f32 %v2915_v43  ;;  %v2921_v25 = vadd.f32 1.0, %v4702_v4  ;;  %v4704_v32 = vpop.eup %4703 }
 0x820   : > { %4707 = vtanh.f32 %v2906_v54  ;;  %v2928_v1 = vadd.f32 1.0, %v4704_v32  ;;  %v2943_v32 = vunpack.c.l.bf16 %v7774_v14 }
 0x821   : > { %4709 = vrcp.f32 %v2921_v25 }
 0x82a   : > { %v2979_v7 = vpop.f32.mrf.mxu0  ;;  %v3020_v40 = vpop.f32.mrf.mxu1 }
 0x82b   : > { %v3027_v36 = vadd.f32 %v2979_v7, %v2941_v16  ;;  %v2944_v7 = vunpack.c.h.bf16 %v7774_v14 }
 0x82c   : > { %v4706_v9 = vpop.eup %4705  ;;  %v2981_v58 = vpop.f32.mrf.mxu0 }
 0x82d   : > { %v3022_v48 = vpop.f32.mrf.mxu1  ;;  %v4708_v34 = vpop.eup %4707  ;;  %v4149_v2 = vmul.f32 -1.442695, %v3027_v36  ;;  %v3028_v60 = vadd.f32 %v2981_v58, %v2942_v63  ;;  %v3029_v63 = vadd.f32 %v3020_v40, %v2943_v32 }
 0x82e   : > { %v4710_v41 = vpop.eup %4709  ;;  %v2983_v43 = vpop.f32.mrf.mxu0  ;;  %v2932_v54 = vmul.f32 %v4708_v34, %v4706_v9  ;;  %v3030_v36 = vadd.f32 %v3022_v48, %v2944_v7 }
 0x82f   : > { %v3024_v4 = vpop.f32.mrf.mxu1  ;;  %v2931_v25 = vmul.f32 %v4710_v41, %v6604_v28  ;;  %4711 = vpow2.f32 %v4149_v2  ;;  %v4150_v24 = vmul.f32 -1.442695, %v3028_v60 }
 0x830   : > { %v2984_v18 = vpop.f32.mrf.mxu0  ;;  %v4151_v58 = vmul.f32 -1.442695, %v3030_v36 }
 0x831   : > { %v3025_v35 = vpop.f32.mrf.mxu1  ;;  %v6870_v16 = vadd.f32 %v2932_v54, %v2931_v25  ;;  %4713 = vpow2.f32 %v4150_v24 }
 0x832   : > { %4715 = vrcp.f32 %v2928_v1 }
 0x833   : > { %4717 = vtanh.f32 %v6870_v16 }
 0x834   : > { %4719 = vtanh.f32 %v3029_v63  ;;  %v4995_v63 = vld [vmem:[#allocation9 + $0xe0] ss:$16 sps:$4 sm:$0xff]  }
 0x835   : > { %4721 = vpow2.f32 %v4151_v58  ;;  %v4996_v58 = vld [vmem:[#allocation9 + $0xc4] ss:$16 sps:$4 sm:$0xff]  }
 0x83c   : > { %v4712_v34 = vpop.eup %4711 }
 0x83d   : > { %v3034_v9 = vadd.f32 1.0, %v4712_v34  ;;  %v4998_v34 = vld [vmem:[#allocation9 + $0xa4] ss:$16 sps:$4 sm:$0xff]  }
 0x83e   : > { %v4714_v41 = vpop.eup %4713 }
 0x83f   : > { %v4716_v18 = vpop.eup %4715  ;;  %4723 = vrcp.f32 %v3034_v9  ;;  %v3040_v28 = vadd.f32 1.0, %v4714_v41  ;;  %v4999_v9 = vld [vmem:[#allocation9 + $0xa0] ss:$16 sps:$4 sm:$0xff]   ;;  %v7808_v41 = vld [vmem:[#allocation51_spill] sm:$0xff] }
 0x840   : > { %v4718_v35 = vpop.eup %4717 }
 0x841   : > { %4725 = vrcp.f32 %v3040_v28  ;;  %v6875_v24 = vmul.f32 %v4718_v35, %v4716_v18  ;;  %v4720_v48 = vpop.eup %4719  ;;  %v7809_v18 = vld [vmem:[#allocation52_spill] sm:$0xff]  ;;  %v7810_v28 = vld [vmem:[#allocation53_spill] sm:$0xff]  ;;  %v7811_v35 = vld [vmem:[#allocation54_spill] sm:$0xff] }
 0x842   : > { %v4722_v40 = vpop.eup %4721 }
 0x843   : > { %v3056_v2 = vpack.c.bf16 %v6875_v24, %v6875_v24  ;;  %v3047_v4 = vadd.f32 1.0, %v4722_v40  ;;  %v7814_v40 = vld [vmem:[#allocation57_spill] sm:$0xff] }
 0x845   : > { %3089 = vmatprep.mubr.bf16.mxu0 %v3056_v2  ;;  %3130 = vmatprep.mubr.bf16.mxu1 %v3056_v2  ;;  %4727 = vrcp.f32 %v3047_v4  ;;  %v7812_v2 = vld [vmem:[#allocation55_spill] sm:$0xff] }
 0x846   : > { %v6967_v4 = vld [vmem:[#allocation12 + $0x38] sm:$0xff]  }
 0x84c   : > { %v4724_v60 = vpop.eup %4723 }
 0x84d   : > { %v3051_v1 = vmul.f32 %v4724_v60, %v4720_v48  ;;  %v7813_v48 = vld [vmem:[#allocation56_spill] sm:$0xff]  ;;  %v7815_v60 = vld [vmem:[#allocation58_spill] sm:$0xff] }
 0x84e   : > { %v4726_v43 = vpop.eup %4725 }
 0x84f   : > { %v3050_v54 = vmul.f32 %v4726_v43, %v6614_v62  ;;  %v4997_v62 = vld [vmem:[#allocation9 + $0xc0] ss:$16 sps:$4 sm:$0xff]  }
 0x850   : > { %v7817_v43 = vld [vmem:[#allocation60_spill] sm:$0xff] }
 0x851   : > { %v6880_v25 = vadd.f32 %v3051_v1, %v3050_v54  ;;  %v7816_v1 = vld [vmem:[#allocation59_spill] sm:$0xff] }
 0x852   : > { %v4728_v14 = vpop.eup %4727 }
 0x853   : > { %4729 = vtanh.f32 %v6880_v25 }
 0x860   : > { %v4730_v7 = vpop.eup %4729 }
 0x861   : > { %v3054_v36 = vmul.f32 %v4730_v7, %v4728_v14  ;;  %v7818_v7 = vld [vmem:[#allocation18_spill] sm:$0xff] }
 0x863   : > { %v3055_v32 = vpack.c.bf16 %v3054_v36, %v3054_v36 }
 0x865   : > { %3090 = vmatmul.mubr.bf16.vlgmr.msra.gmra.mxu0 %v3055_v32  ;;  %3131 = vmatmul.mubr.bf16.vlgmr.msra.gmra.mxu1 %v3055_v32 }
 0x866   : > { %3173 = vmatpush1.bf16.msra.mxu0 %v4995_v63  ;;  %3214 = vmatpush1.bf16.msra.mxu1 %v6482_v17  ;;  %v5000_v17 = vld [vmem:[#allocation9 + $0x84] ss:$16 sps:$4 sm:$0xff]  }
 0x867   : > { %3174 = vmatprep.subr.bf16.mxu0 %v4996_v58  ;;  %3215 = vmatprep.subr.bf16.mxu1 %v6486_v55  ;;  %v5001_v55 = vld [vmem:[#allocation9 + $0x80] ss:$16 sps:$4 sm:$0xff]  }
 0x868   : > { %3204 = vmatprep.mubr.bf16.mxu0 %v7459_v57  ;;  %3245 = vmatprep.mubr.bf16.mxu1 %v7459_v57  ;;  %v5002_v57 = vld [vmem:[#allocation9 + $0x64] ss:$16 sps:$4 sm:$0xff]  }
 0x86a   : > { %3175 = vmatpush1.bf16.msra.mxu0 %v4997_v62  ;;  %3216 = vmatpush1.bf16.msra.mxu1 %v6492_v47  ;;  %v5003_v47 = vld [vmem:[#allocation9 + $0x60] ss:$16 sps:$4 sm:$0xff]  }
 0x86b   : > { %3176 = vmatprep.subr.bf16.mxu0 %v4998_v34  ;;  %3217 = vmatprep.subr.bf16.mxu1 %v6496_v6  ;;  %v5004_v6 = vld [vmem:[#allocation9 + $0x44] ss:$16 sps:$4 sm:$0xff]  }
 0x86c   : > { %v7819_v62 = vld [vmem:[#allocation86_spill] sm:$0xff] }
 0x86e   : > { %3177 = vmatpush1.bf16.msra.mxu0 %v4999_v9  ;;  %3218 = vmatpush1.bf16.msra.mxu1 %v6500_v13  ;;  %v5005_v13 = vld [vmem:[#allocation9 + $0x40] ss:$16 sps:$4 sm:$0xff]  }
 0x86f   : > { %3178 = vmatprep.subr.bf16.mxu0 %v5000_v17  ;;  %3219 = vmatprep.subr.bf16.mxu1 %v6630_v11  ;;  %v5006_v11 = vld [vmem:[#allocation9 + $0x24] ss:$16 sps:$4 sm:$0xff]  }
 0x872   : > { %3179 = vmatpush1.bf16.msra.mxu0 %v5001_v55  ;;  %3220 = vmatpush1.bf16.msra.mxu1 %v6634_v12  ;;  %v7778_v12 = vld [vmem:[#allocation21_spill] sm:$0xff] }
 0x873   : > { %3180 = vmatprep.subr.bf16.mxu0 %v5002_v57  ;;  %3221 = vmatprep.subr.bf16.mxu1 %v6638_v10  ;;  %v7779_v10 = vld [vmem:[#allocation22_spill] sm:$0xff] }
 0x876   : > { %3181 = vmatpush1.bf16.msra.mxu0 %v5003_v47  ;;  %3222 = vmatpush1.bf16.msra.mxu1 %v6642_v61  ;;  %v7780_v61 = vld [vmem:[#allocation23_spill] sm:$0xff] }
 0x877   : > { %3182 = vmatprep.subr.bf16.mxu0 %v5004_v6  ;;  %3223 = vmatprep.subr.bf16.mxu1 %v6646_v38  ;;  %v7781_v38 = vld [vmem:[#allocation24_spill] sm:$0xff]  ;;  %v7820_v6 = vld [vmem:[#allocation87_spill] sm:$0xff] }
 0x87a   : > { %3183 = vmatpush1.bf16.msra.mxu0 %v5005_v13  ;;  %3224 = vmatpush1.bf16.msra.mxu1 %v6650_v49  ;;  %v7782_v49 = vld [vmem:[#allocation25_spill] sm:$0xff] }
 0x87b   : > { %3184 = vmatprep.subr.bf16.mxu0 %v5006_v11  ;;  %3225 = vmatprep.subr.bf16.mxu1 %v6654_v8  ;;  %v7783_v8 = vld [vmem:[#allocation26_spill] sm:$0xff] }
 0x87e   : > { %3185 = vmatpush1.bf16.msra.mxu0 %v6517_v53  ;;  %3226 = vmatpush1.bf16.msra.mxu1 %v6658_v44  ;;  %v7775_v53 = vld [vmem:[#allocation19_spill] sm:$0xff] }
 0x87f   : > { %3186 = vmatprep.subr.bf16.mxu0 %v6521_v42  ;;  %3227 = vmatprep.subr.bf16.mxu1 %v6662_v52  ;;  %v7776_v42 = vld [vmem:[#allocation73_spill] sm:$0xff]  ;;  %v7784_v44 = vld [vmem:[#allocation27_spill] sm:$0xff]  ;;  %v7785_v52 = vld [vmem:[#allocation28_spill] sm:$0xff] }
 0x882   : > { %3187 = vmatpush1.bf16.msra.mxu0 %v6525_v46  ;;  %3228 = vmatpush1.bf16.msra.mxu1 %v6666_v39  ;;  %v7777_v46 = vld [vmem:[#allocation81_spill] sm:$0xff] }
 0x883   : > { %3284 = vmatprep.subr.bf16.mxu0 %v6669_v56  ;;  %3325 = vmatprep.subr.bf16.mxu1 %v6672_v20  ;;  %v7786_v39 = vld [vmem:[#allocation29_spill] sm:$0xff]  ;;  %v7787_v56 = vld [vmem:[#allocation30_spill] sm:$0xff]  ;;  %v7788_v20 = vld [vmem:[#allocation31_spill] sm:$0xff] }
 0x885   : > { %3205 = vmatmul.mubr.bf16.vlgmr.msra.gmra.mxu0 %v3055_v32  ;;  %3246 = vmatmul.mubr.bf16.vlgmr.msra.gmra.mxu1 %v3055_v32 }
 0x886   : > { %3285 = vmatpush1.bf16.msra.mxu0 %v6675_v5  ;;  %3326 = vmatpush1.bf16.msra.mxu1 %v6678_v3  ;;  %v7789_v5 = vld [vmem:[#allocation32_spill] sm:$0xff]  ;;  %v7790_v3 = vld [vmem:[#allocation33_spill] sm:$0xff] }
 0x887   : > { %3286 = vmatprep.subr.bf16.mxu0 %v6681_v59  ;;  %3327 = vmatprep.subr.bf16.mxu1 %v6684_v15  ;;  %v7791_v59 = vld [vmem:[#allocation34_spill] sm:$0xff]  ;;  %v7792_v15 = vld [vmem:[#allocation35_spill] sm:$0xff] }
 0x88a   : > { %3287 = vmatpush1.bf16.msra.mxu0 %v6687_v19  ;;  %3328 = vmatpush1.bf16.msra.mxu1 %v6690_v21  ;;  %v7793_v19 = vld [vmem:[#allocation36_spill] sm:$0xff]  ;;  %v7794_v21 = vld [vmem:[#allocation37_spill] sm:$0xff] }
 0x88b   : > { %3288 = vmatprep.subr.bf16.mxu0 %v6693_v22  ;;  %3329 = vmatprep.subr.bf16.mxu1 %v6696_v23  ;;  %v7795_v22 = vld [vmem:[#allocation38_spill] sm:$0xff]  ;;  %v7796_v23 = vld [vmem:[#allocation39_spill] sm:$0xff] }
 0x88e   : > { %3289 = vmatpush1.bf16.msra.mxu0 %v6699_v26  ;;  %3330 = vmatpush1.bf16.msra.mxu1 %v6702_v29  ;;  %v7797_v26 = vld [vmem:[#allocation40_spill] sm:$0xff]  ;;  %v7798_v29 = vld [vmem:[#allocation41_spill] sm:$0xff] }
 0x88f   : > { %3290 = vmatprep.subr.bf16.mxu0 %v6705_v31  ;;  %3331 = vmatprep.subr.bf16.mxu1 %v6708_v33  ;;  %v7799_v31 = vld [vmem:[#allocation42_spill] sm:$0xff]  ;;  %v7800_v33 = vld [vmem:[#allocation43_spill] sm:$0xff] }
 0x892   : > { %3291 = vmatpush1.bf16.msra.mxu0 %v6711_v51  ;;  %3332 = vmatpush1.bf16.msra.mxu1 %v6714_v37  ;;  %v7801_v51 = vld [vmem:[#allocation44_spill] sm:$0xff]  ;;  %v7802_v37 = vld [vmem:[#allocation45_spill] sm:$0xff] }
 0x893   : > { %3292 = vmatprep.subr.bf16.mxu0 %v6717_v45  ;;  %3333 = vmatprep.subr.bf16.mxu1 %v6720_v30  ;;  %v7803_v45 = vld [vmem:[#allocation46_spill] sm:$0xff]  ;;  %v7804_v30 = vld [vmem:[#allocation47_spill] sm:$0xff] }
 0x896   : > { %3293 = vmatpush1.bf16.msra.mxu0 %v6723_v0  ;;  %3334 = vmatpush1.bf16.msra.mxu1 %v6726_v27  ;;  %v7805_v0 = vld [vmem:[#allocation48_spill] sm:$0xff]  ;;  %v7806_v27 = vld [vmem:[#allocation49_spill] sm:$0xff] }
 0x897   : > { %3294 = vmatprep.subr.bf16.mxu0 %v6729_v50  ;;  %3335 = vmatprep.subr.bf16.mxu1 %v7775_v53  ;;  %v7807_v50 = vld [vmem:[#allocation50_spill] sm:$0xff] }
 0x89a   : > { %3295 = vmatpush1.bf16.msra.mxu0 %v7776_v42  ;;  %3336 = vmatpush1.bf16.msra.mxu1 %v7777_v46  ;;  %v7821_v42 = vld [vmem:[#allocation88_spill] sm:$0xff] }
 0x89b   : > { %3296 = vmatprep.subr.bf16.mxu0 %v7778_v12  ;;  %3337 = vmatprep.subr.bf16.mxu1 %v7779_v10 }
 0x89e   : > { %3297 = vmatpush1.bf16.msra.mxu0 %v7780_v61  ;;  %3338 = vmatpush1.bf16.msra.mxu1 %v7781_v38  ;;  %v7822_v38 = vld [vmem:[#allocation77_spill] sm:$0xff] }
 0x89f   : > { %3298 = vmatprep.subr.bf16.mxu0 %v7782_v49  ;;  %3339 = vmatprep.subr.bf16.mxu1 %v7783_v8  ;;  %v3168_v49 = vunpack.c.l.bf16 %v7822_v38 }
 0x8a2   : > { %3299 = vmatpush1.bf16.msra.mxu0 %v7784_v44  ;;  %3340 = vmatpush1.bf16.msra.mxu1 %v7785_v52 }
 0x8a3   : > { %3300 = vmatprep.subr.bf16.mxu0 %v7786_v39  ;;  %3341 = vmatprep.subr.bf16.mxu1 %v7787_v56  ;;  %v3169_v56 = vunpack.c.h.bf16 %v7822_v38  ;;  %v4522_v38 = vld [vmem:[#allocation12] sm:$0xff]  }
 0x8a6   : > { %3301 = vmatpush2.bf16.msra.mxu0 %v7788_v20  ;;  %3342 = vmatpush2.bf16.msra.mxu1 %v7789_v5 }
 0x8a7   : > { %3302 = vmatprep.subr.bf16.mxu0 %v7790_v3  ;;  %3343 = vmatprep.subr.bf16.mxu1 %v7791_v59 }
 0x8aa   : > { %3303 = vmatpush2.bf16.msra.mxu0 %v7792_v15  ;;  %3344 = vmatpush2.bf16.msra.mxu1 %v7793_v19 }
 0x8ab   : > { %3304 = vmatprep.subr.bf16.mxu0 %v7794_v21  ;;  %3345 = vmatprep.subr.bf16.mxu1 %v7795_v22 }
 0x8ae   : > { %3305 = vmatpush2.bf16.msra.mxu0 %v7796_v23  ;;  %3346 = vmatpush2.bf16.msra.mxu1 %v7797_v26 }
 0x8af   : > { %3306 = vmatprep.subr.bf16.mxu0 %v7798_v29  ;;  %3347 = vmatprep.subr.bf16.mxu1 %v7799_v31 }
 0x8b2   : > { %3307 = vmatpush2.bf16.msra.mxu0 %v7800_v33  ;;  %3348 = vmatpush2.bf16.msra.mxu1 %v7801_v51 }
 0x8b3   : > { %3308 = vmatprep.subr.bf16.mxu0 %v7802_v37  ;;  %3349 = vmatprep.subr.bf16.mxu1 %v7803_v45 }
 0x8b6   : > { %3309 = vmatpush2.bf16.msra.mxu0 %v7804_v30  ;;  %3350 = vmatpush2.bf16.msra.mxu1 %v7805_v0  ;;  %v7823_v30 = vld [vmem:[#allocation84_spill] sm:$0xff] }
 0x8b7   : > { %3310 = vmatprep.subr.bf16.mxu0 %v7806_v27  ;;  %3351 = vmatprep.subr.bf16.mxu1 %v7807_v50  ;;  %v3171_v0 = vunpack.c.h.bf16 %v7823_v30  ;;  %v3170_v50 = vunpack.c.l.bf16 %v7823_v30 }
 0x8ba   : > { %3311 = vmatpush2.bf16.msra.mxu0 %v7808_v41  ;;  %3352 = vmatpush2.bf16.msra.mxu1 %v7809_v18 }
 0x8bb   : > { %3312 = vmatprep.subr.bf16.mxu0 %v7810_v28  ;;  %3353 = vmatprep.subr.bf16.mxu1 %v7811_v35 }
 0x8be   : > { %3313 = vmatpush2.bf16.msra.mxu0 %v7812_v2  ;;  %3354 = vmatpush2.bf16.msra.mxu1 %v7813_v48 }
 0x8bf   : > { %3314 = vmatprep.subr.bf16.mxu0 %v7814_v40  ;;  %3355 = vmatprep.subr.bf16.mxu1 %v7815_v60 }
 0x8c2   : > { %3315 = vmatpush2.bf16.msra.mxu0 %v7816_v1  ;;  %3356 = vmatpush2.bf16.msra.mxu1 %v7817_v43 }
 0x8c3   : > { %4203 = vmatprep.subr.bf16.mxu0 %v6967_v4 }
 0x925   : > { %v3091_v54 = vpop.f32.mrf.mxu0  ;;  %v3132_v14 = vpop.f32.mrf.mxu1 }
 0x926   : > { %v3092_v36 = vadd.f32 %v3091_v54, %v7818_v7  ;;  %v3133_v46 = vadd.f32 %v3132_v14, %v7821_v42 }
 0x927   : > { %v3093_v32 = vpop.f32.mrf.mxu0  ;;  %v3134_v63 = vpop.f32.mrf.mxu1 }
 0x928   : > { %v4152_v58 = vmul.f32 -1.442695, %v3092_v36  ;;  %v3094_v34 = vadd.f32 %v3093_v32, %v7819_v62  ;;  %v3135_v13 = vadd.f32 %v3134_v63, %v7820_v6 }
 0x929   : > { %v3095_v9 = vpop.f32.mrf.mxu0  ;;  %v3136_v17 = vpop.f32.mrf.mxu1 }
 0x92a   : > { %4731 = vpow2.f32 %v4152_v58  ;;  %v4153_v55 = vmul.f32 -1.442695, %v3094_v34  ;;  %v4154_v11 = vmul.f32 -1.442695, %v3135_v13  ;;  %v7824_v13 = vld [vmem:[#allocation70_spill] sm:$0xff] }
 0x92b   : > { %v3096_v57 = vpop.f32.mrf.mxu0  ;;  %v3137_v47 = vpop.f32.mrf.mxu1 }
 0x92c   : > { %4733 = vpow2.f32 %v4153_v55  ;;  %v4516_v47 = vld [vmem:[#allocation12 + $0x30] sm:$0xff]  }
 0x92d   : > { %4735 = vpow2.f32 %v4154_v11  ;;  %v7825_v11 = vld [vmem:[#allocation20_spill] sm:$0xff] }
 0x937   : > { %v4732_v53 = vpop.eup %4731 }
 0x938   : > { %v3142_v12 = vadd.f32 1.0, %v4732_v53  ;;  %v3400_v53 = vpack.c.bf16 %v7825_v11, %v7824_v13 }
 0x939   : > { %v4734_v10 = vpop.eup %4733 }
 0x93a   : > { %4737 = vrcp.f32 %v3142_v12  ;;  %v3148_v61 = vadd.f32 1.0, %v4734_v10  ;;  %v4736_v52 = vpop.eup %4735  ;;  %v4519_v12 = vld [vmem:[#allocation12 + $0x18] sm:$0xff]   ;;  %v4520_v10 = vld [vmem:[#allocation12 + $0x10] sm:$0xff]  }
 0x93b   : > { %4739 = vtanh.f32 %v3133_v46  ;;  %v3155_v22 = vadd.f32 1.0, %v4736_v52  ;;  %v4517_v46 = vld [vmem:[#allocation12 + $0x28] sm:$0xff]  }
 0x93c   : > { %4741 = vrcp.f32 %v3148_v61  ;;  %v4521_v61 = vld [vmem:[#allocation12 + $0x8] sm:$0xff]  }
 0x945   : > { %v3206_v8 = vpop.f32.mrf.mxu0  ;;  %v3247_v44 = vpop.f32.mrf.mxu1 }
 0x946   : > { %v3254_v39 = vadd.f32 %v3206_v8, %v3168_v49  ;;  %v3256_v41 = vadd.f32 %v3247_v44, %v3170_v50  ;;  %v7827_v49 = vld [vmem:[#allocation72_spill] sm:$0xff] }
 0x947   : > { %v4738_v20 = vpop.eup %4737  ;;  %v3208_v5 = vpop.f32.mrf.mxu0  ;;  %v7828_v44 = vld [vmem:[#allocation80_spill] sm:$0xff] }
 0x948   : > { %v3249_v3 = vpop.f32.mrf.mxu1  ;;  %v4740_v59 = vpop.eup %4739  ;;  %v4155_v15 = vmul.f32 -1.442695, %v3254_v39  ;;  %v3255_v19 = vadd.f32 %v3208_v5, %v3169_v56  ;;  %v3402_v52 = vpack.c.bf16 %v6875_v24, %v7828_v44 }
 0x949   : > { %v4742_v21 = vpop.eup %4741  ;;  %v3210_v23 = vpop.f32.mrf.mxu0  ;;  %v3159_v29 = vmul.f32 %v4740_v59, %v4738_v20  ;;  %v3257_v27 = vadd.f32 %v3249_v3, %v3171_v0 }
 0x94a   : > { %v3251_v26 = vpop.f32.mrf.mxu1  ;;  %v3158_v31 = vmul.f32 %v4742_v21, %v6870_v16  ;;  %4743 = vpow2.f32 %v4155_v15  ;;  %v4156_v33 = vmul.f32 -1.442695, %v3255_v19 }
 0x94b   : > { %v3211_v51 = vpop.f32.mrf.mxu0  ;;  %v4157_v18 = vmul.f32 -1.442695, %v3257_v27 }
 0x94c   : > { %v3252_v37 = vpop.f32.mrf.mxu1  ;;  %v6977_v45 = vadd.f32 %v3159_v29, %v3158_v31  ;;  %4745 = vpow2.f32 %v4156_v33 }
 0x94d   : > { %4747 = vrcp.f32 %v3155_v22 }
 0x94e   : > { %4749 = vtanh.f32 %v6977_v45 }
 0x94f   : > { %4751 = vtanh.f32 %v3256_v41 }
 0x950   : > { %4753 = vpow2.f32 %v4157_v18 }
 0x957   : > { %v4744_v28 = vpop.eup %4743 }
 0x958   : > { %v3261_v35 = vadd.f32 1.0, %v4744_v28 }
 0x959   : > { %v4746_v16 = vpop.eup %4745 }
 0x95a   : > { %v4748_v2 = vpop.eup %4747  ;;  %4755 = vrcp.f32 %v3261_v35  ;;  %v3267_v48 = vadd.f32 1.0, %v4746_v16 }
 0x95b   : > { %v4750_v40 = vpop.eup %4749 }
 0x95c   : > { %4757 = vrcp.f32 %v3267_v48  ;;  %v6982_v60 = vmul.f32 %v4750_v40, %v4748_v2  ;;  %v4752_v43 = vpop.eup %4751  ;;  %v4169_v48 = vld [vmem:[%s7078_s7] ss:$0 sm:$0xff] }
 0x95d   : > { %v4754_v54 = vpop.eup %4753 }
 0x95e   : > { %v3283_v1 = vpack.c.bf16 %v6982_v60, %v6982_v60  ;;  %v3274_v63 = vadd.f32 1.0, %v4754_v54 }
 0x960   : > { %3316 = vmatprep.mubr.bf16.mxu0 %v3283_v1  ;;  %3357 = vmatprep.mubr.bf16.mxu1 %v3283_v1  ;;  %4759 = vrcp.f32 %v3274_v63 }
 0x967   : > { %v4756_v14 = vpop.eup %4755 }
 0x968   : > { %v3278_v36 = vmul.f32 %v4756_v14, %v4752_v43 }
 0x969   : > { %v4758_v32 = vpop.eup %4757 }
 0x96a   : > { %v3277_v58 = vmul.f32 %v4758_v32, %v6880_v25  ;;  %v4518_v25 = vld [vmem:[#allocation12 + $0x20] sm:$0xff]  }
 0x96c   : > { %v3279_v34 = vadd.f32 %v3278_v36, %v3277_v58 }
 0x96d   : > { %v4760_v9 = vpop.eup %4759 }
 0x96e   : > { %4761 = vtanh.f32 %v3279_v34 }
 0x97b   : > { %v4762_v17 = vpop.eup %4761 }
 0x97c   : > { %v3281_v55 = vmul.f32 %v4762_v17, %v4760_v9 }
 0x97e   : > { %v3282_v57 = vpack.c.bf16 %v3281_v55, %v3281_v55 }
 0x980   : > { %3317 = vmatmul.mubr.bf16.vlgmr.msra.gmra.mxu0 %v3282_v57  ;;  %3358 = vmatmul.mubr.bf16.vlgmr.msra.gmra.mxu1 %v3282_v57 }
 0x981   : > { %4204 = vmatpush3.bf16.msra.mxu0 %v6967_v4  ;;  %4219 = vmatprep.mubr.bf16.mxu0 %v3400_v53  ;;  %v7826_v4 = vld [vmem:[#allocation71_spill] sm:$0xff] }
 0x982   : > { %4205 = vmatprep.subr.bf16.mxu0 %v4516_v47  ;;  %v3401_v8 = vpack.c.bf16 %v7827_v49, %v7826_v4 }
 0x985   : > { %4206 = vmatpush3.bf16.msra.mxu0 %v4516_v47 }
 0x986   : > { %4207 = vmatprep.subr.bf16.mxu0 %v4517_v46 }
 0x989   : > { %4208 = vmatpush3.bf16.msra.mxu0 %v4517_v46 }
 0x98a   : > { %4209 = vmatprep.subr.bf16.mxu0 %v4518_v25 }
 0x98d   : > { %4210 = vmatpush3.bf16.msra.mxu0 %v4518_v25 }
 0x98e   : > { %4211 = vmatprep.subr.bf16.mxu0 %v4519_v12 }
 0x991   : > { %4212 = vmatpush3.bf16.msra.mxu0 %v4519_v12 }
 0x992   : > { %4213 = vmatprep.subr.bf16.mxu0 %v4520_v10 }
 0x995   : > { %4214 = vmatpush3.bf16.msra.mxu0 %v4520_v10 }
 0x996   : > { %4215 = vmatprep.subr.bf16.mxu0 %v4521_v61 }
 0x999   : > { %4216 = vmatpush3.bf16.msra.mxu0 %v4521_v61 }
 0x99a   : > { %4217 = vmatprep.subr.bf16.mxu0 %v4522_v38 }
 0x99d   : > { %4218 = vmatpush3.bf16.msra.mxu0 %v4522_v38 }
 0x9a0   : > { %4220 = vmatmul.mubr.bf16.vlgmr.msra.gmra.mxu0 %v3401_v8 }
 0x9a1   : > { %4223 = vmatprep.mubr.bf16.mxu0 %v3402_v52 }
 0xa40   : > { %v3318_v39 = vpop.f32.mrf.mxu0  ;;  %v3359_v56 = vpop.f32.mrf.mxu1 }
 0xa41   : > { %v3319_v20 = vadd.f32 %v3318_v39, %v7818_v7  ;;  %v3360_v51 = vadd.f32 %v3359_v56, %v7821_v42  ;;  %v7829_v39 = vlaneseq }
 0xa42   : > { %v3320_v5 = vpop.f32.mrf.mxu0  ;;  %v3361_v3 = vpop.f32.mrf.mxu1 }
 0xa43   : > { %v4158_v59 = vmul.f32 -1.442695, %v3319_v20  ;;  %v3321_v15 = vadd.f32 %v3320_v5, %v7819_v62  ;;  %v3362_v29 = vadd.f32 %v3361_v3, %v7820_v6  ;;  %v3581_v56 = vand.u32 127, %v7829_v39  ;;  %v7830_v5 = vld [vmem:[#allocation67_spill] sm:$0xff] }
 0xa44   : > { %v3322_v19 = vpop.f32.mrf.mxu0  ;;  %v3363_v21 = vpop.f32.mrf.mxu1  ;;  %v3758_v39 = vsub.s32 6, %v7830_v5 }
 0xa45   : > { %4763 = vpow2.f32 %v4158_v59  ;;  %v4159_v22 = vmul.f32 -1.442695, %v3321_v15  ;;  %v4160_v31 = vmul.f32 -1.442695, %v3362_v29  ;;  %v3584_v3 = vsub.s32 %v3581_v56, %v7830_v5 }
 0xa46   : > { %v3323_v23 = vpop.f32.mrf.mxu0  ;;  %v3364_v26 = vpop.f32.mrf.mxu1 }
 0xa47   : > { %4765 = vpow2.f32 %v4159_v22 }
 0xa48   : > { %4767 = vpow2.f32 %v4160_v31 }
 0xa52   : > { %v4764_v33 = vpop.eup %4763 }
 0xa53   : > { %v3369_v37 = vadd.f32 1.0, %v4764_v33 }
 0xa54   : > { %v4766_v7 = vpop.eup %4765 }
 0xa55   : > { %4769 = vrcp.f32 %v3369_v37  ;;  %v3375_v30 = vadd.f32 1.0, %v4766_v7  ;;  %v4768_v0 = vpop.eup %4767 }
 0xa56   : > { %4771 = vtanh.f32 %v3360_v51  ;;  %v3382_v6 = vadd.f32 1.0, %v4768_v0 }
 0xa57   : > { %4773 = vrcp.f32 %v3375_v30 }
 0xa60   : > { %v4221_v62 = vpop.f32.mrf.mxu0 }
 0xa61   : > { %4775 = vtanh.f32 %v4221_v62 }
 0xa62   : > { %v4770_v27 = vpop.eup %4769  ;;  %v3502_v50 = vpop.f32.mrf.mxu0 }
 0xa63   : > { %v4772_v41 = vpop.eup %4771  ;;  %4777 = vtanh.f32 %v3502_v50 }
 0xa64   : > { %v4774_v18 = vpop.eup %4773  ;;  %v4222_v28 = vpop.f32.mrf.mxu0  ;;  %v3386_v35 = vmul.f32 %v4772_v41, %v4770_v27 }
 0xa65   : > { %v3385_v42 = vmul.f32 %v4774_v18, %v6977_v45  ;;  %4779 = vtanh.f32 %v4222_v28 }
 0xa66   : > { %v3505_v16 = vpop.f32.mrf.mxu0 }
 0xa67   : > { %4781 = vtanh.f32 %v3505_v16  ;;  %v3387_v2 = vadd.f32 %v3386_v35, %v3385_v42 }
 0xa68   : > { %4783 = vrcp.f32 %v3382_v6 }
 0xa69   : > { %4785 = vtanh.f32 %v3387_v2 }
 0xa6e   : > { %v4776_v40 = vpop.eup %4775 }
 0xa6f   : > { %v3550_v1 = vmul.f32 %v4776_v40, %v4169_v48 }
 0xa70   : > { %v4778_v43 = vpop.eup %4777 }
 0xa71   : > { %3560 = vadd.xlane.f32.xlu1 %v3550_v1  ;;  %v3548_v54 = vmul.f32 %v4778_v43, %v4169_v48 }
 0xa72   : > { %v4780_v14 = vpop.eup %4779 }
 0xa73   : > { %3556 = vadd.xlane.f32.xlu0 %v3548_v54  ;;  %v3551_v36 = vmul.f32 %v4780_v14, %v4169_v48 }
 0xa74   : > { %v4782_v32 = vpop.eup %4781 }
 0xa75   : > { %v4784_v45 = vpop.eup %4783  ;;  %3562 = vadd.xlane.f32.xlu1 %v3551_v36  ;;  %v3549_v63 = vmul.f32 %v4782_v32, %v4169_v48 }
 0xa76   : > { %v4786_v58 = vpop.eup %4785 }
 0xa77   : > { %3558 = vadd.xlane.f32.xlu0 %v3549_v63  ;;  %v7002_v34 = vmul.f32 %v4786_v58, %v4784_v45  ;;  %v3680_v45 = vld [vmem:[%s458_s29] sm:$0xff] }
 0xa79   : > { %v3403_v9 = vpack.c.bf16 %v7002_v34, %v6982_v60 }
 0xa7b   : > { %4224 = vmatmul.mubr.bf16.gmra.mxu0 %v3403_v9 }
 0xafa   : > { %v3561_v59 = vpop.xlane.xlu1 %3560 }
 0xafb   : > { %v3593_v22 = vrot.slane %v3561_v59, %v3584_v3 }
 0xafc   : > { %v3557_v52 = vpop.xlane.xlu0 %3556 }
 0xafd   : > { %v3585_v19 = vrot.slane %v3557_v52, %v3584_v3  ;;  %v3765_v52 = vsub.s32 7, %v7830_v5 }
 0xafe   : > { %v3563_v23 = vpop.xlane.xlu1 %3562 }
 0xaff   : > { %v3597_v33 = vrot.slane %v3563_v23, %v3584_v3 }
 0xb00   : > { %v3559_v20 = vpop.xlane.xlu0 %3558 }
 0xb01   : > { %v3589_v15 = vrot.slane %v3559_v20, %v3584_v3 }
 0xb03   : > { %v3615_v21 = vsel %vm3614_vm0, %v3589_v15, %v3585_v19 }
 0xb04   : > { %v3617_v29 = vsel %vm3616_vm1, %v3593_v22, %v3615_v21 }
 0xb05   : > { %v3619_v7 = vsel %vm3618_vm2, %v3597_v33, %v3617_v29 }
 0xb3b   : > { %v4225_v17 = vpop.f32.mrf.mxu0 }
 0xb3d   : > { %v3518_v55 = vpop.f32.mrf.mxu0 }
 0xb3e   : > { %4787 = vtanh.f32 %v3518_v55 }
 0xb3f   : > { %v4226_v57 = vpop.f32.mrf.mxu0  ;;  %4789 = vtanh.f32 %v4225_v17  ;;  %v7831_v17 = vld [vmem:[#allocation69_spill] sm:$0xff] }
 0xb41   : > { %v3521_v47 = vpop.f32.mrf.mxu0 }
 0xb42   : > { %4791 = vtanh.f32 %v3521_v47 }
 0xb43   : > { %4793 = vtanh.f32 %v4226_v57  ;;  %v7832_v57 = vld [vmem:[#allocation68_spill] sm:$0xff] }
 0xb4b   : > { %v4788_v53 = vpop.eup %4787 }
 0xb4c   : > { %v3552_v46 = vmul.f32 %v4788_v53, %v4169_v48  ;;  %v4790_v25 = vpop.eup %4789  ;;  %v7833_v53 = vld [vmem:[#allocation78_spill] sm:$0xff] }
 0xb4d   : > { %v3554_v10 = vmul.f32 %v4790_v25, %v4169_v48  ;;  %v7834_v25 = vld [vmem:[#allocation76_spill] sm:$0xff] }
 0xb4e   : > { %3564 = vadd.xlane.f32.xlu0 %v3552_v46 }
 0xb4f   : > { %v4792_v12 = vpop.eup %4791 }
 0xb50   : > { %v3553_v61 = vmul.f32 %v4792_v12, %v4169_v48  ;;  %v4794_v38 = vpop.eup %4793 }
 0xb51   : > { %v3555_v8 = vmul.f32 %v4794_v38, %v4169_v48 }
 0xb52   : > { %3568 = vadd.xlane.f32.xlu0 %v3554_v10  ;;  %3566 = vadd.xlane.f32.xlu1 %v3553_v61  ;;  %v3751_v10 = vsub.s32 5, %v7830_v5  ;;  %v3744_v61 = vsub.s32 4, %v7830_v5 }
 0xb56   : > { %3570 = vadd.xlane.f32.xlu1 %v3555_v8 }
 0xbd7   : > { %v3565_v26 = vpop.xlane.xlu0 %3564 }
 0xbd8   : > { %v3601_v31 = vrot.slane %v3565_v26, %v3584_v3 }
 0xbda   : > { %v3621_v62 = vsel %vm3620_vm3, %v3601_v31, %v3619_v7 }
 0xbdb   : > { %v3569_v51 = vpop.xlane.xlu0 %3568  ;;  %v3567_v37 = vpop.xlane.xlu1 %3566 }
 0xbdc   : > { %v3605_v30 = vrot.slane %v3567_v37, %v3584_v3  ;;  %v3609_v0 = vrot.slane %v3569_v51, %v3584_v3 }
 0xbde   : > { %v3623_v27 = vsel %vm3622_vm4, %v3605_v30, %v3621_v62 }
 0xbdf   : > { %v3571_v50 = vpop.xlane.xlu1 %3570  ;;  %v3625_v18 = vsel %vm3624_vm5, %v3609_v0, %v3623_v27 }
 0xbe0   : > { %v3613_v41 = vrot.slane %v3571_v50, %v3584_v3 }
 0xbe2   : > { %v3627_v6 = vsel %vm3626_vm6, %v3613_v41, %v3625_v18 }
 0xbe3   : > { %3629 = vxpose.xlu0.b32.start.end [1/1] (short) (narrow) %v3627_v6, 8 }
 0xc5f   : > { %v3645_v28 = vpop.trf.xlu0 }
 0xc60   : > { %v4170_v35 = vmul.f32 -1.442695, %v3645_v28  ;;  %v3669_v42 = vsel %vm3667_vm7, %v3645_v28, -inf }
 0xc61   : > { %3670 = vmax.xlane.f32.xlu1 %v3669_v42 }
 0xc62   : > { %4795 = vpow2.f32 %v4170_v35 }
 0xc6f   : > { %v4796_v16 = vpop.eup %4795 }
 0xc70   : > { %v3664_v2 = vadd.f32 1.0, %v4796_v16 }
 0xc72   : > { %4797 = vrcp.f32 %v3664_v2 }
 0xc7f   : > { %v4798_v48 = vpop.eup %4797 }
 0xc80   : > { %3668 = vst.msk [vmem:[%s462_s11] sm:$0xff] %vm3667_vm7, %v4798_v48  ;;  %s5145_s11 = scalar_lea.vmem %s5144_s17, 256 }
 0xc81   : > { %p5147_p1 = scmp.lt.s32.totalorder %s5145_s11, %s5139_s2 }
 0xc83   : > { %p5148_p5 = por %p5147_p1, %p5146_p9 }
 0xc85   : > { %p5149_p6 = pnand %p5148_p5, %p5142_p7 }
 0xcea   : > { %v3671_v40 = vpop.xlane.xlu1 %3670 }
 0xceb   : > { %v3672_v1 = vsub.f32 %v3645_v28, %v3671_v40 }
 0xced   : > { %v3673_v43 = vmul.f32 1.442695, %v3672_v1 }
 0xcef   : > { %4799 = vpow2.f32 %v3673_v43 }
 0xcfc   : > { %v4800_v54 = vpop.eup %4799 }
 0xcfd   : > { %v3675_v14 = vsel %vm3667_vm7, %v4800_v54, 0.0 }
 0xcfe   : > { %3676 = vadd.xlane.f32.xlu1 %v3675_v14 }
 0xd87   : > { %v3677_v36 = vpop.xlane.xlu1 %3676 }
 0xd88   : > { %4801 = vrcp.f32 %v3677_v36 }
 0xd95   : > { %v4802_v32 = vpop.eup %4801 }
 0xd96   : > { %v3679_v63 = vmul.f32 %v4802_v32, %v4800_v54 }
 0xd98   : > { %v3681_v58 = vmul.f32 %v3680_v45, %v3679_v63 }
 0xd9a   : > { %3682 = vxpose.xlu1.b32.start.end [1/1] (short) (narrow) %v3681_v58, 8 }
 0xe16   : > { %v3698_v9 = vpop.trf.xlu1 }
 0xe17   : > { %v3724_v55 = vrot.slane %v3698_v9, %v7831_v17  ;;  %v3717_v47 = vrot.slane %v3698_v9, %v7832_v57  ;;  %v3738_v46 = vrot.slane %v3698_v9, %v7833_v53  ;;  %v3731_v12 = vrot.slane %v3698_v9, %v7834_v25 }
 0xe18   : > { %v3752_v38 = vrot.slane %v3698_v9, %v3751_v10  ;;  %v3745_v8 = vrot.slane %v3698_v9, %v3744_v61  ;;  %v3766_v56 = vrot.slane %v3698_v9, %v3765_v52  ;;  %v3759_v20 = vrot.slane %v3698_v9, %v3758_v39 }
 0xe19   : > { %3726 = vbcast.lane.b32.xlu1 %v3724_v55, 256  ;;  %3719 = vbcast.lane.b32.xlu0 %v3717_v47, 256 }
 0xe1d   : > { %3740 = vbcast.lane.b32.xlu1 %v3738_v46, 256  ;;  %3733 = vbcast.lane.b32.xlu0 %v3731_v12, 256 }
 0xe21   : > { %3754 = vbcast.lane.b32.xlu1 %v3752_v38, 256  ;;  %3747 = vbcast.lane.b32.xlu0 %v3745_v8, 256 }
 0xe25   : > { %3768 = vbcast.lane.b32.xlu1 %v3766_v56, 256  ;;  %3761 = vbcast.lane.b32.xlu0 %v3759_v20, 256 }
 0xe8b   : > { %v3727_v3 = vpop.permute.xlu1 %3726  ;;  %v3720_v59 = vpop.permute.xlu0 %3719 }
 0xe8c   : > { %v3771_v15 = vmul.f32 %v3727_v3, %v7825_v11  ;;  %v3770_v19 = vmul.f32 %v3720_v59, %v7824_v13 }
 0xe8e   : > { %v3778_v23 = vadd.f32 %v3771_v15, %v3770_v19 }
 0xe8f   : > { %v3741_v21 = vpop.permute.xlu1 %3740  ;;  %v3734_v22 = vpop.permute.xlu0 %3733 }
 0xe90   : > { %v3772_v26 = vmul.f32 %v3734_v22, %v7826_v4  ;;  %v3773_v5 = vmul.f32 %v3741_v21, %v7827_v49 }
 0xe92   : > { %v3779_v29 = vadd.f32 %v3778_v23, %v3772_v26 }
 0xe93   : > { %v3755_v31 = vpop.permute.xlu1 %3754  ;;  %v3748_v33 = vpop.permute.xlu0 %3747 }
 0xe94   : > { %v3780_v51 = vadd.f32 %v3779_v29, %v3773_v5  ;;  %v3774_v37 = vmul.f32 %v3748_v33, %v7828_v44  ;;  %v3775_v11 = vmul.f32 %v3755_v31, %v6875_v24 }
 0xe96   : > { %v3781_v7 = vadd.f32 %v3780_v51, %v3774_v37 }
 0xe97   : > { %v3769_v13 = vpop.permute.xlu1 %3768  ;;  %v3762_v30 = vpop.permute.xlu0 %3761 }
 0xe98   : > { %v3782_v62 = vadd.f32 %v3781_v7, %v3775_v11  ;;  %v3776_v0 = vmul.f32 %v3762_v30, %v6982_v60  ;;  %v3777_v4 = vmul.f32 %v3769_v13, %v7002_v34 }
 0xe9a   : > { %v3783_v49 = vadd.f32 %v3782_v62, %v3776_v0 }
 0xe9c   : > { %v3784_v27 = vadd.f32 %v3783_v49, %v3777_v4 }
 0xe9e   : > { %3785 = vst [vmem:[%s448_s21] sm:$0xff] %v3784_v27 }
 0xe9f   : > { %5152 = shalt.err (!%p5149_p6)
}
 0xea0   : > { %s5153_s6 = scalar_lea.hbm %s3802_s24, 128  ;;  %s5157_s29 = scalar_lea.hbm %s7080_s9, 256 }
 0xea1   : > { %p5154_p4 = scmp.ne.s32.totalorder %s3802_s24, %s5153_s6  ;;  %p5158_p11 = scmp.lt.s32.totalorder %s3802_s24, %s7080_s9 }
 0xea2   : > { %p5159_p13 = scmp.lt.s32.totalorder %s5157_s29, %s5153_s6 }
 0xea3   : > { %p5155_p8 = pnand %p5154_p4, %p7835_p3 }
 0xea4   : > { %p5160_p12 = por %p5159_p13, %p5158_p11 }
 0xea5   : > { %p5156_p2 = pneg %p5155_p8 }
 0xea7   : > { %p5161_p0 = pnand %p5160_p12, %p5156_p2 }
 0xea9   : > { %5164 = shalt.err (!%p5161_p0)
}
 0xeaa   : > { %4245 = dma.vmem_to_hbm [thread:$0]  (%p7835_p3), %s3805_s30, 128, %s3802_s24, %s3787_s18  }
 0xeab PF: > { %s3819_s21 = sand.u32 1, %s5199_s13   ;;  %p7836_p10 = scmp.ne.s32.totalorder %s7375_s20, 0 }
 0xeac   : > { %p7837_p7 = scmp.ge.s32.totalorder %s5211_s16, 2  ;;  %s3820_s27 = scalar_lea.sflag [#allocation6], %s3819_s21 }
 0xeae   : > { %p4265_p9 = pnand %p7837_p7, %p7836_p10 }
 0xeb0   : > { %p4266_p1 = pneg %p4265_p9 }
 0xeb2   : > { %5194 = dma.done.wait (%p4266_p1), %s3820_s27, 128  }
 0xeb3   : > { %5196 = vsyncadd (%p4266_p1), %s3820_s27, 4294967168  ;;  %p26_p5 = scmp.ge.s32.totalorder %s5376_s23, 4   ;;  %s7838_s13 = smov %s5203_s14 }
 0xeb4   : > { %s7839_s14 = smov %s5207_s15  ;;  %s7840_s15 = smov %s5385_s26 }
 0xeb5   : > { %s7841_s16 = smov %s5376_s23  ;;  %28 = sbr.rel (!%p26_p5) target bundleno = 12 (0xc), region = 146 }
 0xeba   :  { %3832 = vsyncpa [#allocation5], 1 }
 0xebb   :  { %3834 = vsyncpa [#allocation5 + $0x1], 1 }
 0xebc   :  { %3835 = vsyncpa [#allocation8], 1 }
 0xebd   :  { %3836 = vsyncpa [#allocation11], 1 }
 0xebe   :  { %3837 = vsyncpa [#allocation6], 1 }
 0xebf   :  { %3839 = vsyncpa [#allocation6 + $0x1], 1 }

// kernel: tpu_custom_call.1
= control target key start
LH: loop header
LB: loop body
LE: loop exit
PB: predicated region body
PF: predicated region fallthrough
CT: control target
= control target key end

     0   :  { %s7071_s0 = inlined_call_operand.hbm [shape: f32[8,16,128], index: 0, kind: input, shape index: {}]   ;;  %s7072_s1 = inlined_call_operand.hbm [shape: bf16[128,512], index: 1, kind: input, shape index: {}]   ;;  %s7073_s2 = inlined_call_operand.hbm [shape: bf16[128,512], index: 2, kind: input, shape index: {}]   ;;  %s7074_s3 = inlined_call_operand.vmem [shape: f32[1,512], index: 3, kind: input, shape index: {}]   ;;  %s7075_s4 = inlined_call_operand.hbm [shape: bf16[256,512], index: 4, kind: input, shape index: {}]   ;;  %s7076_s5 = inlined_call_operand.vmem [shape: f32[1,512], index: 5, kind: input, shape index: {}]   ;;  %s7077_s6 = inlined_call_operand.hbm [shape: bf16[128,128], index: 6, kind: input, shape index: {}]   ;;  %s7078_s7 = inlined_call_operand.vmem [shape: f32[1,128], index: 7, kind: input, shape index: {}]   ;;  %s7079_s8 = inlined_call_operand.vmem [shape: f32[16,8], index: 8, kind: input, shape index: {}]   ;;  %s7080_s9 = inlined_call_operand.hbm [shape: f32[16,128], index: 9, kind: output, shape index: {0}]   ;;  %s7081_s10 = inlined_call_operand.vmem [shape: f32[16,8], index: 10, kind: output, shape index: {1}]  }
   0x1   :  { %7370 = sst [smem:[#allocation89_spill]] %s7072_s1 }
   0x2   :  { %7371 = sst [smem:[#allocation90_spill]] %s7073_s2 }
   0x3   :  { %7372 = sst [smem:[#allocation91_spill]] %s7075_s4 }
   0x4   :  { %7373 = sst [smem:[#allocation92_spill]] %s7077_s6 }
   0x5   :  { %16 = vsyncpa [#allocation5], 0 }
   0x6   :  { %18 = vsyncpa [#allocation5 + $0x1], 0 }
   0x7   :  { %19 = vsyncpa [#allocation8], 0 }
   0x8   :  { %20 = vsyncpa [#allocation11], 0 }
   0x9   :  { %21 = vsyncpa [#allocation6], 0 }
   0xa   :  { %23 = vsyncpa [#allocation6 + $0x1], 0  ;;  %s5282_s13 = smov 0   ;;  %s5284_s14 = smov 0  }
   0xb   :  { %s5286_s15 = smov 0   ;;  %s5288_s16 = smov 0  }
   0xc LB: > { %s5303_s17 = sadd.s32 4294967295, %s5211_s16   ;;  %s3951_s18 = sadd.s32 4294967294, %s5211_s16   ;;  %s5211_s16 = sphi %s5288_s16, %s7841_s16   ;;  %s5207_s15 = sphi %s5286_s15, %s7840_s15   ;;  %s5203_s14 = sphi %s5284_s14, %s7839_s14   ;;  %s5199_s13 = sphi %s5282_s13, %s7838_s13  }
   0xd   : > { %p49_p0 = scmp.ne.s32.totalorder %s5203_s14, %s5199_s13  ;;  %p7082_p1 = scmp.eq.s32.totalorder %s5303_s17, 0 }
   0xe   : > { %p252_p3 = scmp.eq.s32.totalorder %s3951_s18, 1  ;;  %p3952_p5 = scmp.ge.s32.totalorder %s5211_s16, 1 }
   0xf   : > { %p5312_p4 = por %p7082_p1, %p49_p0  ;;  %p285_p7 = scmp.lt.s32.totalorder %s5211_s16, 3 }
  0x10   : > { %p5317_p6 = por %p252_p3, %p49_p0  ;;  %s5213_s22 = smov [#allocation7]  }
  0x11   : > { %s7374_s19 = scalar_select %p5312_p4, 1, 0 }
  0x12   : > { %s7375_s20 = scalar_select %p5317_p6, 1, 0 }
  0x13   : > { %p5322_p8 = pnand %p3952_p5, %p285_p7  ;;  %s297_s23 = sshll.u32 %s5213_s22, 4  ;;  %s298_s23 = int_to_ptr.vmem [resolvable:$true] %s297_s23 }
  0x14   : > { %s5214_s25 = smov [#allocation10]   ;;  %s5215_s27 = smov [#allocation9]  }
  0x15   : > { %s7376_s21 = scalar_select %p5322_p8, 1, 0 }
  0x16   : > { %p4247_p9 = pneg %p5322_p8  ;;  %s326_s26 = sshll.u32 %s5214_s25, 4  ;;  %s327_s26 = int_to_ptr.vmem [resolvable:$true] %s326_s26 }
  0x17   : > { %s310_s28 = sshll.u32 %s5215_s27, 4  ;;  %s5018_s29 = scalar_lea.vmem %s298_s23, 4096  ;;  %s311_s28 = int_to_ptr.vmem [resolvable:$true] %s310_s28 }
  0x18   : > { %p5331_p11 = pnand %p4247_p9, %p7082_p1  ;;  %p5019_p13 = scmp.ne.s32.totalorder %s298_s23, %s5018_s29 }
  0x19   : > { %p5026_p5 = scmp.lt.s32.totalorder %s298_s23, %s298_s23  ;;  %p5027_p7 = scmp.lt.s32.totalorder %s5018_s29, %s5018_s29 }
  0x1a   : > { %p5009_p12 = pneg %p5331_p11 }
  0x1b   : > { %p5028_p9 = por %p5027_p7, %p5026_p5 }
  0x1c   : > { %p5021_p0 = pnand %p5019_p13, %p5009_p12 }
  0x1e   : > { %p5022_p3 = pneg %p5021_p0 }
  0x20   : > { %p5029_p10 = pnand %p5028_p9, %p5022_p3 }
  0x22   : > { %5032 = shalt.err (!%p5029_p10)
}
  0x23   : > { %s7083_s30 = smov 256   ;;  %s5217_s11 = smov 16  }
  0x24   : > { %s7378_s1 = sld [smem:[#allocation89_spill]]  ;;  %s5044_s22 = scalar_lea.vmem %s327_s26, 8192 }
  0x25   : > { %p5045_p1 = scmp.ne.s32.totalorder %s327_s26, %s5044_s22  ;;  %p5052_p5 = scmp.lt.s32.totalorder %s327_s26, %s327_s26 }
  0x26   : > { %p5053_p3 = scmp.lt.s32.totalorder %s5044_s22, %s5044_s22 }
  0x27   : > { %p5047_p13 = pnand %p5045_p1, %p5009_p12 }
  0x28   : > { %p5054_p10 = por %p5053_p3, %p5052_p5 }
  0x29   : > { %p5048_p0 = pneg %p5047_p13 }
  0x2a   : > { %4250 = dma.hbm_to_vmem [thread:$0]  (!%p5331_p11), %s7378_s1, 4096, %s298_s23, [#allocation8], %s7083_s30, %s7083_s30, %s5217_s11  }
  0x2b   : > { %p5055_p7 = pnand %p5054_p10, %p5048_p0 }
  0x2d   : > { %5058 = shalt.err (!%p5055_p7)
}
  0x2e   : > { %s7379_s4 = sld [smem:[#allocation91_spill]]  ;;  %s5070_s23 = scalar_lea.vmem %s311_s28, 4096 }
  0x2f   : > { %p5071_p9 = scmp.ne.s32.totalorder %s311_s28, %s5070_s23  ;;  %p5078_p2 = scmp.lt.s32.totalorder %s311_s28, %s311_s28 }
  0x30   : > { %p5079_p5 = scmp.lt.s32.totalorder %s5070_s23, %s5070_s23 }
  0x31   : > { %p5073_p1 = pnand %p5071_p9, %p5009_p12 }
  0x32   : > { %p5080_p0 = por %p5079_p5, %p5078_p2 }
  0x33   : > { %p5074_p13 = pneg %p5073_p1 }
  0x34   : > { %4256 = dma.hbm_to_vmem [thread:$0]  (!%p5331_p11), %s7379_s4, 8192, %s327_s26, [#allocation11], %s7083_s30, %s7083_s30, %s5217_s11  }
  0x35   : > { %p5081_p3 = pnand %p5080_p0, %p5074_p13 }
  0x37   : > { %5084 = shalt.err (!%p5081_p3)
}
  0x38   : > { %s7380_s2 = sld [smem:[#allocation90_spill]]  ;;  %s5218_s26 = smov [#allocation12]  }
  0x39   : > { %s342_s18 = sshll.u32 %s5218_s26, 4  ;;  %s343_s18 = int_to_ptr.vmem [resolvable:$true] %s342_s18 }
  0x3a   : > { %s5096_s22 = scalar_lea.vmem %s343_s18, 1024  ;;  %p5104_p9 = scmp.lt.s32.totalorder %s343_s18, %s343_s18 }
  0x3b   : > { %p5097_p10 = scmp.ne.s32.totalorder %s343_s18, %s5096_s22  ;;  %p5105_p1 = scmp.lt.s32.totalorder %s5096_s22, %s5096_s22 }
  0x3d   : > { %p5099_p7 = pnand %p5097_p10, %p5009_p12  ;;  %p5106_p13 = por %p5105_p1, %p5104_p9 }
  0x3e   : > { %4253 = dma.hbm_to_vmem [thread:$0]  (!%p5331_p11), %s7380_s2, 4096, %s311_s28, [#allocation8], %s7083_s30, %s7083_s30, %s5217_s11  }
  0x3f   : > { %p5100_p2 = pneg %p5099_p7 }
  0x41   : > { %p5107_p5 = pnand %p5106_p13, %p5100_p2 }
  0x43   : > { %5110 = shalt.err (!%p5107_p5)
}
  0x44   : > { %s5219_s25 = smov 64   ;;  %s5220_s28 = smov 4  }
  0x45   : > { %s7381_s6 = sld [smem:[#allocation92_spill]]  ;;  %s5376_s23 = sadd.s32 1, %s5211_s16  }
  0x46   : > { %s33_s29 = ssub.s32 %s5211_s16, %s5376_s23  ;;  %s36_s12 = sadd.s32 1, %s5207_s15 }
  0x47   : > { %p34_p12 = scmp.eq.s32.totalorder %s33_s29, 0  ;;  %p43_p0 = scmp.ne.s32.totalorder %s5207_s15, %s5203_s14 }
  0x48   : > { %p44_p3 = scmp.eq.s32.totalorder %s5211_s16, 0  ;;  %p7382_p7 = scmp.eq.s32.totalorder %s5303_s17, 1 }
  0x49   : > { %s5385_s26 = scalar_select %p34_p12, %s5207_s15, %s36_s12  }
  0x4a   : > { %p45_p10 = por %p44_p3, %p43_p0  ;;  %p5389_p2 = por %p7382_p7, %p43_p0 }
  0x4b   : > { %4259 = dma.hbm_to_vmem [thread:$0]  (!%p5331_p11), %s7381_s6, 1024, %s343_s18, [#allocation11], %s5219_s25, %s5219_s25, %s5220_s28  }
  0x4c   : > { %s7383_s22 = scalar_select %p5389_p2, 1, 0 }
  0x4d   : > { %p4272_p9 = scmp.lt.s32.totalorder %s5211_s16, 2  ;;  %s359_s24 = sand.u32 1, %s5207_s15  }
  0x4e   : > { %s3958_s11 = sshll.u32 %s359_s24, 6  ;;  %s3959_s18 = sshll.u32 %s5211_s16, 7 }
  0x4f   : > { %s5399_s27 = scalar_lea.hbm %s7071_s0, %s3959_s18  ;;  %s363_s29 = scalar_lea.vmem [#allocation4], %s3958_s11 }
  0x50   : > { %s369_s12 = sshll.u32 %s363_s29, 4  ;;  %p5403_p11 = pnand %p4272_p9, %p45_p10  ;;  %s5401_s12 = int_to_ptr.vmem [resolvable:$true] %s369_s12 }
  0x51   : > { %s5407_s1 = scalar_lea.sflag [#allocation5], %s359_s24  ;;  %s5111_s2 = scalar_lea.hbm %s5399_s27, 1024 }
  0x52   : > { %p5112_p1 = scmp.ne.s32.totalorder %s5399_s27, %s5111_s2  ;;  %p5113_p13 = pneg %p5403_p11 }
  0x53   : > { %s5116_s11 = scalar_lea.hbm %s7071_s0, 2048  ;;  %p5117_p0 = scmp.lt.s32.totalorder %s5399_s27, %s7071_s0 }
  0x54   : > { %p5114_p5 = pnand %p5113_p13, %p5112_p1  ;;  %p5118_p3 = scmp.lt.s32.totalorder %s5116_s11, %s5111_s2 }
  0x56   : > { %p5115_p12 = pneg %p5114_p5  ;;  %p5119_p10 = por %p5118_p3, %p5117_p0 }
  0x58   : > { %p5120_p7 = pnand %p5119_p10, %p5115_p12 }
  0x5a   : > { %5123 = shalt.err (!%p5120_p7)
}
  0x5b   : > { %s5124_s24 = scalar_lea.vmem %s5401_s12, 1024  ;;  %s5221_s4 = smov [#allocation4]  }
  0x5c   : > { %p5125_p9 = scmp.ne.s32.totalorder %s5401_s12, %s5124_s24  ;;  %s5129_s6 = sshll.u32 %s5221_s4, 4  ;;  %s5130_s6 = int_to_ptr.vmem [resolvable:$false] %s5129_s6 }
  0x5d   : > { %s5131_s18 = scalar_lea.vmem %s5130_s6, 2048  ;;  %p5132_p5 = scmp.lt.s32.totalorder %s5401_s12, %s5130_s6 }
  0x5e   : > { %p5127_p6 = pnand %p5125_p9, %p5113_p13  ;;  %p5133_p2 = scmp.lt.s32.totalorder %s5131_s18, %s5124_s24 }
  0x60   : > { %p5128_p1 = pneg %p5127_p6  ;;  %p5134_p4 = por %p5133_p2, %p5132_p5 }
  0x62   : > { %p5135_p8 = pnand %p5134_p4, %p5128_p1 }
  0x64   : > { %5138 = shalt.err (!%p5135_p8)
}
  0x65   : > { %s5222_s2 = smov 128   ;;  %s5223_s25 = smov 8  }
  0x66   : > { %s7385_s11 = smov 256   ;;  %p7386_p6 = scmp.ne.s32.totalorder %s7376_s21, 0 }
  0x67   : > { %4263 = dma.hbm_to_vmem [thread:$0]  (!%p5403_p11), %s5399_s27, 1024, %s5401_s12, %s5407_s1, %s7385_s11, %s5222_s2, %s5223_s25  }
  0x68   : > { %388 = sbr.rel (%p7386_p6) target bundleno = 3755 (0xeab), region = 56 }
  0x6d   : > { %s5432_s4 = sand.u32 1, %s5203_s14   ;;  %p7387_p4 = scmp.ne.s32.totalorder %s7374_s19, 0 }
  0x6e   : > { %s3961_s6 = sshll.u32 %s5432_s4, 6  ;;  %s391_s28 = scalar_lea.sflag [#allocation5], %s5432_s4 }
  0x6f   : > { %s5436_s29 = scalar_lea.vmem [#allocation4], %s3961_s6 }
  0x70   : > { %5182 = dma.done.wait (%p7387_p4), %s391_s28, 1024  }
  0x71   : > { %5184 = vsyncadd (%p7387_p4), %s391_s28, 4294966272  ;;  %p7388_p8 = scmp.eq.s32.totalorder %s5303_s17, 0 }
  0x73   : > { %5186 = dma.done.wait (%p7388_p8), [#allocation8], 8192   ;;  %p7389_p2 = pmov %p7388_p8 }
  0x75   : > { %5188 = vsyncadd (%p7389_p2), [#allocation8], 4294959104  ;;  %p7390_p11 = pmov %p7389_p2 }
  0x76   : > { %p7391_p13 = pmov %p7389_p2 }
  0x77   : > { %5190 = dma.done.wait (%p7390_p11), [#allocation11], 9216  }
  0x78   : > { %5192 = vsyncadd (%p7391_p13), [#allocation11], 4294958080  ;;  %v7087_v0 = vmov 0   ;;  %v4323_v1 = vld [vmem:[#allocation7 + $0xe4] ss:$16 sps:$4 sm:$0xff]   ;;  %v465_v32 = vld [vmem:[%s5436_s29 + $0x8] sm:$0xff] }
  0x79   : > { %722 = vmatprep.mubr.bf16.mxu1 %v7087_v0  ;;  %1296 = vmatprep.mubr.bf16.mxu0 %v7087_v0  ;;  %v4325_v2 = vld [vmem:[#allocation7 + $0xe0] ss:$16 sps:$4 sm:$0xff]   ;;  %v4326_v3 = vld [vmem:[#allocation7 + $0xc4] ss:$16 sps:$4 sm:$0xff]   ;;  %v4370_v34 = vld [vmem:[#allocation7 + $0xec] ss:$16 sps:$4 sm:$0xff]  }
  0x7a   : > { %690 = vmatprep.subr.bf16.mxu1 %v4323_v1  ;;  %v4328_v4 = vld [vmem:[#allocation7 + $0xc0] ss:$16 sps:$4 sm:$0xff]   ;;  %v5452_v5 = vld [vmem:[#allocation9 + $0xe4] ss:$16 sps:$4 sm:$0xff]   ;;  %v4368_v37 = vld [vmem:[#allocation7 + $0xe8] ss:$16 sps:$4 sm:$0xff]  }
  0x7b   : > { %691 = vmatpush1.bf16.msra.mxu1 %v4325_v2  ;;  %v4331_v6 = vld [vmem:[#allocation9 + $0xe0] ss:$16 sps:$4 sm:$0xff]   ;;  %v4332_v7 = vld [vmem:[#allocation7 + $0xa4] ss:$16 sps:$4 sm:$0xff]   ;;  %1264 = vmatprep.subr.bf16.mxu0 %v5452_v5  ;;  %v4376_v38 = vld [vmem:[#allocation7 + $0xcc] ss:$16 sps:$4 sm:$0xff]  }
  0x7c   : > { %692 = vmatprep.subr.bf16.mxu1 %v4326_v3  ;;  %1265 = vmatpush1.bf16.msra.mxu0 %v4331_v6  ;;  %v4335_v8 = vld [vmem:[#allocation9 + $0xc4] ss:$16 sps:$4 sm:$0xff]   ;;  %v4337_v9 = vld [vmem:[#allocation9 + $0xc0] ss:$16 sps:$4 sm:$0xff]   ;;  %v4374_v39 = vld [vmem:[#allocation7 + $0xc8] ss:$16 sps:$4 sm:$0xff]  }
  0x7d   : > { %v4334_v10 = vld [vmem:[#allocation7 + $0xa0] ss:$16 sps:$4 sm:$0xff]   ;;  %v4338_v11 = vld [vmem:[#allocation7 + $0x84] ss:$16 sps:$4 sm:$0xff]   ;;  %1266 = vmatprep.subr.bf16.mxu0 %v4335_v8  ;;  %v467_v41 = vld [vmem:[%s5436_s29 + $0x18] sm:$0xff]  ;;  %vm3614_vm0 = vcmask 1041409  }
  0x7e   : > { %v4341_v12 = vld [vmem:[#allocation9 + $0xa4] ss:$16 sps:$4 sm:$0xff]   ;;  %v4343_v13 = vld [vmem:[#allocation9 + $0xa0] ss:$16 sps:$4 sm:$0xff]   ;;  %v4379_v42 = vld [vmem:[#allocation7 + $0xac] ss:$16 sps:$4 sm:$0xff]  }
  0x7f   : > { %693 = vmatpush1.bf16.msra.mxu1 %v4328_v4  ;;  %v4340_v14 = vld [vmem:[#allocation7 + $0x80] ss:$16 sps:$4 sm:$0xff]   ;;  %v4347_v15 = vld [vmem:[#allocation9 + $0x84] ss:$16 sps:$4 sm:$0xff]   ;;  %v4377_v44 = vld [vmem:[#allocation7 + $0xa8] ss:$16 sps:$4 sm:$0xff]  }
  0x80   : > { %694 = vmatprep.subr.bf16.mxu1 %v4332_v7  ;;  %1267 = vmatpush1.bf16.msra.mxu0 %v4337_v9  ;;  %v4344_v16 = vld [vmem:[#allocation7 + $0x64] ss:$16 sps:$4 sm:$0xff]   ;;  %v4349_v17 = vld [vmem:[#allocation9 + $0x80] ss:$16 sps:$4 sm:$0xff]   ;;  %v4382_v45 = vld [vmem:[#allocation7 + $0x8c] ss:$16 sps:$4 sm:$0xff]  }
  0x81   : > { %1268 = vmatprep.subr.bf16.mxu0 %v4341_v12  ;;  %v4346_v18 = vld [vmem:[#allocation7 + $0x60] ss:$16 sps:$4 sm:$0xff]   ;;  %v4353_v19 = vld [vmem:[#allocation9 + $0x64] ss:$16 sps:$4 sm:$0xff]   ;;  %v4380_v46 = vld [vmem:[#allocation7 + $0x88] ss:$16 sps:$4 sm:$0xff]  }
  0x82   : > { %v4350_v20 = vld [vmem:[#allocation7 + $0x44] ss:$16 sps:$4 sm:$0xff]   ;;  %v4355_v21 = vld [vmem:[#allocation9 + $0x60] ss:$16 sps:$4 sm:$0xff]   ;;  %v469_v48 = vld [vmem:[%s5436_s29 + $0x28] sm:$0xff]  ;;  %vm3616_vm1 = vcmask 1042434  }
  0x83   : > { %695 = vmatpush1.bf16.msra.mxu1 %v4334_v10  ;;  %v4352_v22 = vld [vmem:[#allocation7 + $0x40] ss:$16 sps:$4 sm:$0xff]   ;;  %v4359_v23 = vld [vmem:[#allocation9 + $0x44] ss:$16 sps:$4 sm:$0xff]   ;;  %v4385_v49 = vld [vmem:[#allocation7 + $0x6c] ss:$16 sps:$4 sm:$0xff]  }
  0x84   : > { %696 = vmatprep.subr.bf16.mxu1 %v4338_v11  ;;  %1269 = vmatpush1.bf16.msra.mxu0 %v4343_v13  ;;  %v4356_v24 = vld [vmem:[#allocation7 + $0x24] ss:$16 sps:$4 sm:$0xff]   ;;  %v4358_v25 = vld [vmem:[#allocation7 + $0x20] ss:$16 sps:$4 sm:$0xff]   ;;  %v4383_v50 = vld [vmem:[#allocation7 + $0x68] ss:$16 sps:$4 sm:$0xff]  }
  0x85   : > { %1270 = vmatprep.subr.bf16.mxu0 %v4347_v15  ;;  %v4361_v26 = vld [vmem:[#allocation9 + $0x40] ss:$16 sps:$4 sm:$0xff]   ;;  %v4365_v27 = vld [vmem:[#allocation9 + $0x24] ss:$16 sps:$4 sm:$0xff]   ;;  %v4388_v52 = vld [vmem:[#allocation7 + $0x4c] ss:$16 sps:$4 sm:$0xff]  }
  0x86   : > { %v4362_v28 = vld [vmem:[#allocation7 + $0x4] ss:$16 sps:$4 sm:$0xff]   ;;  %v4364_v29 = vld [vmem:[#allocation7] ss:$16 sps:$4 sm:$0xff]   ;;  %v4386_v53 = vld [vmem:[#allocation7 + $0x48] ss:$16 sps:$4 sm:$0xff]  }
  0x87   : > { %697 = vmatpush1.bf16.msra.mxu1 %v4340_v14  ;;  %v5455_v30 = vld [vmem:[#allocation9 + $0x20] ss:$16 sps:$4 sm:$0xff]   ;;  %v5459_v33 = vld [vmem:[#allocation9 + $0x4] ss:$16 sps:$4 sm:$0xff]   ;;  %v471_v55 = vld [vmem:[%s5436_s29 + $0x38] sm:$0xff]  ;;  %vm3618_vm2 = vcmask 1043459  }
  0x88   : > { %698 = vmatprep.subr.bf16.mxu1 %v4344_v16  ;;  %1271 = vmatpush1.bf16.msra.mxu0 %v4349_v17  ;;  %v464_v31 = vld [vmem:[%s5436_s29] sm:$0xff]  ;;  %v466_v40 = vld [vmem:[%s5436_s29 + $0x10] sm:$0xff]  ;;  %v4391_v56 = vld [vmem:[#allocation7 + $0x2c] ss:$16 sps:$4 sm:$0xff]   ;;  %vm3620_vm3 = vcmask 1044484   ;;  %vm3622_vm4 = vcmask 1045509  }
  0x89   : > { %1272 = vmatprep.subr.bf16.mxu0 %v4353_v19  ;;  %v472_v35 = vpack.c.bf16 %v465_v32, %v464_v31  ;;  %v5462_v36 = vld [vmem:[#allocation9] ss:$16 sps:$4 sm:$0xff]   ;;  %v473_v43 = vpack.c.bf16 %v467_v41, %v466_v40  ;;  %v4389_v57 = vld [vmem:[#allocation7 + $0x28] ss:$16 sps:$4 sm:$0xff]   ;;  %v4394_v59 = vld [vmem:[#allocation7 + $0xc] ss:$16 sps:$4 sm:$0xff]  }
  0x8a   : > { %v468_v47 = vld [vmem:[%s5436_s29 + $0x20] sm:$0xff]  ;;  %v470_v54 = vld [vmem:[%s5436_s29 + $0x30] sm:$0xff]  ;;  %v4392_v60 = vld [vmem:[#allocation7 + $0x8] ss:$16 sps:$4 sm:$0xff]   ;;  %vm3624_vm5 = vcmask 1046534   ;;  %vm3626_vm6 = vcmask 1047559  }
  0x8b   : > { %699 = vmatpush1.bf16.msra.mxu1 %v4346_v18  ;;  %v474_v51 = vpack.c.bf16 %v469_v48, %v468_v47  ;;  %v475_v58 = vpack.c.bf16 %v471_v55, %v470_v54  ;;  %v5476_v61 = vld [vmem:[#allocation9 + $0xec] ss:$16 sps:$4 sm:$0xff]   ;;  %v5479_v62 = vld [vmem:[#allocation9 + $0xe8] ss:$16 sps:$4 sm:$0xff]   ;;  %v5530_v15 = vld [vmem:[#allocation10 + $0xe4] ss:$16 sps:$4 sm:$0xff]  }
  0x8c   : > { %700 = vmatprep.subr.bf16.mxu1 %v4350_v20  ;;  %1273 = vmatpush1.bf16.msra.mxu0 %v4355_v21  ;;  %7392 = vst [vmem:[#allocation18_spill] sm:$0xff] %v5476_v61  ;;  %v5481_v63 = vld [vmem:[#allocation9 + $0xcc] ss:$16 sps:$4 sm:$0xff]   ;;  %v5484_v1 = vld [vmem:[#allocation9 + $0xc8] ss:$16 sps:$4 sm:$0xff]   ;;  %vm3667_vm7 = vcmask 64512  }
  0x8d   : > { %1274 = vmatprep.subr.bf16.mxu0 %v4359_v23  ;;  %v5486_v2 = vld [vmem:[#allocation9 + $0xac] ss:$16 sps:$4 sm:$0xff]   ;;  %v5491_v3 = vld [vmem:[#allocation9 + $0xa8] ss:$16 sps:$4 sm:$0xff]   ;;  %v5534_v17 = vld [vmem:[#allocation10 + $0xe0] ss:$16 sps:$4 sm:$0xff]  }
  0x8e   : > { %v5495_v4 = vld [vmem:[#allocation9 + $0x8c] ss:$16 sps:$4 sm:$0xff]   ;;  %v5498_v6 = vld [vmem:[#allocation9 + $0x88] ss:$16 sps:$4 sm:$0xff]   ;;  %v5542_v19 = vld [vmem:[#allocation10 + $0xc4] ss:$16 sps:$4 sm:$0xff]  }
  0x8f   : > { %701 = vmatpush1.bf16.msra.mxu1 %v4352_v22  ;;  %v5502_v7 = vld [vmem:[#allocation9 + $0x6c] ss:$16 sps:$4 sm:$0xff]   ;;  %v5505_v8 = vld [vmem:[#allocation9 + $0x68] ss:$16 sps:$4 sm:$0xff]   ;;  %v5546_v21 = vld [vmem:[#allocation10 + $0xc0] ss:$16 sps:$4 sm:$0xff]  }
  0x90   : > { %702 = vmatprep.subr.bf16.mxu1 %v4356_v24  ;;  %1275 = vmatpush1.bf16.msra.mxu0 %v4361_v26  ;;  %v5508_v9 = vld [vmem:[#allocation9 + $0x4c] ss:$16 sps:$4 sm:$0xff]   ;;  %v5511_v10 = vld [vmem:[#allocation9 + $0x48] ss:$16 sps:$4 sm:$0xff]   ;;  %v5554_v23 = vld [vmem:[#allocation10 + $0xa4] ss:$16 sps:$4 sm:$0xff]  }
  0x91   : > { %1276 = vmatprep.subr.bf16.mxu0 %v4365_v27  ;;  %v5515_v11 = vld [vmem:[#allocation9 + $0x2c] ss:$16 sps:$4 sm:$0xff]   ;;  %v5518_v12 = vld [vmem:[#allocation9 + $0x28] ss:$16 sps:$4 sm:$0xff]   ;;  %v5566_v27 = vld [vmem:[#allocation10 + $0x84] ss:$16 sps:$4 sm:$0xff]  }
  0x92   : > { %v5521_v13 = vld [vmem:[#allocation9 + $0xc] ss:$16 sps:$4 sm:$0xff]   ;;  %v5524_v14 = vld [vmem:[#allocation9 + $0x8] ss:$16 sps:$4 sm:$0xff]   ;;  %v5578_v32 = vld [vmem:[#allocation10 + $0x64] ss:$16 sps:$4 sm:$0xff]  }
  0x93   : > { %703 = vmatpush1.bf16.msra.mxu1 %v4358_v25  ;;  %v5532_v16 = vld [vmem:[#allocation10 + $0xec] ss:$16 sps:$4 sm:$0xff]   ;;  %v5536_v18 = vld [vmem:[#allocation10 + $0xe8] ss:$16 sps:$4 sm:$0xff]   ;;  %v5558_v25 = vld [vmem:[#allocation10 + $0xa0] ss:$16 sps:$4 sm:$0xff]  }
  0x94   : > { %704 = vmatprep.subr.bf16.mxu1 %v4362_v28  ;;  %1277 = vmatpush1.bf16.msra.mxu0 %v5455_v30  ;;  %v5544_v20 = vld [vmem:[#allocation10 + $0xcc] ss:$16 sps:$4 sm:$0xff]   ;;  %v5548_v22 = vld [vmem:[#allocation10 + $0xc8] ss:$16 sps:$4 sm:$0xff]   ;;  %7393 = vst [vmem:[#allocation19_spill] sm:$0xff] %v5578_v32  ;;  %p455_p12 = scmp.lt.s32.totalorder %s5303_s17, 1 }
  0x95   : > { %1278 = vmatprep.subr.bf16.mxu0 %v5459_v33  ;;  %v5556_v24 = vld [vmem:[#allocation10 + $0xac] ss:$16 sps:$4 sm:$0xff]   ;;  %v5560_v26 = vld [vmem:[#allocation10 + $0xa8] ss:$16 sps:$4 sm:$0xff]   ;;  %v5594_v40 = vld [vmem:[#allocation10 + $0x40] ss:$16 sps:$4 sm:$0xff]  }
  0x96   : > { %v5568_v28 = vld [vmem:[#allocation10 + $0x8c] ss:$16 sps:$4 sm:$0xff]   ;;  %v5572_v31 = vld [vmem:[#allocation10 + $0x88] ss:$16 sps:$4 sm:$0xff]   ;;  %7399 = vst [vmem:[#allocation25_spill] sm:$0xff] %v5594_v40  ;;  %s456_s24 = scalar_select %p455_p12, %s5303_s17, 1 }
  0x97   : > { %705 = vmatpush1.bf16.msra.mxu1 %v4364_v29  ;;  %v5570_v29 = vld [vmem:[#allocation10 + $0x80] ss:$16 sps:$4 sm:$0xff]   ;;  %v5596_v41 = vld [vmem:[#allocation10 + $0x48] ss:$16 sps:$4 sm:$0xff]   ;;  %v5616_v47 = vld [vmem:[#allocation10 + $0xc] ss:$16 sps:$4 sm:$0xff]  }
  0x98   : > { %763 = vmatprep.subr.bf16.mxu1 %v4370_v34  ;;  %1279 = vmatpush1.bf16.msra.mxu0 %v5462_v36  ;;  %v5580_v34 = vld [vmem:[#allocation10 + $0x6c] ss:$16 sps:$4 sm:$0xff]   ;;  %7400 = vst [vmem:[#allocation26_spill] sm:$0xff] %v5596_v41  ;;  %7406 = vst [vmem:[#allocation32_spill] sm:$0xff] %v5616_v47  ;;  %v5618_v48 = vld [vmem:[#allocation10] ss:$16 sps:$4 sm:$0xff]  }
  0x99   : > { %1696 = vmatprep.subr.bf16.mxu0 %v5530_v15  ;;  %7394 = vst [vmem:[#allocation20_spill] sm:$0xff] %v5580_v34  ;;  %7407 = vst [vmem:[#allocation33_spill] sm:$0xff] %v5618_v48  ;;  %v5638_v54 = vld [vmem:[#allocation10 + $0x1c4] ss:$16 sps:$4 sm:$0xff]   ;;  %v5640_v55 = vld [vmem:[#allocation10 + $0x1cc] ss:$16 sps:$4 sm:$0xff]  }
  0x9a   : > { %723 = vmatmul.mubr.bf16.vlgmr.msra.gmra.mxu1 %v472_v35  ;;  %7413 = vst [vmem:[#allocation39_spill] sm:$0xff] %v5638_v54  ;;  %7414 = vst [vmem:[#allocation40_spill] sm:$0xff] %v5640_v55  ;;  %s3967_s18 = sshll.u32 %s456_s24, 3  ;;  %s3966_s1 = sshll.u32 %s5432_s4, 3 }
  0x9b   : > { %764 = vmatpush1.bf16.msra.mxu1 %v4368_v37  ;;  %732 = vmatprep.mubr.bf16.mxu1 %v7087_v0  ;;  %v5584_v37 = vld [vmem:[#allocation10 + $0x68] ss:$16 sps:$4 sm:$0xff]   ;;  %s462_s11 = scalar_lea.vmem %s7081_s10, %s3967_s18  ;;  %s458_s29 = scalar_lea.vmem %s7079_s8, %s3967_s18 }
  0x9c   : > { %765 = vmatprep.subr.bf16.mxu1 %v4376_v38  ;;  %1297 = vmatmul.mubr.bf16.vlgmr.msra.gmra.mxu0 %v7087_v0  ;;  %7396 = vst [vmem:[#allocation22_spill] sm:$0xff] %v5584_v37  ;;  %v5590_v38 = vld [vmem:[#allocation10 + $0x44] ss:$16 sps:$4 sm:$0xff]   ;;  %s4172_s19 = sshll.u32 %s5303_s17, 7  ;;  %s448_s21 = scalar_lea.vmem [#allocation13], %s3966_s1 }
  0x9d   : > { %1697 = vmatpush1.bf16.msra.mxu0 %v5534_v17  ;;  %7397 = vst [vmem:[#allocation23_spill] sm:$0xff] %v5590_v38  ;;  %s3804_s30 = sshll.u32 %s448_s21, 4  ;;  %s3802_s24 = scalar_lea.hbm %s7080_s9, %s4172_s19  ;;  %s3805_s30 = int_to_ptr.vmem [resolvable:$true] %s3804_s30 }
  0x9e   : > { %1698 = vmatprep.subr.bf16.mxu0 %v5542_v19  ;;  %s3787_s18 = scalar_lea.sflag [#allocation6], %s5432_s4  ;;  %s5139_s2 = scalar_lea.vmem %s3805_s30, 128 }
  0x9f   : > { %766 = vmatpush1.bf16.msra.mxu1 %v4374_v39  ;;  %v5592_v39 = vld [vmem:[#allocation10 + $0x4c] ss:$16 sps:$4 sm:$0xff]   ;;  %p5140_p0 = scmp.ne.s32.totalorder %s3805_s30, %s5139_s2  ;;  %p7835_p3 = scmp.ne.s32.totalorder %s7383_s22, 0 }
  0xa0   : > { %767 = vmatprep.subr.bf16.mxu1 %v4379_v42  ;;  %7398 = vst [vmem:[#allocation24_spill] sm:$0xff] %v5592_v39  ;;  %v5602_v42 = vld [vmem:[#allocation10 + $0x24] ss:$16 sps:$4 sm:$0xff]   ;;  %s5226_s25 = smov [#allocation13]  }
  0xa1   : > { %1699 = vmatpush1.bf16.msra.mxu0 %v5546_v21  ;;  %7401 = vst [vmem:[#allocation27_spill] sm:$0xff] %v5602_v42  ;;  %p5141_p10 = pnand %p5140_p0, %p7835_p3  ;;  %s5143_s17 = sshll.u32 %s5226_s25, 4  ;;  %s5144_s17 = int_to_ptr.vmem [resolvable:$false] %s5143_s17 }
  0xa2   : > { %733 = vmatmul.mubr.bf16.gmra.mxu1 %v473_v43  ;;  %1700 = vmatprep.subr.bf16.mxu0 %v5554_v23  ;;  %p5146_p9 = scmp.lt.s32.totalorder %s3805_s30, %s5144_s17 }
  0xa3   : > { %768 = vmatpush1.bf16.msra.mxu1 %v4377_v44  ;;  %742 = vmatprep.mubr.bf16.mxu1 %v7087_v0  ;;  %v5606_v44 = vld [vmem:[#allocation10 + $0x20] ss:$16 sps:$4 sm:$0xff]   ;;  %p5142_p7 = pneg %p5141_p10 }
  0xa4   : > { %769 = vmatprep.subr.bf16.mxu1 %v4382_v45  ;;  %7403 = vst [vmem:[#allocation29_spill] sm:$0xff] %v5606_v44  ;;  %v5608_v45 = vld [vmem:[#allocation10 + $0x28] ss:$16 sps:$4 sm:$0xff]  }
  0xa5   : > { %1701 = vmatpush1.bf16.msra.mxu0 %v5558_v25  ;;  %7404 = vst [vmem:[#allocation30_spill] sm:$0xff] %v5608_v45 }
  0xa6   : > { %1702 = vmatprep.subr.bf16.mxu0 %v5566_v27 }
  0xa7   : > { %770 = vmatpush1.bf16.msra.mxu1 %v4380_v46  ;;  %v5614_v46 = vld [vmem:[#allocation10 + $0x4] ss:$16 sps:$4 sm:$0xff]  }
  0xa8   : > { %771 = vmatprep.subr.bf16.mxu1 %v4385_v49  ;;  %7405 = vst [vmem:[#allocation31_spill] sm:$0xff] %v5614_v46  ;;  %v5620_v49 = vld [vmem:[#allocation10 + $0x8] ss:$16 sps:$4 sm:$0xff]  }
  0xa9   : > { %1703 = vmatpush1.bf16.msra.mxu0 %v5570_v29  ;;  %7408 = vst [vmem:[#allocation34_spill] sm:$0xff] %v5620_v49 }
  0xaa   : > { %743 = vmatmul.mubr.bf16.gmra.mxu1 %v474_v51  ;;  %1704 = vmatprep.subr.bf16.mxu0 %v5578_v32 }
  0xab   : > { %772 = vmatpush1.bf16.msra.mxu1 %v4383_v50  ;;  %752 = vmatprep.mubr.bf16.mxu1 %v7087_v0  ;;  %v5626_v50 = vld [vmem:[#allocation10 + $0x1e4] ss:$16 sps:$4 sm:$0xff]  }
  0xac   : > { %773 = vmatprep.subr.bf16.mxu1 %v4388_v52  ;;  %7409 = vst [vmem:[#allocation35_spill] sm:$0xff] %v5626_v50  ;;  %v5630_v52 = vld [vmem:[#allocation10 + $0x1e0] ss:$16 sps:$4 sm:$0xff]  }
  0xad   : > { %7411 = vst [vmem:[#allocation37_spill] sm:$0xff] %v5630_v52 }
  0xaf   : > { %774 = vmatpush1.bf16.msra.mxu1 %v4386_v53  ;;  %v5632_v53 = vld [vmem:[#allocation10 + $0x1e8] ss:$16 sps:$4 sm:$0xff]  }
  0xb0   : > { %775 = vmatprep.subr.bf16.mxu1 %v4391_v56  ;;  %7412 = vst [vmem:[#allocation38_spill] sm:$0xff] %v5632_v53  ;;  %v5642_v56 = vld [vmem:[#allocation10 + $0x1c0] ss:$16 sps:$4 sm:$0xff]  }
  0xb1   : > { %7415 = vst [vmem:[#allocation41_spill] sm:$0xff] %v5642_v56 }
  0xb2   : > { %753 = vmatmul.mubr.bf16.gmra.mxu1 %v475_v58 }
  0xb3   : > { %776 = vmatpush1.bf16.msra.mxu1 %v4389_v57  ;;  %795 = vmatprep.mubr.bf16.mxu1 %v7087_v0  ;;  %v5644_v57 = vld [vmem:[#allocation10 + $0x1c8] ss:$16 sps:$4 sm:$0xff]  }
  0xb4   : > { %777 = vmatprep.subr.bf16.mxu1 %v4394_v59  ;;  %7416 = vst [vmem:[#allocation42_spill] sm:$0xff] %v5644_v57  ;;  %v5652_v59 = vld [vmem:[#allocation10 + $0x1ac] ss:$16 sps:$4 sm:$0xff]  }
  0xb5   : > { %7418 = vst [vmem:[#allocation44_spill] sm:$0xff] %v5652_v59 }
  0xb7   : > { %778 = vmatpush1.bf16.msra.mxu1 %v4392_v60  ;;  %v5654_v60 = vld [vmem:[#allocation10 + $0x1a0] ss:$16 sps:$4 sm:$0xff]  }
  0xb8   : > { %1305 = vmatprep.subr.bf16.mxu1 %v5476_v61  ;;  %7419 = vst [vmem:[#allocation45_spill] sm:$0xff] %v5654_v60 }
  0xba   : > { %796 = vmatmul.mubr.bf16.vlgmr.msra.gmra.mxu1 %v472_v35  ;;  %v5582_v35 = vld [vmem:[#allocation10 + $0x60] ss:$16 sps:$4 sm:$0xff]  }
  0xbb   : > { %1306 = vmatpush1.bf16.msra.mxu1 %v5479_v62  ;;  %805 = vmatprep.mubr.bf16.mxu1 %v7087_v0  ;;  %7395 = vst [vmem:[#allocation21_spill] sm:$0xff] %v5582_v35 }
  0xbc   : > { %1307 = vmatprep.subr.bf16.mxu1 %v5481_v63  ;;  %1705 = vmatpush1.bf16.msra.mxu0 %v5582_v35 }
  0xbd   : > { %1706 = vmatprep.subr.bf16.mxu0 %v5590_v38 }
  0xbf   : > { %1308 = vmatpush1.bf16.msra.mxu1 %v5484_v1 }
  0xc0   : > { %1309 = vmatprep.subr.bf16.mxu1 %v5486_v2  ;;  %1707 = vmatpush1.bf16.msra.mxu0 %v5594_v40 }
  0xc1   : > { %1708 = vmatprep.subr.bf16.mxu0 %v5602_v42 }
  0xc2   : > { %806 = vmatmul.mubr.bf16.gmra.mxu1 %v473_v43  ;;  %v5604_v43 = vld [vmem:[#allocation10 + $0x2c] ss:$16 sps:$4 sm:$0xff]  }
  0xc3   : > { %1310 = vmatpush1.bf16.msra.mxu1 %v5491_v3  ;;  %815 = vmatprep.mubr.bf16.mxu1 %v7087_v0  ;;  %7402 = vst [vmem:[#allocation28_spill] sm:$0xff] %v5604_v43 }
  0xc4   : > { %1311 = vmatprep.subr.bf16.mxu1 %v5495_v4  ;;  %1709 = vmatpush1.bf16.msra.mxu0 %v5606_v44 }
  0xc5   : > { %1710 = vmatprep.subr.bf16.mxu0 %v5614_v46 }
  0xc7   : > { %1312 = vmatpush1.bf16.msra.mxu1 %v5498_v6 }
  0xc8   : > { %1313 = vmatprep.subr.bf16.mxu1 %v5502_v7  ;;  %1711 = vmatpush1.bf16.msra.mxu0 %v5618_v48 }
  0xc9   : > { %1712 = vmatprep.subr.bf16.mxu0 %v5626_v50 }
  0xca   : > { %816 = vmatmul.mubr.bf16.gmra.mxu1 %v474_v51  ;;  %v5628_v51 = vld [vmem:[#allocation10 + $0x1ec] ss:$16 sps:$4 sm:$0xff]  }
  0xcb   : > { %1314 = vmatpush1.bf16.msra.mxu1 %v5505_v8  ;;  %825 = vmatprep.mubr.bf16.mxu1 %v7087_v0  ;;  %7410 = vst [vmem:[#allocation36_spill] sm:$0xff] %v5628_v51 }
  0xcc   : > { %1315 = vmatprep.subr.bf16.mxu1 %v5508_v9  ;;  %1713 = vmatpush2.bf16.msra.mxu0 %v5630_v52  ;;  %v5684_v52 = vld [vmem:[#allocation10 + $0x14c] ss:$16 sps:$4 sm:$0xff]  }
  0xcd   : > { %1714 = vmatprep.subr.bf16.mxu0 %v5638_v54  ;;  %v5668_v54 = vld [vmem:[#allocation10 + $0x188] ss:$16 sps:$4 sm:$0xff]   ;;  %7430 = vst [vmem:[#allocation56_spill] sm:$0xff] %v5684_v52 }
  0xce   : > { %7424 = vst [vmem:[#allocation50_spill] sm:$0xff] %v5668_v54 }
  0xcf   : > { %1316 = vmatpush1.bf16.msra.mxu1 %v5511_v10 }
  0xd0   : > { %1317 = vmatprep.subr.bf16.mxu1 %v5515_v11  ;;  %1715 = vmatpush2.bf16.msra.mxu0 %v5642_v56  ;;  %v5664_v56 = vld [vmem:[#allocation10 + $0x18c] ss:$16 sps:$4 sm:$0xff]  }
  0xd1   : > { %7422 = vst [vmem:[#allocation48_spill] sm:$0xff] %v5664_v56 }
  0xd2   : > { %826 = vmatmul.mubr.bf16.gmra.mxu1 %v475_v58  ;;  %v5650_v58 = vld [vmem:[#allocation10 + $0x1a4] ss:$16 sps:$4 sm:$0xff]  }
  0xd3   : > { %1318 = vmatpush1.bf16.msra.mxu1 %v5518_v12  ;;  %1337 = vmatprep.mubr.bf16.mxu1 %v7087_v0  ;;  %7417 = vst [vmem:[#allocation43_spill] sm:$0xff] %v5650_v58 }
  0xd4   : > { %1319 = vmatprep.subr.bf16.mxu1 %v5521_v13  ;;  %1716 = vmatprep.subr.bf16.mxu0 %v5650_v58  ;;  %v5680_v58 = vld [vmem:[#allocation10 + $0x168] ss:$16 sps:$4 sm:$0xff]  }
  0xd5   : > { %1717 = vmatpush2.bf16.msra.mxu0 %v5654_v60  ;;  %v5676_v60 = vld [vmem:[#allocation10 + $0x16c] ss:$16 sps:$4 sm:$0xff]   ;;  %7428 = vst [vmem:[#allocation54_spill] sm:$0xff] %v5680_v58 }
  0xd6   : > { %7426 = vst [vmem:[#allocation52_spill] sm:$0xff] %v5676_v60 }
  0xd7   : > { %1320 = vmatpush1.bf16.msra.mxu1 %v5524_v14 }
  0xd8   : > { %1737 = vmatprep.subr.bf16.mxu1 %v5532_v16 }
  0xda   : > { %1338 = vmatmul.mubr.bf16.vlgmr.msra.gmra.mxu1 %v7087_v0  ;;  %v5656_v0 = vld [vmem:[#allocation10 + $0x1a8] ss:$16 sps:$4 sm:$0xff]  }
  0xdb   : > { %1738 = vmatpush1.bf16.msra.mxu1 %v5536_v18  ;;  %7420 = vst [vmem:[#allocation46_spill] sm:$0xff] %v5656_v0 }
  0xdc   : > { %1739 = vmatprep.subr.bf16.mxu1 %v5544_v20 }
  0xdf   : > { %1740 = vmatpush1.bf16.msra.mxu1 %v5548_v22 }
  0xe0   : > { %1741 = vmatprep.subr.bf16.mxu1 %v5556_v24 }
  0xe3   : > { %1742 = vmatpush1.bf16.msra.mxu1 %v5560_v26 }
  0xe4   : > { %1743 = vmatprep.subr.bf16.mxu1 %v5568_v28 }
  0xe7   : > { %1744 = vmatpush1.bf16.msra.mxu1 %v5572_v31 }
  0xe8   : > { %1745 = vmatprep.subr.bf16.mxu1 %v5580_v34 }
  0xeb   : > { %1746 = vmatpush1.bf16.msra.mxu1 %v5584_v37 }
  0xec   : > { %1747 = vmatprep.subr.bf16.mxu1 %v5592_v39 }
  0xef   : > { %1748 = vmatpush1.bf16.msra.mxu1 %v5596_v41 }
  0xf0   : > { %1749 = vmatprep.subr.bf16.mxu1 %v5604_v43 }
  0xf3   : > { %1750 = vmatpush1.bf16.msra.mxu1 %v5608_v45 }
  0xf4   : > { %1751 = vmatprep.subr.bf16.mxu1 %v5616_v47 }
  0xf7   : > { %1752 = vmatpush1.bf16.msra.mxu1 %v5620_v49 }
  0xf8   : > { %1753 = vmatprep.subr.bf16.mxu1 %v5628_v51  ;;  %v5225_v51 = vmov 0.0|0.0  }
  0xf9   : > { %1728 = vmatprep.mubr.bf16.mxu0 %v5225_v51  ;;  %1769 = vmatprep.mubr.bf16.mxu1 %v5225_v51  ;;  %v5714_v51 = vld [vmem:[#allocation10 + $0x100] ss:$16 sps:$4 sm:$0xff]  }
  0xfa   : > { %7439 = vst [vmem:[#allocation65_spill] sm:$0xff] %v5714_v51 }
  0xfb   : > { %1754 = vmatpush2.bf16.msra.mxu1 %v5632_v53  ;;  %v5682_v53 = vld [vmem:[#allocation10 + $0x144] ss:$16 sps:$4 sm:$0xff]  }
  0xfc   : > { %1755 = vmatprep.subr.bf16.mxu1 %v5640_v55  ;;  %v5662_v55 = vld [vmem:[#allocation10 + $0x184] ss:$16 sps:$4 sm:$0xff]   ;;  %7429 = vst [vmem:[#allocation55_spill] sm:$0xff] %v5682_v53 }
  0xfd   : > { %7421 = vst [vmem:[#allocation47_spill] sm:$0xff] %v5662_v55  ;;  %1718 = vmatprep.subr.bf16.mxu0 %v5662_v55  ;;  %v5698_v55 = vld [vmem:[#allocation10 + $0x12c] ss:$16 sps:$4 sm:$0xff]  }
  0xfe   : > { %7434 = vst [vmem:[#allocation60_spill] sm:$0xff] %v5698_v55 }
  0xff   : > { %1756 = vmatpush2.bf16.msra.mxu1 %v5644_v57  ;;  %v5666_v57 = vld [vmem:[#allocation10 + $0x180] ss:$16 sps:$4 sm:$0xff]  }
 0x100   : > { %1757 = vmatprep.subr.bf16.mxu1 %v5652_v59  ;;  %7423 = vst [vmem:[#allocation49_spill] sm:$0xff] %v5666_v57  ;;  %1719 = vmatpush2.bf16.msra.mxu0 %v5666_v57  ;;  %v5674_v59 = vld [vmem:[#allocation10 + $0x164] ss:$16 sps:$4 sm:$0xff]   ;;  %v5692_v57 = vld [vmem:[#allocation10 + $0x148] ss:$16 sps:$4 sm:$0xff]  }
 0x101   : > { %7425 = vst [vmem:[#allocation51_spill] sm:$0xff] %v5674_v59  ;;  %1720 = vmatprep.subr.bf16.mxu0 %v5674_v59  ;;  %7432 = vst [vmem:[#allocation58_spill] sm:$0xff] %v5692_v57 }
 0x103   : > { %1758 = vmatpush2.bf16.msra.mxu1 %v5656_v0  ;;  %v5678_v0 = vld [vmem:[#allocation10 + $0x160] ss:$16 sps:$4 sm:$0xff]  }
 0x104   : > { %1759 = vmatprep.subr.bf16.mxu1 %v5664_v56  ;;  %7427 = vst [vmem:[#allocation53_spill] sm:$0xff] %v5678_v0  ;;  %1721 = vmatpush2.bf16.msra.mxu0 %v5678_v0  ;;  %v5696_v56 = vld [vmem:[#allocation10 + $0x124] ss:$16 sps:$4 sm:$0xff]   ;;  %v5704_v0 = vld [vmem:[#allocation10 + $0x128] ss:$16 sps:$4 sm:$0xff]  }
 0x105   : > { %1722 = vmatprep.subr.bf16.mxu0 %v5682_v53  ;;  %7433 = vst [vmem:[#allocation59_spill] sm:$0xff] %v5696_v56  ;;  %7436 = vst [vmem:[#allocation62_spill] sm:$0xff] %v5704_v0  ;;  %v5710_v53 = vld [vmem:[#allocation10 + $0x10c] ss:$16 sps:$4 sm:$0xff]  }
 0x106   : > { %7438 = vst [vmem:[#allocation64_spill] sm:$0xff] %v5710_v53 }
 0x107   : > { %1760 = vmatpush2.bf16.msra.mxu1 %v5668_v54  ;;  %v5690_v54 = vld [vmem:[#allocation10 + $0x140] ss:$16 sps:$4 sm:$0xff]  }
 0x108   : > { %1761 = vmatprep.subr.bf16.mxu1 %v5676_v60  ;;  %7431 = vst [vmem:[#allocation57_spill] sm:$0xff] %v5690_v54  ;;  %1723 = vmatpush2.bf16.msra.mxu0 %v5690_v54  ;;  %v5716_v54 = vld [vmem:[#allocation10 + $0x108] ss:$16 sps:$4 sm:$0xff]  }
 0x109   : > { %1724 = vmatprep.subr.bf16.mxu0 %v5696_v56  ;;  %7440 = vst [vmem:[#allocation66_spill] sm:$0xff] %v5716_v54 }
 0x10b   : > { %1762 = vmatpush2.bf16.msra.mxu1 %v5680_v58  ;;  %v5702_v58 = vld [vmem:[#allocation10 + $0x120] ss:$16 sps:$4 sm:$0xff]  }
 0x10c   : > { %1763 = vmatprep.subr.bf16.mxu1 %v5684_v52  ;;  %7435 = vst [vmem:[#allocation61_spill] sm:$0xff] %v5702_v58  ;;  %v5708_v52 = vld [vmem:[#allocation10 + $0x104] ss:$16 sps:$4 sm:$0xff]   ;;  %1725 = vmatpush2.bf16.msra.mxu0 %v5702_v58 }
 0x10d   : > { %7437 = vst [vmem:[#allocation63_spill] sm:$0xff] %v5708_v52  ;;  %1726 = vmatprep.subr.bf16.mxu0 %v5708_v52  ;;  %v508_v52 = vld [vmem:[%s7074_s3] sm:$0xf] }
 0x10f   : > { %1764 = vmatpush2.bf16.msra.mxu1 %v5692_v57 }
 0x110   : > { %1765 = vmatprep.subr.bf16.mxu1 %v5698_v55  ;;  %1727 = vmatpush2.bf16.msra.mxu0 %v5714_v51  ;;  %v7148_v55 = vlaneseq }
 0x111   : > { %1810 = vmatprep.subr.bf16.mxu0 %v5452_v5 }
 0x112   : > { %v5725_v58 = vshrl.u32 %v7148_v55, 7 }
 0x113   : > { %1766 = vmatpush2.bf16.msra.mxu1 %v5704_v0 }
 0x114   : > { %1767 = vmatprep.subr.bf16.mxu1 %v5710_v53  ;;  %7441 = vst [vmem:[#allocation67_spill] sm:$0xff] %v5725_v58  ;;  %v5728_v0 = vsub.s32 0, %v5725_v58  ;;  %v5734_v51 = vsub.s32 1, %v5725_v58 }
 0x116   : > { %7442 = vst [vmem:[#allocation68_spill] sm:$0xff] %v5728_v0  ;;  %7443 = vst [vmem:[#allocation69_spill] sm:$0xff] %v5734_v51  ;;  %v513_v5 = vrot.slane %v508_v52, %v5728_v0  ;;  %v517_v57 = vrot.slane %v508_v52, %v5734_v51 }
 0x117   : > { %1768 = vmatpush2.bf16.msra.mxu1 %v5716_v54 }
 0x118   : > { %1851 = vmatprep.subr.bf16.mxu1 %v5476_v61 }
 0x15a   : > { %v724_v53 = vpop.f32.mrf.mxu1 }
 0x15c   : > { %v726_v54 = vpop.f32.mrf.mxu1  ;;  %v1298_v56 = vpop.f32.mrf.mxu0 }
 0x15e   : > { %v728_v61 = vpop.f32.mrf.mxu1  ;;  %v1300_v60 = vpop.f32.mrf.mxu0 }
 0x15f   : > { %v729_v55 = vadd.f32 %v728_v61, %v513_v5 }
 0x160   : > { %v730_v59 = vpop.f32.mrf.mxu1  ;;  %v1302_v49 = vpop.f32.mrf.mxu0 }
 0x161   : > { %v731_v50 = vadd.f32 %v730_v59, %v517_v57 }
 0x162   : > { %v734_v48 = vpop.f32.mrf.mxu1  ;;  %v1303_v45 = vpop.f32.mrf.mxu0 }
 0x163   : > { %v5738_v47 = vpack.c.bf16 %v731_v50, %v729_v55  ;;  %v735_v46 = vadd.f32 %v734_v48, %v513_v5 }
 0x164   : > { %v736_v44 = vpop.f32.mrf.mxu1 }
 0x165   : > { %7444 = vst [vmem:[#allocation70_spill] sm:$0xff] %v5738_v47  ;;  %v737_v43 = vadd.f32 %v736_v44, %v517_v57  ;;  %v727_v44 = vadd.f32 %v726_v54, %v517_v57  ;;  %v5756_v54 = vsub.s32 3, %v5725_v58 }
 0x166   : > { %v738_v42 = vpop.f32.mrf.mxu1 }
 0x167   : > { %v5740_v41 = vpack.c.bf16 %v737_v43, %v735_v46  ;;  %v739_v0 = vadd.f32 %v738_v42, %v513_v5  ;;  %v725_v46 = vadd.f32 %v724_v53, %v513_v5  ;;  %7452 = vst [vmem:[#allocation78_spill] sm:$0xff] %v5756_v54 }
 0x168   : > { %v740_v40 = vpop.f32.mrf.mxu1 }
 0x169   : > { %7445 = vst [vmem:[#allocation71_spill] sm:$0xff] %v5740_v41  ;;  %v741_v39 = vadd.f32 %v740_v40, %v517_v57 }
 0x16a   : > { %v744_v38 = vpop.f32.mrf.mxu1 }
 0x16b   : > { %v5742_v51 = vpack.c.bf16 %v741_v39, %v739_v0  ;;  %v745_v61 = vadd.f32 %v744_v38, %v513_v5  ;;  %v4175_v0 = vpack.c.bf16 %v727_v44, %v725_v46 }
 0x16c   : > { %v746_v37 = vpop.f32.mrf.mxu1 }
 0x16d   : > { %7446 = vst [vmem:[#allocation72_spill] sm:$0xff] %v5742_v51  ;;  %v747_v59 = vadd.f32 %v746_v37, %v517_v57 }
 0x16e   : > { %v748_v49 = vpop.f32.mrf.mxu1 }
 0x16f   : > { %v5744_v35 = vpack.c.bf16 %v747_v59, %v745_v61  ;;  %v749_v50 = vadd.f32 %v748_v49, %v513_v5  ;;  %v5751_v61 = vsub.s32 2, %v5725_v58  ;;  %v1101_v49 = vunpack.c.h.bf16 %v4175_v0 }
 0x170   : > { %v750_v48 = vpop.f32.mrf.mxu1 }
 0x171   : > { %7447 = vst [vmem:[#allocation73_spill] sm:$0xff] %v5744_v35  ;;  %v751_v45 = vadd.f32 %v750_v48, %v517_v57  ;;  %7450 = vst [vmem:[#allocation76_spill] sm:$0xff] %v5751_v61  ;;  %v1347_v44 = vadd.f32 %v1300_v60, %v1101_v49 }
 0x172   : > { %v754_v55 = vpop.f32.mrf.mxu1 }
 0x173   : > { %v5746_v47 = vpack.c.bf16 %v751_v45, %v749_v50  ;;  %v755_v43 = vadd.f32 %v754_v55, %v513_v5  ;;  %v1100_v50 = vunpack.c.l.bf16 %v4175_v0  ;;  %v521_v45 = vrot.slane %v508_v52, %v5751_v61 }
 0x174   : > { %v756_v42 = vpop.f32.mrf.mxu1 }
 0x175   : > { %7448 = vst [vmem:[#allocation74_spill] sm:$0xff] %v5746_v47  ;;  %v757_v40 = vadd.f32 %v756_v42, %v517_v57 }
 0x176   : > { %v758_v41 = vpop.f32.mrf.mxu1 }
 0x177   : > { %v5748_v39 = vpack.c.bf16 %v757_v40, %v755_v43  ;;  %v759_v38 = vadd.f32 %v758_v41, %v513_v5  ;;  %v525_v41 = vrot.slane %v508_v52, %v5756_v54  ;;  %v4050_v40 = vmul.f32 -1.442695, %v1347_v44 }
 0x178   : > { %v760_v37 = vpop.f32.mrf.mxu1 }
 0x179   : > { %7449 = vst [vmem:[#allocation75_spill] sm:$0xff] %v5748_v39  ;;  %v761_v51 = vadd.f32 %v760_v37, %v517_v57  ;;  %v1346_v57 = vadd.f32 %v1298_v56, %v1100_v50  ;;  %4523 = vpow2.f32 %v4050_v40 }
 0x17a   : > { %v797_v59 = vpop.f32.mrf.mxu1 }
 0x17b   : > { %v5753_v48 = vpack.c.bf16 %v761_v51, %v759_v38  ;;  %v4049_v38 = vmul.f32 -1.442695, %v1346_v57 }
 0x17c   : > { %v799_v53 = vpop.f32.mrf.mxu1 }
 0x17d   : > { %7451 = vst [vmem:[#allocation77_spill] sm:$0xff] %v5753_v48  ;;  %4525 = vpow2.f32 %v4049_v38 }
 0x17e   : > { %v801_v55 = vpop.f32.mrf.mxu1 }
 0x17f   : > { %v802_v5 = vadd.f32 %v801_v55, %v521_v45 }
 0x180   : > { %v803_v43 = vpop.f32.mrf.mxu1 }
 0x181   : > { %v804_v42 = vadd.f32 %v803_v43, %v525_v41 }
 0x182   : > { %v807_v46 = vpop.f32.mrf.mxu1 }
 0x183   : > { %v5760_v37 = vpack.c.bf16 %v804_v42, %v802_v5  ;;  %v808_v51 = vadd.f32 %v807_v46, %v521_v45 }
 0x184   : > { %v809_v58 = vpop.f32.mrf.mxu1 }
 0x185   : > { %v810_v48 = vadd.f32 %v809_v58, %v525_v41  ;;  %v800_v58 = vadd.f32 %v799_v53, %v525_v41 }
 0x186   : > { %v811_v0 = vpop.f32.mrf.mxu1 }
 0x187   : > { %v5762_v39 = vpack.c.bf16 %v810_v48, %v808_v51  ;;  %v812_v47 = vadd.f32 %v811_v0, %v521_v45  ;;  %v798_v48 = vadd.f32 %v797_v59, %v521_v45  ;;  %v4524_v0 = vpop.eup %4523 }
 0x188   : > { %v813_v60 = vpop.f32.mrf.mxu1 }
 0x189   : > { %7453 = vst [vmem:[#allocation79_spill] sm:$0xff] %v5762_v39  ;;  %v814_v52 = vadd.f32 %v813_v60, %v525_v41  ;;  %v7478_v39 = vld [vmem:[#allocation39_spill] sm:$0xff] }
 0x18a   : > { %v817_v49 = vpop.f32.mrf.mxu1  ;;  %v4526_v35 = vpop.eup %4525 }
 0x18b   : > { %v5764_v56 = vpack.c.bf16 %v814_v52, %v812_v47  ;;  %v818_v50 = vadd.f32 %v817_v49, %v521_v45  ;;  %v4176_v47 = vpack.c.bf16 %v800_v58, %v798_v48 }
 0x18c   : > { %v819_v55 = vpop.f32.mrf.mxu1 }
 0x18d   : > { %7454 = vst [vmem:[#allocation80_spill] sm:$0xff] %v5764_v56  ;;  %v820_v44 = vadd.f32 %v819_v55, %v525_v41  ;;  %v1359_v56 = vadd.f32 1.0, %v4524_v0  ;;  %v1102_v53 = vunpack.c.l.bf16 %v4176_v47 }
 0x18e   : > { %v821_v5 = vpop.f32.mrf.mxu1 }
 0x18f   : > { %v5766_v43 = vpack.c.bf16 %v820_v44, %v818_v50  ;;  %v822_v57 = vadd.f32 %v821_v5, %v521_v45  ;;  %v1353_v44 = vadd.f32 1.0, %v4526_v35  ;;  %4527 = vrcp.f32 %v1359_v56 }
 0x190   : > { %v823_v42 = vpop.f32.mrf.mxu1 }
 0x191   : > { %7455 = vst [vmem:[#allocation81_spill] sm:$0xff] %v5766_v43  ;;  %v824_v46 = vadd.f32 %v823_v42, %v525_v41  ;;  %4529 = vrcp.f32 %v1353_v44 }
 0x192   : > { %v827_v40 = vpop.f32.mrf.mxu1 }
 0x193   : > { %v5768_v51 = vpack.c.bf16 %v824_v46, %v822_v57  ;;  %v828_v38 = vadd.f32 %v827_v40, %v521_v45  ;;  %v1103_v46 = vunpack.c.h.bf16 %v4176_v47 }
 0x194   : > { %v829_v60 = vpop.f32.mrf.mxu1 }
 0x195   : > { %7456 = vst [vmem:[#allocation82_spill] sm:$0xff] %v5768_v51  ;;  %v830_v52 = vadd.f32 %v829_v60, %v525_v41  ;;  %v7477_v51 = vld [vmem:[#allocation38_spill] sm:$0xff] }
 0x196   : > { %v831_v49 = vpop.f32.mrf.mxu1 }
 0x197   : > { %v5770_v55 = vpack.c.bf16 %v830_v52, %v828_v38  ;;  %v832_v50 = vadd.f32 %v831_v49, %v521_v45 }
 0x198   : > { %v833_v5 = vpop.f32.mrf.mxu1 }
 0x199   : > { %7457 = vst [vmem:[#allocation83_spill] sm:$0xff] %v5770_v55  ;;  %v834_v43 = vadd.f32 %v833_v5, %v525_v41  ;;  %v7476_v55 = vld [vmem:[#allocation37_spill] sm:$0xff] }
 0x19a   : > { %v1339_v42 = vpop.f32.mrf.mxu1 }
 0x19b   : > { %v5772_v59 = vpack.c.bf16 %v834_v43, %v832_v50  ;;  %v1348_v57 = vadd.f32 %v1339_v42, %v1102_v53  ;;  %v5777_v53 = vld [vmem:[#allocation9 + $0xe0] ss:$16 sps:$4 sm:$0xff]   ;;  %v5781_v42 = vld [vmem:[#allocation9 + $0xc4] ss:$16 sps:$4 sm:$0xff]  }
 0x19c   : > { %v1341_v40 = vpop.f32.mrf.mxu1  ;;  %v4528_v38 = vpop.eup %4527 }
 0x19d   : > { %7458 = vst [vmem:[#allocation84_spill] sm:$0xff] %v5772_v59  ;;  %4531 = vtanh.f32 %v1348_v57  ;;  %v1349_v58 = vadd.f32 %v1341_v40, %v1103_v46  ;;  %v1369_v52 = vmul.f32 0.0, %v4528_v38  ;;  %v7459_v57 = vmov 0   ;;  %v5787_v46 = vld [vmem:[#allocation9 + $0xc0] ss:$16 sps:$4 sm:$0xff]   ;;  %v7464_v38 = vld [vmem:[#allocation25_spill] sm:$0xff] }
 0x19e   : > { %v1343_v48 = vpop.f32.mrf.mxu1  ;;  %v4530_v45 = vpop.eup %4529  ;;  %v5791_v40 = vld [vmem:[#allocation9 + $0xa4] ss:$16 sps:$4 sm:$0xff]  }
 0x19f   : > { %v4051_v60 = vmul.f32 -1.442695, %v1349_v58  ;;  %v5803_v58 = vld [vmem:[#allocation9 + $0x80] ss:$16 sps:$4 sm:$0xff]  }
 0x1a0   : > { %v1344_v0 = vpop.f32.mrf.mxu1  ;;  %v5819_v48 = vld [vmem:[#allocation9 + $0x40] ss:$16 sps:$4 sm:$0xff]  }
 0x1a1   : > { %4533 = vpow2.f32 %v4051_v60  ;;  %v5823_v60 = vld [vmem:[#allocation9 + $0x24] ss:$16 sps:$4 sm:$0xff]  }
 0x1a2   : > { %v7463_v0 = vld [vmem:[#allocation24_spill] sm:$0xff] }
 0x1a3   : > { %v7475_v59 = vld [vmem:[#allocation36_spill] sm:$0xff] }
 0x1aa   : > { %v4532_v35 = vpop.eup %4531 }
 0x1ab   : > { %v1370_v41 = vmul.f32 %v4532_v35, %v4530_v45  ;;  %v7465_v45 = vld [vmem:[#allocation26_spill] sm:$0xff]  ;;  %v7466_v35 = vld [vmem:[#allocation27_spill] sm:$0xff] }
 0x1ad   : > { %v5774_v49 = vadd.f32 %v1370_v41, %v1369_v52  ;;  %v7467_v52 = vld [vmem:[#allocation28_spill] sm:$0xff]  ;;  %v7468_v41 = vld [vmem:[#allocation29_spill] sm:$0xff] }
 0x1ae   : > { %v4534_v56 = vpop.eup %4533 }
 0x1af   : > { %v1366_v43 = vadd.f32 1.0, %v4534_v56  ;;  %4535 = vtanh.f32 %v5774_v49  ;;  %v7469_v56 = vld [vmem:[#allocation30_spill] sm:$0xff] }
 0x1b1   : > { %4537 = vrcp.f32 %v1366_v43  ;;  %v7470_v43 = vld [vmem:[#allocation31_spill] sm:$0xff] }
 0x1bc   : > { %v4536_v47 = vpop.eup %4535 }
 0x1be   : > { %v4538_v50 = vpop.eup %4537 }
 0x1bf   : > { %v1373_v44 = vmul.f32 %v4538_v50, %v4536_v47  ;;  %v7471_v47 = vld [vmem:[#allocation32_spill] sm:$0xff]  ;;  %v7472_v50 = vld [vmem:[#allocation33_spill] sm:$0xff] }
 0x1c1   : > { %v1374_v5 = vpack.c.bf16 %v1373_v44, %v1373_v44  ;;  %v7473_v44 = vld [vmem:[#allocation34_spill] sm:$0xff] }
 0x1c3   : > { %1729 = vmatmul.mubr.bf16.vlgmr.msra.gmra.mxu0 %v1374_v5  ;;  %1770 = vmatmul.mubr.bf16.vlgmr.msra.gmra.mxu1 %v1374_v5 }
 0x1c4   : > { %1811 = vmatpush1.bf16.msra.mxu0 %v5777_v53  ;;  %1852 = vmatpush1.bf16.msra.mxu1 %v5479_v62  ;;  %v5795_v62 = vld [vmem:[#allocation9 + $0xa0] ss:$16 sps:$4 sm:$0xff]  }
 0x1c5   : > { %1812 = vmatprep.subr.bf16.mxu0 %v5781_v42  ;;  %1853 = vmatprep.subr.bf16.mxu1 %v5481_v63  ;;  %v5799_v63 = vld [vmem:[#allocation9 + $0x84] ss:$16 sps:$4 sm:$0xff]  }
 0x1c6   : > { %1842 = vmatprep.mubr.bf16.mxu0 %v7459_v57  ;;  %1883 = vmatprep.mubr.bf16.mxu1 %v7459_v57 }
 0x1c8   : > { %1813 = vmatpush1.bf16.msra.mxu0 %v5787_v46  ;;  %1854 = vmatpush1.bf16.msra.mxu1 %v5484_v1  ;;  %v5807_v1 = vld [vmem:[#allocation9 + $0x64] ss:$16 sps:$4 sm:$0xff]  }
 0x1c9   : > { %1814 = vmatprep.subr.bf16.mxu0 %v5791_v40  ;;  %1855 = vmatprep.subr.bf16.mxu1 %v5486_v2  ;;  %v5811_v2 = vld [vmem:[#allocation9 + $0x60] ss:$16 sps:$4 sm:$0xff]  }
 0x1cc   : > { %1815 = vmatpush1.bf16.msra.mxu0 %v5795_v62  ;;  %1856 = vmatpush1.bf16.msra.mxu1 %v5491_v3  ;;  %v5815_v3 = vld [vmem:[#allocation9 + $0x44] ss:$16 sps:$4 sm:$0xff]  }
 0x1cd   : > { %1816 = vmatprep.subr.bf16.mxu0 %v5799_v63  ;;  %1857 = vmatprep.subr.bf16.mxu1 %v5495_v4 }
 0x1d0   : > { %1817 = vmatpush1.bf16.msra.mxu0 %v5803_v58  ;;  %1858 = vmatpush1.bf16.msra.mxu1 %v5498_v6 }
 0x1d1   : > { %1818 = vmatprep.subr.bf16.mxu0 %v5807_v1  ;;  %1859 = vmatprep.subr.bf16.mxu1 %v5502_v7 }
 0x1d4   : > { %1819 = vmatpush1.bf16.msra.mxu0 %v5811_v2  ;;  %1860 = vmatpush1.bf16.msra.mxu1 %v5505_v8 }
 0x1d5   : > { %1820 = vmatprep.subr.bf16.mxu0 %v5815_v3  ;;  %1861 = vmatprep.subr.bf16.mxu1 %v5508_v9 }
 0x1d8   : > { %1821 = vmatpush1.bf16.msra.mxu0 %v5819_v48  ;;  %1862 = vmatpush1.bf16.msra.mxu1 %v5511_v10 }
 0x1d9   : > { %1822 = vmatprep.subr.bf16.mxu0 %v5823_v60  ;;  %1863 = vmatprep.subr.bf16.mxu1 %v5515_v11 }
 0x1dc   : > { %1823 = vmatpush1.bf16.msra.mxu0 %v5455_v30  ;;  %1864 = vmatpush1.bf16.msra.mxu1 %v5518_v12  ;;  %v7460_v30 = vld [vmem:[#allocation21_spill] sm:$0xff] }
 0x1dd   : > { %1824 = vmatprep.subr.bf16.mxu0 %v5459_v33  ;;  %1865 = vmatprep.subr.bf16.mxu1 %v5521_v13  ;;  %v7461_v33 = vld [vmem:[#allocation22_spill] sm:$0xff] }
 0x1e0   : > { %1825 = vmatpush1.bf16.msra.mxu0 %v5462_v36  ;;  %1866 = vmatpush1.bf16.msra.mxu1 %v5524_v14  ;;  %v7462_v36 = vld [vmem:[#allocation23_spill] sm:$0xff] }
 0x1e1   : > { %1922 = vmatprep.subr.bf16.mxu0 %v5530_v15  ;;  %1963 = vmatprep.subr.bf16.mxu1 %v5532_v16 }
 0x1e3   : > { %1843 = vmatmul.mubr.bf16.vlgmr.msra.gmra.mxu0 %v1374_v5  ;;  %1884 = vmatmul.mubr.bf16.vlgmr.msra.gmra.mxu1 %v1374_v5  ;;  %v7474_v5 = vld [vmem:[#allocation35_spill] sm:$0xff] }
 0x1e4   : > { %1923 = vmatpush1.bf16.msra.mxu0 %v5534_v17  ;;  %1964 = vmatpush1.bf16.msra.mxu1 %v5536_v18 }
 0x1e5   : > { %1924 = vmatprep.subr.bf16.mxu0 %v5542_v19  ;;  %1965 = vmatprep.subr.bf16.mxu1 %v5544_v20 }
 0x1e8   : > { %1925 = vmatpush1.bf16.msra.mxu0 %v5546_v21  ;;  %1966 = vmatpush1.bf16.msra.mxu1 %v5548_v22 }
 0x1e9   : > { %1926 = vmatprep.subr.bf16.mxu0 %v5554_v23  ;;  %1967 = vmatprep.subr.bf16.mxu1 %v5556_v24 }
 0x1ec   : > { %1927 = vmatpush1.bf16.msra.mxu0 %v5558_v25  ;;  %1968 = vmatpush1.bf16.msra.mxu1 %v5560_v26 }
 0x1ed   : > { %1928 = vmatprep.subr.bf16.mxu0 %v5566_v27  ;;  %1969 = vmatprep.subr.bf16.mxu1 %v5568_v28 }
 0x1f0   : > { %1929 = vmatpush1.bf16.msra.mxu0 %v5570_v29  ;;  %1970 = vmatpush1.bf16.msra.mxu1 %v5572_v31 }
 0x1f1   : > { %1930 = vmatprep.subr.bf16.mxu0 %v5578_v32  ;;  %1971 = vmatprep.subr.bf16.mxu1 %v5580_v34 }
 0x1f4   : > { %1931 = vmatpush1.bf16.msra.mxu0 %v7460_v30  ;;  %1972 = vmatpush1.bf16.msra.mxu1 %v7461_v33 }
 0x1f5   : > { %1932 = vmatprep.subr.bf16.mxu0 %v7462_v36  ;;  %1973 = vmatprep.subr.bf16.mxu1 %v7463_v0 }
 0x1f8   : > { %1933 = vmatpush1.bf16.msra.mxu0 %v7464_v38  ;;  %1974 = vmatpush1.bf16.msra.mxu1 %v7465_v45 }
 0x1f9   : > { %1934 = vmatprep.subr.bf16.mxu0 %v7466_v35  ;;  %1975 = vmatprep.subr.bf16.mxu1 %v7467_v52 }
 0x1fc   : > { %1935 = vmatpush1.bf16.msra.mxu0 %v7468_v41  ;;  %1976 = vmatpush1.bf16.msra.mxu1 %v7469_v56  ;;  %v7479_v41 = vld [vmem:[#allocation40_spill] sm:$0xff]  ;;  %v7480_v56 = vld [vmem:[#allocation41_spill] sm:$0xff] }
 0x1fd   : > { %1936 = vmatprep.subr.bf16.mxu0 %v7470_v43  ;;  %1977 = vmatprep.subr.bf16.mxu1 %v7471_v47  ;;  %v7481_v43 = vld [vmem:[#allocation42_spill] sm:$0xff]  ;;  %v7482_v47 = vld [vmem:[#allocation43_spill] sm:$0xff] }
 0x200   : > { %1937 = vmatpush1.bf16.msra.mxu0 %v7472_v50  ;;  %1978 = vmatpush1.bf16.msra.mxu1 %v7473_v44  ;;  %v7483_v50 = vld [vmem:[#allocation44_spill] sm:$0xff]  ;;  %v7484_v44 = vld [vmem:[#allocation45_spill] sm:$0xff] }
 0x201   : > { %1938 = vmatprep.subr.bf16.mxu0 %v7474_v5  ;;  %1979 = vmatprep.subr.bf16.mxu1 %v7475_v59  ;;  %v7485_v5 = vld [vmem:[#allocation46_spill] sm:$0xff]  ;;  %v7486_v59 = vld [vmem:[#allocation47_spill] sm:$0xff] }
 0x204   : > { %1939 = vmatpush2.bf16.msra.mxu0 %v7476_v55  ;;  %1980 = vmatpush2.bf16.msra.mxu1 %v7477_v51  ;;  %v7487_v55 = vld [vmem:[#allocation48_spill] sm:$0xff]  ;;  %v7488_v51 = vld [vmem:[#allocation49_spill] sm:$0xff] }
 0x205   : > { %1940 = vmatprep.subr.bf16.mxu0 %v7478_v39  ;;  %1981 = vmatprep.subr.bf16.mxu1 %v7479_v41  ;;  %v7489_v39 = vld [vmem:[#allocation50_spill] sm:$0xff]  ;;  %v7490_v41 = vld [vmem:[#allocation51_spill] sm:$0xff] }
 0x208   : > { %1941 = vmatpush2.bf16.msra.mxu0 %v7480_v56  ;;  %1982 = vmatpush2.bf16.msra.mxu1 %v7481_v43  ;;  %v7491_v56 = vld [vmem:[#allocation52_spill] sm:$0xff]  ;;  %v7492_v43 = vld [vmem:[#allocation53_spill] sm:$0xff] }
 0x209   : > { %1942 = vmatprep.subr.bf16.mxu0 %v7482_v47  ;;  %1983 = vmatprep.subr.bf16.mxu1 %v7483_v50  ;;  %v7493_v47 = vld [vmem:[#allocation54_spill] sm:$0xff]  ;;  %v7494_v50 = vld [vmem:[#allocation55_spill] sm:$0xff] }
 0x20c   : > { %1943 = vmatpush2.bf16.msra.mxu0 %v7484_v44  ;;  %1984 = vmatpush2.bf16.msra.mxu1 %v7485_v5  ;;  %v7495_v44 = vld [vmem:[#allocation56_spill] sm:$0xff]  ;;  %v7496_v5 = vld [vmem:[#allocation57_spill] sm:$0xff] }
 0x20d   : > { %1944 = vmatprep.subr.bf16.mxu0 %v7486_v59  ;;  %1985 = vmatprep.subr.bf16.mxu1 %v7487_v55  ;;  %v7497_v59 = vld [vmem:[#allocation58_spill] sm:$0xff]  ;;  %v7498_v55 = vld [vmem:[#allocation59_spill] sm:$0xff] }
 0x210   : > { %1945 = vmatpush2.bf16.msra.mxu0 %v7488_v51  ;;  %1986 = vmatpush2.bf16.msra.mxu1 %v7489_v39  ;;  %v7499_v51 = vld [vmem:[#allocation60_spill] sm:$0xff]  ;;  %v7500_v39 = vld [vmem:[#allocation61_spill] sm:$0xff] }
 0x211   : > { %1946 = vmatprep.subr.bf16.mxu0 %v7490_v41  ;;  %1987 = vmatprep.subr.bf16.mxu1 %v7491_v56  ;;  %v7501_v41 = vld [vmem:[#allocation62_spill] sm:$0xff]  ;;  %v7502_v56 = vld [vmem:[#allocation63_spill] sm:$0xff] }
 0x214   : > { %1947 = vmatpush2.bf16.msra.mxu0 %v7492_v43  ;;  %1988 = vmatpush2.bf16.msra.mxu1 %v7493_v47  ;;  %v7503_v43 = vld [vmem:[#allocation64_spill] sm:$0xff]  ;;  %v7504_v47 = vld [vmem:[#allocation65_spill] sm:$0xff] }
 0x215   : > { %1948 = vmatprep.subr.bf16.mxu0 %v7494_v50  ;;  %1989 = vmatprep.subr.bf16.mxu1 %v7495_v44  ;;  %v7505_v50 = vld [vmem:[#allocation66_spill] sm:$0xff] }
 0x216   : > { %v5897_v44 = vld [vmem:[#allocation9 + $0xe4] ss:$16 sps:$4 sm:$0xff]  }
 0x217   : > { %7506 = vst [vmem:[#allocation85_spill] sm:$0xff] %v5897_v44 }
 0x218   : > { %1949 = vmatpush2.bf16.msra.mxu0 %v7496_v5  ;;  %1990 = vmatpush2.bf16.msra.mxu1 %v7497_v59  ;;  %v7507_v59 = vld [vmem:[#allocation18_spill] sm:$0xff] }
 0x219   : > { %1950 = vmatprep.subr.bf16.mxu0 %v7498_v55  ;;  %1991 = vmatprep.subr.bf16.mxu1 %v7499_v51  ;;  %v7508_v51 = vld [vmem:[#allocation68_spill] sm:$0xff] }
 0x21c   : > { %1951 = vmatpush2.bf16.msra.mxu0 %v7500_v39  ;;  %1992 = vmatpush2.bf16.msra.mxu1 %v7501_v41  ;;  %v1076_v39 = vld [vmem:[%s7076_s5] sm:$0xf] }
 0x21d   : > { %1952 = vmatprep.subr.bf16.mxu0 %v7502_v56  ;;  %1993 = vmatprep.subr.bf16.mxu1 %v7503_v43  ;;  %v5905_v41 = vrot.slane %v1076_v39, %v7508_v51  ;;  %v7510_v56 = vld [vmem:[#allocation69_spill] sm:$0xff]  ;;  %v5913_v51 = vrot.slane %v1076_v39, %v5756_v54  ;;  %v5917_v33 = vrot.slane %v1076_v39, %v5751_v61 }
 0x21e   : > { %v5908_v55 = vrot.slane %v1076_v39, %v7510_v56 }
 0x21f   : > { %7509 = vst [vmem:[#allocation18_spill] sm:$0xff] %v5905_v41  ;;  %7512 = vst [vmem:[#allocation87_spill] sm:$0xff] %v5913_v51 }
 0x220   : > { %1953 = vmatpush2.bf16.msra.mxu0 %v7504_v47  ;;  %1994 = vmatpush2.bf16.msra.mxu1 %v7505_v50  ;;  %7511 = vst [vmem:[#allocation86_spill] sm:$0xff] %v5908_v55  ;;  %7513 = vst [vmem:[#allocation88_spill] sm:$0xff] %v5917_v33 }
 0x221   : > { %2037 = vmatprep.subr.bf16.mxu0 %v5897_v44  ;;  %2078 = vmatprep.subr.bf16.mxu1 %v7507_v59 }
 0x283   : > { %v1730_v43 = vpop.f32.mrf.mxu0  ;;  %v1771_v47 = vpop.f32.mrf.mxu1 }
 0x284   : > { %v1731_v50 = vadd.f32 %v1730_v43, %v5905_v41 }
 0x285   : > { %v1732_v5 = vpop.f32.mrf.mxu0  ;;  %v1773_v52 = vpop.f32.mrf.mxu1 }
 0x286   : > { %v4116_v35 = vmul.f32 -1.442695, %v1731_v50  ;;  %v1733_v44 = vadd.f32 %v1732_v5, %v5908_v55  ;;  %v1774_v56 = vadd.f32 %v1773_v52, %v5913_v51  ;;  %v1772_v50 = vadd.f32 %v1771_v47, %v5917_v33 }
 0x287   : > { %v1734_v59 = vpop.f32.mrf.mxu0  ;;  %v1775_v45 = vpop.f32.mrf.mxu1 }
 0x288   : > { %4539 = vpow2.f32 %v4116_v35  ;;  %v4117_v38 = vmul.f32 -1.442695, %v1733_v44  ;;  %v4118_v43 = vmul.f32 -1.442695, %v1774_v56 }
 0x289   : > { %v1735_v0 = vpop.f32.mrf.mxu0  ;;  %v1776_v36 = vpop.f32.mrf.mxu1 }
 0x28a   : > { %4541 = vpow2.f32 %v4117_v38  ;;  %v7514_v36 = vld [vmem:[#allocation70_spill] sm:$0xff] }
 0x28b   : > { %4543 = vpow2.f32 %v4118_v43  ;;  %v1806_v0 = vunpack.c.l.bf16 %v7514_v36  ;;  %v1807_v39 = vunpack.c.h.bf16 %v7514_v36  ;;  %v1809_v36 = vunpack.c.h.bf16 %v5760_v37 }
 0x295   : > { %v4540_v41 = vpop.eup %4539 }
 0x296   : > { %v1781_v5 = vadd.f32 1.0, %v4540_v41 }
 0x297   : > { %v4542_v59 = vpop.eup %4541 }
 0x298   : > { %4545 = vrcp.f32 %v1781_v5  ;;  %v1787_v45 = vadd.f32 1.0, %v4542_v59  ;;  %v4544_v44 = vpop.eup %4543 }
 0x299   : > { %4547 = vtanh.f32 %v1772_v50  ;;  %v1794_v43 = vadd.f32 1.0, %v4544_v44 }
 0x29a   : > { %4549 = vrcp.f32 %v1787_v45 }
 0x2a3   : > { %v1844_v38 = vpop.f32.mrf.mxu0  ;;  %v1885_v35 = vpop.f32.mrf.mxu1 }
 0x2a4   : > { %v1892_v52 = vadd.f32 %v1844_v38, %v1806_v0  ;;  %v1808_v38 = vunpack.c.l.bf16 %v5760_v37 }
 0x2a5   : > { %v4546_v61 = vpop.eup %4545  ;;  %v1846_v56 = vpop.f32.mrf.mxu0 }
 0x2a6   : > { %v1887_v54 = vpop.f32.mrf.mxu1  ;;  %v4548_v51 = vpop.eup %4547  ;;  %v4119_v47 = vmul.f32 -1.442695, %v1892_v52  ;;  %v1893_v41 = vadd.f32 %v1846_v56, %v1807_v39  ;;  %v1894_v44 = vadd.f32 %v1885_v35, %v1808_v38  ;;  %v5936_v38 = vld [vmem:[#allocation9 + $0xe8] ss:$16 sps:$4 sm:$0xff]  }
 0x2a7   : > { %v4550_v33 = vpop.eup %4549  ;;  %v1848_v5 = vpop.f32.mrf.mxu0  ;;  %v1798_v45 = vmul.f32 %v4548_v51, %v4546_v61  ;;  %v1895_v0 = vadd.f32 %v1887_v54, %v1809_v36 }
 0x2a8   : > { %v1889_v59 = vpop.f32.mrf.mxu1  ;;  %v1797_v50 = vmul.f32 0.0, %v4550_v33  ;;  %4551 = vpow2.f32 %v4119_v47  ;;  %v4120_v55 = vmul.f32 -1.442695, %v1893_v41 }
 0x2a9   : > { %v1849_v30 = vpop.f32.mrf.mxu0  ;;  %v4121_v52 = vmul.f32 -1.442695, %v1895_v0 }
 0x2aa   : > { %v1890_v34 = vpop.f32.mrf.mxu1  ;;  %v5922_v32 = vadd.f32 %v1798_v45, %v1797_v50  ;;  %4553 = vpow2.f32 %v4120_v55 }
 0x2ab   : > { %4555 = vrcp.f32 %v1794_v43 }
 0x2ac   : > { %4557 = vtanh.f32 %v5922_v32 }
 0x2ad   : > { %4559 = vtanh.f32 %v1894_v44  ;;  %v5946_v44 = vld [vmem:[#allocation9 + $0xc8] ss:$16 sps:$4 sm:$0xff]  }
 0x2ae   : > { %4561 = vpow2.f32 %v4121_v52  ;;  %v5950_v52 = vld [vmem:[#allocation9 + $0xac] ss:$16 sps:$4 sm:$0xff]  }
 0x2b5   : > { %v4552_v39 = vpop.eup %4551 }
 0x2b6   : > { %v1899_v33 = vadd.f32 1.0, %v4552_v39  ;;  %v5954_v39 = vld [vmem:[#allocation9 + $0xa8] ss:$16 sps:$4 sm:$0xff]  }
 0x2b7   : > { %v4554_v61 = vpop.eup %4553 }
 0x2b8   : > { %v4556_v51 = vpop.eup %4555  ;;  %4563 = vrcp.f32 %v1899_v33  ;;  %v1905_v34 = vadd.f32 1.0, %v4554_v61  ;;  %v7539_v33 = vld [vmem:[#allocation42_spill] sm:$0xff]  ;;  %v7540_v61 = vld [vmem:[#allocation43_spill] sm:$0xff] }
 0x2b9   : > { %v4558_v30 = vpop.eup %4557 }
 0x2ba   : > { %4565 = vrcp.f32 %v1905_v34  ;;  %v5927_v55 = vmul.f32 %v4558_v30, %v4556_v51  ;;  %v4560_v54 = vpop.eup %4559  ;;  %v7541_v51 = vld [vmem:[#allocation44_spill] sm:$0xff]  ;;  %v7542_v34 = vld [vmem:[#allocation45_spill] sm:$0xff]  ;;  %v7543_v30 = vld [vmem:[#allocation46_spill] sm:$0xff] }
 0x2bb   : > { %v4562_v37 = vpop.eup %4561 }
 0x2bc   : > { %7515 = vst [vmem:[#allocation70_spill] sm:$0xff] %v5927_v55  ;;  %v1921_v56 = vpack.c.bf16 %v5927_v55, %v5927_v55  ;;  %v1912_v43 = vadd.f32 1.0, %v4562_v37  ;;  %v7546_v37 = vld [vmem:[#allocation49_spill] sm:$0xff]  ;;  %v6231_v55 = vld [vmem:[#allocation10 + $0x1c4] ss:$16 sps:$4 sm:$0xff]  }
 0x2be   : > { %1954 = vmatprep.mubr.bf16.mxu0 %v1921_v56  ;;  %1995 = vmatprep.mubr.bf16.mxu1 %v1921_v56  ;;  %4567 = vrcp.f32 %v1912_v43  ;;  %v7544_v56 = vld [vmem:[#allocation47_spill] sm:$0xff]  ;;  %v7550_v43 = vld [vmem:[#allocation53_spill] sm:$0xff] }
 0x2c5   : > { %v4564_v35 = vpop.eup %4563 }
 0x2c6   : > { %v1916_v47 = vmul.f32 %v4564_v35, %v4560_v54  ;;  %v7545_v54 = vld [vmem:[#allocation48_spill] sm:$0xff]  ;;  %v7547_v35 = vld [vmem:[#allocation50_spill] sm:$0xff] }
 0x2c7   : > { %v4566_v41 = vpop.eup %4565 }
 0x2c8   : > { %v1915_v5 = vmul.f32 %v4566_v41, %v5774_v49  ;;  %v5940_v49 = vld [vmem:[#allocation9 + $0xcc] ss:$16 sps:$4 sm:$0xff]   ;;  %v7549_v41 = vld [vmem:[#allocation52_spill] sm:$0xff] }
 0x2ca   : > { %v5932_v59 = vadd.f32 %v1916_v47, %v1915_v5  ;;  %v7548_v47 = vld [vmem:[#allocation51_spill] sm:$0xff]  ;;  %v7551_v5 = vld [vmem:[#allocation54_spill] sm:$0xff] }
 0x2cb   : > { %v4568_v50 = vpop.eup %4567 }
 0x2cc   : > { %4569 = vtanh.f32 %v5932_v59 }
 0x2d9   : > { %v4570_v45 = vpop.eup %4569 }
 0x2da   : > { %v1919_v36 = vmul.f32 %v4570_v45, %v4568_v50  ;;  %v7552_v50 = vld [vmem:[#allocation55_spill] sm:$0xff]  ;;  %v7553_v45 = vld [vmem:[#allocation56_spill] sm:$0xff] }
 0x2dc   : > { %v1920_v0 = vpack.c.bf16 %v1919_v36, %v1919_v36  ;;  %v7554_v36 = vld [vmem:[#allocation57_spill] sm:$0xff] }
 0x2de   : > { %1955 = vmatmul.mubr.bf16.vlgmr.msra.gmra.mxu0 %v1920_v0  ;;  %1996 = vmatmul.mubr.bf16.vlgmr.msra.gmra.mxu1 %v1920_v0 }
 0x2df   : > { %2038 = vmatpush1.bf16.msra.mxu0 %v5777_v53  ;;  %2079 = vmatpush1.bf16.msra.mxu1 %v5936_v38 }
 0x2e0   : > { %2039 = vmatprep.subr.bf16.mxu0 %v5781_v42  ;;  %2080 = vmatprep.subr.bf16.mxu1 %v5940_v49 }
 0x2e1   : > { %2069 = vmatprep.mubr.bf16.mxu0 %v7459_v57  ;;  %2110 = vmatprep.mubr.bf16.mxu1 %v7459_v57 }
 0x2e3   : > { %2040 = vmatpush1.bf16.msra.mxu0 %v5787_v46  ;;  %2081 = vmatpush1.bf16.msra.mxu1 %v5946_v44 }
 0x2e4   : > { %2041 = vmatprep.subr.bf16.mxu0 %v5791_v40  ;;  %2082 = vmatprep.subr.bf16.mxu1 %v5950_v52 }
 0x2e7   : > { %2042 = vmatpush1.bf16.msra.mxu0 %v5795_v62  ;;  %2083 = vmatpush1.bf16.msra.mxu1 %v5954_v39 }
 0x2e8   : > { %2043 = vmatprep.subr.bf16.mxu0 %v5799_v63  ;;  %2084 = vmatprep.subr.bf16.mxu1 %v5495_v4  ;;  %v5971_v4 = vld [vmem:[#allocation9 + $0x20] ss:$16 sps:$4 sm:$0xff]  }
 0x2eb   : > { %2044 = vmatpush1.bf16.msra.mxu0 %v5803_v58  ;;  %2085 = vmatpush1.bf16.msra.mxu1 %v5498_v6  ;;  %v5975_v6 = vld [vmem:[#allocation9 + $0x4] ss:$16 sps:$4 sm:$0xff]  }
 0x2ec   : > { %2045 = vmatprep.subr.bf16.mxu0 %v5807_v1  ;;  %2086 = vmatprep.subr.bf16.mxu1 %v5502_v7  ;;  %v5979_v7 = vld [vmem:[#allocation9] ss:$16 sps:$4 sm:$0xff]  }
 0x2ef   : > { %2046 = vmatpush1.bf16.msra.mxu0 %v5811_v2  ;;  %2087 = vmatpush1.bf16.msra.mxu1 %v5505_v8  ;;  %v7516_v8 = vld [vmem:[#allocation19_spill] sm:$0xff] }
 0x2f0   : > { %2047 = vmatprep.subr.bf16.mxu0 %v5815_v3  ;;  %2088 = vmatprep.subr.bf16.mxu1 %v5508_v9  ;;  %v7517_v9 = vld [vmem:[#allocation20_spill] sm:$0xff] }
 0x2f3   : > { %2048 = vmatpush1.bf16.msra.mxu0 %v5819_v48  ;;  %2089 = vmatpush1.bf16.msra.mxu1 %v5511_v10  ;;  %v7518_v10 = vld [vmem:[#allocation21_spill] sm:$0xff] }
 0x2f4   : > { %2049 = vmatprep.subr.bf16.mxu0 %v5823_v60  ;;  %2090 = vmatprep.subr.bf16.mxu1 %v5515_v11  ;;  %v7519_v11 = vld [vmem:[#allocation22_spill] sm:$0xff] }
 0x2f7   : > { %2050 = vmatpush1.bf16.msra.mxu0 %v5971_v4  ;;  %2091 = vmatpush1.bf16.msra.mxu1 %v5518_v12  ;;  %v7520_v12 = vld [vmem:[#allocation23_spill] sm:$0xff] }
 0x2f8   : > { %2051 = vmatprep.subr.bf16.mxu0 %v5975_v6  ;;  %2092 = vmatprep.subr.bf16.mxu1 %v5521_v13  ;;  %v7521_v13 = vld [vmem:[#allocation24_spill] sm:$0xff] }
 0x2fb   : > { %2052 = vmatpush1.bf16.msra.mxu0 %v5979_v7  ;;  %2093 = vmatpush1.bf16.msra.mxu1 %v5524_v14  ;;  %v7522_v14 = vld [vmem:[#allocation25_spill] sm:$0xff] }
 0x2fc   : > { %2149 = vmatprep.subr.bf16.mxu0 %v5530_v15  ;;  %2190 = vmatprep.subr.bf16.mxu1 %v5532_v16  ;;  %v7523_v15 = vld [vmem:[#allocation26_spill] sm:$0xff]  ;;  %v7524_v16 = vld [vmem:[#allocation27_spill] sm:$0xff] }
 0x2fe   : > { %2070 = vmatmul.mubr.bf16.vlgmr.msra.gmra.mxu0 %v1920_v0  ;;  %2111 = vmatmul.mubr.bf16.vlgmr.msra.gmra.mxu1 %v1920_v0  ;;  %v7555_v0 = vld [vmem:[#allocation58_spill] sm:$0xff] }
 0x2ff   : > { %2150 = vmatpush1.bf16.msra.mxu0 %v5534_v17  ;;  %2191 = vmatpush1.bf16.msra.mxu1 %v5536_v18  ;;  %v7525_v17 = vld [vmem:[#allocation28_spill] sm:$0xff]  ;;  %v7526_v18 = vld [vmem:[#allocation29_spill] sm:$0xff] }
 0x300   : > { %2151 = vmatprep.subr.bf16.mxu0 %v5542_v19  ;;  %2192 = vmatprep.subr.bf16.mxu1 %v5544_v20  ;;  %v7527_v19 = vld [vmem:[#allocation30_spill] sm:$0xff]  ;;  %v7528_v20 = vld [vmem:[#allocation31_spill] sm:$0xff] }
 0x303   : > { %2152 = vmatpush1.bf16.msra.mxu0 %v5546_v21  ;;  %2193 = vmatpush1.bf16.msra.mxu1 %v5548_v22  ;;  %v7529_v21 = vld [vmem:[#allocation32_spill] sm:$0xff]  ;;  %v7530_v22 = vld [vmem:[#allocation33_spill] sm:$0xff] }
 0x304   : > { %2153 = vmatprep.subr.bf16.mxu0 %v5554_v23  ;;  %2194 = vmatprep.subr.bf16.mxu1 %v5556_v24  ;;  %v7531_v23 = vld [vmem:[#allocation34_spill] sm:$0xff]  ;;  %v7532_v24 = vld [vmem:[#allocation35_spill] sm:$0xff] }
 0x307   : > { %2154 = vmatpush1.bf16.msra.mxu0 %v5558_v25  ;;  %2195 = vmatpush1.bf16.msra.mxu1 %v5560_v26  ;;  %v7533_v25 = vld [vmem:[#allocation36_spill] sm:$0xff]  ;;  %v7534_v26 = vld [vmem:[#allocation37_spill] sm:$0xff] }
 0x308   : > { %2155 = vmatprep.subr.bf16.mxu0 %v5566_v27  ;;  %2196 = vmatprep.subr.bf16.mxu1 %v5568_v28  ;;  %v7535_v27 = vld [vmem:[#allocation38_spill] sm:$0xff]  ;;  %v7536_v28 = vld [vmem:[#allocation39_spill] sm:$0xff] }
 0x30b   : > { %2156 = vmatpush1.bf16.msra.mxu0 %v5570_v29  ;;  %2197 = vmatpush1.bf16.msra.mxu1 %v5572_v31  ;;  %v7537_v29 = vld [vmem:[#allocation40_spill] sm:$0xff]  ;;  %v7538_v31 = vld [vmem:[#allocation41_spill] sm:$0xff] }
 0x30c   : > { %2157 = vmatprep.subr.bf16.mxu0 %v7516_v8  ;;  %2198 = vmatprep.subr.bf16.mxu1 %v7517_v9  ;;  %v7556_v8 = vld [vmem:[#allocation59_spill] sm:$0xff]  ;;  %v7557_v9 = vld [vmem:[#allocation60_spill] sm:$0xff]  ;;  %7592 = vst [vmem:[#allocation40_spill] sm:$0xff] %v6231_v55 }
 0x30f   : > { %2158 = vmatpush1.bf16.msra.mxu0 %v7518_v10  ;;  %2199 = vmatpush1.bf16.msra.mxu1 %v7519_v11  ;;  %v7558_v10 = vld [vmem:[#allocation61_spill] sm:$0xff]  ;;  %v7559_v11 = vld [vmem:[#allocation62_spill] sm:$0xff] }
 0x310   : > { %2159 = vmatprep.subr.bf16.mxu0 %v7520_v12  ;;  %2200 = vmatprep.subr.bf16.mxu1 %v7521_v13  ;;  %v7560_v12 = vld [vmem:[#allocation63_spill] sm:$0xff]  ;;  %v7561_v13 = vld [vmem:[#allocation64_spill] sm:$0xff] }
 0x313   : > { %2160 = vmatpush1.bf16.msra.mxu0 %v7522_v14  ;;  %2201 = vmatpush1.bf16.msra.mxu1 %v7523_v15  ;;  %v7562_v14 = vld [vmem:[#allocation65_spill] sm:$0xff]  ;;  %v7563_v15 = vld [vmem:[#allocation66_spill] sm:$0xff] }
 0x314   : > { %2161 = vmatprep.subr.bf16.mxu0 %v7524_v16  ;;  %2202 = vmatprep.subr.bf16.mxu1 %v7525_v17  ;;  %v7564_v16 = vld [vmem:[#allocation85_spill] sm:$0xff] }
 0x315   : > { %v6048_v17 = vld [vmem:[#allocation9 + $0xec] ss:$16 sps:$4 sm:$0xff]  }
 0x316   : > { %7565 = vst [vmem:[#allocation19_spill] sm:$0xff] %v6048_v17 }
 0x317   : > { %2162 = vmatpush1.bf16.msra.mxu0 %v7526_v18  ;;  %2203 = vmatpush1.bf16.msra.mxu1 %v7527_v19 }
 0x318   : > { %2163 = vmatprep.subr.bf16.mxu0 %v7528_v20  ;;  %2204 = vmatprep.subr.bf16.mxu1 %v7529_v21  ;;  %v7566_v20 = vld [vmem:[#allocation18_spill] sm:$0xff] }
 0x31b   : > { %2164 = vmatpush1.bf16.msra.mxu0 %v7530_v22  ;;  %2205 = vmatpush1.bf16.msra.mxu1 %v7531_v23 }
 0x31c   : > { %2165 = vmatprep.subr.bf16.mxu0 %v7532_v24  ;;  %2206 = vmatprep.subr.bf16.mxu1 %v7533_v25  ;;  %v7567_v25 = vld [vmem:[#allocation86_spill] sm:$0xff] }
 0x31f   : > { %2166 = vmatpush2.bf16.msra.mxu0 %v7534_v26  ;;  %2207 = vmatpush2.bf16.msra.mxu1 %v7535_v27 }
 0x320   : > { %2167 = vmatprep.subr.bf16.mxu0 %v7536_v28  ;;  %2208 = vmatprep.subr.bf16.mxu1 %v7537_v29 }
 0x323   : > { %2168 = vmatpush2.bf16.msra.mxu0 %v7538_v31  ;;  %2209 = vmatpush2.bf16.msra.mxu1 %v7539_v33 }
 0x324   : > { %2169 = vmatprep.subr.bf16.mxu0 %v7540_v61  ;;  %2210 = vmatprep.subr.bf16.mxu1 %v7541_v51  ;;  %v7568_v61 = vld [vmem:[#allocation87_spill] sm:$0xff] }
 0x327   : > { %2170 = vmatpush2.bf16.msra.mxu0 %v7542_v34  ;;  %2211 = vmatpush2.bf16.msra.mxu1 %v7543_v30 }
 0x328   : > { %2171 = vmatprep.subr.bf16.mxu0 %v7544_v56  ;;  %2212 = vmatprep.subr.bf16.mxu1 %v7545_v54  ;;  %v7569_v56 = vld [vmem:[#allocation88_spill] sm:$0xff] }
 0x32b   : > { %2172 = vmatpush2.bf16.msra.mxu0 %v7546_v37  ;;  %2213 = vmatpush2.bf16.msra.mxu1 %v7547_v35 }
 0x32c   : > { %2173 = vmatprep.subr.bf16.mxu0 %v7548_v47  ;;  %2214 = vmatprep.subr.bf16.mxu1 %v7549_v41  ;;  %v7570_v41 = vld [vmem:[#allocation71_spill] sm:$0xff] }
 0x32f   : > { %2174 = vmatpush2.bf16.msra.mxu0 %v7550_v43  ;;  %2215 = vmatpush2.bf16.msra.mxu1 %v7551_v5  ;;  %v2033_v43 = vunpack.c.l.bf16 %v7570_v41 }
 0x330   : > { %2175 = vmatprep.subr.bf16.mxu0 %v7552_v50  ;;  %2216 = vmatprep.subr.bf16.mxu1 %v7553_v45 }
 0x333   : > { %2176 = vmatpush2.bf16.msra.mxu0 %v7554_v36  ;;  %2217 = vmatpush2.bf16.msra.mxu1 %v7555_v0  ;;  %v2034_v0 = vunpack.c.h.bf16 %v7570_v41 }
 0x334   : > { %2177 = vmatprep.subr.bf16.mxu0 %v7556_v8  ;;  %2218 = vmatprep.subr.bf16.mxu1 %v7557_v9 }
 0x337   : > { %2178 = vmatpush2.bf16.msra.mxu0 %v7558_v10  ;;  %2219 = vmatpush2.bf16.msra.mxu1 %v7559_v11 }
 0x338   : > { %2179 = vmatprep.subr.bf16.mxu0 %v7560_v12  ;;  %2220 = vmatprep.subr.bf16.mxu1 %v7561_v13 }
 0x33b   : > { %2180 = vmatpush2.bf16.msra.mxu0 %v7562_v14  ;;  %2221 = vmatpush2.bf16.msra.mxu1 %v7563_v15 }
 0x33c   : > { %2264 = vmatprep.subr.bf16.mxu0 %v7564_v16  ;;  %2305 = vmatprep.subr.bf16.mxu1 %v6048_v17 }
 0x39e   : > { %v1956_v18 = vpop.f32.mrf.mxu0  ;;  %v1997_v19 = vpop.f32.mrf.mxu1 }
 0x39f   : > { %v1957_v21 = vadd.f32 %v1956_v18, %v7566_v20  ;;  %v1998_v54 = vadd.f32 %v1997_v19, %v7569_v56 }
 0x3a0   : > { %v1958_v22 = vpop.f32.mrf.mxu0  ;;  %v1999_v23 = vpop.f32.mrf.mxu1 }
 0x3a1   : > { %v4122_v24 = vmul.f32 -1.442695, %v1957_v21  ;;  %v1959_v26 = vadd.f32 %v1958_v22, %v7567_v25  ;;  %v2000_v51 = vadd.f32 %v1999_v23, %v7568_v61 }
 0x3a2   : > { %v1960_v27 = vpop.f32.mrf.mxu0  ;;  %v2001_v28 = vpop.f32.mrf.mxu1 }
 0x3a3   : > { %4571 = vpow2.f32 %v4122_v24  ;;  %v4123_v29 = vmul.f32 -1.442695, %v1959_v26  ;;  %v4124_v34 = vmul.f32 -1.442695, %v2000_v51  ;;  %v7571_v28 = vld [vmem:[#allocation79_spill] sm:$0xff] }
 0x3a4   : > { %v1961_v31 = vpop.f32.mrf.mxu0  ;;  %v2002_v33 = vpop.f32.mrf.mxu1 }
 0x3a5   : > { %4573 = vpow2.f32 %v4123_v29  ;;  %v2036_v29 = vunpack.c.h.bf16 %v7571_v28  ;;  %v2035_v33 = vunpack.c.l.bf16 %v7571_v28  ;;  %v6156_v28 = vld [vmem:[#allocation10 + $0xa8] ss:$16 sps:$4 sm:$0xff]  }
 0x3a6   : > { %4575 = vpow2.f32 %v4124_v34 }
 0x3b0   : > { %v4572_v30 = vpop.eup %4571 }
 0x3b1   : > { %v2007_v37 = vadd.f32 1.0, %v4572_v30 }
 0x3b2   : > { %v4574_v35 = vpop.eup %4573 }
 0x3b3   : > { %4577 = vrcp.f32 %v2007_v37  ;;  %v2013_v47 = vadd.f32 1.0, %v4574_v35  ;;  %v4576_v45 = vpop.eup %4575 }
 0x3b4   : > { %4579 = vtanh.f32 %v1998_v54  ;;  %v2020_v15 = vadd.f32 1.0, %v4576_v45 }
 0x3b5   : > { %4581 = vrcp.f32 %v2013_v47 }
 0x3be   : > { %v2071_v5 = vpop.f32.mrf.mxu0  ;;  %v2112_v50 = vpop.f32.mrf.mxu1 }
 0x3bf   : > { %v2119_v36 = vadd.f32 %v2071_v5, %v2033_v43  ;;  %v2121_v51 = vadd.f32 %v2112_v50, %v2035_v33  ;;  %v6165_v33 = vld [vmem:[#allocation10 + $0x80] ss:$16 sps:$4 sm:$0xff]  }
 0x3c0   : > { %v4578_v8 = vpop.eup %4577  ;;  %v2073_v9 = vpop.f32.mrf.mxu0 }
 0x3c1   : > { %v2114_v10 = vpop.f32.mrf.mxu1  ;;  %v4580_v11 = vpop.eup %4579  ;;  %v4125_v12 = vmul.f32 -1.442695, %v2119_v36  ;;  %v2120_v13 = vadd.f32 %v2073_v9, %v2034_v0 }
 0x3c2   : > { %v4582_v14 = vpop.eup %4581  ;;  %v2075_v18 = vpop.f32.mrf.mxu0  ;;  %v2024_v21 = vmul.f32 %v4580_v11, %v4578_v8  ;;  %v2122_v31 = vadd.f32 %v2114_v10, %v2036_v29  ;;  %v6159_v29 = vld [vmem:[#allocation10 + $0x84] ss:$16 sps:$4 sm:$0xff]  }
 0x3c3   : > { %v2116_v19 = vpop.f32.mrf.mxu1  ;;  %v2023_v22 = vmul.f32 %v4582_v14, %v5922_v32  ;;  %4583 = vpow2.f32 %v4125_v12  ;;  %v4126_v23 = vmul.f32 -1.442695, %v2120_v13  ;;  %v6135_v18 = vld [vmem:[#allocation10 + $0xc4] ss:$16 sps:$4 sm:$0xff]  }
 0x3c4   : > { %v2076_v24 = vpop.f32.mrf.mxu0  ;;  %v4127_v34 = vmul.f32 -1.442695, %v2122_v31  ;;  %v6138_v19 = vld [vmem:[#allocation10 + $0xcc] ss:$16 sps:$4 sm:$0xff]  }
 0x3c5   : > { %v2117_v26 = vpop.f32.mrf.mxu1  ;;  %v6058_v27 = vadd.f32 %v2024_v21, %v2023_v22  ;;  %4585 = vpow2.f32 %v4126_v23  ;;  %v6141_v21 = vld [vmem:[#allocation10 + $0xc0] ss:$16 sps:$4 sm:$0xff]   ;;  %v6144_v22 = vld [vmem:[#allocation10 + $0xc8] ss:$16 sps:$4 sm:$0xff]   ;;  %v6147_v23 = vld [vmem:[#allocation10 + $0xa4] ss:$16 sps:$4 sm:$0xff]  }
 0x3c6   : > { %4587 = vrcp.f32 %v2020_v15  ;;  %v6132_v15 = vld [vmem:[#allocation10 + $0xe8] ss:$16 sps:$4 sm:$0xff]   ;;  %v6150_v24 = vld [vmem:[#allocation10 + $0xac] ss:$16 sps:$4 sm:$0xff]   ;;  %v6153_v26 = vld [vmem:[#allocation10 + $0xa0] ss:$16 sps:$4 sm:$0xff]  }
 0x3c7   : > { %4589 = vtanh.f32 %v6058_v27  ;;  %v6162_v31 = vld [vmem:[#allocation10 + $0x8c] ss:$16 sps:$4 sm:$0xff]  }
 0x3c8   : > { %4591 = vtanh.f32 %v2121_v51  ;;  %v6168_v51 = vld [vmem:[#allocation10 + $0x88] ss:$16 sps:$4 sm:$0xff]  }
 0x3c9   : > { %4593 = vpow2.f32 %v4127_v34  ;;  %v6171_v34 = vld [vmem:[#allocation10 + $0x64] ss:$16 sps:$4 sm:$0xff]  }
 0x3d0   : > { %v4584_v30 = vpop.eup %4583 }
 0x3d1   : > { %v2126_v54 = vadd.f32 1.0, %v4584_v30  ;;  %v6174_v30 = vld [vmem:[#allocation10 + $0x6c] ss:$16 sps:$4 sm:$0xff]  }
 0x3d2   : > { %v4586_v32 = vpop.eup %4585  ;;  %7573 = vst [vmem:[#allocation21_spill] sm:$0xff] %v6174_v30 }
 0x3d3   : > { %v4588_v37 = vpop.eup %4587  ;;  %4595 = vrcp.f32 %v2126_v54  ;;  %v2132_v35 = vadd.f32 1.0, %v4586_v32  ;;  %v6177_v54 = vld [vmem:[#allocation10 + $0x60] ss:$16 sps:$4 sm:$0xff]   ;;  %v6180_v32 = vld [vmem:[#allocation10 + $0x68] ss:$16 sps:$4 sm:$0xff]  }
 0x3d4   : > { %v4590_v47 = vpop.eup %4589  ;;  %7574 = vst [vmem:[#allocation22_spill] sm:$0xff] %v6177_v54  ;;  %7575 = vst [vmem:[#allocation23_spill] sm:$0xff] %v6180_v32 }
 0x3d5   : > { %4597 = vrcp.f32 %v2132_v35  ;;  %v6063_v41 = vmul.f32 %v4590_v47, %v4588_v37  ;;  %v4592_v5 = vpop.eup %4591  ;;  %v6183_v37 = vld [vmem:[#allocation10 + $0x44] ss:$16 sps:$4 sm:$0xff]   ;;  %v6186_v35 = vld [vmem:[#allocation10 + $0x4c] ss:$16 sps:$4 sm:$0xff]   ;;  %v6189_v47 = vld [vmem:[#allocation10 + $0x40] ss:$16 sps:$4 sm:$0xff]  }
 0x3d6   : > { %v4594_v50 = vpop.eup %4593  ;;  %7576 = vst [vmem:[#allocation24_spill] sm:$0xff] %v6183_v37  ;;  %7577 = vst [vmem:[#allocation25_spill] sm:$0xff] %v6186_v35 }
 0x3d7   : > { %7572 = vst [vmem:[#allocation20_spill] sm:$0xff] %v6063_v41  ;;  %v2148_v43 = vpack.c.bf16 %v6063_v41, %v6063_v41  ;;  %v2139_v8 = vadd.f32 1.0, %v4594_v50  ;;  %7578 = vst [vmem:[#allocation26_spill] sm:$0xff] %v6189_v47  ;;  %v6198_v50 = vld [vmem:[#allocation10 + $0x2c] ss:$16 sps:$4 sm:$0xff]  }
 0x3d8   : > { %7581 = vst [vmem:[#allocation29_spill] sm:$0xff] %v6198_v50  ;;  %v6228_v41 = vld [vmem:[#allocation10 + $0x1e8] ss:$16 sps:$4 sm:$0xff]  }
 0x3d9   : > { %2181 = vmatprep.mubr.bf16.mxu0 %v2148_v43  ;;  %2222 = vmatprep.mubr.bf16.mxu1 %v2148_v43  ;;  %4599 = vrcp.f32 %v2139_v8  ;;  %v6192_v43 = vld [vmem:[#allocation10 + $0x48] ss:$16 sps:$4 sm:$0xff]   ;;  %v6210_v8 = vld [vmem:[#allocation10 + $0xc] ss:$16 sps:$4 sm:$0xff]   ;;  %7591 = vst [vmem:[#allocation39_spill] sm:$0xff] %v6228_v41 }
 0x3da   : > { %7579 = vst [vmem:[#allocation27_spill] sm:$0xff] %v6192_v43  ;;  %7585 = vst [vmem:[#allocation33_spill] sm:$0xff] %v6210_v8 }
 0x3e0   : > { %v4596_v45 = vpop.eup %4595 }
 0x3e1   : > { %v2143_v36 = vmul.f32 %v4596_v45, %v4592_v5  ;;  %v6195_v5 = vld [vmem:[#allocation10 + $0x24] ss:$16 sps:$4 sm:$0xff]   ;;  %v6201_v45 = vld [vmem:[#allocation10 + $0x20] ss:$16 sps:$4 sm:$0xff]  }
 0x3e2   : > { %v4598_v0 = vpop.eup %4597  ;;  %7580 = vst [vmem:[#allocation28_spill] sm:$0xff] %v6195_v5  ;;  %7582 = vst [vmem:[#allocation30_spill] sm:$0xff] %v6201_v45 }
 0x3e3   : > { %v2142_v9 = vmul.f32 %v4598_v0, %v5932_v59  ;;  %v6129_v59 = vld [vmem:[#allocation10 + $0xe0] ss:$16 sps:$4 sm:$0xff]   ;;  %v6207_v0 = vld [vmem:[#allocation10 + $0x4] ss:$16 sps:$4 sm:$0xff]  }
 0x3e4   : > { %7584 = vst [vmem:[#allocation32_spill] sm:$0xff] %v6207_v0 }
 0x3e5   : > { %v6068_v10 = vadd.f32 %v2143_v36, %v2142_v9  ;;  %v6204_v36 = vld [vmem:[#allocation10 + $0x28] ss:$16 sps:$4 sm:$0xff]   ;;  %v6213_v9 = vld [vmem:[#allocation10] ss:$16 sps:$4 sm:$0xff]  }
 0x3e6   : > { %v4600_v11 = vpop.eup %4599  ;;  %7583 = vst [vmem:[#allocation31_spill] sm:$0xff] %v6204_v36  ;;  %7586 = vst [vmem:[#allocation34_spill] sm:$0xff] %v6213_v9 }
 0x3e7   : > { %4601 = vtanh.f32 %v6068_v10 }
 0x3f4   : > { %v4602_v12 = vpop.eup %4601 }
 0x3f5   : > { %v2146_v13 = vmul.f32 %v4602_v12, %v4600_v11  ;;  %v6216_v11 = vld [vmem:[#allocation10 + $0x8] ss:$16 sps:$4 sm:$0xff]   ;;  %v6219_v12 = vld [vmem:[#allocation10 + $0x1e4] ss:$16 sps:$4 sm:$0xff]  }
 0x3f6   : > { %7587 = vst [vmem:[#allocation35_spill] sm:$0xff] %v6216_v11  ;;  %7588 = vst [vmem:[#allocation36_spill] sm:$0xff] %v6219_v12 }
 0x3f7   : > { %v2147_v14 = vpack.c.bf16 %v2146_v13, %v2146_v13  ;;  %v6222_v13 = vld [vmem:[#allocation10 + $0x1ec] ss:$16 sps:$4 sm:$0xff]  }
 0x3f8   : > { %7589 = vst [vmem:[#allocation37_spill] sm:$0xff] %v6222_v13 }
 0x3f9   : > { %2182 = vmatmul.mubr.bf16.vlgmr.msra.gmra.mxu0 %v2147_v14  ;;  %2223 = vmatmul.mubr.bf16.vlgmr.msra.gmra.mxu1 %v2147_v14 }
 0x3fa   : > { %2265 = vmatpush1.bf16.msra.mxu0 %v5777_v53  ;;  %2306 = vmatpush1.bf16.msra.mxu1 %v5936_v38  ;;  %v6084_v53 = vld [vmem:[#allocation9 + $0x8c] ss:$16 sps:$4 sm:$0xff]  }
 0x3fb   : > { %2266 = vmatprep.subr.bf16.mxu0 %v5781_v42  ;;  %2307 = vmatprep.subr.bf16.mxu1 %v5940_v49  ;;  %v6088_v42 = vld [vmem:[#allocation9 + $0x88] ss:$16 sps:$4 sm:$0xff]  }
 0x3fc   : > { %2296 = vmatprep.mubr.bf16.mxu0 %v7459_v57  ;;  %2337 = vmatprep.mubr.bf16.mxu1 %v7459_v57 }
 0x3fe   : > { %2267 = vmatpush1.bf16.msra.mxu0 %v5787_v46  ;;  %2308 = vmatpush1.bf16.msra.mxu1 %v5946_v44  ;;  %v6092_v46 = vld [vmem:[#allocation9 + $0x6c] ss:$16 sps:$4 sm:$0xff]  }
 0x3ff   : > { %2268 = vmatprep.subr.bf16.mxu0 %v5791_v40  ;;  %2309 = vmatprep.subr.bf16.mxu1 %v5950_v52  ;;  %v6096_v40 = vld [vmem:[#allocation9 + $0x68] ss:$16 sps:$4 sm:$0xff]  }
 0x402   : > { %2269 = vmatpush1.bf16.msra.mxu0 %v5795_v62  ;;  %2310 = vmatpush1.bf16.msra.mxu1 %v5954_v39  ;;  %v6100_v62 = vld [vmem:[#allocation9 + $0x4c] ss:$16 sps:$4 sm:$0xff]  }
 0x403   : > { %2270 = vmatprep.subr.bf16.mxu0 %v5799_v63  ;;  %2311 = vmatprep.subr.bf16.mxu1 %v6084_v53  ;;  %v6104_v63 = vld [vmem:[#allocation9 + $0x48] ss:$16 sps:$4 sm:$0xff]  }
 0x406   : > { %2271 = vmatpush1.bf16.msra.mxu0 %v5803_v58  ;;  %2312 = vmatpush1.bf16.msra.mxu1 %v6088_v42  ;;  %v6108_v58 = vld [vmem:[#allocation9 + $0x2c] ss:$16 sps:$4 sm:$0xff]  }
 0x407   : > { %2272 = vmatprep.subr.bf16.mxu0 %v5807_v1  ;;  %2313 = vmatprep.subr.bf16.mxu1 %v6092_v46  ;;  %v6112_v1 = vld [vmem:[#allocation9 + $0x28] ss:$16 sps:$4 sm:$0xff]  }
 0x40a   : > { %2273 = vmatpush1.bf16.msra.mxu0 %v5811_v2  ;;  %2314 = vmatpush1.bf16.msra.mxu1 %v6096_v40  ;;  %v6116_v2 = vld [vmem:[#allocation9 + $0xc] ss:$16 sps:$4 sm:$0xff]  }
 0x40b   : > { %2274 = vmatprep.subr.bf16.mxu0 %v5815_v3  ;;  %2315 = vmatprep.subr.bf16.mxu1 %v6100_v62  ;;  %v6120_v3 = vld [vmem:[#allocation9 + $0x8] ss:$16 sps:$4 sm:$0xff]  }
 0x40e   : > { %2275 = vmatpush1.bf16.msra.mxu0 %v5819_v48  ;;  %2316 = vmatpush1.bf16.msra.mxu1 %v6104_v63  ;;  %v6123_v48 = vld [vmem:[#allocation10 + $0xe4] ss:$16 sps:$4 sm:$0xff]  }
 0x40f   : > { %2276 = vmatprep.subr.bf16.mxu0 %v5823_v60  ;;  %2317 = vmatprep.subr.bf16.mxu1 %v6108_v58  ;;  %v6126_v60 = vld [vmem:[#allocation10 + $0xec] ss:$16 sps:$4 sm:$0xff]  }
 0x412   : > { %2277 = vmatpush1.bf16.msra.mxu0 %v5971_v4  ;;  %2318 = vmatpush1.bf16.msra.mxu1 %v6112_v1 }
 0x413   : > { %2278 = vmatprep.subr.bf16.mxu0 %v5975_v6  ;;  %2319 = vmatprep.subr.bf16.mxu1 %v6116_v2 }
 0x416   : > { %2279 = vmatpush1.bf16.msra.mxu0 %v5979_v7  ;;  %2320 = vmatpush1.bf16.msra.mxu1 %v6120_v3 }
 0x417   : > { %2376 = vmatprep.subr.bf16.mxu0 %v6123_v48  ;;  %2417 = vmatprep.subr.bf16.mxu1 %v6126_v60 }
 0x419   : > { %2297 = vmatmul.mubr.bf16.vlgmr.msra.gmra.mxu0 %v2147_v14  ;;  %2338 = vmatmul.mubr.bf16.vlgmr.msra.gmra.mxu1 %v2147_v14  ;;  %v6225_v14 = vld [vmem:[#allocation10 + $0x1e0] ss:$16 sps:$4 sm:$0xff]  }
 0x41a   : > { %2377 = vmatpush1.bf16.msra.mxu0 %v6129_v59  ;;  %2418 = vmatpush1.bf16.msra.mxu1 %v6132_v15  ;;  %7590 = vst [vmem:[#allocation38_spill] sm:$0xff] %v6225_v14 }
 0x41b   : > { %2378 = vmatprep.subr.bf16.mxu0 %v6135_v18  ;;  %2419 = vmatprep.subr.bf16.mxu1 %v6138_v19 }
 0x41e   : > { %2379 = vmatpush1.bf16.msra.mxu0 %v6141_v21  ;;  %2420 = vmatpush1.bf16.msra.mxu1 %v6144_v22 }
 0x41f   : > { %2380 = vmatprep.subr.bf16.mxu0 %v6147_v23  ;;  %2421 = vmatprep.subr.bf16.mxu1 %v6150_v24 }
 0x422   : > { %2381 = vmatpush1.bf16.msra.mxu0 %v6153_v26  ;;  %2422 = vmatpush1.bf16.msra.mxu1 %v6156_v28 }
 0x423   : > { %2382 = vmatprep.subr.bf16.mxu0 %v6159_v29  ;;  %2423 = vmatprep.subr.bf16.mxu1 %v6162_v31 }
 0x426   : > { %2383 = vmatpush1.bf16.msra.mxu0 %v6165_v33  ;;  %2424 = vmatpush1.bf16.msra.mxu1 %v6168_v51 }
 0x427   : > { %2384 = vmatprep.subr.bf16.mxu0 %v6171_v34  ;;  %2425 = vmatprep.subr.bf16.mxu1 %v6174_v30 }
 0x42a   : > { %2385 = vmatpush1.bf16.msra.mxu0 %v6177_v54  ;;  %2426 = vmatpush1.bf16.msra.mxu1 %v6180_v32 }
 0x42b   : > { %2386 = vmatprep.subr.bf16.mxu0 %v6183_v37  ;;  %2427 = vmatprep.subr.bf16.mxu1 %v6186_v35 }
 0x42e   : > { %2387 = vmatpush1.bf16.msra.mxu0 %v6189_v47  ;;  %2428 = vmatpush1.bf16.msra.mxu1 %v6192_v43 }
 0x42f   : > { %2388 = vmatprep.subr.bf16.mxu0 %v6195_v5  ;;  %2429 = vmatprep.subr.bf16.mxu1 %v6198_v50 }
 0x432   : > { %2389 = vmatpush1.bf16.msra.mxu0 %v6201_v45  ;;  %2430 = vmatpush1.bf16.msra.mxu1 %v6204_v36 }
 0x433   : > { %2390 = vmatprep.subr.bf16.mxu0 %v6207_v0  ;;  %2431 = vmatprep.subr.bf16.mxu1 %v6210_v8 }
 0x436   : > { %2391 = vmatpush1.bf16.msra.mxu0 %v6213_v9  ;;  %2432 = vmatpush1.bf16.msra.mxu1 %v6216_v11  ;;  %v6234_v11 = vld [vmem:[#allocation10 + $0x1cc] ss:$16 sps:$4 sm:$0xff]  }
 0x437   : > { %2392 = vmatprep.subr.bf16.mxu0 %v6219_v12  ;;  %2433 = vmatprep.subr.bf16.mxu1 %v6222_v13  ;;  %7593 = vst [vmem:[#allocation41_spill] sm:$0xff] %v6234_v11  ;;  %v6237_v12 = vld [vmem:[#allocation10 + $0x1c0] ss:$16 sps:$4 sm:$0xff]   ;;  %v6240_v13 = vld [vmem:[#allocation10 + $0x1c8] ss:$16 sps:$4 sm:$0xff]  }
 0x438   : > { %7594 = vst [vmem:[#allocation42_spill] sm:$0xff] %v6237_v12  ;;  %7595 = vst [vmem:[#allocation43_spill] sm:$0xff] %v6240_v13 }
 0x43a   : > { %2393 = vmatpush2.bf16.msra.mxu0 %v6225_v14  ;;  %2434 = vmatpush2.bf16.msra.mxu1 %v6228_v41  ;;  %v6243_v14 = vld [vmem:[#allocation10 + $0x1a4] ss:$16 sps:$4 sm:$0xff]   ;;  %v6246_v41 = vld [vmem:[#allocation10 + $0x1ac] ss:$16 sps:$4 sm:$0xff]  }
 0x43b   : > { %2394 = vmatprep.subr.bf16.mxu0 %v6231_v55  ;;  %2435 = vmatprep.subr.bf16.mxu1 %v6234_v11  ;;  %7596 = vst [vmem:[#allocation44_spill] sm:$0xff] %v6243_v14  ;;  %7597 = vst [vmem:[#allocation45_spill] sm:$0xff] %v6246_v41  ;;  %v6249_v55 = vld [vmem:[#allocation10 + $0x1a0] ss:$16 sps:$4 sm:$0xff]   ;;  %v6252_v11 = vld [vmem:[#allocation10 + $0x1a8] ss:$16 sps:$4 sm:$0xff]  }
 0x43c   : > { %7598 = vst [vmem:[#allocation46_spill] sm:$0xff] %v6249_v55  ;;  %7599 = vst [vmem:[#allocation47_spill] sm:$0xff] %v6252_v11 }
 0x43e   : > { %2395 = vmatpush2.bf16.msra.mxu0 %v6237_v12  ;;  %2436 = vmatpush2.bf16.msra.mxu1 %v6240_v13  ;;  %v6255_v12 = vld [vmem:[#allocation10 + $0x184] ss:$16 sps:$4 sm:$0xff]   ;;  %v6258_v13 = vld [vmem:[#allocation10 + $0x18c] ss:$16 sps:$4 sm:$0xff]  }
 0x43f   : > { %2396 = vmatprep.subr.bf16.mxu0 %v6243_v14  ;;  %2437 = vmatprep.subr.bf16.mxu1 %v6246_v41  ;;  %7600 = vst [vmem:[#allocation48_spill] sm:$0xff] %v6255_v12  ;;  %7601 = vst [vmem:[#allocation49_spill] sm:$0xff] %v6258_v13  ;;  %v6261_v14 = vld [vmem:[#allocation10 + $0x180] ss:$16 sps:$4 sm:$0xff]   ;;  %v6264_v41 = vld [vmem:[#allocation10 + $0x188] ss:$16 sps:$4 sm:$0xff]  }
 0x440   : > { %7602 = vst [vmem:[#allocation50_spill] sm:$0xff] %v6261_v14  ;;  %7603 = vst [vmem:[#allocation51_spill] sm:$0xff] %v6264_v41 }
 0x442   : > { %2397 = vmatpush2.bf16.msra.mxu0 %v6249_v55  ;;  %2438 = vmatpush2.bf16.msra.mxu1 %v6252_v11  ;;  %v6267_v55 = vld [vmem:[#allocation10 + $0x164] ss:$16 sps:$4 sm:$0xff]   ;;  %v6270_v11 = vld [vmem:[#allocation10 + $0x16c] ss:$16 sps:$4 sm:$0xff]  }
 0x443   : > { %2398 = vmatprep.subr.bf16.mxu0 %v6255_v12  ;;  %2439 = vmatprep.subr.bf16.mxu1 %v6258_v13  ;;  %7604 = vst [vmem:[#allocation52_spill] sm:$0xff] %v6267_v55  ;;  %7605 = vst [vmem:[#allocation53_spill] sm:$0xff] %v6270_v11  ;;  %v6273_v12 = vld [vmem:[#allocation10 + $0x160] ss:$16 sps:$4 sm:$0xff]   ;;  %v6276_v13 = vld [vmem:[#allocation10 + $0x168] ss:$16 sps:$4 sm:$0xff]  }
 0x444   : > { %7606 = vst [vmem:[#allocation54_spill] sm:$0xff] %v6273_v12  ;;  %7607 = vst [vmem:[#allocation55_spill] sm:$0xff] %v6276_v13 }
 0x446   : > { %2399 = vmatpush2.bf16.msra.mxu0 %v6261_v14  ;;  %2440 = vmatpush2.bf16.msra.mxu1 %v6264_v41  ;;  %v6279_v14 = vld [vmem:[#allocation10 + $0x144] ss:$16 sps:$4 sm:$0xff]   ;;  %v6282_v41 = vld [vmem:[#allocation10 + $0x14c] ss:$16 sps:$4 sm:$0xff]  }
 0x447   : > { %2400 = vmatprep.subr.bf16.mxu0 %v6267_v55  ;;  %2441 = vmatprep.subr.bf16.mxu1 %v6270_v11  ;;  %7608 = vst [vmem:[#allocation56_spill] sm:$0xff] %v6279_v14  ;;  %7609 = vst [vmem:[#allocation57_spill] sm:$0xff] %v6282_v41  ;;  %v6285_v55 = vld [vmem:[#allocation10 + $0x140] ss:$16 sps:$4 sm:$0xff]   ;;  %v6288_v11 = vld [vmem:[#allocation10 + $0x148] ss:$16 sps:$4 sm:$0xff]  }
 0x448   : > { %7610 = vst [vmem:[#allocation58_spill] sm:$0xff] %v6285_v55  ;;  %7611 = vst [vmem:[#allocation59_spill] sm:$0xff] %v6288_v11 }
 0x44a   : > { %2401 = vmatpush2.bf16.msra.mxu0 %v6273_v12  ;;  %2442 = vmatpush2.bf16.msra.mxu1 %v6276_v13  ;;  %v6291_v12 = vld [vmem:[#allocation10 + $0x124] ss:$16 sps:$4 sm:$0xff]   ;;  %v6294_v13 = vld [vmem:[#allocation10 + $0x12c] ss:$16 sps:$4 sm:$0xff]  }
 0x44b   : > { %2402 = vmatprep.subr.bf16.mxu0 %v6279_v14  ;;  %2443 = vmatprep.subr.bf16.mxu1 %v6282_v41  ;;  %7612 = vst [vmem:[#allocation60_spill] sm:$0xff] %v6291_v12  ;;  %7613 = vst [vmem:[#allocation61_spill] sm:$0xff] %v6294_v13  ;;  %v6297_v14 = vld [vmem:[#allocation10 + $0x120] ss:$16 sps:$4 sm:$0xff]   ;;  %v6300_v41 = vld [vmem:[#allocation10 + $0x128] ss:$16 sps:$4 sm:$0xff]  }
 0x44c   : > { %7614 = vst [vmem:[#allocation62_spill] sm:$0xff] %v6297_v14  ;;  %7615 = vst [vmem:[#allocation63_spill] sm:$0xff] %v6300_v41 }
 0x44e   : > { %2403 = vmatpush2.bf16.msra.mxu0 %v6285_v55  ;;  %2444 = vmatpush2.bf16.msra.mxu1 %v6288_v11  ;;  %v6303_v55 = vld [vmem:[#allocation10 + $0x104] ss:$16 sps:$4 sm:$0xff]   ;;  %v6306_v11 = vld [vmem:[#allocation10 + $0x10c] ss:$16 sps:$4 sm:$0xff]  }
 0x44f   : > { %2404 = vmatprep.subr.bf16.mxu0 %v6291_v12  ;;  %2445 = vmatprep.subr.bf16.mxu1 %v6294_v13  ;;  %7616 = vst [vmem:[#allocation64_spill] sm:$0xff] %v6303_v55  ;;  %7617 = vst [vmem:[#allocation65_spill] sm:$0xff] %v6306_v11  ;;  %v6309_v12 = vld [vmem:[#allocation10 + $0x100] ss:$16 sps:$4 sm:$0xff]   ;;  %v6312_v13 = vld [vmem:[#allocation10 + $0x108] ss:$16 sps:$4 sm:$0xff]  }
 0x450   : > { %7618 = vst [vmem:[#allocation66_spill] sm:$0xff] %v6309_v12  ;;  %7619 = vst [vmem:[#allocation85_spill] sm:$0xff] %v6312_v13 }
 0x452   : > { %2405 = vmatpush2.bf16.msra.mxu0 %v6297_v14  ;;  %2446 = vmatpush2.bf16.msra.mxu1 %v6300_v41 }
 0x453   : > { %2406 = vmatprep.subr.bf16.mxu0 %v6303_v55  ;;  %2447 = vmatprep.subr.bf16.mxu1 %v6306_v11 }
 0x456   : > { %2407 = vmatpush2.bf16.msra.mxu0 %v6309_v12  ;;  %2448 = vmatpush2.bf16.msra.mxu1 %v6312_v13 }
 0x457   : > { %2491 = vmatprep.subr.bf16.mxu0 %v7564_v16  ;;  %2532 = vmatprep.subr.bf16.mxu1 %v6048_v17 }
 0x4b9   : > { %v2183_v41 = vpop.f32.mrf.mxu0  ;;  %v2224_v14 = vpop.f32.mrf.mxu1 }
 0x4ba   : > { %v2184_v55 = vadd.f32 %v2183_v41, %v7566_v20  ;;  %v2225_v43 = vadd.f32 %v2224_v14, %v7569_v56 }
 0x4bb   : > { %v2185_v9 = vpop.f32.mrf.mxu0  ;;  %v2226_v8 = vpop.f32.mrf.mxu1 }
 0x4bc   : > { %v4128_v0 = vmul.f32 -1.442695, %v2184_v55  ;;  %v2186_v11 = vadd.f32 %v2185_v9, %v7567_v25  ;;  %v2227_v16 = vadd.f32 %v2226_v8, %v7568_v61 }
 0x4bd   : > { %v2187_v36 = vpop.f32.mrf.mxu0  ;;  %v2228_v45 = vpop.f32.mrf.mxu1 }
 0x4be   : > { %4603 = vpow2.f32 %v4128_v0  ;;  %v4129_v12 = vmul.f32 -1.442695, %v2186_v11  ;;  %v4130_v13 = vmul.f32 -1.442695, %v2227_v16  ;;  %v7620_v36 = vld [vmem:[#allocation72_spill] sm:$0xff] }
 0x4bf   : > { %v2188_v50 = vpop.f32.mrf.mxu0  ;;  %v2229_v5 = vpop.f32.mrf.mxu1  ;;  %v2260_v45 = vunpack.c.l.bf16 %v7620_v36  ;;  %v2261_v11 = vunpack.c.h.bf16 %v7620_v36  ;;  %v7621_v36 = vld [vmem:[#allocation80_spill] sm:$0xff] }
 0x4c0   : > { %4605 = vpow2.f32 %v4129_v12 }
 0x4c1   : > { %4607 = vpow2.f32 %v4130_v13 }
 0x4cb   : > { %v4604_v17 = vpop.eup %4603 }
 0x4cc   : > { %v2234_v47 = vadd.f32 1.0, %v4604_v17 }
 0x4cd   : > { %v4606_v41 = vpop.eup %4605 }
 0x4ce   : > { %4609 = vrcp.f32 %v2234_v47  ;;  %v2240_v55 = vadd.f32 1.0, %v4606_v41  ;;  %v4608_v50 = vpop.eup %4607 }
 0x4cf   : > { %4611 = vtanh.f32 %v2225_v43  ;;  %v2247_v13 = vadd.f32 1.0, %v4608_v50  ;;  %v2262_v50 = vunpack.c.l.bf16 %v7621_v36 }
 0x4d0   : > { %4613 = vrcp.f32 %v2240_v55 }
 0x4d9   : > { %v2298_v0 = vpop.f32.mrf.mxu0  ;;  %v2339_v9 = vpop.f32.mrf.mxu1 }
 0x4da   : > { %v2346_v5 = vadd.f32 %v2298_v0, %v2260_v45  ;;  %v2263_v0 = vunpack.c.h.bf16 %v7621_v36 }
 0x4db   : > { %v4610_v8 = vpop.eup %4609  ;;  %v2300_v12 = vpop.f32.mrf.mxu0 }
 0x4dc   : > { %v2341_v16 = vpop.f32.mrf.mxu1  ;;  %v4612_v61 = vpop.eup %4611  ;;  %v4131_v14 = vmul.f32 -1.442695, %v2346_v5  ;;  %v2347_v17 = vadd.f32 %v2300_v12, %v2261_v11  ;;  %v2348_v11 = vadd.f32 %v2339_v9, %v2262_v50 }
 0x4dd   : > { %v4614_v56 = vpop.eup %4613  ;;  %v2302_v47 = vpop.f32.mrf.mxu0  ;;  %v2251_v43 = vmul.f32 %v4612_v61, %v4610_v8  ;;  %v2349_v5 = vadd.f32 %v2341_v16, %v2263_v0 }
 0x4de   : > { %v2343_v41 = vpop.f32.mrf.mxu1  ;;  %v2250_v55 = vmul.f32 %v4614_v56, %v6058_v27  ;;  %4615 = vpow2.f32 %v4131_v14  ;;  %v4132_v25 = vmul.f32 -1.442695, %v2347_v17 }
 0x4df   : > { %v2303_v20 = vpop.f32.mrf.mxu0  ;;  %v4133_v12 = vmul.f32 -1.442695, %v2349_v5 }
 0x4e0   : > { %v2344_v35 = vpop.f32.mrf.mxu1  ;;  %v6324_v45 = vadd.f32 %v2251_v43, %v2250_v55  ;;  %4617 = vpow2.f32 %v4132_v25 }
 0x4e1   : > { %4619 = vrcp.f32 %v2247_v13 }
 0x4e2   : > { %4621 = vtanh.f32 %v6324_v45 }
 0x4e3   : > { %4623 = vtanh.f32 %v2348_v11  ;;  %v6337_v11 = vld [vmem:[#allocation9 + $0xe0] ss:$16 sps:$4 sm:$0xff]  }
 0x4e4   : > { %4625 = vpow2.f32 %v4133_v12  ;;  %v6341_v12 = vld [vmem:[#allocation9 + $0xc4] ss:$16 sps:$4 sm:$0xff]  }
 0x4eb   : > { %v4616_v61 = vpop.eup %4615 }
 0x4ec   : > { %v2353_v8 = vadd.f32 1.0, %v4616_v61  ;;  %v6351_v61 = vld [vmem:[#allocation9 + $0xa4] ss:$16 sps:$4 sm:$0xff]  }
 0x4ed   : > { %v4618_v56 = vpop.eup %4617 }
 0x4ee   : > { %v4620_v20 = vpop.eup %4619  ;;  %4627 = vrcp.f32 %v2353_v8  ;;  %v2359_v27 = vadd.f32 1.0, %v4618_v56  ;;  %v6363_v8 = vld [vmem:[#allocation9 + $0x80] ss:$16 sps:$4 sm:$0xff]  }
 0x4ef   : > { %v4622_v35 = vpop.eup %4621  ;;  %v6379_v56 = vld [vmem:[#allocation9 + $0x40] ss:$16 sps:$4 sm:$0xff]  }
 0x4f0   : > { %4629 = vrcp.f32 %v2359_v27  ;;  %v6329_v25 = vmul.f32 %v4622_v35, %v4620_v20  ;;  %v4624_v16 = vpop.eup %4623  ;;  %v6383_v20 = vld [vmem:[#allocation9 + $0x24] ss:$16 sps:$4 sm:$0xff]   ;;  %v7627_v35 = vld [vmem:[#allocation29_spill] sm:$0xff] }
 0x4f1   : > { %v4626_v9 = vpop.eup %4625  ;;  %v7626_v27 = vld [vmem:[#allocation28_spill] sm:$0xff] }
 0x4f2   : > { %7622 = vst [vmem:[#allocation71_spill] sm:$0xff] %v6329_v25  ;;  %v2375_v14 = vpack.c.bf16 %v6329_v25, %v6329_v25  ;;  %v2366_v41 = vadd.f32 1.0, %v4626_v9  ;;  %v7630_v9 = vld [vmem:[#allocation32_spill] sm:$0xff]  ;;  %v7640_v25 = vld [vmem:[#allocation42_spill] sm:$0xff] }
 0x4f4   : > { %2408 = vmatprep.mubr.bf16.mxu0 %v2375_v14  ;;  %2449 = vmatprep.mubr.bf16.mxu1 %v2375_v14  ;;  %4631 = vrcp.f32 %v2366_v41  ;;  %v7628_v14 = vld [vmem:[#allocation30_spill] sm:$0xff]  ;;  %v7634_v41 = vld [vmem:[#allocation36_spill] sm:$0xff] }
 0x4fb   : > { %v4628_v17 = vpop.eup %4627 }
 0x4fc   : > { %v2370_v13 = vmul.f32 %v4628_v17, %v4624_v16  ;;  %v7629_v16 = vld [vmem:[#allocation31_spill] sm:$0xff]  ;;  %v7631_v17 = vld [vmem:[#allocation33_spill] sm:$0xff] }
 0x4fd   : > { %v4630_v47 = vpop.eup %4629 }
 0x4fe   : > { %v2369_v43 = vmul.f32 %v4630_v47, %v6068_v10  ;;  %v6347_v10 = vld [vmem:[#allocation9 + $0xc0] ss:$16 sps:$4 sm:$0xff]   ;;  %v7633_v47 = vld [vmem:[#allocation35_spill] sm:$0xff] }
 0x500   : > { %v6334_v55 = vadd.f32 %v2370_v13, %v2369_v43  ;;  %v7632_v13 = vld [vmem:[#allocation34_spill] sm:$0xff]  ;;  %v7635_v43 = vld [vmem:[#allocation37_spill] sm:$0xff] }
 0x501   : > { %v4632_v36 = vpop.eup %4631 }
 0x502   : > { %4633 = vtanh.f32 %v6334_v55 }
 0x50f   : > { %v4634_v0 = vpop.eup %4633 }
 0x510   : > { %v2373_v5 = vmul.f32 %v4634_v0, %v4632_v36  ;;  %v7636_v36 = vld [vmem:[#allocation38_spill] sm:$0xff]  ;;  %v7637_v0 = vld [vmem:[#allocation39_spill] sm:$0xff] }
 0x512   : > { %v2374_v50 = vpack.c.bf16 %v2373_v5, %v2373_v5  ;;  %v7638_v5 = vld [vmem:[#allocation40_spill] sm:$0xff] }
 0x514   : > { %2409 = vmatmul.mubr.bf16.vlgmr.msra.gmra.mxu0 %v2374_v50  ;;  %2450 = vmatmul.mubr.bf16.vlgmr.msra.gmra.mxu1 %v2374_v50 }
 0x515   : > { %2492 = vmatpush1.bf16.msra.mxu0 %v6337_v11  ;;  %2533 = vmatpush1.bf16.msra.mxu1 %v5936_v38  ;;  %v6355_v38 = vld [vmem:[#allocation9 + $0xa0] ss:$16 sps:$4 sm:$0xff]  }
 0x516   : > { %2493 = vmatprep.subr.bf16.mxu0 %v6341_v12  ;;  %2534 = vmatprep.subr.bf16.mxu1 %v5940_v49  ;;  %v6359_v49 = vld [vmem:[#allocation9 + $0x84] ss:$16 sps:$4 sm:$0xff]  }
 0x517   : > { %2523 = vmatprep.mubr.bf16.mxu0 %v7459_v57  ;;  %2564 = vmatprep.mubr.bf16.mxu1 %v7459_v57 }
 0x519   : > { %2494 = vmatpush1.bf16.msra.mxu0 %v6347_v10  ;;  %2535 = vmatpush1.bf16.msra.mxu1 %v5946_v44  ;;  %v6367_v44 = vld [vmem:[#allocation9 + $0x64] ss:$16 sps:$4 sm:$0xff]  }
 0x51a   : > { %2495 = vmatprep.subr.bf16.mxu0 %v6351_v61  ;;  %2536 = vmatprep.subr.bf16.mxu1 %v5950_v52  ;;  %v6371_v52 = vld [vmem:[#allocation9 + $0x60] ss:$16 sps:$4 sm:$0xff]  }
 0x51d   : > { %2496 = vmatpush1.bf16.msra.mxu0 %v6355_v38  ;;  %2537 = vmatpush1.bf16.msra.mxu1 %v5954_v39  ;;  %v6375_v39 = vld [vmem:[#allocation9 + $0x44] ss:$16 sps:$4 sm:$0xff]  }
 0x51e   : > { %2497 = vmatprep.subr.bf16.mxu0 %v6359_v49  ;;  %2538 = vmatprep.subr.bf16.mxu1 %v6084_v53 }
 0x521   : > { %2498 = vmatpush1.bf16.msra.mxu0 %v6363_v8  ;;  %2539 = vmatpush1.bf16.msra.mxu1 %v6088_v42 }
 0x522   : > { %2499 = vmatprep.subr.bf16.mxu0 %v6367_v44  ;;  %2540 = vmatprep.subr.bf16.mxu1 %v6092_v46 }
 0x525   : > { %2500 = vmatpush1.bf16.msra.mxu0 %v6371_v52  ;;  %2541 = vmatpush1.bf16.msra.mxu1 %v6096_v40 }
 0x526   : > { %2501 = vmatprep.subr.bf16.mxu0 %v6375_v39  ;;  %2542 = vmatprep.subr.bf16.mxu1 %v6100_v62 }
 0x529   : > { %2502 = vmatpush1.bf16.msra.mxu0 %v6379_v56  ;;  %2543 = vmatpush1.bf16.msra.mxu1 %v6104_v63 }
 0x52a   : > { %2503 = vmatprep.subr.bf16.mxu0 %v6383_v20  ;;  %2544 = vmatprep.subr.bf16.mxu1 %v6108_v58 }
 0x52d   : > { %2504 = vmatpush1.bf16.msra.mxu0 %v5971_v4  ;;  %2545 = vmatpush1.bf16.msra.mxu1 %v6112_v1  ;;  %v7623_v4 = vld [vmem:[#allocation25_spill] sm:$0xff] }
 0x52e   : > { %2505 = vmatprep.subr.bf16.mxu0 %v5975_v6  ;;  %2546 = vmatprep.subr.bf16.mxu1 %v6116_v2  ;;  %v7624_v6 = vld [vmem:[#allocation26_spill] sm:$0xff] }
 0x531   : > { %2506 = vmatpush1.bf16.msra.mxu0 %v5979_v7  ;;  %2547 = vmatpush1.bf16.msra.mxu1 %v6120_v3  ;;  %v7625_v7 = vld [vmem:[#allocation27_spill] sm:$0xff] }
 0x532   : > { %2603 = vmatprep.subr.bf16.mxu0 %v6123_v48  ;;  %2644 = vmatprep.subr.bf16.mxu1 %v6126_v60 }
 0x534   : > { %2524 = vmatmul.mubr.bf16.vlgmr.msra.gmra.mxu0 %v2374_v50  ;;  %2565 = vmatmul.mubr.bf16.vlgmr.msra.gmra.mxu1 %v2374_v50  ;;  %v7639_v50 = vld [vmem:[#allocation41_spill] sm:$0xff] }
 0x535   : > { %2604 = vmatpush1.bf16.msra.mxu0 %v6129_v59  ;;  %2645 = vmatpush1.bf16.msra.mxu1 %v6132_v15 }
 0x536   : > { %2605 = vmatprep.subr.bf16.mxu0 %v6135_v18  ;;  %2646 = vmatprep.subr.bf16.mxu1 %v6138_v19 }
 0x539   : > { %2606 = vmatpush1.bf16.msra.mxu0 %v6141_v21  ;;  %2647 = vmatpush1.bf16.msra.mxu1 %v6144_v22 }
 0x53a   : > { %2607 = vmatprep.subr.bf16.mxu0 %v6147_v23  ;;  %2648 = vmatprep.subr.bf16.mxu1 %v6150_v24 }
 0x53d   : > { %2608 = vmatpush1.bf16.msra.mxu0 %v6153_v26  ;;  %2649 = vmatpush1.bf16.msra.mxu1 %v6156_v28 }
 0x53e   : > { %2609 = vmatprep.subr.bf16.mxu0 %v6159_v29  ;;  %2650 = vmatprep.subr.bf16.mxu1 %v6162_v31 }
 0x541   : > { %2610 = vmatpush1.bf16.msra.mxu0 %v6165_v33  ;;  %2651 = vmatpush1.bf16.msra.mxu1 %v6168_v51 }
 0x542   : > { %2611 = vmatprep.subr.bf16.mxu0 %v6171_v34  ;;  %2652 = vmatprep.subr.bf16.mxu1 %v6174_v30 }
 0x545   : > { %2612 = vmatpush1.bf16.msra.mxu0 %v6177_v54  ;;  %2653 = vmatpush1.bf16.msra.mxu1 %v6180_v32 }
 0x546   : > { %2613 = vmatprep.subr.bf16.mxu0 %v6183_v37  ;;  %2654 = vmatprep.subr.bf16.mxu1 %v7623_v4  ;;  %v7671_v37 = vld [vmem:[#allocation88_spill] sm:$0xff] }
 0x549   : > { %2614 = vmatpush1.bf16.msra.mxu0 %v7624_v6  ;;  %2655 = vmatpush1.bf16.msra.mxu1 %v7625_v7  ;;  %v7670_v6 = vld [vmem:[#allocation87_spill] sm:$0xff] }
 0x54a   : > { %2615 = vmatprep.subr.bf16.mxu0 %v7626_v27  ;;  %2656 = vmatprep.subr.bf16.mxu1 %v7627_v35 }
 0x54d   : > { %2616 = vmatpush1.bf16.msra.mxu0 %v7628_v14  ;;  %2657 = vmatpush1.bf16.msra.mxu1 %v7629_v16 }
 0x54e   : > { %2617 = vmatprep.subr.bf16.mxu0 %v7630_v9  ;;  %2658 = vmatprep.subr.bf16.mxu1 %v7631_v17  ;;  %v7641_v9 = vld [vmem:[#allocation43_spill] sm:$0xff]  ;;  %v7642_v17 = vld [vmem:[#allocation44_spill] sm:$0xff] }
 0x551   : > { %2618 = vmatpush1.bf16.msra.mxu0 %v7632_v13  ;;  %2659 = vmatpush1.bf16.msra.mxu1 %v7633_v47  ;;  %v7643_v13 = vld [vmem:[#allocation45_spill] sm:$0xff]  ;;  %v7644_v47 = vld [vmem:[#allocation46_spill] sm:$0xff] }
 0x552   : > { %2619 = vmatprep.subr.bf16.mxu0 %v7634_v41  ;;  %2660 = vmatprep.subr.bf16.mxu1 %v7635_v43  ;;  %v7645_v41 = vld [vmem:[#allocation47_spill] sm:$0xff]  ;;  %v7646_v43 = vld [vmem:[#allocation48_spill] sm:$0xff] }
 0x555   : > { %2620 = vmatpush2.bf16.msra.mxu0 %v7636_v36  ;;  %2661 = vmatpush2.bf16.msra.mxu1 %v7637_v0  ;;  %v7647_v36 = vld [vmem:[#allocation49_spill] sm:$0xff]  ;;  %v7648_v0 = vld [vmem:[#allocation50_spill] sm:$0xff] }
 0x556   : > { %2621 = vmatprep.subr.bf16.mxu0 %v7638_v5  ;;  %2662 = vmatprep.subr.bf16.mxu1 %v7639_v50  ;;  %v7649_v5 = vld [vmem:[#allocation51_spill] sm:$0xff]  ;;  %v7650_v50 = vld [vmem:[#allocation52_spill] sm:$0xff] }
 0x559   : > { %2622 = vmatpush2.bf16.msra.mxu0 %v7640_v25  ;;  %2663 = vmatpush2.bf16.msra.mxu1 %v7641_v9  ;;  %v7651_v25 = vld [vmem:[#allocation53_spill] sm:$0xff]  ;;  %v7652_v9 = vld [vmem:[#allocation54_spill] sm:$0xff] }
 0x55a   : > { %2623 = vmatprep.subr.bf16.mxu0 %v7642_v17  ;;  %2664 = vmatprep.subr.bf16.mxu1 %v7643_v13  ;;  %v7653_v17 = vld [vmem:[#allocation55_spill] sm:$0xff]  ;;  %v7654_v13 = vld [vmem:[#allocation56_spill] sm:$0xff] }
 0x55d   : > { %2624 = vmatpush2.bf16.msra.mxu0 %v7644_v47  ;;  %2665 = vmatpush2.bf16.msra.mxu1 %v7645_v41  ;;  %v7655_v47 = vld [vmem:[#allocation57_spill] sm:$0xff]  ;;  %v7656_v41 = vld [vmem:[#allocation58_spill] sm:$0xff] }
 0x55e   : > { %2625 = vmatprep.subr.bf16.mxu0 %v7646_v43  ;;  %2666 = vmatprep.subr.bf16.mxu1 %v7647_v36  ;;  %v7657_v43 = vld [vmem:[#allocation59_spill] sm:$0xff]  ;;  %v7658_v36 = vld [vmem:[#allocation60_spill] sm:$0xff] }
 0x561   : > { %2626 = vmatpush2.bf16.msra.mxu0 %v7648_v0  ;;  %2667 = vmatpush2.bf16.msra.mxu1 %v7649_v5  ;;  %v7659_v0 = vld [vmem:[#allocation61_spill] sm:$0xff]  ;;  %v7660_v5 = vld [vmem:[#allocation62_spill] sm:$0xff] }
 0x562   : > { %2627 = vmatprep.subr.bf16.mxu0 %v7650_v50  ;;  %2668 = vmatprep.subr.bf16.mxu1 %v7651_v25  ;;  %v7661_v50 = vld [vmem:[#allocation63_spill] sm:$0xff]  ;;  %v7662_v25 = vld [vmem:[#allocation64_spill] sm:$0xff] }
 0x565   : > { %2628 = vmatpush2.bf16.msra.mxu0 %v7652_v9  ;;  %2669 = vmatpush2.bf16.msra.mxu1 %v7653_v17  ;;  %v7663_v9 = vld [vmem:[#allocation65_spill] sm:$0xff]  ;;  %v7664_v17 = vld [vmem:[#allocation66_spill] sm:$0xff] }
 0x566   : > { %2629 = vmatprep.subr.bf16.mxu0 %v7654_v13  ;;  %2670 = vmatprep.subr.bf16.mxu1 %v7655_v47  ;;  %v7665_v13 = vld [vmem:[#allocation85_spill] sm:$0xff]  ;;  %v6457_v47 = vld [vmem:[#allocation9 + $0xe4] ss:$16 sps:$4 sm:$0xff]  }
 0x567   : > { %7666 = vst [vmem:[#allocation79_spill] sm:$0xff] %v6457_v47 }
 0x569   : > { %2630 = vmatpush2.bf16.msra.mxu0 %v7656_v41  ;;  %2671 = vmatpush2.bf16.msra.mxu1 %v7657_v43  ;;  %v7667_v43 = vld [vmem:[#allocation19_spill] sm:$0xff]  ;;  %v7668_v41 = vld [vmem:[#allocation18_spill] sm:$0xff] }
 0x56a   : > { %2631 = vmatprep.subr.bf16.mxu0 %v7658_v36  ;;  %2672 = vmatprep.subr.bf16.mxu1 %v7659_v0 }
 0x56d   : > { %2632 = vmatpush2.bf16.msra.mxu0 %v7660_v5  ;;  %2673 = vmatpush2.bf16.msra.mxu1 %v7661_v50 }
 0x56e   : > { %2633 = vmatprep.subr.bf16.mxu0 %v7662_v25  ;;  %2674 = vmatprep.subr.bf16.mxu1 %v7663_v9  ;;  %v7669_v25 = vld [vmem:[#allocation86_spill] sm:$0xff] }
 0x571   : > { %2634 = vmatpush2.bf16.msra.mxu0 %v7664_v17  ;;  %2675 = vmatpush2.bf16.msra.mxu1 %v7665_v13 }
 0x572   : > { %2718 = vmatprep.subr.bf16.mxu0 %v6457_v47  ;;  %2759 = vmatprep.subr.bf16.mxu1 %v7667_v43 }
 0x5d4   : > { %v2410_v36 = vpop.f32.mrf.mxu0  ;;  %v2451_v0 = vpop.f32.mrf.mxu1 }
 0x5d5   : > { %v2411_v5 = vadd.f32 %v2410_v36, %v7668_v41  ;;  %v2452_v32 = vadd.f32 %v2451_v0, %v7671_v37 }
 0x5d6   : > { %v2412_v16 = vpop.f32.mrf.mxu0  ;;  %v2453_v50 = vpop.f32.mrf.mxu1 }
 0x5d7   : > { %v4134_v14 = vmul.f32 -1.442695, %v2411_v5  ;;  %v2413_v35 = vadd.f32 %v2412_v16, %v7669_v25  ;;  %v2454_v47 = vadd.f32 %v2453_v50, %v7670_v6  ;;  %v7672_v16 = vld [vmem:[#allocation73_spill] sm:$0xff] }
 0x5d8   : > { %v2414_v9 = vpop.f32.mrf.mxu0  ;;  %v2455_v27 = vpop.f32.mrf.mxu1 }
 0x5d9   : > { %4635 = vpow2.f32 %v4134_v14  ;;  %v4135_v17 = vmul.f32 -1.442695, %v2413_v35  ;;  %v4136_v4 = vmul.f32 -1.442695, %v2454_v47  ;;  %v2487_v27 = vunpack.c.l.bf16 %v7672_v16 }
 0x5da   : > { %v2415_v13 = vpop.f32.mrf.mxu0  ;;  %v2456_v7 = vpop.f32.mrf.mxu1 }
 0x5db   : > { %4637 = vpow2.f32 %v4135_v17  ;;  %v2488_v17 = vunpack.c.h.bf16 %v7672_v16  ;;  %v7673_v16 = vld [vmem:[#allocation81_spill] sm:$0xff] }
 0x5dc   : > { %4639 = vpow2.f32 %v4136_v4 }
 0x5e6   : > { %v4636_v43 = vpop.eup %4635 }
 0x5e7   : > { %v2461_v54 = vadd.f32 1.0, %v4636_v43 }
 0x5e8   : > { %v4638_v36 = vpop.eup %4637 }
 0x5e9   : > { %4641 = vrcp.f32 %v2461_v54  ;;  %v2467_v5 = vadd.f32 1.0, %v4638_v36  ;;  %v4640_v9 = vpop.eup %4639 }
 0x5ea   : > { %4643 = vtanh.f32 %v2452_v32  ;;  %v2474_v4 = vadd.f32 1.0, %v4640_v9  ;;  %v2489_v9 = vunpack.c.l.bf16 %v7673_v16 }
 0x5eb   : > { %4645 = vrcp.f32 %v2467_v5 }
 0x5f4   : > { %v2525_v14 = vpop.f32.mrf.mxu0  ;;  %v2566_v35 = vpop.f32.mrf.mxu1 }
 0x5f5   : > { %v2573_v7 = vadd.f32 %v2525_v14, %v2487_v27  ;;  %v2490_v14 = vunpack.c.h.bf16 %v7673_v16 }
 0x5f6   : > { %v4642_v13 = vpop.eup %4641  ;;  %v2527_v47 = vpop.f32.mrf.mxu0 }
 0x5f7   : > { %v2568_v50 = vpop.f32.mrf.mxu1  ;;  %v4644_v6 = vpop.eup %4643  ;;  %v4137_v0 = vmul.f32 -1.442695, %v2573_v7  ;;  %v2574_v43 = vadd.f32 %v2527_v47, %v2488_v17  ;;  %v2575_v17 = vadd.f32 %v2566_v35, %v2489_v9 }
 0x5f8   : > { %v4646_v37 = vpop.eup %4645  ;;  %v2529_v54 = vpop.f32.mrf.mxu0  ;;  %v2478_v32 = vmul.f32 %v4644_v6, %v4642_v13  ;;  %v2576_v7 = vadd.f32 %v2568_v50, %v2490_v14 }
 0x5f9   : > { %v2570_v36 = vpop.f32.mrf.mxu1  ;;  %v2477_v5 = vmul.f32 %v4646_v37, %v6324_v45  ;;  %4647 = vpow2.f32 %v4137_v0  ;;  %v4138_v25 = vmul.f32 -1.442695, %v2574_v43 }
 0x5fa   : > { %v2530_v41 = vpop.f32.mrf.mxu0  ;;  %v4139_v47 = vmul.f32 -1.442695, %v2576_v7 }
 0x5fb   : > { %v2571_v30 = vpop.f32.mrf.mxu1  ;;  %v6468_v27 = vadd.f32 %v2478_v32, %v2477_v5  ;;  %4649 = vpow2.f32 %v4138_v25 }
 0x5fc   : > { %4651 = vrcp.f32 %v2474_v4 }
 0x5fd   : > { %4653 = vtanh.f32 %v6468_v27 }
 0x5fe   : > { %4655 = vtanh.f32 %v2575_v17  ;;  %v6482_v17 = vld [vmem:[#allocation9 + $0xe8] ss:$16 sps:$4 sm:$0xff]  }
 0x5ff   : > { %4657 = vpow2.f32 %v4139_v47  ;;  %v6492_v47 = vld [vmem:[#allocation9 + $0xc8] ss:$16 sps:$4 sm:$0xff]  }
 0x606   : > { %v4648_v6 = vpop.eup %4647 }
 0x607   : > { %v2580_v13 = vadd.f32 1.0, %v4648_v6  ;;  %v6496_v6 = vld [vmem:[#allocation9 + $0xac] ss:$16 sps:$4 sm:$0xff]  }
 0x608   : > { %v4650_v37 = vpop.eup %4649 }
 0x609   : > { %v4652_v45 = vpop.eup %4651  ;;  %4659 = vrcp.f32 %v2580_v13  ;;  %v2586_v30 = vadd.f32 1.0, %v4650_v37  ;;  %v6500_v13 = vld [vmem:[#allocation9 + $0xa8] ss:$16 sps:$4 sm:$0xff]  }
 0x60a   : > { %v4654_v41 = vpop.eup %4653  ;;  %v7699_v37 = vld [vmem:[#allocation45_spill] sm:$0xff] }
 0x60b   : > { %4661 = vrcp.f32 %v2586_v30  ;;  %v6473_v25 = vmul.f32 %v4654_v41, %v4652_v45  ;;  %v4656_v50 = vpop.eup %4655  ;;  %v7700_v45 = vld [vmem:[#allocation46_spill] sm:$0xff]  ;;  %v7701_v30 = vld [vmem:[#allocation47_spill] sm:$0xff]  ;;  %v7702_v41 = vld [vmem:[#allocation48_spill] sm:$0xff] }
 0x60c   : > { %v4658_v35 = vpop.eup %4657 }
 0x60d   : > { %7674 = vst [vmem:[#allocation72_spill] sm:$0xff] %v6473_v25  ;;  %v2602_v0 = vpack.c.bf16 %v6473_v25, %v6473_v25  ;;  %v2593_v36 = vadd.f32 1.0, %v4658_v35  ;;  %v7705_v35 = vld [vmem:[#allocation51_spill] sm:$0xff]  ;;  %v6777_v25 = vld [vmem:[#allocation10 + $0x1c4] ss:$16 sps:$4 sm:$0xff]  }
 0x60f   : > { %2635 = vmatprep.mubr.bf16.mxu0 %v2602_v0  ;;  %2676 = vmatprep.mubr.bf16.mxu1 %v2602_v0  ;;  %4663 = vrcp.f32 %v2593_v36  ;;  %v7703_v0 = vld [vmem:[#allocation49_spill] sm:$0xff]  ;;  %v7709_v36 = vld [vmem:[#allocation55_spill] sm:$0xff] }
 0x616   : > { %v4660_v43 = vpop.eup %4659 }
 0x617   : > { %v2597_v4 = vmul.f32 %v4660_v43, %v4656_v50  ;;  %v7704_v50 = vld [vmem:[#allocation50_spill] sm:$0xff]  ;;  %v7706_v43 = vld [vmem:[#allocation52_spill] sm:$0xff] }
 0x618   : > { %v4662_v54 = vpop.eup %4661 }
 0x619   : > { %v2596_v32 = vmul.f32 %v4662_v54, %v6334_v55  ;;  %v6486_v55 = vld [vmem:[#allocation9 + $0xcc] ss:$16 sps:$4 sm:$0xff]   ;;  %v7708_v54 = vld [vmem:[#allocation54_spill] sm:$0xff] }
 0x61b   : > { %v6478_v5 = vadd.f32 %v2597_v4, %v2596_v32  ;;  %v7707_v4 = vld [vmem:[#allocation53_spill] sm:$0xff]  ;;  %v7710_v32 = vld [vmem:[#allocation56_spill] sm:$0xff] }
 0x61c   : > { %v4664_v16 = vpop.eup %4663 }
 0x61d   : > { %4665 = vtanh.f32 %v6478_v5 }
 0x62a   : > { %v4666_v14 = vpop.eup %4665 }
 0x62b   : > { %v2600_v7 = vmul.f32 %v4666_v14, %v4664_v16  ;;  %v7711_v16 = vld [vmem:[#allocation57_spill] sm:$0xff]  ;;  %v7712_v14 = vld [vmem:[#allocation58_spill] sm:$0xff] }
 0x62d   : > { %v2601_v9 = vpack.c.bf16 %v2600_v7, %v2600_v7  ;;  %v7713_v7 = vld [vmem:[#allocation59_spill] sm:$0xff] }
 0x62f   : > { %2636 = vmatmul.mubr.bf16.vlgmr.msra.gmra.mxu0 %v2601_v9  ;;  %2677 = vmatmul.mubr.bf16.vlgmr.msra.gmra.mxu1 %v2601_v9 }
 0x630   : > { %2719 = vmatpush1.bf16.msra.mxu0 %v6337_v11  ;;  %2760 = vmatpush1.bf16.msra.mxu1 %v6482_v17 }
 0x631   : > { %2720 = vmatprep.subr.bf16.mxu0 %v6341_v12  ;;  %2761 = vmatprep.subr.bf16.mxu1 %v6486_v55 }
 0x632   : > { %2750 = vmatprep.mubr.bf16.mxu0 %v7459_v57  ;;  %2791 = vmatprep.mubr.bf16.mxu1 %v7459_v57 }
 0x634   : > { %2721 = vmatpush1.bf16.msra.mxu0 %v6347_v10  ;;  %2762 = vmatpush1.bf16.msra.mxu1 %v6492_v47 }
 0x635   : > { %2722 = vmatprep.subr.bf16.mxu0 %v6351_v61  ;;  %2763 = vmatprep.subr.bf16.mxu1 %v6496_v6 }
 0x638   : > { %2723 = vmatpush1.bf16.msra.mxu0 %v6355_v38  ;;  %2764 = vmatpush1.bf16.msra.mxu1 %v6500_v13 }
 0x639   : > { %2724 = vmatprep.subr.bf16.mxu0 %v6359_v49  ;;  %2765 = vmatprep.subr.bf16.mxu1 %v6084_v53  ;;  %v6517_v53 = vld [vmem:[#allocation9 + $0x20] ss:$16 sps:$4 sm:$0xff]  }
 0x63c   : > { %2725 = vmatpush1.bf16.msra.mxu0 %v6363_v8  ;;  %2766 = vmatpush1.bf16.msra.mxu1 %v6088_v42  ;;  %v6521_v42 = vld [vmem:[#allocation9 + $0x4] ss:$16 sps:$4 sm:$0xff]  }
 0x63d   : > { %2726 = vmatprep.subr.bf16.mxu0 %v6367_v44  ;;  %2767 = vmatprep.subr.bf16.mxu1 %v6092_v46  ;;  %v6525_v46 = vld [vmem:[#allocation9] ss:$16 sps:$4 sm:$0xff]  }
 0x640   : > { %2727 = vmatpush1.bf16.msra.mxu0 %v6371_v52  ;;  %2768 = vmatpush1.bf16.msra.mxu1 %v6096_v40  ;;  %v7675_v40 = vld [vmem:[#allocation21_spill] sm:$0xff] }
 0x641   : > { %2728 = vmatprep.subr.bf16.mxu0 %v6375_v39  ;;  %2769 = vmatprep.subr.bf16.mxu1 %v6100_v62  ;;  %v7676_v62 = vld [vmem:[#allocation22_spill] sm:$0xff] }
 0x644   : > { %2729 = vmatpush1.bf16.msra.mxu0 %v6379_v56  ;;  %2770 = vmatpush1.bf16.msra.mxu1 %v6104_v63  ;;  %v7677_v63 = vld [vmem:[#allocation23_spill] sm:$0xff] }
 0x645   : > { %2730 = vmatprep.subr.bf16.mxu0 %v6383_v20  ;;  %2771 = vmatprep.subr.bf16.mxu1 %v6108_v58  ;;  %v7678_v58 = vld [vmem:[#allocation24_spill] sm:$0xff] }
 0x648   : > { %2731 = vmatpush1.bf16.msra.mxu0 %v6517_v53  ;;  %2772 = vmatpush1.bf16.msra.mxu1 %v6112_v1  ;;  %v7679_v1 = vld [vmem:[#allocation25_spill] sm:$0xff] }
 0x649   : > { %2732 = vmatprep.subr.bf16.mxu0 %v6521_v42  ;;  %2773 = vmatprep.subr.bf16.mxu1 %v6116_v2  ;;  %v7680_v2 = vld [vmem:[#allocation26_spill] sm:$0xff] }
 0x64c   : > { %2733 = vmatpush1.bf16.msra.mxu0 %v6525_v46  ;;  %2774 = vmatpush1.bf16.msra.mxu1 %v6120_v3  ;;  %v7681_v3 = vld [vmem:[#allocation27_spill] sm:$0xff] }
 0x64d   : > { %2830 = vmatprep.subr.bf16.mxu0 %v6123_v48  ;;  %2871 = vmatprep.subr.bf16.mxu1 %v6126_v60  ;;  %v7682_v48 = vld [vmem:[#allocation28_spill] sm:$0xff]  ;;  %v7683_v60 = vld [vmem:[#allocation29_spill] sm:$0xff] }
 0x64f   : > { %2751 = vmatmul.mubr.bf16.vlgmr.msra.gmra.mxu0 %v2601_v9  ;;  %2792 = vmatmul.mubr.bf16.vlgmr.msra.gmra.mxu1 %v2601_v9  ;;  %v7714_v9 = vld [vmem:[#allocation60_spill] sm:$0xff] }
 0x650   : > { %2831 = vmatpush1.bf16.msra.mxu0 %v6129_v59  ;;  %2872 = vmatpush1.bf16.msra.mxu1 %v6132_v15  ;;  %v7684_v59 = vld [vmem:[#allocation30_spill] sm:$0xff]  ;;  %v7685_v15 = vld [vmem:[#allocation31_spill] sm:$0xff] }
 0x651   : > { %2832 = vmatprep.subr.bf16.mxu0 %v6135_v18  ;;  %2873 = vmatprep.subr.bf16.mxu1 %v6138_v19  ;;  %v7686_v18 = vld [vmem:[#allocation32_spill] sm:$0xff]  ;;  %v7687_v19 = vld [vmem:[#allocation33_spill] sm:$0xff] }
 0x652   : > { %7745 = vst [vmem:[#allocation33_spill] sm:$0xff] %v6777_v25 }
 0x654   : > { %2833 = vmatpush1.bf16.msra.mxu0 %v6141_v21  ;;  %2874 = vmatpush1.bf16.msra.mxu1 %v6144_v22  ;;  %v7688_v21 = vld [vmem:[#allocation34_spill] sm:$0xff]  ;;  %v7689_v22 = vld [vmem:[#allocation35_spill] sm:$0xff] }
 0x655   : > { %2834 = vmatprep.subr.bf16.mxu0 %v6147_v23  ;;  %2875 = vmatprep.subr.bf16.mxu1 %v6150_v24  ;;  %v7690_v23 = vld [vmem:[#allocation36_spill] sm:$0xff]  ;;  %v7691_v24 = vld [vmem:[#allocation37_spill] sm:$0xff] }
 0x658   : > { %2835 = vmatpush1.bf16.msra.mxu0 %v6153_v26  ;;  %2876 = vmatpush1.bf16.msra.mxu1 %v6156_v28  ;;  %v7692_v26 = vld [vmem:[#allocation38_spill] sm:$0xff]  ;;  %v7693_v28 = vld [vmem:[#allocation39_spill] sm:$0xff] }
 0x659   : > { %2836 = vmatprep.subr.bf16.mxu0 %v6159_v29  ;;  %2877 = vmatprep.subr.bf16.mxu1 %v6162_v31  ;;  %v7694_v29 = vld [vmem:[#allocation40_spill] sm:$0xff]  ;;  %v7695_v31 = vld [vmem:[#allocation41_spill] sm:$0xff] }
 0x65c   : > { %2837 = vmatpush1.bf16.msra.mxu0 %v6165_v33  ;;  %2878 = vmatpush1.bf16.msra.mxu1 %v6168_v51  ;;  %v7696_v33 = vld [vmem:[#allocation42_spill] sm:$0xff]  ;;  %v7697_v51 = vld [vmem:[#allocation43_spill] sm:$0xff] }
 0x65d   : > { %2838 = vmatprep.subr.bf16.mxu0 %v6171_v34  ;;  %2879 = vmatprep.subr.bf16.mxu1 %v7675_v40  ;;  %v7698_v34 = vld [vmem:[#allocation44_spill] sm:$0xff]  ;;  %v7715_v40 = vld [vmem:[#allocation61_spill] sm:$0xff] }
 0x660   : > { %2839 = vmatpush1.bf16.msra.mxu0 %v7676_v62  ;;  %2880 = vmatpush1.bf16.msra.mxu1 %v7677_v63  ;;  %v7716_v62 = vld [vmem:[#allocation62_spill] sm:$0xff]  ;;  %v7717_v63 = vld [vmem:[#allocation63_spill] sm:$0xff] }
 0x661   : > { %2840 = vmatprep.subr.bf16.mxu0 %v7678_v58  ;;  %2881 = vmatprep.subr.bf16.mxu1 %v7679_v1  ;;  %v7718_v58 = vld [vmem:[#allocation64_spill] sm:$0xff]  ;;  %v7719_v1 = vld [vmem:[#allocation65_spill] sm:$0xff] }
 0x664   : > { %2841 = vmatpush1.bf16.msra.mxu0 %v7680_v2  ;;  %2882 = vmatpush1.bf16.msra.mxu1 %v7681_v3  ;;  %v7720_v2 = vld [vmem:[#allocation66_spill] sm:$0xff]  ;;  %v7721_v3 = vld [vmem:[#allocation85_spill] sm:$0xff] }
 0x665   : > { %2842 = vmatprep.subr.bf16.mxu0 %v7682_v48  ;;  %2883 = vmatprep.subr.bf16.mxu1 %v7683_v60  ;;  %v7722_v48 = vld [vmem:[#allocation79_spill] sm:$0xff] }
 0x666   : > { %v6594_v60 = vld [vmem:[#allocation9 + $0xec] ss:$16 sps:$4 sm:$0xff]  }
 0x668   : > { %2843 = vmatpush1.bf16.msra.mxu0 %v7684_v59  ;;  %2884 = vmatpush1.bf16.msra.mxu1 %v7685_v15 }
 0x669   : > { %2844 = vmatprep.subr.bf16.mxu0 %v7686_v18  ;;  %2885 = vmatprep.subr.bf16.mxu1 %v7687_v19  ;;  %v7723_v18 = vld [vmem:[#allocation18_spill] sm:$0xff] }
 0x66c   : > { %2845 = vmatpush1.bf16.msra.mxu0 %v7688_v21  ;;  %2886 = vmatpush1.bf16.msra.mxu1 %v7689_v22 }
 0x66d   : > { %2846 = vmatprep.subr.bf16.mxu0 %v7690_v23  ;;  %2887 = vmatprep.subr.bf16.mxu1 %v7691_v24  ;;  %v7724_v24 = vld [vmem:[#allocation86_spill] sm:$0xff] }
 0x670   : > { %2847 = vmatpush2.bf16.msra.mxu0 %v7692_v26  ;;  %2888 = vmatpush2.bf16.msra.mxu1 %v7693_v28 }
 0x671   : > { %2848 = vmatprep.subr.bf16.mxu0 %v7694_v29  ;;  %2889 = vmatprep.subr.bf16.mxu1 %v7695_v31 }
 0x674   : > { %2849 = vmatpush2.bf16.msra.mxu0 %v7696_v33  ;;  %2890 = vmatpush2.bf16.msra.mxu1 %v7697_v51 }
 0x675   : > { %2850 = vmatprep.subr.bf16.mxu0 %v7698_v34  ;;  %2891 = vmatprep.subr.bf16.mxu1 %v7699_v37  ;;  %v7725_v34 = vld [vmem:[#allocation87_spill] sm:$0xff] }
 0x678   : > { %2851 = vmatpush2.bf16.msra.mxu0 %v7700_v45  ;;  %2892 = vmatpush2.bf16.msra.mxu1 %v7701_v30 }
 0x679   : > { %2852 = vmatprep.subr.bf16.mxu0 %v7702_v41  ;;  %2893 = vmatprep.subr.bf16.mxu1 %v7703_v0  ;;  %v7726_v41 = vld [vmem:[#allocation88_spill] sm:$0xff] }
 0x67c   : > { %2853 = vmatpush2.bf16.msra.mxu0 %v7704_v50  ;;  %2894 = vmatpush2.bf16.msra.mxu1 %v7705_v35 }
 0x67d   : > { %2854 = vmatprep.subr.bf16.mxu0 %v7706_v43  ;;  %2895 = vmatprep.subr.bf16.mxu1 %v7707_v4  ;;  %v7727_v4 = vld [vmem:[#allocation74_spill] sm:$0xff] }
 0x680   : > { %2855 = vmatpush2.bf16.msra.mxu0 %v7708_v54  ;;  %2896 = vmatpush2.bf16.msra.mxu1 %v7709_v36  ;;  %v2714_v54 = vunpack.c.l.bf16 %v7727_v4 }
 0x681   : > { %2856 = vmatprep.subr.bf16.mxu0 %v7710_v32  ;;  %2897 = vmatprep.subr.bf16.mxu1 %v7711_v16 }
 0x684   : > { %2857 = vmatpush2.bf16.msra.mxu0 %v7712_v14  ;;  %2898 = vmatpush2.bf16.msra.mxu1 %v7713_v7  ;;  %v2715_v7 = vunpack.c.h.bf16 %v7727_v4 }
 0x685   : > { %2858 = vmatprep.subr.bf16.mxu0 %v7714_v9  ;;  %2899 = vmatprep.subr.bf16.mxu1 %v7715_v40 }
 0x688   : > { %2859 = vmatpush2.bf16.msra.mxu0 %v7716_v62  ;;  %2900 = vmatpush2.bf16.msra.mxu1 %v7717_v63 }
 0x689   : > { %2860 = vmatprep.subr.bf16.mxu0 %v7718_v58  ;;  %2901 = vmatprep.subr.bf16.mxu1 %v7719_v1 }
 0x68c   : > { %2861 = vmatpush2.bf16.msra.mxu0 %v7720_v2  ;;  %2902 = vmatpush2.bf16.msra.mxu1 %v7721_v3 }
 0x68d   : > { %2945 = vmatprep.subr.bf16.mxu0 %v7722_v48  ;;  %2986 = vmatprep.subr.bf16.mxu1 %v6594_v60 }
 0x6ef   : > { %v2637_v59 = vpop.f32.mrf.mxu0  ;;  %v2678_v15 = vpop.f32.mrf.mxu1 }
 0x6f0   : > { %v2638_v19 = vadd.f32 %v2637_v59, %v7723_v18  ;;  %v2679_v0 = vadd.f32 %v2678_v15, %v7726_v41 }
 0x6f1   : > { %v2639_v21 = vpop.f32.mrf.mxu0  ;;  %v2680_v22 = vpop.f32.mrf.mxu1 }
 0x6f2   : > { %v4140_v23 = vmul.f32 -1.442695, %v2638_v19  ;;  %v2640_v26 = vadd.f32 %v2639_v21, %v7724_v24  ;;  %v2681_v37 = vadd.f32 %v2680_v22, %v7725_v34 }
 0x6f3   : > { %v2641_v28 = vpop.f32.mrf.mxu0  ;;  %v2682_v29 = vpop.f32.mrf.mxu1 }
 0x6f4   : > { %4667 = vpow2.f32 %v4140_v23  ;;  %v4141_v31 = vmul.f32 -1.442695, %v2640_v26  ;;  %v4142_v45 = vmul.f32 -1.442695, %v2681_v37  ;;  %v7728_v29 = vld [vmem:[#allocation82_spill] sm:$0xff] }
 0x6f5   : > { %v2642_v33 = vpop.f32.mrf.mxu0  ;;  %v2683_v51 = vpop.f32.mrf.mxu1 }
 0x6f6   : > { %4669 = vpow2.f32 %v4141_v31  ;;  %v2717_v31 = vunpack.c.h.bf16 %v7728_v29  ;;  %v2716_v51 = vunpack.c.l.bf16 %v7728_v29  ;;  %v6702_v29 = vld [vmem:[#allocation10 + $0xa8] ss:$16 sps:$4 sm:$0xff]  }
 0x6f7   : > { %4671 = vpow2.f32 %v4142_v45 }
 0x701   : > { %v4668_v30 = vpop.eup %4667 }
 0x702   : > { %v2688_v50 = vadd.f32 1.0, %v4668_v30 }
 0x703   : > { %v4670_v35 = vpop.eup %4669 }
 0x704   : > { %4673 = vrcp.f32 %v2688_v50  ;;  %v2694_v43 = vadd.f32 1.0, %v4670_v35  ;;  %v4672_v16 = vpop.eup %4671 }
 0x705   : > { %4675 = vtanh.f32 %v2679_v0  ;;  %v2701_v3 = vadd.f32 1.0, %v4672_v16 }
 0x706   : > { %4677 = vrcp.f32 %v2694_v43 }
 0x70f   : > { %v2752_v36 = vpop.f32.mrf.mxu0  ;;  %v2793_v32 = vpop.f32.mrf.mxu1 }
 0x710   : > { %v2800_v14 = vadd.f32 %v2752_v36, %v2714_v54  ;;  %v2802_v37 = vadd.f32 %v2793_v32, %v2716_v51  ;;  %v6711_v51 = vld [vmem:[#allocation10 + $0x80] ss:$16 sps:$4 sm:$0xff]  }
 0x711   : > { %v4674_v9 = vpop.eup %4673  ;;  %v2754_v40 = vpop.f32.mrf.mxu0 }
 0x712   : > { %v2795_v62 = vpop.f32.mrf.mxu1  ;;  %v4676_v63 = vpop.eup %4675  ;;  %v4143_v58 = vmul.f32 -1.442695, %v2800_v14  ;;  %v2801_v1 = vadd.f32 %v2754_v40, %v2715_v7 }
 0x713   : > { %v4678_v2 = vpop.eup %4677  ;;  %v2756_v59 = vpop.f32.mrf.mxu0  ;;  %v2705_v19 = vmul.f32 %v4676_v63, %v4674_v9  ;;  %v2803_v33 = vadd.f32 %v2795_v62, %v2717_v31  ;;  %v6705_v31 = vld [vmem:[#allocation10 + $0x84] ss:$16 sps:$4 sm:$0xff]  }
 0x714   : > { %v2797_v15 = vpop.f32.mrf.mxu1  ;;  %v2704_v21 = vmul.f32 %v4678_v2, %v6468_v27  ;;  %4679 = vpow2.f32 %v4143_v58  ;;  %v4144_v22 = vmul.f32 -1.442695, %v2801_v1  ;;  %v6681_v59 = vld [vmem:[#allocation10 + $0xc4] ss:$16 sps:$4 sm:$0xff]  }
 0x715   : > { %v2757_v23 = vpop.f32.mrf.mxu0  ;;  %v4145_v45 = vmul.f32 -1.442695, %v2803_v33  ;;  %v6684_v15 = vld [vmem:[#allocation10 + $0xcc] ss:$16 sps:$4 sm:$0xff]  }
 0x716   : > { %v2798_v26 = vpop.f32.mrf.mxu1  ;;  %v6604_v28 = vadd.f32 %v2705_v19, %v2704_v21  ;;  %4681 = vpow2.f32 %v4144_v22  ;;  %v6687_v19 = vld [vmem:[#allocation10 + $0xc0] ss:$16 sps:$4 sm:$0xff]   ;;  %v6690_v21 = vld [vmem:[#allocation10 + $0xc8] ss:$16 sps:$4 sm:$0xff]   ;;  %v6693_v22 = vld [vmem:[#allocation10 + $0xa4] ss:$16 sps:$4 sm:$0xff]  }
 0x717   : > { %4683 = vrcp.f32 %v2701_v3  ;;  %v6678_v3 = vld [vmem:[#allocation10 + $0xe8] ss:$16 sps:$4 sm:$0xff]   ;;  %v6696_v23 = vld [vmem:[#allocation10 + $0xac] ss:$16 sps:$4 sm:$0xff]   ;;  %v6699_v26 = vld [vmem:[#allocation10 + $0xa0] ss:$16 sps:$4 sm:$0xff]  }
 0x718   : > { %4685 = vtanh.f32 %v6604_v28  ;;  %v6708_v33 = vld [vmem:[#allocation10 + $0x8c] ss:$16 sps:$4 sm:$0xff]  }
 0x719   : > { %4687 = vtanh.f32 %v2802_v37  ;;  %v6714_v37 = vld [vmem:[#allocation10 + $0x88] ss:$16 sps:$4 sm:$0xff]  }
 0x71a   : > { %4689 = vpow2.f32 %v4145_v45  ;;  %v6717_v45 = vld [vmem:[#allocation10 + $0x64] ss:$16 sps:$4 sm:$0xff]  }
 0x721   : > { %v4680_v30 = vpop.eup %4679 }
 0x722   : > { %v2807_v0 = vadd.f32 1.0, %v4680_v30  ;;  %v6720_v30 = vld [vmem:[#allocation10 + $0x6c] ss:$16 sps:$4 sm:$0xff]  }
 0x723   : > { %v4682_v27 = vpop.eup %4681 }
 0x724   : > { %v4684_v50 = vpop.eup %4683  ;;  %4691 = vrcp.f32 %v2807_v0  ;;  %v2813_v35 = vadd.f32 1.0, %v4682_v27  ;;  %v6723_v0 = vld [vmem:[#allocation10 + $0x60] ss:$16 sps:$4 sm:$0xff]   ;;  %v6726_v27 = vld [vmem:[#allocation10 + $0x68] ss:$16 sps:$4 sm:$0xff]  }
 0x725   : > { %v4686_v43 = vpop.eup %4685 }
 0x726   : > { %4693 = vrcp.f32 %v2813_v35  ;;  %v6609_v4 = vmul.f32 %v4686_v43, %v4684_v50  ;;  %v4688_v36 = vpop.eup %4687  ;;  %v6729_v50 = vld [vmem:[#allocation10 + $0x44] ss:$16 sps:$4 sm:$0xff]   ;;  %v6732_v35 = vld [vmem:[#allocation10 + $0x4c] ss:$16 sps:$4 sm:$0xff]   ;;  %v6735_v43 = vld [vmem:[#allocation10 + $0x40] ss:$16 sps:$4 sm:$0xff]  }
 0x727   : > { %v4690_v32 = vpop.eup %4689  ;;  %7730 = vst [vmem:[#allocation19_spill] sm:$0xff] %v6732_v35  ;;  %7731 = vst [vmem:[#allocation73_spill] sm:$0xff] %v6735_v43 }
 0x728   : > { %7729 = vst [vmem:[#allocation80_spill] sm:$0xff] %v6609_v4  ;;  %v2829_v54 = vpack.c.bf16 %v6609_v4, %v6609_v4  ;;  %v2820_v9 = vadd.f32 1.0, %v4690_v32  ;;  %v6744_v32 = vld [vmem:[#allocation10 + $0x2c] ss:$16 sps:$4 sm:$0xff]   ;;  %v6774_v4 = vld [vmem:[#allocation10 + $0x1e8] ss:$16 sps:$4 sm:$0xff]  }
 0x729   : > { %7734 = vst [vmem:[#allocation22_spill] sm:$0xff] %v6744_v32  ;;  %7744 = vst [vmem:[#allocation32_spill] sm:$0xff] %v6774_v4 }
 0x72a   : > { %2862 = vmatprep.mubr.bf16.mxu0 %v2829_v54  ;;  %2903 = vmatprep.mubr.bf16.mxu1 %v2829_v54  ;;  %4695 = vrcp.f32 %v2820_v9  ;;  %v6738_v54 = vld [vmem:[#allocation10 + $0x48] ss:$16 sps:$4 sm:$0xff]   ;;  %v6756_v9 = vld [vmem:[#allocation10 + $0xc] ss:$16 sps:$4 sm:$0xff]  }
 0x72b   : > { %7732 = vst [vmem:[#allocation81_spill] sm:$0xff] %v6738_v54  ;;  %7738 = vst [vmem:[#allocation26_spill] sm:$0xff] %v6756_v9 }
 0x731   : > { %v4692_v16 = vpop.eup %4691 }
 0x732   : > { %v2824_v14 = vmul.f32 %v4692_v16, %v4688_v36  ;;  %v6741_v36 = vld [vmem:[#allocation10 + $0x24] ss:$16 sps:$4 sm:$0xff]   ;;  %v6747_v16 = vld [vmem:[#allocation10 + $0x20] ss:$16 sps:$4 sm:$0xff]  }
 0x733   : > { %v4694_v7 = vpop.eup %4693  ;;  %7733 = vst [vmem:[#allocation21_spill] sm:$0xff] %v6741_v36  ;;  %7735 = vst [vmem:[#allocation23_spill] sm:$0xff] %v6747_v16 }
 0x734   : > { %v2823_v40 = vmul.f32 %v4694_v7, %v6478_v5  ;;  %v6675_v5 = vld [vmem:[#allocation10 + $0xe0] ss:$16 sps:$4 sm:$0xff]   ;;  %v6753_v7 = vld [vmem:[#allocation10 + $0x4] ss:$16 sps:$4 sm:$0xff]  }
 0x735   : > { %7737 = vst [vmem:[#allocation25_spill] sm:$0xff] %v6753_v7 }
 0x736   : > { %v6614_v62 = vadd.f32 %v2824_v14, %v2823_v40  ;;  %v6750_v14 = vld [vmem:[#allocation10 + $0x28] ss:$16 sps:$4 sm:$0xff]   ;;  %v6759_v40 = vld [vmem:[#allocation10] ss:$16 sps:$4 sm:$0xff]  }
 0x737   : > { %v4696_v63 = vpop.eup %4695  ;;  %7736 = vst [vmem:[#allocation24_spill] sm:$0xff] %v6750_v14  ;;  %7739 = vst [vmem:[#allocation27_spill] sm:$0xff] %v6759_v40 }
 0x738   : > { %4697 = vtanh.f32 %v6614_v62 }
 0x745   : > { %v4698_v58 = vpop.eup %4697 }
 0x746   : > { %v2827_v1 = vmul.f32 %v4698_v58, %v4696_v63  ;;  %v6762_v63 = vld [vmem:[#allocation10 + $0x8] ss:$16 sps:$4 sm:$0xff]   ;;  %v6765_v58 = vld [vmem:[#allocation10 + $0x1e4] ss:$16 sps:$4 sm:$0xff]  }
 0x747   : > { %7740 = vst [vmem:[#allocation28_spill] sm:$0xff] %v6762_v63  ;;  %7741 = vst [vmem:[#allocation29_spill] sm:$0xff] %v6765_v58 }
 0x748   : > { %v2828_v2 = vpack.c.bf16 %v2827_v1, %v2827_v1  ;;  %v6768_v1 = vld [vmem:[#allocation10 + $0x1ec] ss:$16 sps:$4 sm:$0xff]  }
 0x749   : > { %7742 = vst [vmem:[#allocation30_spill] sm:$0xff] %v6768_v1 }
 0x74a   : > { %2863 = vmatmul.mubr.bf16.vlgmr.msra.gmra.mxu0 %v2828_v2  ;;  %2904 = vmatmul.mubr.bf16.vlgmr.msra.gmra.mxu1 %v2828_v2 }
 0x74b   : > { %2946 = vmatpush1.bf16.msra.mxu0 %v6337_v11  ;;  %2987 = vmatpush1.bf16.msra.mxu1 %v6482_v17  ;;  %v6630_v11 = vld [vmem:[#allocation9 + $0x8c] ss:$16 sps:$4 sm:$0xff]  }
 0x74c   : > { %2947 = vmatprep.subr.bf16.mxu0 %v6341_v12  ;;  %2988 = vmatprep.subr.bf16.mxu1 %v6486_v55  ;;  %v6634_v12 = vld [vmem:[#allocation9 + $0x88] ss:$16 sps:$4 sm:$0xff]  }
 0x74d   : > { %2977 = vmatprep.mubr.bf16.mxu0 %v7459_v57  ;;  %3018 = vmatprep.mubr.bf16.mxu1 %v7459_v57 }
 0x74f   : > { %2948 = vmatpush1.bf16.msra.mxu0 %v6347_v10  ;;  %2989 = vmatpush1.bf16.msra.mxu1 %v6492_v47  ;;  %v6638_v10 = vld [vmem:[#allocation9 + $0x6c] ss:$16 sps:$4 sm:$0xff]  }
 0x750   : > { %2949 = vmatprep.subr.bf16.mxu0 %v6351_v61  ;;  %2990 = vmatprep.subr.bf16.mxu1 %v6496_v6  ;;  %v6642_v61 = vld [vmem:[#allocation9 + $0x68] ss:$16 sps:$4 sm:$0xff]  }
 0x753   : > { %2950 = vmatpush1.bf16.msra.mxu0 %v6355_v38  ;;  %2991 = vmatpush1.bf16.msra.mxu1 %v6500_v13  ;;  %v6646_v38 = vld [vmem:[#allocation9 + $0x4c] ss:$16 sps:$4 sm:$0xff]  }
 0x754   : > { %2951 = vmatprep.subr.bf16.mxu0 %v6359_v49  ;;  %2992 = vmatprep.subr.bf16.mxu1 %v6630_v11  ;;  %v6650_v49 = vld [vmem:[#allocation9 + $0x48] ss:$16 sps:$4 sm:$0xff]  }
 0x757   : > { %2952 = vmatpush1.bf16.msra.mxu0 %v6363_v8  ;;  %2993 = vmatpush1.bf16.msra.mxu1 %v6634_v12  ;;  %v6654_v8 = vld [vmem:[#allocation9 + $0x2c] ss:$16 sps:$4 sm:$0xff]  }
 0x758   : > { %2953 = vmatprep.subr.bf16.mxu0 %v6367_v44  ;;  %2994 = vmatprep.subr.bf16.mxu1 %v6638_v10  ;;  %v6658_v44 = vld [vmem:[#allocation9 + $0x28] ss:$16 sps:$4 sm:$0xff]  }
 0x75b   : > { %2954 = vmatpush1.bf16.msra.mxu0 %v6371_v52  ;;  %2995 = vmatpush1.bf16.msra.mxu1 %v6642_v61  ;;  %v6662_v52 = vld [vmem:[#allocation9 + $0xc] ss:$16 sps:$4 sm:$0xff]  }
 0x75c   : > { %2955 = vmatprep.subr.bf16.mxu0 %v6375_v39  ;;  %2996 = vmatprep.subr.bf16.mxu1 %v6646_v38  ;;  %v6666_v39 = vld [vmem:[#allocation9 + $0x8] ss:$16 sps:$4 sm:$0xff]  }
 0x75f   : > { %2956 = vmatpush1.bf16.msra.mxu0 %v6379_v56  ;;  %2997 = vmatpush1.bf16.msra.mxu1 %v6650_v49  ;;  %v6669_v56 = vld [vmem:[#allocation10 + $0xe4] ss:$16 sps:$4 sm:$0xff]  }
 0x760   : > { %2957 = vmatprep.subr.bf16.mxu0 %v6383_v20  ;;  %2998 = vmatprep.subr.bf16.mxu1 %v6654_v8  ;;  %v6672_v20 = vld [vmem:[#allocation10 + $0xec] ss:$16 sps:$4 sm:$0xff]  }
 0x763   : > { %2958 = vmatpush1.bf16.msra.mxu0 %v6517_v53  ;;  %2999 = vmatpush1.bf16.msra.mxu1 %v6658_v44 }
 0x764   : > { %2959 = vmatprep.subr.bf16.mxu0 %v6521_v42  ;;  %3000 = vmatprep.subr.bf16.mxu1 %v6662_v52 }
 0x767   : > { %2960 = vmatpush1.bf16.msra.mxu0 %v6525_v46  ;;  %3001 = vmatpush1.bf16.msra.mxu1 %v6666_v39 }
 0x768   : > { %3057 = vmatprep.subr.bf16.mxu0 %v6669_v56  ;;  %3098 = vmatprep.subr.bf16.mxu1 %v6672_v20 }
 0x76a   : > { %2978 = vmatmul.mubr.bf16.vlgmr.msra.gmra.mxu0 %v2828_v2  ;;  %3019 = vmatmul.mubr.bf16.vlgmr.msra.gmra.mxu1 %v2828_v2  ;;  %v6771_v2 = vld [vmem:[#allocation10 + $0x1e0] ss:$16 sps:$4 sm:$0xff]  }
 0x76b   : > { %3058 = vmatpush1.bf16.msra.mxu0 %v6675_v5  ;;  %3099 = vmatpush1.bf16.msra.mxu1 %v6678_v3  ;;  %7743 = vst [vmem:[#allocation31_spill] sm:$0xff] %v6771_v2 }
 0x76c   : > { %3059 = vmatprep.subr.bf16.mxu0 %v6681_v59  ;;  %3100 = vmatprep.subr.bf16.mxu1 %v6684_v15 }
 0x76f   : > { %3060 = vmatpush1.bf16.msra.mxu0 %v6687_v19  ;;  %3101 = vmatpush1.bf16.msra.mxu1 %v6690_v21 }
 0x770   : > { %3061 = vmatprep.subr.bf16.mxu0 %v6693_v22  ;;  %3102 = vmatprep.subr.bf16.mxu1 %v6696_v23 }
 0x773   : > { %3062 = vmatpush1.bf16.msra.mxu0 %v6699_v26  ;;  %3103 = vmatpush1.bf16.msra.mxu1 %v6702_v29 }
 0x774   : > { %3063 = vmatprep.subr.bf16.mxu0 %v6705_v31  ;;  %3104 = vmatprep.subr.bf16.mxu1 %v6708_v33 }
 0x777   : > { %3064 = vmatpush1.bf16.msra.mxu0 %v6711_v51  ;;  %3105 = vmatpush1.bf16.msra.mxu1 %v6714_v37 }
 0x778   : > { %3065 = vmatprep.subr.bf16.mxu0 %v6717_v45  ;;  %3106 = vmatprep.subr.bf16.mxu1 %v6720_v30 }
 0x77b   : > { %3066 = vmatpush1.bf16.msra.mxu0 %v6723_v0  ;;  %3107 = vmatpush1.bf16.msra.mxu1 %v6726_v27 }
 0x77c   : > { %3067 = vmatprep.subr.bf16.mxu0 %v6729_v50  ;;  %3108 = vmatprep.subr.bf16.mxu1 %v6732_v35 }
 0x77f   : > { %3068 = vmatpush1.bf16.msra.mxu0 %v6735_v43  ;;  %3109 = vmatpush1.bf16.msra.mxu1 %v6738_v54 }
 0x780   : > { %3069 = vmatprep.subr.bf16.mxu0 %v6741_v36  ;;  %3110 = vmatprep.subr.bf16.mxu1 %v6744_v32 }
 0x783   : > { %3070 = vmatpush1.bf16.msra.mxu0 %v6747_v16  ;;  %3111 = vmatpush1.bf16.msra.mxu1 %v6750_v14 }
 0x784   : > { %3071 = vmatprep.subr.bf16.mxu0 %v6753_v7  ;;  %3112 = vmatprep.subr.bf16.mxu1 %v6756_v9 }
 0x787   : > { %3072 = vmatpush1.bf16.msra.mxu0 %v6759_v40  ;;  %3113 = vmatpush1.bf16.msra.mxu1 %v6762_v63  ;;  %v6780_v63 = vld [vmem:[#allocation10 + $0x1cc] ss:$16 sps:$4 sm:$0xff]  }
 0x788   : > { %3073 = vmatprep.subr.bf16.mxu0 %v6765_v58  ;;  %3114 = vmatprep.subr.bf16.mxu1 %v6768_v1  ;;  %7746 = vst [vmem:[#allocation34_spill] sm:$0xff] %v6780_v63  ;;  %v6783_v58 = vld [vmem:[#allocation10 + $0x1c0] ss:$16 sps:$4 sm:$0xff]   ;;  %v6786_v1 = vld [vmem:[#allocation10 + $0x1c8] ss:$16 sps:$4 sm:$0xff]  }
 0x789   : > { %7747 = vst [vmem:[#allocation35_spill] sm:$0xff] %v6783_v58  ;;  %7748 = vst [vmem:[#allocation36_spill] sm:$0xff] %v6786_v1 }
 0x78b   : > { %3074 = vmatpush2.bf16.msra.mxu0 %v6771_v2  ;;  %3115 = vmatpush2.bf16.msra.mxu1 %v6774_v4  ;;  %v6789_v2 = vld [vmem:[#allocation10 + $0x1a4] ss:$16 sps:$4 sm:$0xff]   ;;  %v6792_v4 = vld [vmem:[#allocation10 + $0x1ac] ss:$16 sps:$4 sm:$0xff]  }
 0x78c   : > { %3075 = vmatprep.subr.bf16.mxu0 %v6777_v25  ;;  %3116 = vmatprep.subr.bf16.mxu1 %v6780_v63  ;;  %7749 = vst [vmem:[#allocation37_spill] sm:$0xff] %v6789_v2  ;;  %7750 = vst [vmem:[#allocation38_spill] sm:$0xff] %v6792_v4  ;;  %v6795_v25 = vld [vmem:[#allocation10 + $0x1a0] ss:$16 sps:$4 sm:$0xff]   ;;  %v6798_v63 = vld [vmem:[#allocation10 + $0x1a8] ss:$16 sps:$4 sm:$0xff]  }
 0x78d   : > { %7751 = vst [vmem:[#allocation39_spill] sm:$0xff] %v6795_v25  ;;  %7752 = vst [vmem:[#allocation40_spill] sm:$0xff] %v6798_v63 }
 0x78f   : > { %3076 = vmatpush2.bf16.msra.mxu0 %v6783_v58  ;;  %3117 = vmatpush2.bf16.msra.mxu1 %v6786_v1  ;;  %v6801_v58 = vld [vmem:[#allocation10 + $0x184] ss:$16 sps:$4 sm:$0xff]   ;;  %v6804_v1 = vld [vmem:[#allocation10 + $0x18c] ss:$16 sps:$4 sm:$0xff]  }
 0x790   : > { %3077 = vmatprep.subr.bf16.mxu0 %v6789_v2  ;;  %3118 = vmatprep.subr.bf16.mxu1 %v6792_v4  ;;  %7753 = vst [vmem:[#allocation41_spill] sm:$0xff] %v6801_v58  ;;  %7754 = vst [vmem:[#allocation42_spill] sm:$0xff] %v6804_v1  ;;  %v6807_v2 = vld [vmem:[#allocation10 + $0x180] ss:$16 sps:$4 sm:$0xff]   ;;  %v6810_v4 = vld [vmem:[#allocation10 + $0x188] ss:$16 sps:$4 sm:$0xff]  }
 0x791   : > { %7755 = vst [vmem:[#allocation43_spill] sm:$0xff] %v6807_v2  ;;  %7756 = vst [vmem:[#allocation44_spill] sm:$0xff] %v6810_v4 }
 0x793   : > { %3078 = vmatpush2.bf16.msra.mxu0 %v6795_v25  ;;  %3119 = vmatpush2.bf16.msra.mxu1 %v6798_v63  ;;  %v6813_v25 = vld [vmem:[#allocation10 + $0x164] ss:$16 sps:$4 sm:$0xff]   ;;  %v6816_v63 = vld [vmem:[#allocation10 + $0x16c] ss:$16 sps:$4 sm:$0xff]  }
 0x794   : > { %3079 = vmatprep.subr.bf16.mxu0 %v6801_v58  ;;  %3120 = vmatprep.subr.bf16.mxu1 %v6804_v1  ;;  %7757 = vst [vmem:[#allocation45_spill] sm:$0xff] %v6813_v25  ;;  %7758 = vst [vmem:[#allocation46_spill] sm:$0xff] %v6816_v63  ;;  %v6819_v58 = vld [vmem:[#allocation10 + $0x160] ss:$16 sps:$4 sm:$0xff]   ;;  %v6822_v1 = vld [vmem:[#allocation10 + $0x168] ss:$16 sps:$4 sm:$0xff]  }
 0x795   : > { %7759 = vst [vmem:[#allocation47_spill] sm:$0xff] %v6819_v58  ;;  %7760 = vst [vmem:[#allocation48_spill] sm:$0xff] %v6822_v1 }
 0x797   : > { %3080 = vmatpush2.bf16.msra.mxu0 %v6807_v2  ;;  %3121 = vmatpush2.bf16.msra.mxu1 %v6810_v4  ;;  %v6825_v2 = vld [vmem:[#allocation10 + $0x144] ss:$16 sps:$4 sm:$0xff]   ;;  %v6828_v4 = vld [vmem:[#allocation10 + $0x14c] ss:$16 sps:$4 sm:$0xff]  }
 0x798   : > { %3081 = vmatprep.subr.bf16.mxu0 %v6813_v25  ;;  %3122 = vmatprep.subr.bf16.mxu1 %v6816_v63  ;;  %7761 = vst [vmem:[#allocation49_spill] sm:$0xff] %v6825_v2  ;;  %7762 = vst [vmem:[#allocation50_spill] sm:$0xff] %v6828_v4  ;;  %v6831_v25 = vld [vmem:[#allocation10 + $0x140] ss:$16 sps:$4 sm:$0xff]   ;;  %v6834_v63 = vld [vmem:[#allocation10 + $0x148] ss:$16 sps:$4 sm:$0xff]  }
 0x799   : > { %7763 = vst [vmem:[#allocation51_spill] sm:$0xff] %v6831_v25  ;;  %7764 = vst [vmem:[#allocation52_spill] sm:$0xff] %v6834_v63 }
 0x79b   : > { %3082 = vmatpush2.bf16.msra.mxu0 %v6819_v58  ;;  %3123 = vmatpush2.bf16.msra.mxu1 %v6822_v1  ;;  %v6837_v58 = vld [vmem:[#allocation10 + $0x124] ss:$16 sps:$4 sm:$0xff]   ;;  %v6840_v1 = vld [vmem:[#allocation10 + $0x12c] ss:$16 sps:$4 sm:$0xff]  }
 0x79c   : > { %3083 = vmatprep.subr.bf16.mxu0 %v6825_v2  ;;  %3124 = vmatprep.subr.bf16.mxu1 %v6828_v4  ;;  %7765 = vst [vmem:[#allocation53_spill] sm:$0xff] %v6837_v58  ;;  %7766 = vst [vmem:[#allocation54_spill] sm:$0xff] %v6840_v1  ;;  %v6843_v2 = vld [vmem:[#allocation10 + $0x120] ss:$16 sps:$4 sm:$0xff]   ;;  %v6846_v4 = vld [vmem:[#allocation10 + $0x128] ss:$16 sps:$4 sm:$0xff]  }
 0x79d   : > { %7767 = vst [vmem:[#allocation55_spill] sm:$0xff] %v6843_v2  ;;  %7768 = vst [vmem:[#allocation56_spill] sm:$0xff] %v6846_v4 }
 0x79f   : > { %3084 = vmatpush2.bf16.msra.mxu0 %v6831_v25  ;;  %3125 = vmatpush2.bf16.msra.mxu1 %v6834_v63  ;;  %v6849_v25 = vld [vmem:[#allocation10 + $0x104] ss:$16 sps:$4 sm:$0xff]   ;;  %v6852_v63 = vld [vmem:[#allocation10 + $0x10c] ss:$16 sps:$4 sm:$0xff]  }
 0x7a0   : > { %3085 = vmatprep.subr.bf16.mxu0 %v6837_v58  ;;  %3126 = vmatprep.subr.bf16.mxu1 %v6840_v1  ;;  %7769 = vst [vmem:[#allocation57_spill] sm:$0xff] %v6849_v25  ;;  %7770 = vst [vmem:[#allocation58_spill] sm:$0xff] %v6852_v63  ;;  %v6855_v58 = vld [vmem:[#allocation10 + $0x100] ss:$16 sps:$4 sm:$0xff]   ;;  %v6858_v1 = vld [vmem:[#allocation10 + $0x108] ss:$16 sps:$4 sm:$0xff]  }
 0x7a1   : > { %7771 = vst [vmem:[#allocation59_spill] sm:$0xff] %v6855_v58  ;;  %7772 = vst [vmem:[#allocation60_spill] sm:$0xff] %v6858_v1 }
 0x7a3   : > { %3086 = vmatpush2.bf16.msra.mxu0 %v6843_v2  ;;  %3127 = vmatpush2.bf16.msra.mxu1 %v6846_v4 }
 0x7a4   : > { %3087 = vmatprep.subr.bf16.mxu0 %v6849_v25  ;;  %3128 = vmatprep.subr.bf16.mxu1 %v6852_v63 }
 0x7a7   : > { %3088 = vmatpush2.bf16.msra.mxu0 %v6855_v58  ;;  %3129 = vmatpush2.bf16.msra.mxu1 %v6858_v1 }
 0x7a8   : > { %3172 = vmatprep.subr.bf16.mxu0 %v7722_v48  ;;  %3213 = vmatprep.subr.bf16.mxu1 %v6594_v60 }
 0x80a   : > { %v2864_v4 = vpop.f32.mrf.mxu0  ;;  %v2905_v2 = vpop.f32.mrf.mxu1 }
 0x80b   : > { %v2865_v25 = vadd.f32 %v2864_v4, %v7723_v18  ;;  %v2906_v54 = vadd.f32 %v2905_v2, %v7726_v41 }
 0x80c   : > { %v2866_v40 = vpop.f32.mrf.mxu0  ;;  %v2907_v9 = vpop.f32.mrf.mxu1 }
 0x80d   : > { %v4146_v7 = vmul.f32 -1.442695, %v2865_v25  ;;  %v2867_v63 = vadd.f32 %v2866_v40, %v7724_v24  ;;  %v2908_v48 = vadd.f32 %v2907_v9, %v7725_v34 }
 0x80e   : > { %v2868_v14 = vpop.f32.mrf.mxu0  ;;  %v2909_v16 = vpop.f32.mrf.mxu1 }
 0x80f   : > { %4699 = vpow2.f32 %v4146_v7  ;;  %v4147_v58 = vmul.f32 -1.442695, %v2867_v63  ;;  %v4148_v1 = vmul.f32 -1.442695, %v2908_v48  ;;  %v7773_v14 = vld [vmem:[#allocation75_spill] sm:$0xff] }
 0x810   : > { %v2869_v32 = vpop.f32.mrf.mxu0  ;;  %v2910_v36 = vpop.f32.mrf.mxu1  ;;  %v2941_v16 = vunpack.c.l.bf16 %v7773_v14  ;;  %v2942_v63 = vunpack.c.h.bf16 %v7773_v14  ;;  %v7774_v14 = vld [vmem:[#allocation83_spill] sm:$0xff] }
 0x811   : > { %4701 = vpow2.f32 %v4147_v58 }
 0x812   : > { %4703 = vpow2.f32 %v4148_v1 }
 0x81c   : > { %v4700_v60 = vpop.eup %4699 }
 0x81d   : > { %v2915_v43 = vadd.f32 1.0, %v4700_v60 }
 0x81e   : > { %v4702_v4 = vpop.eup %4701 }
 0x81f   : > { %4705 = vrcp.f32 %v2915_v43  ;;  %v2921_v25 = vadd.f32 1.0, %v4702_v4  ;;  %v4704_v32 = vpop.eup %4703 }
 0x820   : > { %4707 = vtanh.f32 %v2906_v54  ;;  %v2928_v1 = vadd.f32 1.0, %v4704_v32  ;;  %v2943_v32 = vunpack.c.l.bf16 %v7774_v14 }
 0x821   : > { %4709 = vrcp.f32 %v2921_v25 }
 0x82a   : > { %v2979_v7 = vpop.f32.mrf.mxu0  ;;  %v3020_v40 = vpop.f32.mrf.mxu1 }
 0x82b   : > { %v3027_v36 = vadd.f32 %v2979_v7, %v2941_v16  ;;  %v2944_v7 = vunpack.c.h.bf16 %v7774_v14 }
 0x82c   : > { %v4706_v9 = vpop.eup %4705  ;;  %v2981_v58 = vpop.f32.mrf.mxu0 }
 0x82d   : > { %v3022_v48 = vpop.f32.mrf.mxu1  ;;  %v4708_v34 = vpop.eup %4707  ;;  %v4149_v2 = vmul.f32 -1.442695, %v3027_v36  ;;  %v3028_v60 = vadd.f32 %v2981_v58, %v2942_v63  ;;  %v3029_v63 = vadd.f32 %v3020_v40, %v2943_v32 }
 0x82e   : > { %v4710_v41 = vpop.eup %4709  ;;  %v2983_v43 = vpop.f32.mrf.mxu0  ;;  %v2932_v54 = vmul.f32 %v4708_v34, %v4706_v9  ;;  %v3030_v36 = vadd.f32 %v3022_v48, %v2944_v7 }
 0x82f   : > { %v3024_v4 = vpop.f32.mrf.mxu1  ;;  %v2931_v25 = vmul.f32 %v4710_v41, %v6604_v28  ;;  %4711 = vpow2.f32 %v4149_v2  ;;  %v4150_v24 = vmul.f32 -1.442695, %v3028_v60 }
 0x830   : > { %v2984_v18 = vpop.f32.mrf.mxu0  ;;  %v4151_v58 = vmul.f32 -1.442695, %v3030_v36 }
 0x831   : > { %v3025_v35 = vpop.f32.mrf.mxu1  ;;  %v6870_v16 = vadd.f32 %v2932_v54, %v2931_v25  ;;  %4713 = vpow2.f32 %v4150_v24 }
 0x832   : > { %4715 = vrcp.f32 %v2928_v1 }
 0x833   : > { %4717 = vtanh.f32 %v6870_v16 }
 0x834   : > { %4719 = vtanh.f32 %v3029_v63  ;;  %v4995_v63 = vld [vmem:[#allocation9 + $0xe0] ss:$16 sps:$4 sm:$0xff]  }
 0x835   : > { %4721 = vpow2.f32 %v4151_v58  ;;  %v4996_v58 = vld [vmem:[#allocation9 + $0xc4] ss:$16 sps:$4 sm:$0xff]  }
 0x83c   : > { %v4712_v34 = vpop.eup %4711 }
 0x83d   : > { %v3034_v9 = vadd.f32 1.0, %v4712_v34  ;;  %v4998_v34 = vld [vmem:[#allocation9 + $0xa4] ss:$16 sps:$4 sm:$0xff]  }
 0x83e   : > { %v4714_v41 = vpop.eup %4713 }
 0x83f   : > { %v4716_v18 = vpop.eup %4715  ;;  %4723 = vrcp.f32 %v3034_v9  ;;  %v3040_v28 = vadd.f32 1.0, %v4714_v41  ;;  %v4999_v9 = vld [vmem:[#allocation9 + $0xa0] ss:$16 sps:$4 sm:$0xff]   ;;  %v7808_v41 = vld [vmem:[#allocation51_spill] sm:$0xff] }
 0x840   : > { %v4718_v35 = vpop.eup %4717 }
 0x841   : > { %4725 = vrcp.f32 %v3040_v28  ;;  %v6875_v24 = vmul.f32 %v4718_v35, %v4716_v18  ;;  %v4720_v48 = vpop.eup %4719  ;;  %v7809_v18 = vld [vmem:[#allocation52_spill] sm:$0xff]  ;;  %v7810_v28 = vld [vmem:[#allocation53_spill] sm:$0xff]  ;;  %v7811_v35 = vld [vmem:[#allocation54_spill] sm:$0xff] }
 0x842   : > { %v4722_v40 = vpop.eup %4721 }
 0x843   : > { %v3056_v2 = vpack.c.bf16 %v6875_v24, %v6875_v24  ;;  %v3047_v4 = vadd.f32 1.0, %v4722_v40  ;;  %v7814_v40 = vld [vmem:[#allocation57_spill] sm:$0xff] }
 0x845   : > { %3089 = vmatprep.mubr.bf16.mxu0 %v3056_v2  ;;  %3130 = vmatprep.mubr.bf16.mxu1 %v3056_v2  ;;  %4727 = vrcp.f32 %v3047_v4  ;;  %v7812_v2 = vld [vmem:[#allocation55_spill] sm:$0xff] }
 0x846   : > { %v6967_v4 = vld [vmem:[#allocation12 + $0x38] sm:$0xff]  }
 0x84c   : > { %v4724_v60 = vpop.eup %4723 }
 0x84d   : > { %v3051_v1 = vmul.f32 %v4724_v60, %v4720_v48  ;;  %v7813_v48 = vld [vmem:[#allocation56_spill] sm:$0xff]  ;;  %v7815_v60 = vld [vmem:[#allocation58_spill] sm:$0xff] }
 0x84e   : > { %v4726_v43 = vpop.eup %4725 }
 0x84f   : > { %v3050_v54 = vmul.f32 %v4726_v43, %v6614_v62  ;;  %v4997_v62 = vld [vmem:[#allocation9 + $0xc0] ss:$16 sps:$4 sm:$0xff]  }
 0x850   : > { %v7817_v43 = vld [vmem:[#allocation60_spill] sm:$0xff] }
 0x851   : > { %v6880_v25 = vadd.f32 %v3051_v1, %v3050_v54  ;;  %v7816_v1 = vld [vmem:[#allocation59_spill] sm:$0xff] }
 0x852   : > { %v4728_v14 = vpop.eup %4727 }
 0x853   : > { %4729 = vtanh.f32 %v6880_v25 }
 0x860   : > { %v4730_v7 = vpop.eup %4729 }
 0x861   : > { %v3054_v36 = vmul.f32 %v4730_v7, %v4728_v14  ;;  %v7818_v7 = vld [vmem:[#allocation18_spill] sm:$0xff] }
 0x863   : > { %v3055_v32 = vpack.c.bf16 %v3054_v36, %v3054_v36 }
 0x865   : > { %3090 = vmatmul.mubr.bf16.vlgmr.msra.gmra.mxu0 %v3055_v32  ;;  %3131 = vmatmul.mubr.bf16.vlgmr.msra.gmra.mxu1 %v3055_v32 }
 0x866   : > { %3173 = vmatpush1.bf16.msra.mxu0 %v4995_v63  ;;  %3214 = vmatpush1.bf16.msra.mxu1 %v6482_v17  ;;  %v5000_v17 = vld [vmem:[#allocation9 + $0x84] ss:$16 sps:$4 sm:$0xff]  }
 0x867   : > { %3174 = vmatprep.subr.bf16.mxu0 %v4996_v58  ;;  %3215 = vmatprep.subr.bf16.mxu1 %v6486_v55  ;;  %v5001_v55 = vld [vmem:[#allocation9 + $0x80] ss:$16 sps:$4 sm:$0xff]  }
 0x868   : > { %3204 = vmatprep.mubr.bf16.mxu0 %v7459_v57  ;;  %3245 = vmatprep.mubr.bf16.mxu1 %v7459_v57  ;;  %v5002_v57 = vld [vmem:[#allocation9 + $0x64] ss:$16 sps:$4 sm:$0xff]  }
 0x86a   : > { %3175 = vmatpush1.bf16.msra.mxu0 %v4997_v62  ;;  %3216 = vmatpush1.bf16.msra.mxu1 %v6492_v47  ;;  %v5003_v47 = vld [vmem:[#allocation9 + $0x60] ss:$16 sps:$4 sm:$0xff]  }
 0x86b   : > { %3176 = vmatprep.subr.bf16.mxu0 %v4998_v34  ;;  %3217 = vmatprep.subr.bf16.mxu1 %v6496_v6  ;;  %v5004_v6 = vld [vmem:[#allocation9 + $0x44] ss:$16 sps:$4 sm:$0xff]  }
 0x86c   : > { %v7819_v62 = vld [vmem:[#allocation86_spill] sm:$0xff] }
 0x86e   : > { %3177 = vmatpush1.bf16.msra.mxu0 %v4999_v9  ;;  %3218 = vmatpush1.bf16.msra.mxu1 %v6500_v13  ;;  %v5005_v13 = vld [vmem:[#allocation9 + $0x40] ss:$16 sps:$4 sm:$0xff]  }
 0x86f   : > { %3178 = vmatprep.subr.bf16.mxu0 %v5000_v17  ;;  %3219 = vmatprep.subr.bf16.mxu1 %v6630_v11  ;;  %v5006_v11 = vld [vmem:[#allocation9 + $0x24] ss:$16 sps:$4 sm:$0xff]  }
 0x872   : > { %3179 = vmatpush1.bf16.msra.mxu0 %v5001_v55  ;;  %3220 = vmatpush1.bf16.msra.mxu1 %v6634_v12  ;;  %v7778_v12 = vld [vmem:[#allocation21_spill] sm:$0xff] }
 0x873   : > { %3180 = vmatprep.subr.bf16.mxu0 %v5002_v57  ;;  %3221 = vmatprep.subr.bf16.mxu1 %v6638_v10  ;;  %v7779_v10 = vld [vmem:[#allocation22_spill] sm:$0xff] }
 0x876   : > { %3181 = vmatpush1.bf16.msra.mxu0 %v5003_v47  ;;  %3222 = vmatpush1.bf16.msra.mxu1 %v6642_v61  ;;  %v7780_v61 = vld [vmem:[#allocation23_spill] sm:$0xff] }
 0x877   : > { %3182 = vmatprep.subr.bf16.mxu0 %v5004_v6  ;;  %3223 = vmatprep.subr.bf16.mxu1 %v6646_v38  ;;  %v7781_v38 = vld [vmem:[#allocation24_spill] sm:$0xff]  ;;  %v7820_v6 = vld [vmem:[#allocation87_spill] sm:$0xff] }
 0x87a   : > { %3183 = vmatpush1.bf16.msra.mxu0 %v5005_v13  ;;  %3224 = vmatpush1.bf16.msra.mxu1 %v6650_v49  ;;  %v7782_v49 = vld [vmem:[#allocation25_spill] sm:$0xff] }
 0x87b   : > { %3184 = vmatprep.subr.bf16.mxu0 %v5006_v11  ;;  %3225 = vmatprep.subr.bf16.mxu1 %v6654_v8  ;;  %v7783_v8 = vld [vmem:[#allocation26_spill] sm:$0xff] }
 0x87e   : > { %3185 = vmatpush1.bf16.msra.mxu0 %v6517_v53  ;;  %3226 = vmatpush1.bf16.msra.mxu1 %v6658_v44  ;;  %v7775_v53 = vld [vmem:[#allocation19_spill] sm:$0xff] }
 0x87f   : > { %3186 = vmatprep.subr.bf16.mxu0 %v6521_v42  ;;  %3227 = vmatprep.subr.bf16.mxu1 %v6662_v52  ;;  %v7776_v42 = vld [vmem:[#allocation73_spill] sm:$0xff]  ;;  %v7784_v44 = vld [vmem:[#allocation27_spill] sm:$0xff]  ;;  %v7785_v52 = vld [vmem:[#allocation28_spill] sm:$0xff] }
 0x882   : > { %3187 = vmatpush1.bf16.msra.mxu0 %v6525_v46  ;;  %3228 = vmatpush1.bf16.msra.mxu1 %v6666_v39  ;;  %v7777_v46 = vld [vmem:[#allocation81_spill] sm:$0xff] }
 0x883   : > { %3284 = vmatprep.subr.bf16.mxu0 %v6669_v56  ;;  %3325 = vmatprep.subr.bf16.mxu1 %v6672_v20  ;;  %v7786_v39 = vld [vmem:[#allocation29_spill] sm:$0xff]  ;;  %v7787_v56 = vld [vmem:[#allocation30_spill] sm:$0xff]  ;;  %v7788_v20 = vld [vmem:[#allocation31_spill] sm:$0xff] }
 0x885   : > { %3205 = vmatmul.mubr.bf16.vlgmr.msra.gmra.mxu0 %v3055_v32  ;;  %3246 = vmatmul.mubr.bf16.vlgmr.msra.gmra.mxu1 %v3055_v32 }
 0x886   : > { %3285 = vmatpush1.bf16.msra.mxu0 %v6675_v5  ;;  %3326 = vmatpush1.bf16.msra.mxu1 %v6678_v3  ;;  %v7789_v5 = vld [vmem:[#allocation32_spill] sm:$0xff]  ;;  %v7790_v3 = vld [vmem:[#allocation33_spill] sm:$0xff] }
 0x887   : > { %3286 = vmatprep.subr.bf16.mxu0 %v6681_v59  ;;  %3327 = vmatprep.subr.bf16.mxu1 %v6684_v15  ;;  %v7791_v59 = vld [vmem:[#allocation34_spill] sm:$0xff]  ;;  %v7792_v15 = vld [vmem:[#allocation35_spill] sm:$0xff] }
 0x88a   : > { %3287 = vmatpush1.bf16.msra.mxu0 %v6687_v19  ;;  %3328 = vmatpush1.bf16.msra.mxu1 %v6690_v21  ;;  %v7793_v19 = vld [vmem:[#allocation36_spill] sm:$0xff]  ;;  %v7794_v21 = vld [vmem:[#allocation37_spill] sm:$0xff] }
 0x88b   : > { %3288 = vmatprep.subr.bf16.mxu0 %v6693_v22  ;;  %3329 = vmatprep.subr.bf16.mxu1 %v6696_v23  ;;  %v7795_v22 = vld [vmem:[#allocation38_spill] sm:$0xff]  ;;  %v7796_v23 = vld [vmem:[#allocation39_spill] sm:$0xff] }
 0x88e   : > { %3289 = vmatpush1.bf16.msra.mxu0 %v6699_v26  ;;  %3330 = vmatpush1.bf16.msra.mxu1 %v6702_v29  ;;  %v7797_v26 = vld [vmem:[#allocation40_spill] sm:$0xff]  ;;  %v7798_v29 = vld [vmem:[#allocation41_spill] sm:$0xff] }
 0x88f   : > { %3290 = vmatprep.subr.bf16.mxu0 %v6705_v31  ;;  %3331 = vmatprep.subr.bf16.mxu1 %v6708_v33  ;;  %v7799_v31 = vld [vmem:[#allocation42_spill] sm:$0xff]  ;;  %v7800_v33 = vld [vmem:[#allocation43_spill] sm:$0xff] }
 0x892   : > { %3291 = vmatpush1.bf16.msra.mxu0 %v6711_v51  ;;  %3332 = vmatpush1.bf16.msra.mxu1 %v6714_v37  ;;  %v7801_v51 = vld [vmem:[#allocation44_spill] sm:$0xff]  ;;  %v7802_v37 = vld [vmem:[#allocation45_spill] sm:$0xff] }
 0x893   : > { %3292 = vmatprep.subr.bf16.mxu0 %v6717_v45  ;;  %3333 = vmatprep.subr.bf16.mxu1 %v6720_v30  ;;  %v7803_v45 = vld [vmem:[#allocation46_spill] sm:$0xff]  ;;  %v7804_v30 = vld [vmem:[#allocation47_spill] sm:$0xff] }
 0x896   : > { %3293 = vmatpush1.bf16.msra.mxu0 %v6723_v0  ;;  %3334 = vmatpush1.bf16.msra.mxu1 %v6726_v27  ;;  %v7805_v0 = vld [vmem:[#allocation48_spill] sm:$0xff]  ;;  %v7806_v27 = vld [vmem:[#allocation49_spill] sm:$0xff] }
 0x897   : > { %3294 = vmatprep.subr.bf16.mxu0 %v6729_v50  ;;  %3335 = vmatprep.subr.bf16.mxu1 %v7775_v53  ;;  %v7807_v50 = vld [vmem:[#allocation50_spill] sm:$0xff] }
 0x89a   : > { %3295 = vmatpush1.bf16.msra.mxu0 %v7776_v42  ;;  %3336 = vmatpush1.bf16.msra.mxu1 %v7777_v46  ;;  %v7821_v42 = vld [vmem:[#allocation88_spill] sm:$0xff] }
 0x89b   : > { %3296 = vmatprep.subr.bf16.mxu0 %v7778_v12  ;;  %3337 = vmatprep.subr.bf16.mxu1 %v7779_v10 }
 0x89e   : > { %3297 = vmatpush1.bf16.msra.mxu0 %v7780_v61  ;;  %3338 = vmatpush1.bf16.msra.mxu1 %v7781_v38  ;;  %v7822_v38 = vld [vmem:[#allocation77_spill] sm:$0xff] }
 0x89f   : > { %3298 = vmatprep.subr.bf16.mxu0 %v7782_v49  ;;  %3339 = vmatprep.subr.bf16.mxu1 %v7783_v8  ;;  %v3168_v49 = vunpack.c.l.bf16 %v7822_v38 }
 0x8a2   : > { %3299 = vmatpush1.bf16.msra.mxu0 %v7784_v44  ;;  %3340 = vmatpush1.bf16.msra.mxu1 %v7785_v52 }
 0x8a3   : > { %3300 = vmatprep.subr.bf16.mxu0 %v7786_v39  ;;  %3341 = vmatprep.subr.bf16.mxu1 %v7787_v56  ;;  %v3169_v56 = vunpack.c.h.bf16 %v7822_v38  ;;  %v4522_v38 = vld [vmem:[#allocation12] sm:$0xff]  }
 0x8a6   : > { %3301 = vmatpush2.bf16.msra.mxu0 %v7788_v20  ;;  %3342 = vmatpush2.bf16.msra.mxu1 %v7789_v5 }
 0x8a7   : > { %3302 = vmatprep.subr.bf16.mxu0 %v7790_v3  ;;  %3343 = vmatprep.subr.bf16.mxu1 %v7791_v59 }
 0x8aa   : > { %3303 = vmatpush2.bf16.msra.mxu0 %v7792_v15  ;;  %3344 = vmatpush2.bf16.msra.mxu1 %v7793_v19 }
 0x8ab   : > { %3304 = vmatprep.subr.bf16.mxu0 %v7794_v21  ;;  %3345 = vmatprep.subr.bf16.mxu1 %v7795_v22 }
 0x8ae   : > { %3305 = vmatpush2.bf16.msra.mxu0 %v7796_v23  ;;  %3346 = vmatpush2.bf16.msra.mxu1 %v7797_v26 }
 0x8af   : > { %3306 = vmatprep.subr.bf16.mxu0 %v7798_v29  ;;  %3347 = vmatprep.subr.bf16.mxu1 %v7799_v31 }
 0x8b2   : > { %3307 = vmatpush2.bf16.msra.mxu0 %v7800_v33  ;;  %3348 = vmatpush2.bf16.msra.mxu1 %v7801_v51 }
 0x8b3   : > { %3308 = vmatprep.subr.bf16.mxu0 %v7802_v37  ;;  %3349 = vmatprep.subr.bf16.mxu1 %v7803_v45 }
 0x8b6   : > { %3309 = vmatpush2.bf16.msra.mxu0 %v7804_v30  ;;  %3350 = vmatpush2.bf16.msra.mxu1 %v7805_v0  ;;  %v7823_v30 = vld [vmem:[#allocation84_spill] sm:$0xff] }
 0x8b7   : > { %3310 = vmatprep.subr.bf16.mxu0 %v7806_v27  ;;  %3351 = vmatprep.subr.bf16.mxu1 %v7807_v50  ;;  %v3171_v0 = vunpack.c.h.bf16 %v7823_v30  ;;  %v3170_v50 = vunpack.c.l.bf16 %v7823_v30 }
 0x8ba   : > { %3311 = vmatpush2.bf16.msra.mxu0 %v7808_v41  ;;  %3352 = vmatpush2.bf16.msra.mxu1 %v7809_v18 }
 0x8bb   : > { %3312 = vmatprep.subr.bf16.mxu0 %v7810_v28  ;;  %3353 = vmatprep.subr.bf16.mxu1 %v7811_v35 }
 0x8be   : > { %3313 = vmatpush2.bf16.msra.mxu0 %v7812_v2  ;;  %3354 = vmatpush2.bf16.msra.mxu1 %v7813_v48 }
 0x8bf   : > { %3314 = vmatprep.subr.bf16.mxu0 %v7814_v40  ;;  %3355 = vmatprep.subr.bf16.mxu1 %v7815_v60 }
 0x8c2   : > { %3315 = vmatpush2.bf16.msra.mxu0 %v7816_v1  ;;  %3356 = vmatpush2.bf16.msra.mxu1 %v7817_v43 }
 0x8c3   : > { %4203 = vmatprep.subr.bf16.mxu0 %v6967_v4 }
 0x925   : > { %v3091_v54 = vpop.f32.mrf.mxu0  ;;  %v3132_v14 = vpop.f32.mrf.mxu1 }
 0x926   : > { %v3092_v36 = vadd.f32 %v3091_v54, %v7818_v7  ;;  %v3133_v46 = vadd.f32 %v3132_v14, %v7821_v42 }
 0x927   : > { %v3093_v32 = vpop.f32.mrf.mxu0  ;;  %v3134_v63 = vpop.f32.mrf.mxu1 }
 0x928   : > { %v4152_v58 = vmul.f32 -1.442695, %v3092_v36  ;;  %v3094_v34 = vadd.f32 %v3093_v32, %v7819_v62  ;;  %v3135_v13 = vadd.f32 %v3134_v63, %v7820_v6 }
 0x929   : > { %v3095_v9 = vpop.f32.mrf.mxu0  ;;  %v3136_v17 = vpop.f32.mrf.mxu1 }
 0x92a   : > { %4731 = vpow2.f32 %v4152_v58  ;;  %v4153_v55 = vmul.f32 -1.442695, %v3094_v34  ;;  %v4154_v11 = vmul.f32 -1.442695, %v3135_v13  ;;  %v7824_v13 = vld [vmem:[#allocation70_spill] sm:$0xff] }
 0x92b   : > { %v3096_v57 = vpop.f32.mrf.mxu0  ;;  %v3137_v47 = vpop.f32.mrf.mxu1 }
 0x92c   : > { %4733 = vpow2.f32 %v4153_v55  ;;  %v4516_v47 = vld [vmem:[#allocation12 + $0x30] sm:$0xff]  }
 0x92d   : > { %4735 = vpow2.f32 %v4154_v11  ;;  %v7825_v11 = vld [vmem:[#allocation20_spill] sm:$0xff] }
 0x937   : > { %v4732_v53 = vpop.eup %4731 }
 0x938   : > { %v3142_v12 = vadd.f32 1.0, %v4732_v53  ;;  %v3400_v53 = vpack.c.bf16 %v7825_v11, %v7824_v13 }
 0x939   : > { %v4734_v10 = vpop.eup %4733 }
 0x93a   : > { %4737 = vrcp.f32 %v3142_v12  ;;  %v3148_v61 = vadd.f32 1.0, %v4734_v10  ;;  %v4736_v52 = vpop.eup %4735  ;;  %v4519_v12 = vld [vmem:[#allocation12 + $0x18] sm:$0xff]   ;;  %v4520_v10 = vld [vmem:[#allocation12 + $0x10] sm:$0xff]  }
 0x93b   : > { %4739 = vtanh.f32 %v3133_v46  ;;  %v3155_v22 = vadd.f32 1.0, %v4736_v52  ;;  %v4517_v46 = vld [vmem:[#allocation12 + $0x28] sm:$0xff]  }
 0x93c   : > { %4741 = vrcp.f32 %v3148_v61  ;;  %v4521_v61 = vld [vmem:[#allocation12 + $0x8] sm:$0xff]  }
 0x945   : > { %v3206_v8 = vpop.f32.mrf.mxu0  ;;  %v3247_v44 = vpop.f32.mrf.mxu1 }
 0x946   : > { %v3254_v39 = vadd.f32 %v3206_v8, %v3168_v49  ;;  %v3256_v41 = vadd.f32 %v3247_v44, %v3170_v50  ;;  %v7827_v49 = vld [vmem:[#allocation72_spill] sm:$0xff] }
 0x947   : > { %v4738_v20 = vpop.eup %4737  ;;  %v3208_v5 = vpop.f32.mrf.mxu0  ;;  %v7828_v44 = vld [vmem:[#allocation80_spill] sm:$0xff] }
 0x948   : > { %v3249_v3 = vpop.f32.mrf.mxu1  ;;  %v4740_v59 = vpop.eup %4739  ;;  %v4155_v15 = vmul.f32 -1.442695, %v3254_v39  ;;  %v3255_v19 = vadd.f32 %v3208_v5, %v3169_v56  ;;  %v3402_v52 = vpack.c.bf16 %v6875_v24, %v7828_v44 }
 0x949   : > { %v4742_v21 = vpop.eup %4741  ;;  %v3210_v23 = vpop.f32.mrf.mxu0  ;;  %v3159_v29 = vmul.f32 %v4740_v59, %v4738_v20  ;;  %v3257_v27 = vadd.f32 %v3249_v3, %v3171_v0 }
 0x94a   : > { %v3251_v26 = vpop.f32.mrf.mxu1  ;;  %v3158_v31 = vmul.f32 %v4742_v21, %v6870_v16  ;;  %4743 = vpow2.f32 %v4155_v15  ;;  %v4156_v33 = vmul.f32 -1.442695, %v3255_v19 }
 0x94b   : > { %v3211_v51 = vpop.f32.mrf.mxu0  ;;  %v4157_v18 = vmul.f32 -1.442695, %v3257_v27 }
 0x94c   : > { %v3252_v37 = vpop.f32.mrf.mxu1  ;;  %v6977_v45 = vadd.f32 %v3159_v29, %v3158_v31  ;;  %4745 = vpow2.f32 %v4156_v33 }
 0x94d   : > { %4747 = vrcp.f32 %v3155_v22 }
 0x94e   : > { %4749 = vtanh.f32 %v6977_v45 }
 0x94f   : > { %4751 = vtanh.f32 %v3256_v41 }
 0x950   : > { %4753 = vpow2.f32 %v4157_v18 }
 0x957   : > { %v4744_v28 = vpop.eup %4743 }
 0x958   : > { %v3261_v35 = vadd.f32 1.0, %v4744_v28 }
 0x959   : > { %v4746_v16 = vpop.eup %4745 }
 0x95a   : > { %v4748_v2 = vpop.eup %4747  ;;  %4755 = vrcp.f32 %v3261_v35  ;;  %v3267_v48 = vadd.f32 1.0, %v4746_v16 }
 0x95b   : > { %v4750_v40 = vpop.eup %4749 }
 0x95c   : > { %4757 = vrcp.f32 %v3267_v48  ;;  %v6982_v60 = vmul.f32 %v4750_v40, %v4748_v2  ;;  %v4752_v43 = vpop.eup %4751  ;;  %v4169_v48 = vld [vmem:[%s7078_s7] ss:$0 sm:$0xff] }
 0x95d   : > { %v4754_v54 = vpop.eup %4753 }
 0x95e   : > { %v3283_v1 = vpack.c.bf16 %v6982_v60, %v6982_v60  ;;  %v3274_v63 = vadd.f32 1.0, %v4754_v54 }
 0x960   : > { %3316 = vmatprep.mubr.bf16.mxu0 %v3283_v1  ;;  %3357 = vmatprep.mubr.bf16.mxu1 %v3283_v1  ;;  %4759 = vrcp.f32 %v3274_v63 }
 0x967   : > { %v4756_v14 = vpop.eup %4755 }
 0x968   : > { %v3278_v36 = vmul.f32 %v4756_v14, %v4752_v43 }
 0x969   : > { %v4758_v32 = vpop.eup %4757 }
 0x96a   : > { %v3277_v58 = vmul.f32 %v4758_v32, %v6880_v25  ;;  %v4518_v25 = vld [vmem:[#allocation12 + $0x20] sm:$0xff]  }
 0x96c   : > { %v3279_v34 = vadd.f32 %v3278_v36, %v3277_v58 }
 0x96d   : > { %v4760_v9 = vpop.eup %4759 }
 0x96e   : > { %4761 = vtanh.f32 %v3279_v34 }
 0x97b   : > { %v4762_v17 = vpop.eup %4761 }
 0x97c   : > { %v3281_v55 = vmul.f32 %v4762_v17, %v4760_v9 }
 0x97e   : > { %v3282_v57 = vpack.c.bf16 %v3281_v55, %v3281_v55 }
 0x980   : > { %3317 = vmatmul.mubr.bf16.vlgmr.msra.gmra.mxu0 %v3282_v57  ;;  %3358 = vmatmul.mubr.bf16.vlgmr.msra.gmra.mxu1 %v3282_v57 }
 0x981   : > { %4204 = vmatpush3.bf16.msra.mxu0 %v6967_v4  ;;  %4219 = vmatprep.mubr.bf16.mxu0 %v3400_v53  ;;  %v7826_v4 = vld [vmem:[#allocation71_spill] sm:$0xff] }
 0x982   : > { %4205 = vmatprep.subr.bf16.mxu0 %v4516_v47  ;;  %v3401_v8 = vpack.c.bf16 %v7827_v49, %v7826_v4 }
 0x985   : > { %4206 = vmatpush3.bf16.msra.mxu0 %v4516_v47 }
 0x986   : > { %4207 = vmatprep.subr.bf16.mxu0 %v4517_v46 }
 0x989   : > { %4208 = vmatpush3.bf16.msra.mxu0 %v4517_v46 }
 0x98a   : > { %4209 = vmatprep.subr.bf16.mxu0 %v4518_v25 }
 0x98d   : > { %4210 = vmatpush3.bf16.msra.mxu0 %v4518_v25 }
 0x98e   : > { %4211 = vmatprep.subr.bf16.mxu0 %v4519_v12 }
 0x991   : > { %4212 = vmatpush3.bf16.msra.mxu0 %v4519_v12 }
 0x992   : > { %4213 = vmatprep.subr.bf16.mxu0 %v4520_v10 }
 0x995   : > { %4214 = vmatpush3.bf16.msra.mxu0 %v4520_v10 }
 0x996   : > { %4215 = vmatprep.subr.bf16.mxu0 %v4521_v61 }
 0x999   : > { %4216 = vmatpush3.bf16.msra.mxu0 %v4521_v61 }
 0x99a   : > { %4217 = vmatprep.subr.bf16.mxu0 %v4522_v38 }
 0x99d   : > { %4218 = vmatpush3.bf16.msra.mxu0 %v4522_v38 }
 0x9a0   : > { %4220 = vmatmul.mubr.bf16.vlgmr.msra.gmra.mxu0 %v3401_v8 }
 0x9a1   : > { %4223 = vmatprep.mubr.bf16.mxu0 %v3402_v52 }
 0xa40   : > { %v3318_v39 = vpop.f32.mrf.mxu0  ;;  %v3359_v56 = vpop.f32.mrf.mxu1 }
 0xa41   : > { %v3319_v20 = vadd.f32 %v3318_v39, %v7818_v7  ;;  %v3360_v51 = vadd.f32 %v3359_v56, %v7821_v42  ;;  %v7829_v39 = vlaneseq }
 0xa42   : > { %v3320_v5 = vpop.f32.mrf.mxu0  ;;  %v3361_v3 = vpop.f32.mrf.mxu1 }
 0xa43   : > { %v4158_v59 = vmul.f32 -1.442695, %v3319_v20  ;;  %v3321_v15 = vadd.f32 %v3320_v5, %v7819_v62  ;;  %v3362_v29 = vadd.f32 %v3361_v3, %v7820_v6  ;;  %v3581_v56 = vand.u32 127, %v7829_v39  ;;  %v7830_v5 = vld [vmem:[#allocation67_spill] sm:$0xff] }
 0xa44   : > { %v3322_v19 = vpop.f32.mrf.mxu0  ;;  %v3363_v21 = vpop.f32.mrf.mxu1  ;;  %v3758_v39 = vsub.s32 6, %v7830_v5 }
 0xa45   : > { %4763 = vpow2.f32 %v4158_v59  ;;  %v4159_v22 = vmul.f32 -1.442695, %v3321_v15  ;;  %v4160_v31 = vmul.f32 -1.442695, %v3362_v29  ;;  %v3584_v3 = vsub.s32 %v3581_v56, %v7830_v5 }
 0xa46   : > { %v3323_v23 = vpop.f32.mrf.mxu0  ;;  %v3364_v26 = vpop.f32.mrf.mxu1 }
 0xa47   : > { %4765 = vpow2.f32 %v4159_v22 }
 0xa48   : > { %4767 = vpow2.f32 %v4160_v31 }
 0xa52   : > { %v4764_v33 = vpop.eup %4763 }
 0xa53   : > { %v3369_v37 = vadd.f32 1.0, %v4764_v33 }
 0xa54   : > { %v4766_v7 = vpop.eup %4765 }
 0xa55   : > { %4769 = vrcp.f32 %v3369_v37  ;;  %v3375_v30 = vadd.f32 1.0, %v4766_v7  ;;  %v4768_v0 = vpop.eup %4767 }
 0xa56   : > { %4771 = vtanh.f32 %v3360_v51  ;;  %v3382_v6 = vadd.f32 1.0, %v4768_v0 }
 0xa57   : > { %4773 = vrcp.f32 %v3375_v30 }
 0xa60   : > { %v4221_v62 = vpop.f32.mrf.mxu0 }
 0xa61   : > { %4775 = vtanh.f32 %v4221_v62 }
 0xa62   : > { %v4770_v27 = vpop.eup %4769  ;;  %v3502_v50 = vpop.f32.mrf.mxu0 }
 0xa63   : > { %v4772_v41 = vpop.eup %4771  ;;  %4777 = vtanh.f32 %v3502_v50 }
 0xa64   : > { %v4774_v18 = vpop.eup %4773  ;;  %v4222_v28 = vpop.f32.mrf.mxu0  ;;  %v3386_v35 = vmul.f32 %v4772_v41, %v4770_v27 }
 0xa65   : > { %v3385_v42 = vmul.f32 %v4774_v18, %v6977_v45  ;;  %4779 = vtanh.f32 %v4222_v28 }
 0xa66   : > { %v3505_v16 = vpop.f32.mrf.mxu0 }
 0xa67   : > { %4781 = vtanh.f32 %v3505_v16  ;;  %v3387_v2 = vadd.f32 %v3386_v35, %v3385_v42 }
 0xa68   : > { %4783 = vrcp.f32 %v3382_v6 }
 0xa69   : > { %4785 = vtanh.f32 %v3387_v2 }
 0xa6e   : > { %v4776_v40 = vpop.eup %4775 }
 0xa6f   : > { %v3550_v1 = vmul.f32 %v4776_v40, %v4169_v48 }
 0xa70   : > { %v4778_v43 = vpop.eup %4777 }
 0xa71   : > { %3560 = vadd.xlane.f32.xlu1 %v3550_v1  ;;  %v3548_v54 = vmul.f32 %v4778_v43, %v4169_v48 }
 0xa72   : > { %v4780_v14 = vpop.eup %4779 }
 0xa73   : > { %3556 = vadd.xlane.f32.xlu0 %v3548_v54  ;;  %v3551_v36 = vmul.f32 %v4780_v14, %v4169_v48 }
 0xa74   : > { %v4782_v32 = vpop.eup %4781 }
 0xa75   : > { %v4784_v45 = vpop.eup %4783  ;;  %3562 = vadd.xlane.f32.xlu1 %v3551_v36  ;;  %v3549_v63 = vmul.f32 %v4782_v32, %v4169_v48 }
 0xa76   : > { %v4786_v58 = vpop.eup %4785 }
 0xa77   : > { %3558 = vadd.xlane.f32.xlu0 %v3549_v63  ;;  %v7002_v34 = vmul.f32 %v4786_v58, %v4784_v45  ;;  %v3680_v45 = vld [vmem:[%s458_s29] sm:$0xff] }
 0xa79   : > { %v3403_v9 = vpack.c.bf16 %v7002_v34, %v6982_v60 }
 0xa7b   : > { %4224 = vmatmul.mubr.bf16.gmra.mxu0 %v3403_v9 }
 0xafa   : > { %v3561_v59 = vpop.xlane.xlu1 %3560 }
 0xafb   : > { %v3593_v22 = vrot.slane %v3561_v59, %v3584_v3 }
 0xafc   : > { %v3557_v52 = vpop.xlane.xlu0 %3556 }
 0xafd   : > { %v3585_v19 = vrot.slane %v3557_v52, %v3584_v3  ;;  %v3765_v52 = vsub.s32 7, %v7830_v5 }
 0xafe   : > { %v3563_v23 = vpop.xlane.xlu1 %3562 }
 0xaff   : > { %v3597_v33 = vrot.slane %v3563_v23, %v3584_v3 }
 0xb00   : > { %v3559_v20 = vpop.xlane.xlu0 %3558 }
 0xb01   : > { %v3589_v15 = vrot.slane %v3559_v20, %v3584_v3 }
 0xb03   : > { %v3615_v21 = vsel %vm3614_vm0, %v3589_v15, %v3585_v19 }
 0xb04   : > { %v3617_v29 = vsel %vm3616_vm1, %v3593_v22, %v3615_v21 }
 0xb05   : > { %v3619_v7 = vsel %vm3618_vm2, %v3597_v33, %v3617_v29 }
 0xb3b   : > { %v4225_v17 = vpop.f32.mrf.mxu0 }
 0xb3d   : > { %v3518_v55 = vpop.f32.mrf.mxu0 }
 0xb3e   : > { %4787 = vtanh.f32 %v3518_v55 }
 0xb3f   : > { %v4226_v57 = vpop.f32.mrf.mxu0  ;;  %4789 = vtanh.f32 %v4225_v17  ;;  %v7831_v17 = vld [vmem:[#allocation69_spill] sm:$0xff] }
 0xb41   : > { %v3521_v47 = vpop.f32.mrf.mxu0 }
 0xb42   : > { %4791 = vtanh.f32 %v3521_v47 }
 0xb43   : > { %4793 = vtanh.f32 %v4226_v57  ;;  %v7832_v57 = vld [vmem:[#allocation68_spill] sm:$0xff] }
 0xb4b   : > { %v4788_v53 = vpop.eup %4787 }
 0xb4c   : > { %v3552_v46 = vmul.f32 %v4788_v53, %v4169_v48  ;;  %v4790_v25 = vpop.eup %4789  ;;  %v7833_v53 = vld [vmem:[#allocation78_spill] sm:$0xff] }
 0xb4d   : > { %v3554_v10 = vmul.f32 %v4790_v25, %v4169_v48  ;;  %v7834_v25 = vld [vmem:[#allocation76_spill] sm:$0xff] }
 0xb4e   : > { %3564 = vadd.xlane.f32.xlu0 %v3552_v46 }
 0xb4f   : > { %v4792_v12 = vpop.eup %4791 }
 0xb50   : > { %v3553_v61 = vmul.f32 %v4792_v12, %v4169_v48  ;;  %v4794_v38 = vpop.eup %4793 }
 0xb51   : > { %v3555_v8 = vmul.f32 %v4794_v38, %v4169_v48 }
 0xb52   : > { %3568 = vadd.xlane.f32.xlu0 %v3554_v10  ;;  %3566 = vadd.xlane.f32.xlu1 %v3553_v61  ;;  %v3751_v10 = vsub.s32 5, %v7830_v5  ;;  %v3744_v61 = vsub.s32 4, %v7830_v5 }
 0xb56   : > { %3570 = vadd.xlane.f32.xlu1 %v3555_v8 }
 0xbd7   : > { %v3565_v26 = vpop.xlane.xlu0 %3564 }
 0xbd8   : > { %v3601_v31 = vrot.slane %v3565_v26, %v3584_v3 }
 0xbda   : > { %v3621_v62 = vsel %vm3620_vm3, %v3601_v31, %v3619_v7 }
 0xbdb   : > { %v3569_v51 = vpop.xlane.xlu0 %3568  ;;  %v3567_v37 = vpop.xlane.xlu1 %3566 }
 0xbdc   : > { %v3605_v30 = vrot.slane %v3567_v37, %v3584_v3  ;;  %v3609_v0 = vrot.slane %v3569_v51, %v3584_v3 }
 0xbde   : > { %v3623_v27 = vsel %vm3622_vm4, %v3605_v30, %v3621_v62 }
 0xbdf   : > { %v3571_v50 = vpop.xlane.xlu1 %3570  ;;  %v3625_v18 = vsel %vm3624_vm5, %v3609_v0, %v3623_v27 }
 0xbe0   : > { %v3613_v41 = vrot.slane %v3571_v50, %v3584_v3 }
 0xbe2   : > { %v3627_v6 = vsel %vm3626_vm6, %v3613_v41, %v3625_v18 }
 0xbe3   : > { %3629 = vxpose.xlu0.b32.start.end [1/1] (short) (narrow) %v3627_v6, 8 }
 0xc5f   : > { %v3645_v28 = vpop.trf.xlu0 }
 0xc60   : > { %v4170_v35 = vmul.f32 -1.442695, %v3645_v28  ;;  %v3669_v42 = vsel %vm3667_vm7, %v3645_v28, -inf }
 0xc61   : > { %3670 = vmax.xlane.f32.xlu1 %v3669_v42 }
 0xc62   : > { %4795 = vpow2.f32 %v4170_v35 }
 0xc6f   : > { %v4796_v16 = vpop.eup %4795 }
 0xc70   : > { %v3664_v2 = vadd.f32 1.0, %v4796_v16 }
 0xc72   : > { %4797 = vrcp.f32 %v3664_v2 }
 0xc7f   : > { %v4798_v48 = vpop.eup %4797 }
 0xc80   : > { %3668 = vst.msk [vmem:[%s462_s11] sm:$0xff] %vm3667_vm7, %v4798_v48  ;;  %s5145_s11 = scalar_lea.vmem %s5144_s17, 256 }
 0xc81   : > { %p5147_p1 = scmp.lt.s32.totalorder %s5145_s11, %s5139_s2 }
 0xc83   : > { %p5148_p5 = por %p5147_p1, %p5146_p9 }
 0xc85   : > { %p5149_p6 = pnand %p5148_p5, %p5142_p7 }
 0xcea   : > { %v3671_v40 = vpop.xlane.xlu1 %3670 }
 0xceb   : > { %v3672_v1 = vsub.f32 %v3645_v28, %v3671_v40 }
 0xced   : > { %v3673_v43 = vmul.f32 1.442695, %v3672_v1 }
 0xcef   : > { %4799 = vpow2.f32 %v3673_v43 }
 0xcfc   : > { %v4800_v54 = vpop.eup %4799 }
 0xcfd   : > { %v3675_v14 = vsel %vm3667_vm7, %v4800_v54, 0.0 }
 0xcfe   : > { %3676 = vadd.xlane.f32.xlu1 %v3675_v14 }
 0xd87   : > { %v3677_v36 = vpop.xlane.xlu1 %3676 }
 0xd88   : > { %4801 = vrcp.f32 %v3677_v36 }
 0xd95   : > { %v4802_v32 = vpop.eup %4801 }
 0xd96   : > { %v3679_v63 = vmul.f32 %v4802_v32, %v4800_v54 }
 0xd98   : > { %v3681_v58 = vmul.f32 %v3680_v45, %v3679_v63 }
 0xd9a   : > { %3682 = vxpose.xlu1.b32.start.end [1/1] (short) (narrow) %v3681_v58, 8 }
 0xe16   : > { %v3698_v9 = vpop.trf.xlu1 }
 0xe17   : > { %v3724_v55 = vrot.slane %v3698_v9, %v7831_v17  ;;  %v3717_v47 = vrot.slane %v3698_v9, %v7832_v57  ;;  %v3738_v46 = vrot.slane %v3698_v9, %v7833_v53  ;;  %v3731_v12 = vrot.slane %v3698_v9, %v7834_v25 }
 0xe18   : > { %v3752_v38 = vrot.slane %v3698_v9, %v3751_v10  ;;  %v3745_v8 = vrot.slane %v3698_v9, %v3744_v61  ;;  %v3766_v56 = vrot.slane %v3698_v9, %v3765_v52  ;;  %v3759_v20 = vrot.slane %v3698_v9, %v3758_v39 }
 0xe19   : > { %3726 = vbcast.lane.b32.xlu1 %v3724_v55, 256  ;;  %3719 = vbcast.lane.b32.xlu0 %v3717_v47, 256 }
 0xe1d   : > { %3740 = vbcast.lane.b32.xlu1 %v3738_v46, 256  ;;  %3733 = vbcast.lane.b32.xlu0 %v3731_v12, 256 }
 0xe21   : > { %3754 = vbcast.lane.b32.xlu1 %v3752_v38, 256  ;;  %3747 = vbcast.lane.b32.xlu0 %v3745_v8, 256 }
 0xe25   : > { %3768 = vbcast.lane.b32.xlu1 %v3766_v56, 256  ;;  %3761 = vbcast.lane.b32.xlu0 %v3759_v20, 256 }
 0xe8b   : > { %v3727_v3 = vpop.permute.xlu1 %3726  ;;  %v3720_v59 = vpop.permute.xlu0 %3719 }
 0xe8c   : > { %v3771_v15 = vmul.f32 %v3727_v3, %v7825_v11  ;;  %v3770_v19 = vmul.f32 %v3720_v59, %v7824_v13 }
 0xe8e   : > { %v3778_v23 = vadd.f32 %v3771_v15, %v3770_v19 }
 0xe8f   : > { %v3741_v21 = vpop.permute.xlu1 %3740  ;;  %v3734_v22 = vpop.permute.xlu0 %3733 }
 0xe90   : > { %v3772_v26 = vmul.f32 %v3734_v22, %v7826_v4  ;;  %v3773_v5 = vmul.f32 %v3741_v21, %v7827_v49 }
 0xe92   : > { %v3779_v29 = vadd.f32 %v3778_v23, %v3772_v26 }
 0xe93   : > { %v3755_v31 = vpop.permute.xlu1 %3754  ;;  %v3748_v33 = vpop.permute.xlu0 %3747 }
 0xe94   : > { %v3780_v51 = vadd.f32 %v3779_v29, %v3773_v5  ;;  %v3774_v37 = vmul.f32 %v3748_v33, %v7828_v44  ;;  %v3775_v11 = vmul.f32 %v3755_v31, %v6875_v24 }
 0xe96   : > { %v3781_v7 = vadd.f32 %v3780_v51, %v3774_v37 }
 0xe97   : > { %v3769_v13 = vpop.permute.xlu1 %3768  ;;  %v3762_v30 = vpop.permute.xlu0 %3761 }
 0xe98   : > { %v3782_v62 = vadd.f32 %v3781_v7, %v3775_v11  ;;  %v3776_v0 = vmul.f32 %v3762_v30, %v6982_v60  ;;  %v3777_v4 = vmul.f32 %v3769_v13, %v7002_v34 }
 0xe9a   : > { %v3783_v49 = vadd.f32 %v3782_v62, %v3776_v0 }
 0xe9c   : > { %v3784_v27 = vadd.f32 %v3783_v49, %v3777_v4 }
 0xe9e   : > { %3785 = vst [vmem:[%s448_s21] sm:$0xff] %v3784_v27 }
 0xe9f   : > { %5152 = shalt.err (!%p5149_p6)
}
 0xea0   : > { %s5153_s6 = scalar_lea.hbm %s3802_s24, 128  ;;  %s5157_s29 = scalar_lea.hbm %s7080_s9, 256 }
 0xea1   : > { %p5154_p4 = scmp.ne.s32.totalorder %s3802_s24, %s5153_s6  ;;  %p5158_p11 = scmp.lt.s32.totalorder %s3802_s24, %s7080_s9 }
 0xea2   : > { %p5159_p13 = scmp.lt.s32.totalorder %s5157_s29, %s5153_s6 }
 0xea3   : > { %p5155_p8 = pnand %p5154_p4, %p7835_p3 }
 0xea4   : > { %p5160_p12 = por %p5159_p13, %p5158_p11 }
 0xea5   : > { %p5156_p2 = pneg %p5155_p8 }
 0xea7   : > { %p5161_p0 = pnand %p5160_p12, %p5156_p2 }
 0xea9   : > { %5164 = shalt.err (!%p5161_p0)
}
 0xeaa   : > { %4245 = dma.vmem_to_hbm [thread:$0]  (%p7835_p3), %s3805_s30, 128, %s3802_s24, %s3787_s18  }
 0xeab PF: > { %s3819_s21 = sand.u32 1, %s5199_s13   ;;  %p7836_p10 = scmp.ne.s32.totalorder %s7375_s20, 0 }
 0xeac   : > { %p7837_p7 = scmp.ge.s32.totalorder %s5211_s16, 2  ;;  %s3820_s27 = scalar_lea.sflag [#allocation6], %s3819_s21 }
 0xeae   : > { %p4265_p9 = pnand %p7837_p7, %p7836_p10 }
 0xeb0   : > { %p4266_p1 = pneg %p4265_p9 }
 0xeb2   : > { %5194 = dma.done.wait (%p4266_p1), %s3820_s27, 128  }
 0xeb3   : > { %5196 = vsyncadd (%p4266_p1), %s3820_s27, 4294967168  ;;  %p26_p5 = scmp.ge.s32.totalorder %s5376_s23, 4   ;;  %s7838_s13 = smov %s5203_s14 }
 0xeb4   : > { %s7839_s14 = smov %s5207_s15  ;;  %s7840_s15 = smov %s5385_s26 }
 0xeb5   : > { %s7841_s16 = smov %s5376_s23  ;;  %28 = sbr.rel (!%p26_p5) target bundleno = 12 (0xc), region = 146 }
 0xeba   :  { %3832 = vsyncpa [#allocation5], 1 }
 0xebb   :  { %3834 = vsyncpa [#allocation5 + $0x1], 1 }
 0xebc   :  { %3835 = vsyncpa [#allocation8], 1 }
 0xebd   :  { %3836 = vsyncpa [#allocation11], 1 }
 0xebe   :  { %3837 = vsyncpa [#allocation6], 1 }
 0xebf   :  { %3839 = vsyncpa [#allocation6 + $0x1], 1 }

</bundles_post_ra>
